<compile_context>
chip_gen: v7x
topology: tpu7x:2x2x1
jax: 0.10.0
libtpu: 0.0.40
codegen_flags: <defaults>
</compile_context>

<pallas_src>
import jax
import jax.numpy as jnp
from jax.experimental import pallas as pl
from jax.experimental.pallas import tpu as pltpu


_CIN_PAD = 8     # layer-1 input channels padded 2 -> 8 (was 64: ~8x wasted MXU)
_PAD_L = 8       # interior starts at sublane column 8 (aligned stores)
_W_EXTRA = 16    # scratch width = W + 16; halo columns live at 7 and 8+W
_M_TILE = 128    # im2col rows per accumulation tile (f32 acc <= 32 vregs)


def _encoder_kernel(x_ref, w1_ref, b1_ref, w2_ref, b2_ref, w3_ref, b3_ref,
                    o_ref, a0_ref, a1_ref, a2_ref):
    # x_ref : (1, H, W, _CIN_PAD)  bf16 — one image per grid step (batch axis)
    # wX_ref: (3, 3*Cin, Cout)     bf16 — K ordered (kw, cin); VMEM-resident
    # bX_ref: (1, Cout)            f32
    # o_ref : (1, H, W, 256)       f32
    # aX_ref: (H+2, W+16, C)       bf16 padded activation scratch.  The image
    #   interior lives at rows 1..H, sublane columns 8..8+W-1 so interior
    #   stores are 8-sublane aligned; the zero halo (rows 0/H+1, columns 7 and
    #   8+W) implements padding=1.
    _, H, W, _ = x_ref.shape

    def zero_halo(ref):
        # Re-zero only the halo each step (interiors are fully rewritten).
        WP, C = ref.shape[1], ref.shape[2]
        z_row = jnp.zeros((1, WP, C), ref.dtype)
        ref[0:1, :, :] = z_row                                   # top halo row
        ref[H + 1:H + 2, :, :] = z_row                           # bottom halo row
        z_col = jnp.zeros((H + 2, _PAD_L, C), ref.dtype)
        ref[:, 0:_PAD_L, :] = z_col                              # incl. halo col 7
        ref[:, _PAD_L + W:_PAD_L + W + _PAD_L, :] = z_col        # incl. halo col 8+W

    zero_halo(a0_ref)
    zero_halo(a1_ref)
    zero_halo(a2_ref)

    # Layer-1 input -> a0 interior (aligned store at sublane offset 8).
    a0_ref[1:H + 1, _PAD_L:_PAD_L + W, :] = x_ref[0]

    def conv3x3(a_ref, w_ref, b_ref, emit):
        k3 = w_ref.shape[1]          # 3 * Cin
        cout = w_ref.shape[2]
        # Fold the 3 kw taps into the contraction dim (built once per layer):
        # 3 width-shifted views concatenated on channels -> (H+2, W, 3*Cin).
        x3 = jnp.concatenate(
            [a_ref[:, _PAD_L - 1 + kw:_PAD_L - 1 + kw + W, :] for kw in range(3)],
            axis=-1)
        wk = [w_ref[kh] for kh in range(3)]      # hoist VMEM weight loads
        bias = b_ref[...]                        # (1, Cout) f32
        rows_per_tile = max(1, _M_TILE // W)
        # Tile M (= H*W rows); full Cout width per dot (256-wide MXU friendly,
        # f32 accumulator stays <= (128, 256) = 32 vregs).
        for r0 in range(0, H, rows_per_tile):
            nrows = min(rows_per_tile, H - r0)
            acc = None
            for kh in range(3):
                lhs = x3[kh + r0:kh + r0 + nrows].reshape(nrows * W, k3)
                d = jnp.dot(lhs, wk[kh], preferred_element_type=jnp.float32)
                acc = d if acc is None else acc + d
            y = jnp.maximum(acc + bias, 0.0)     # bias + ReLU in f32
            emit(r0, nrows, y.reshape(nrows, W, cout))

    def emit1(r0, nrows, y):
        a1_ref[1 + r0:1 + r0 + nrows, _PAD_L:_PAD_L + W, :] = y.astype(a1_ref.dtype)

    def emit2(r0, nrows, y):
        a2_ref[1 + r0:1 + r0 + nrows, _PAD_L:_PAD_L + W, :] = y.astype(a2_ref.dtype)

    def emit3(r0, nrows, y):
        o_ref[0, r0:r0 + nrows, :, :] = y.astype(o_ref.dtype)

    conv3x3(a0_ref, w1_ref, b1_ref, emit1)   # Conv2d(2->64)    + ReLU
    conv3x3(a1_ref, w2_ref, b2_ref, emit2)   # Conv2d(64->128)  + ReLU
    conv3x3(a2_ref, w3_ref, b3_ref, emit3)   # Conv2d(128->256) + ReLU


def _prep_weight(w_hwio, cin_pad=None):
    """HWIO (3,3,Cin,Cout) -> (3, 3*Cin', Cout) bf16 with K ordered (kw, cin)."""
    kh, kw, cin, cout = w_hwio.shape
    if cin_pad is not None and cin_pad != cin:
        w_hwio = jnp.pad(w_hwio, ((0, 0), (0, 0), (0, cin_pad - cin), (0, 0)))
        cin = cin_pad
    return w_hwio.reshape(kh, kw * cin, cout).astype(jnp.bfloat16)


@jax.jit
def encoder_forward_nhwc(x_nhwc, w1, b1, w2, b2, w3, b3):
    """Fused Encoder forward, channels-last (fast path, no output transpose)."""
    N, H, W, cin = x_nhwc.shape
    C1, C2, C3 = w1.shape[-1], w2.shape[-1], w3.shape[-1]

    x = x_nhwc.astype(jnp.bfloat16)
    x = jnp.pad(x, ((0, 0), (0, 0), (0, 0), (0, _CIN_PAD - cin)))

    w1r = _prep_weight(w1, _CIN_PAD)
    w2r = _prep_weight(w2)
    w3r = _prep_weight(w3)
    b1r = b1.reshape(1, C1).astype(jnp.float32)
    b2r = b2.reshape(1, C2).astype(jnp.float32)
    b3r = b3.reshape(1, C3).astype(jnp.float32)

    wp = W + _W_EXTRA
    return pl.pallas_call(
        _encoder_kernel,
        out_shape=jax.ShapeDtypeStruct((N, H, W, C3), jnp.float32),
        grid_spec=pltpu.PrefetchScalarGridSpec(
            num_scalar_prefetch=0,
            grid=(N,),   # batch as a parallel grid axis (v7x: one image / TC)
            in_specs=[
                pl.BlockSpec((1, H, W, _CIN_PAD), lambda n: (n, 0, 0, 0)),
                # Constant index maps keep weights/biases VMEM-resident across
                # grid steps (no per-image re-DMA).
                pl.BlockSpec((3, 3 * _CIN_PAD, C1), lambda n: (0, 0, 0)),
                pl.BlockSpec((1, C1), lambda n: (0, 0)),
                pl.BlockSpec((3, 3 * C1, C2), lambda n: (0, 0, 0)),
                pl.BlockSpec((1, C2), lambda n: (0, 0)),
                pl.BlockSpec((3, 3 * C2, C3), lambda n: (0, 0, 0)),
                pl.BlockSpec((1, C3), lambda n: (0, 0)),
            ],
            out_specs=pl.BlockSpec((1, H, W, C3), lambda n: (n, 0, 0, 0)),
            scratch_shapes=[
                pltpu.VMEM((H + 2, wp, _CIN_PAD), jnp.bfloat16),
                pltpu.VMEM((H + 2, wp, C1), jnp.bfloat16),
                pltpu.VMEM((H + 2, wp, C2), jnp.bfloat16),
            ],
        ),
        compiler_params=pltpu.CompilerParams(
            dimension_semantics=("parallel",),
        ),
    )(x, w1r, b1r, w2r, b2r, w3r, b3r)


@jax.jit
def encoder_forward(x_nchw, w1, b1, w2, b2, w3, b3):
    """PyTorch-layout (NCHW) wrapper around the fused NHWC kernel."""
    x_nhwc = jnp.transpose(x_nchw, (0, 2, 3, 1))
    out_nhwc = encoder_forward_nhwc(x_nhwc, w1, b1, w2, b2, w3, b3)
    # TODO(synk): consumers that accept NHWC should call encoder_forward_nhwc
    # directly — this transpose moves ~1 MB of HBM, comparable to the kernel's
    # own HBM traffic at this size.
    return jnp.transpose(out_nhwc, (0, 3, 1, 2))


def init_encoder_params(key):
    """Deterministic synthetic parameters matching the PyTorch module shapes.

    PyTorch Conv2d weights are OIHW; we store HWIO directly.
    """
    channels = [(2, 64), (64, 128), (128, 256)]
    params = []
    for i, (cin, cout) in enumerate(channels):
        kw_key, kb_key = jax.random.split(jax.random.fold_in(key, i))
        bound = 1.0 / jnp.sqrt(cin * 9.0)
        w = jax.random.uniform(
            kw_key, (3, 3, cin, cout), jnp.float32, minval=-bound, maxval=bound)
        b = jax.random.uniform(
            kb_key, (cout,), jnp.float32, minval=-bound, maxval=bound)
        params.append((w, b))
    return params


def _reference_forward(x_nchw, params):
    """Pure-JAX reference with matching bf16-operand / f32-accumulate numerics."""
    x = jnp.transpose(x_nchw, (0, 2, 3, 1)).astype(jnp.bfloat16)
    y = None
    for w, b in params:
        y = jax.lax.conv_general_dilated(
            x, w.astype(jnp.bfloat16),
            window_strides=(1, 1), padding=((1, 1), (1, 1)),
            dimension_numbers=("NHWC", "HWIO", "NHWC"),
            preferred_element_type=jnp.float32)
        y = jnp.maximum(y + b.astype(jnp.float32), 0.0)
        x = y.astype(jnp.bfloat16)   # next-layer input is bf16, like the kernel
    return jnp.transpose(y, (0, 3, 1, 2))


if __name__ == "__main__":
    key = jax.random.PRNGKey(0)
    pkey, xkey = jax.random.split(key)

    # Small shapes consistent with the module: batch=2, in_channels=2, 16x16.
    x = jax.random.normal(xkey, (2, 2, 16, 16), dtype=jnp.float32)

    params = init_encoder_params(pkey)
    (w1, b1), (w2, b2), (w3, b3) = params

    out = jax.block_until_ready(encoder_forward(x, w1, b1, w2, b2, w3, b3))
    assert out.shape == (2, 256, 16, 16), out.shape

    ref = jax.block_until_ready(_reference_forward(x, params))
    max_err = float(jnp.max(jnp.abs(out - ref)))
    assert jnp.allclose(out, ref, atol=1e-2, rtol=1e-2), max_err

    print("KERNEL_OK")
</pallas_src>

<mosaic_0001>
module attributes {stable_mosaic.version = 11 : i64} {
  func.func @_encoder_kernel(%arg0: i32, %arg1: memref<1x16x16x8xbf16, #tpu.memory_space<vmem>>, %arg2: memref<3x24x64xbf16, #tpu.memory_space<vmem>>, %arg3: memref<1x64xf32, #tpu.memory_space<vmem>>, %arg4: memref<3x192x128xbf16, #tpu.memory_space<vmem>>, %arg5: memref<1x128xf32, #tpu.memory_space<vmem>>, %arg6: memref<3x384x256xbf16, #tpu.memory_space<vmem>>, %arg7: memref<1x256xf32, #tpu.memory_space<vmem>>, %arg8: memref<1x16x16x256xf32, #tpu.memory_space<vmem>>, %arg9: memref<18x32x8xbf16, #tpu.memory_space<vmem>>, %arg10: memref<18x32x64xbf16, #tpu.memory_space<vmem>>, %arg11: memref<18x32x128xbf16, #tpu.memory_space<vmem>>) attributes {dimension_semantics = [#tpu.dimension_semantics<parallel>], iteration_bounds = array<i64: 2>, scalar_prefetch = 0 : i64, scratch_operands = 3 : i64, tpu.core_type = #tpu.core_type<tc>, window_params = [{transform_indices = @transform_0, window_bounds = array<i64: 1, 16, 16, 8>}, {pipeline_mode = #tpu.pipeline_mode<synchronous>, transform_indices = @transform_1, window_bounds = array<i64: 3, 24, 64>}, {pipeline_mode = #tpu.pipeline_mode<synchronous>, transform_indices = @transform_2, window_bounds = array<i64: 1, 64>}, {pipeline_mode = #tpu.pipeline_mode<synchronous>, transform_indices = @transform_3, window_bounds = array<i64: 3, 192, 128>}, {pipeline_mode = #tpu.pipeline_mode<synchronous>, transform_indices = @transform_4, window_bounds = array<i64: 1, 128>}, {pipeline_mode = #tpu.pipeline_mode<synchronous>, transform_indices = @transform_5, window_bounds = array<i64: 3, 384, 256>}, {pipeline_mode = #tpu.pipeline_mode<synchronous>, transform_indices = @transform_6, window_bounds = array<i64: 1, 256>}, {transform_indices = @transform_7, window_bounds = array<i64: 1, 16, 16, 256>}]} {
    %cst = arith.constant 0.000000e+00 : bf16
    %0 = vector.broadcast %cst : bf16 to vector<1x32x8xbf16>
    %c0 = arith.constant 0 : index
    %c0_0 = arith.constant 0 : index
    %c0_1 = arith.constant 0 : index
    %1 = vector.load %arg9[%c0, %c0_0, %c0_1] : memref<18x32x8xbf16, #tpu.memory_space<vmem>>, vector<1x32x8xbf16>
    tpu.vector_store %arg9[%c0, %c0_0, %c0_1], %0 {strides = array<i32>} : memref<18x32x8xbf16, #tpu.memory_space<vmem>>, vector<1x32x8xbf16>,
    %c17 = arith.constant 17 : index
    %c0_2 = arith.constant 0 : index
    %c0_3 = arith.constant 0 : index
    %2 = vector.load %arg9[%c17, %c0_2, %c0_3] : memref<18x32x8xbf16, #tpu.memory_space<vmem>>, vector<1x32x8xbf16>
    tpu.vector_store %arg9[%c17, %c0_2, %c0_3], %0 {strides = array<i32>} : memref<18x32x8xbf16, #tpu.memory_space<vmem>>, vector<1x32x8xbf16>,
    %cst_4 = arith.constant 0.000000e+00 : bf16
    %3 = vector.broadcast %cst_4 : bf16 to vector<18x8x8xbf16>
    %c0_5 = arith.constant 0 : index
    %c0_6 = arith.constant 0 : index
    %c0_7 = arith.constant 0 : index
    %4 = vector.load %arg9[%c0_5, %c0_6, %c0_7] : memref<18x32x8xbf16, #tpu.memory_space<vmem>>, vector<18x8x8xbf16>
    tpu.vector_store %arg9[%c0_5, %c0_6, %c0_7], %3 {strides = array<i32>} : memref<18x32x8xbf16, #tpu.memory_space<vmem>>, vector<18x8x8xbf16>,
    %c0_8 = arith.constant 0 : index
    %c24 = arith.constant 24 : index
    %c0_9 = arith.constant 0 : index
    %5 = vector.load %arg9[%c0_8, %c24, %c0_9] : memref<18x32x8xbf16, #tpu.memory_space<vmem>>, vector<18x8x8xbf16>
    tpu.vector_store %arg9[%c0_8, %c24, %c0_9], %3 {strides = array<i32>} : memref<18x32x8xbf16, #tpu.memory_space<vmem>>, vector<18x8x8xbf16>,
    %cst_10 = arith.constant 0.000000e+00 : bf16
    %6 = vector.broadcast %cst_10 : bf16 to vector<1x32x64xbf16>
    %c0_11 = arith.constant 0 : index
    %c0_12 = arith.constant 0 : index
    %c0_13 = arith.constant 0 : index
    %7 = vector.load %arg10[%c0_11, %c0_12, %c0_13] : memref<18x32x64xbf16, #tpu.memory_space<vmem>>, vector<1x32x64xbf16>
    tpu.vector_store %arg10[%c0_11, %c0_12, %c0_13], %6 {strides = array<i32>} : memref<18x32x64xbf16, #tpu.memory_space<vmem>>, vector<1x32x64xbf16>,
    %c17_14 = arith.constant 17 : index
    %c0_15 = arith.constant 0 : index
    %c0_16 = arith.constant 0 : index
    %8 = vector.load %arg10[%c17_14, %c0_15, %c0_16] : memref<18x32x64xbf16, #tpu.memory_space<vmem>>, vector<1x32x64xbf16>
    tpu.vector_store %arg10[%c17_14, %c0_15, %c0_16], %6 {strides = array<i32>} : memref<18x32x64xbf16, #tpu.memory_space<vmem>>, vector<1x32x64xbf16>,
    %cst_17 = arith.constant 0.000000e+00 : bf16
    %9 = vector.broadcast %cst_17 : bf16 to vector<18x8x64xbf16>
    %c0_18 = arith.constant 0 : index
    %c0_19 = arith.constant 0 : index
    %c0_20 = arith.constant 0 : index
    %10 = vector.load %arg10[%c0_18, %c0_19, %c0_20] : memref<18x32x64xbf16, #tpu.memory_space<vmem>>, vector<18x8x64xbf16>
    tpu.vector_store %arg10[%c0_18, %c0_19, %c0_20], %9 {strides = array<i32>} : memref<18x32x64xbf16, #tpu.memory_space<vmem>>, vector<18x8x64xbf16>,
    %c0_21 = arith.constant 0 : index
    %c24_22 = arith.constant 24 : index
    %c0_23 = arith.constant 0 : index
    %11 = vector.load %arg10[%c0_21, %c24_22, %c0_23] : memref<18x32x64xbf16, #tpu.memory_space<vmem>>, vector<18x8x64xbf16>
    tpu.vector_store %arg10[%c0_21, %c24_22, %c0_23], %9 {strides = array<i32>} : memref<18x32x64xbf16, #tpu.memory_space<vmem>>, vector<18x8x64xbf16>,
    %cst_24 = arith.constant 0.000000e+00 : bf16
    %12 = vector.broadcast %cst_24 : bf16 to vector<1x32x128xbf16>
    %c0_25 = arith.constant 0 : index
    %c0_26 = arith.constant 0 : index
    %c0_27 = arith.constant 0 : index
    %13 = vector.load %arg11[%c0_25, %c0_26, %c0_27] : memref<18x32x128xbf16, #tpu.memory_space<vmem>>, vector<1x32x128xbf16>
    tpu.vector_store %arg11[%c0_25, %c0_26, %c0_27], %12 {strides = array<i32>} : memref<18x32x128xbf16, #tpu.memory_space<vmem>>, vector<1x32x128xbf16>,
    %c17_28 = arith.constant 17 : index
    %c0_29 = arith.constant 0 : index
    %c0_30 = arith.constant 0 : index
    %14 = vector.load %arg11[%c17_28, %c0_29, %c0_30] : memref<18x32x128xbf16, #tpu.memory_space<vmem>>, vector<1x32x128xbf16>
    tpu.vector_store %arg11[%c17_28, %c0_29, %c0_30], %12 {strides = array<i32>} : memref<18x32x128xbf16, #tpu.memory_space<vmem>>, vector<1x32x128xbf16>,
    %cst_31 = arith.constant 0.000000e+00 : bf16
    %15 = vector.broadcast %cst_31 : bf16 to vector<18x8x128xbf16>
    %c0_32 = arith.constant 0 : index
    %c0_33 = arith.constant 0 : index
    %c0_34 = arith.constant 0 : index
    %16 = vector.load %arg11[%c0_32, %c0_33, %c0_34] : memref<18x32x128xbf16, #tpu.memory_space<vmem>>, vector<18x8x128xbf16>
    tpu.vector_store %arg11[%c0_32, %c0_33, %c0_34], %15 {strides = array<i32>} : memref<18x32x128xbf16, #tpu.memory_space<vmem>>, vector<18x8x128xbf16>,
    %c0_35 = arith.constant 0 : index
    %c24_36 = arith.constant 24 : index
    %c0_37 = arith.constant 0 : index
    %17 = vector.load %arg11[%c0_35, %c24_36, %c0_37] : memref<18x32x128xbf16, #tpu.memory_space<vmem>>, vector<18x8x128xbf16>
    tpu.vector_store %arg11[%c0_35, %c24_36, %c0_37], %15 {strides = array<i32>} : memref<18x32x128xbf16, #tpu.memory_space<vmem>>, vector<18x8x128xbf16>,
    %c0_38 = arith.constant 0 : index
    %c0_39 = arith.constant 0 : index
    %c0_40 = arith.constant 0 : index
    %c0_41 = arith.constant 0 : index
    %18 = vector.load %arg1[%c0_38, %c0_39, %c0_40, %c0_41] : memref<1x16x16x8xbf16, #tpu.memory_space<vmem>>, vector<1x16x16x8xbf16>
    %19 = vector.shape_cast %18 : vector<1x16x16x8xbf16> to vector<16x16x8xbf16>
    %c1 = arith.constant 1 : index
    %c8 = arith.constant 8 : index
    %c0_42 = arith.constant 0 : index
    %20 = vector.load %arg9[%c1, %c8, %c0_42] : memref<18x32x8xbf16, #tpu.memory_space<vmem>>, vector<16x16x8xbf16>
    tpu.vector_store %arg9[%c1, %c8, %c0_42], %19 {strides = array<i32>} : memref<18x32x8xbf16, #tpu.memory_space<vmem>>, vector<16x16x8xbf16>,
    %c0_43 = arith.constant 0 : index
    %c7 = arith.constant 7 : index
    %c0_44 = arith.constant 0 : index
    %21 = vector.load %arg9[%c0_43, %c7, %c0_44] : memref<18x32x8xbf16, #tpu.memory_space<vmem>>, vector<18x16x8xbf16>
    %c0_45 = arith.constant 0 : index
    %c8_46 = arith.constant 8 : index
    %c0_47 = arith.constant 0 : index
    %22 = vector.load %arg9[%c0_45, %c8_46, %c0_47] : memref<18x32x8xbf16, #tpu.memory_space<vmem>>, vector<18x16x8xbf16>
    %c0_48 = arith.constant 0 : index
    %c9 = arith.constant 9 : index
    %c0_49 = arith.constant 0 : index
    %23 = vector.load %arg9[%c0_48, %c9, %c0_49] : memref<18x32x8xbf16, #tpu.memory_space<vmem>>, vector<18x16x8xbf16>
    %24 = tpu.concatenate %21, %22, %23 in 2 : vector<18x16x8xbf16>, vector<18x16x8xbf16>, vector<18x16x8xbf16> -> vector<18x16x24xbf16>
    %c0_50 = arith.constant 0 : index
    %c0_51 = arith.constant 0 : index
    %c0_52 = arith.constant 0 : index
    %25 = vector.load %arg2[%c0_50, %c0_51, %c0_52] : memref<3x24x64xbf16, #tpu.memory_space<vmem>>, vector<1x24x64xbf16>
    %26 = vector.shape_cast %25 : vector<1x24x64xbf16> to vector<24x64xbf16>
    %c1_53 = arith.constant 1 : index
    %c0_54 = arith.constant 0 : index
    %c0_55 = arith.constant 0 : index
    %27 = vector.load %arg2[%c1_53, %c0_54, %c0_55] : memref<3x24x64xbf16, #tpu.memory_space<vmem>>, vector<1x24x64xbf16>
    %28 = vector.shape_cast %27 : vector<1x24x64xbf16> to vector<24x64xbf16>
    %c2 = arith.constant 2 : index
    %c0_56 = arith.constant 0 : index
    %c0_57 = arith.constant 0 : index
    %29 = vector.load %arg2[%c2, %c0_56, %c0_57] : memref<3x24x64xbf16, #tpu.memory_space<vmem>>, vector<1x24x64xbf16>
    %30 = vector.shape_cast %29 : vector<1x24x64xbf16> to vector<24x64xbf16>
    %c0_58 = arith.constant 0 : index
    %c0_59 = arith.constant 0 : index
    %31 = vector.load %arg3[%c0_58, %c0_59] : memref<1x64xf32, #tpu.memory_space<vmem>>, vector<1x64xf32>
    %32 = vector.extract_strided_slice %24 {offsets = [0, 0, 0], sizes = [8, 16, 24], strides = [1, 1, 1]} : vector<18x16x24xbf16> to vector<8x16x24xbf16>
    %33 = vector.shape_cast %32 : vector<8x16x24xbf16> to vector<128x24xbf16>
    %cst_60 = arith.constant dense<0.000000e+00> : vector<128x64xf32>
    %34 = tpu.matmul %33, %26, %cst_60 {dimension_numbers = #tpu.dot_dimension_numbers<[1], [0], [0], [1], [0, 0, 1, 1], [], []>} : vector<128x24xbf16>, vector<24x64xbf16>, vector<128x64xf32> -> vector<128x64xf32>
    %35 = vector.extract_strided_slice %24 {offsets = [1, 0, 0], sizes = [8, 16, 24], strides = [1, 1, 1]} : vector<18x16x24xbf16> to vector<8x16x24xbf16>
    %36 = vector.shape_cast %35 : vector<8x16x24xbf16> to vector<128x24xbf16>
    %cst_61 = arith.constant dense<0.000000e+00> : vector<128x64xf32>
    %37 = tpu.matmul %36, %28, %cst_61 {dimension_numbers = #tpu.dot_dimension_numbers<[1], [0], [0], [1], [0, 0, 1, 1], [], []>} : vector<128x24xbf16>, vector<24x64xbf16>, vector<128x64xf32> -> vector<128x64xf32>
    %38 = arith.addf %34, %37 : vector<128x64xf32>
    %39 = vector.extract_strided_slice %24 {offsets = [2, 0, 0], sizes = [8, 16, 24], strides = [1, 1, 1]} : vector<18x16x24xbf16> to vector<8x16x24xbf16>
    %40 = vector.shape_cast %39 : vector<8x16x24xbf16> to vector<128x24xbf16>
    %cst_62 = arith.constant dense<0.000000e+00> : vector<128x64xf32>
    %41 = tpu.matmul %40, %30, %cst_62 {dimension_numbers = #tpu.dot_dimension_numbers<[1], [0], [0], [1], [0, 0, 1, 1], [], []>} : vector<128x24xbf16>, vector<24x64xbf16>, vector<128x64xf32> -> vector<128x64xf32>
    %42 = arith.addf %38, %41 : vector<128x64xf32>
    %43 = vector.broadcast %31 : vector<1x64xf32> to vector<128x64xf32>
    %44 = arith.addf %42, %43 : vector<128x64xf32>
    %cst_63 = arith.constant 0.000000e+00 : f32
    %45 = vector.broadcast %cst_63 : f32 to vector<128x64xf32>
    %46 = arith.maximumf %44, %45 : vector<128x64xf32>
    %47 = vector.shape_cast %46 : vector<128x64xf32> to vector<8x16x64xf32>
    %48 = arith.truncf %47 : vector<8x16x64xf32> to vector<8x16x64xbf16>
    %c1_64 = arith.constant 1 : index
    %c8_65 = arith.constant 8 : index
    %c0_66 = arith.constant 0 : index
    %49 = vector.load %arg10[%c1_64, %c8_65, %c0_66] : memref<18x32x64xbf16, #tpu.memory_space<vmem>>, vector<8x16x64xbf16>
    tpu.vector_store %arg10[%c1_64, %c8_65, %c0_66], %48 {strides = array<i32>} : memref<18x32x64xbf16, #tpu.memory_space<vmem>>, vector<8x16x64xbf16>,
    %50 = vector.extract_strided_slice %24 {offsets = [8, 0, 0], sizes = [8, 16, 24], strides = [1, 1, 1]} : vector<18x16x24xbf16> to vector<8x16x24xbf16>
    %51 = vector.shape_cast %50 : vector<8x16x24xbf16> to vector<128x24xbf16>
    %cst_67 = arith.constant dense<0.000000e+00> : vector<128x64xf32>
    %52 = tpu.matmul %51, %26, %cst_67 {dimension_numbers = #tpu.dot_dimension_numbers<[1], [0], [0], [1], [0, 0, 1, 1], [], []>} : vector<128x24xbf16>, vector<24x64xbf16>, vector<128x64xf32> -> vector<128x64xf32>
    %53 = vector.extract_strided_slice %24 {offsets = [9, 0, 0], sizes = [8, 16, 24], strides = [1, 1, 1]} : vector<18x16x24xbf16> to vector<8x16x24xbf16>
    %54 = vector.shape_cast %53 : vector<8x16x24xbf16> to vector<128x24xbf16>
    %cst_68 = arith.constant dense<0.000000e+00> : vector<128x64xf32>
    %55 = tpu.matmul %54, %28, %cst_68 {dimension_numbers = #tpu.dot_dimension_numbers<[1], [0], [0], [1], [0, 0, 1, 1], [], []>} : vector<128x24xbf16>, vector<24x64xbf16>, vector<128x64xf32> -> vector<128x64xf32>
    %56 = arith.addf %52, %55 : vector<128x64xf32>
    %57 = vector.extract_strided_slice %24 {offsets = [10, 0, 0], sizes = [8, 16, 24], strides = [1, 1, 1]} : vector<18x16x24xbf16> to vector<8x16x24xbf16>
    %58 = vector.shape_cast %57 : vector<8x16x24xbf16> to vector<128x24xbf16>
    %cst_69 = arith.constant dense<0.000000e+00> : vector<128x64xf32>
    %59 = tpu.matmul %58, %30, %cst_69 {dimension_numbers = #tpu.dot_dimension_numbers<[1], [0], [0], [1], [0, 0, 1, 1], [], []>} : vector<128x24xbf16>, vector<24x64xbf16>, vector<128x64xf32> -> vector<128x64xf32>
    %60 = arith.addf %56, %59 : vector<128x64xf32>
    %61 = vector.broadcast %31 : vector<1x64xf32> to vector<128x64xf32>
    %62 = arith.addf %60, %61 : vector<128x64xf32>
    %cst_70 = arith.constant 0.000000e+00 : f32
    %63 = vector.broadcast %cst_70 : f32 to vector<128x64xf32>
    %64 = arith.maximumf %62, %63 : vector<128x64xf32>
    %65 = vector.shape_cast %64 : vector<128x64xf32> to vector<8x16x64xf32>
    %66 = arith.truncf %65 : vector<8x16x64xf32> to vector<8x16x64xbf16>
    %c9_71 = arith.constant 9 : index
    %c8_72 = arith.constant 8 : index
    %c0_73 = arith.constant 0 : index
    %67 = vector.load %arg10[%c9_71, %c8_72, %c0_73] : memref<18x32x64xbf16, #tpu.memory_space<vmem>>, vector<8x16x64xbf16>
    tpu.vector_store %arg10[%c9_71, %c8_72, %c0_73], %66 {strides = array<i32>} : memref<18x32x64xbf16, #tpu.memory_space<vmem>>, vector<8x16x64xbf16>,
    %c0_74 = arith.constant 0 : index
    %c7_75 = arith.constant 7 : index
    %c0_76 = arith.constant 0 : index
    %68 = vector.load %arg10[%c0_74, %c7_75, %c0_76] : memref<18x32x64xbf16, #tpu.memory_space<vmem>>, vector<18x16x64xbf16>
    %c0_77 = arith.constant 0 : index
    %c8_78 = arith.constant 8 : index
    %c0_79 = arith.constant 0 : index
    %69 = vector.load %arg10[%c0_77, %c8_78, %c0_79] : memref<18x32x64xbf16, #tpu.memory_space<vmem>>, vector<18x16x64xbf16>
    %c0_80 = arith.constant 0 : index
    %c9_81 = arith.constant 9 : index
    %c0_82 = arith.constant 0 : index
    %70 = vector.load %arg10[%c0_80, %c9_81, %c0_82] : memref<18x32x64xbf16, #tpu.memory_space<vmem>>, vector<18x16x64xbf16>
    %71 = tpu.concatenate %68, %69, %70 in 2 : vector<18x16x64xbf16>, vector<18x16x64xbf16>, vector<18x16x64xbf16> -> vector<18x16x192xbf16>
    %c0_83 = arith.constant 0 : index
    %c0_84 = arith.constant 0 : index
    %c0_85 = arith.constant 0 : index
    %72 = vector.load %arg4[%c0_83, %c0_84, %c0_85] : memref<3x192x128xbf16, #tpu.memory_space<vmem>>, vector<1x192x128xbf16>
    %73 = vector.shape_cast %72 : vector<1x192x128xbf16> to vector<192x128xbf16>
    %c1_86 = arith.constant 1 : index
    %c0_87 = arith.constant 0 : index
    %c0_88 = arith.constant 0 : index
    %74 = vector.load %arg4[%c1_86, %c0_87, %c0_88] : memref<3x192x128xbf16, #tpu.memory_space<vmem>>, vector<1x192x128xbf16>
    %75 = vector.shape_cast %74 : vector<1x192x128xbf16> to vector<192x128xbf16>
    %c2_89 = arith.constant 2 : index
    %c0_90 = arith.constant 0 : index
    %c0_91 = arith.constant 0 : index
    %76 = vector.load %arg4[%c2_89, %c0_90, %c0_91] : memref<3x192x128xbf16, #tpu.memory_space<vmem>>, vector<1x192x128xbf16>
    %77 = vector.shape_cast %76 : vector<1x192x128xbf16> to vector<192x128xbf16>
    %c0_92 = arith.constant 0 : index
    %c0_93 = arith.constant 0 : index
    %78 = vector.load %arg5[%c0_92, %c0_93] : memref<1x128xf32, #tpu.memory_space<vmem>>, vector<1x128xf32>
    %79 = vector.extract_strided_slice %71 {offsets = [0, 0, 0], sizes = [8, 16, 192], strides = [1, 1, 1]} : vector<18x16x192xbf16> to vector<8x16x192xbf16>
    %80 = vector.shape_cast %79 : vector<8x16x192xbf16> to vector<128x192xbf16>
    %cst_94 = arith.constant dense<0.000000e+00> : vector<128x128xf32>
    %81 = tpu.matmul %80, %73, %cst_94 {dimension_numbers = #tpu.dot_dimension_numbers<[1], [0], [0], [1], [0, 0, 1, 1], [], []>} : vector<128x192xbf16>, vector<192x128xbf16>, vector<128x128xf32> -> vector<128x128xf32>
    %82 = vector.extract_strided_slice %71 {offsets = [1, 0, 0], sizes = [8, 16, 192], strides = [1, 1, 1]} : vector<18x16x192xbf16> to vector<8x16x192xbf16>
    %83 = vector.shape_cast %82 : vector<8x16x192xbf16> to vector<128x192xbf16>
    %cst_95 = arith.constant dense<0.000000e+00> : vector<128x128xf32>
    %84 = tpu.matmul %83, %75, %cst_95 {dimension_numbers = #tpu.dot_dimension_numbers<[1], [0], [0], [1], [0, 0, 1, 1], [], []>} : vector<128x192xbf16>, vector<192x128xbf16>, vector<128x128xf32> -> vector<128x128xf32>
    %85 = arith.addf %81, %84 : vector<128x128xf32>
    %86 = vector.extract_strided_slice %71 {offsets = [2, 0, 0], sizes = [8, 16, 192], strides = [1, 1, 1]} : vector<18x16x192xbf16> to vector<8x16x192xbf16>
    %87 = vector.shape_cast %86 : vector<8x16x192xbf16> to vector<128x192xbf16>
    %cst_96 = arith.constant dense<0.000000e+00> : vector<128x128xf32>
    %88 = tpu.matmul %87, %77, %cst_96 {dimension_numbers = #tpu.dot_dimension_numbers<[1], [0], [0], [1], [0, 0, 1, 1], [], []>} : vector<128x192xbf16>, vector<192x128xbf16>, vector<128x128xf32> -> vector<128x128xf32>
    %89 = arith.addf %85, %88 : vector<128x128xf32>
    %90 = vector.broadcast %78 : vector<1x128xf32> to vector<128x128xf32>
    %91 = arith.addf %89, %90 : vector<128x128xf32>
    %cst_97 = arith.constant 0.000000e+00 : f32
    %92 = vector.broadcast %cst_97 : f32 to vector<128x128xf32>
    %93 = arith.maximumf %91, %92 : vector<128x128xf32>
    %94 = vector.shape_cast %93 : vector<128x128xf32> to vector<8x16x128xf32>
    %95 = arith.truncf %94 : vector<8x16x128xf32> to vector<8x16x128xbf16>
    %c1_98 = arith.constant 1 : index
    %c8_99 = arith.constant 8 : index
    %c0_100 = arith.constant 0 : index
    %96 = vector.load %arg11[%c1_98, %c8_99, %c0_100] : memref<18x32x128xbf16, #tpu.memory_space<vmem>>, vector<8x16x128xbf16>
    tpu.vector_store %arg11[%c1_98, %c8_99, %c0_100], %95 {strides = array<i32>} : memref<18x32x128xbf16, #tpu.memory_space<vmem>>, vector<8x16x128xbf16>,
    %97 = vector.extract_strided_slice %71 {offsets = [8, 0, 0], sizes = [8, 16, 192], strides = [1, 1, 1]} : vector<18x16x192xbf16> to vector<8x16x192xbf16>
    %98 = vector.shape_cast %97 : vector<8x16x192xbf16> to vector<128x192xbf16>
    %cst_101 = arith.constant dense<0.000000e+00> : vector<128x128xf32>
    %99 = tpu.matmul %98, %73, %cst_101 {dimension_numbers = #tpu.dot_dimension_numbers<[1], [0], [0], [1], [0, 0, 1, 1], [], []>} : vector<128x192xbf16>, vector<192x128xbf16>, vector<128x128xf32> -> vector<128x128xf32>
    %100 = vector.extract_strided_slice %71 {offsets = [9, 0, 0], sizes = [8, 16, 192], strides = [1, 1, 1]} : vector<18x16x192xbf16> to vector<8x16x192xbf16>
    %101 = vector.shape_cast %100 : vector<8x16x192xbf16> to vector<128x192xbf16>
    %cst_102 = arith.constant dense<0.000000e+00> : vector<128x128xf32>
    %102 = tpu.matmul %101, %75, %cst_102 {dimension_numbers = #tpu.dot_dimension_numbers<[1], [0], [0], [1], [0, 0, 1, 1], [], []>} : vector<128x192xbf16>, vector<192x128xbf16>, vector<128x128xf32> -> vector<128x128xf32>
    %103 = arith.addf %99, %102 : vector<128x128xf32>
    %104 = vector.extract_strided_slice %71 {offsets = [10, 0, 0], sizes = [8, 16, 192], strides = [1, 1, 1]} : vector<18x16x192xbf16> to vector<8x16x192xbf16>
    %105 = vector.shape_cast %104 : vector<8x16x192xbf16> to vector<128x192xbf16>
    %cst_103 = arith.constant dense<0.000000e+00> : vector<128x128xf32>
    %106 = tpu.matmul %105, %77, %cst_103 {dimension_numbers = #tpu.dot_dimension_numbers<[1], [0], [0], [1], [0, 0, 1, 1], [], []>} : vector<128x192xbf16>, vector<192x128xbf16>, vector<128x128xf32> -> vector<128x128xf32>
    %107 = arith.addf %103, %106 : vector<128x128xf32>
    %108 = vector.broadcast %78 : vector<1x128xf32> to vector<128x128xf32>
    %109 = arith.addf %107, %108 : vector<128x128xf32>
    %cst_104 = arith.constant 0.000000e+00 : f32
    %110 = vector.broadcast %cst_104 : f32 to vector<128x128xf32>
    %111 = arith.maximumf %109, %110 : vector<128x128xf32>
    %112 = vector.shape_cast %111 : vector<128x128xf32> to vector<8x16x128xf32>
    %113 = arith.truncf %112 : vector<8x16x128xf32> to vector<8x16x128xbf16>
    %c9_105 = arith.constant 9 : index
    %c8_106 = arith.constant 8 : index
    %c0_107 = arith.constant 0 : index
    %114 = vector.load %arg11[%c9_105, %c8_106, %c0_107] : memref<18x32x128xbf16, #tpu.memory_space<vmem>>, vector<8x16x128xbf16>
    tpu.vector_store %arg11[%c9_105, %c8_106, %c0_107], %113 {strides = array<i32>} : memref<18x32x128xbf16, #tpu.memory_space<vmem>>, vector<8x16x128xbf16>,
    %c0_108 = arith.constant 0 : index
    %c7_109 = arith.constant 7 : index
    %c0_110 = arith.constant 0 : index
    %115 = vector.load %arg11[%c0_108, %c7_109, %c0_110] : memref<18x32x128xbf16, #tpu.memory_space<vmem>>, vector<18x16x128xbf16>
    %c0_111 = arith.constant 0 : index
    %c8_112 = arith.constant 8 : index
    %c0_113 = arith.constant 0 : index
    %116 = vector.load %arg11[%c0_111, %c8_112, %c0_113] : memref<18x32x128xbf16, #tpu.memory_space<vmem>>, vector<18x16x128xbf16>
    %c0_114 = arith.constant 0 : index
    %c9_115 = arith.constant 9 : index
    %c0_116 = arith.constant 0 : index
    %117 = vector.load %arg11[%c0_114, %c9_115, %c0_116] : memref<18x32x128xbf16, #tpu.memory_space<vmem>>, vector<18x16x128xbf16>
    %118 = tpu.concatenate %115, %116, %117 in 2 : vector<18x16x128xbf16>, vector<18x16x128xbf16>, vector<18x16x128xbf16> -> vector<18x16x384xbf16>
    %c0_117 = arith.constant 0 : index
    %c0_118 = arith.constant 0 : index
    %c0_119 = arith.constant 0 : index
    %119 = vector.load %arg6[%c0_117, %c0_118, %c0_119] : memref<3x384x256xbf16, #tpu.memory_space<vmem>>, vector<1x384x256xbf16>
    %120 = vector.shape_cast %119 : vector<1x384x256xbf16> to vector<384x256xbf16>
    %c1_120 = arith.constant 1 : index
    %c0_121 = arith.constant 0 : index
    %c0_122 = arith.constant 0 : index
    %121 = vector.load %arg6[%c1_120, %c0_121, %c0_122] : memref<3x384x256xbf16, #tpu.memory_space<vmem>>, vector<1x384x256xbf16>
    %122 = vector.shape_cast %121 : vector<1x384x256xbf16> to vector<384x256xbf16>
    %c2_123 = arith.constant 2 : index
    %c0_124 = arith.constant 0 : index
    %c0_125 = arith.constant 0 : index
    %123 = vector.load %arg6[%c2_123, %c0_124, %c0_125] : memref<3x384x256xbf16, #tpu.memory_space<vmem>>, vector<1x384x256xbf16>
    %124 = vector.shape_cast %123 : vector<1x384x256xbf16> to vector<384x256xbf16>
    %c0_126 = arith.constant 0 : index
    %c0_127 = arith.constant 0 : index
    %125 = vector.load %arg7[%c0_126, %c0_127] : memref<1x256xf32, #tpu.memory_space<vmem>>, vector<1x256xf32>
    %126 = vector.extract_strided_slice %118 {offsets = [0, 0, 0], sizes = [8, 16, 384], strides = [1, 1, 1]} : vector<18x16x384xbf16> to vector<8x16x384xbf16>
    %127 = vector.shape_cast %126 : vector<8x16x384xbf16> to vector<128x384xbf16>
    %cst_128 = arith.constant dense<0.000000e+00> : vector<128x256xf32>
    %128 = tpu.matmul %127, %120, %cst_128 {dimension_numbers = #tpu.dot_dimension_numbers<[1], [0], [0], [1], [0, 0, 1, 1], [], []>} : vector<128x384xbf16>, vector<384x256xbf16>, vector<128x256xf32> -> vector<128x256xf32>
    %129 = vector.extract_strided_slice %118 {offsets = [1, 0, 0], sizes = [8, 16, 384], strides = [1, 1, 1]} : vector<18x16x384xbf16> to vector<8x16x384xbf16>
    %130 = vector.shape_cast %129 : vector<8x16x384xbf16> to vector<128x384xbf16>
    %cst_129 = arith.constant dense<0.000000e+00> : vector<128x256xf32>
    %131 = tpu.matmul %130, %122, %cst_129 {dimension_numbers = #tpu.dot_dimension_numbers<[1], [0], [0], [1], [0, 0, 1, 1], [], []>} : vector<128x384xbf16>, vector<384x256xbf16>, vector<128x256xf32> -> vector<128x256xf32>
    %132 = arith.addf %128, %131 : vector<128x256xf32>
    %133 = vector.extract_strided_slice %118 {offsets = [2, 0, 0], sizes = [8, 16, 384], strides = [1, 1, 1]} : vector<18x16x384xbf16> to vector<8x16x384xbf16>
    %134 = vector.shape_cast %133 : vector<8x16x384xbf16> to vector<128x384xbf16>
    %cst_130 = arith.constant dense<0.000000e+00> : vector<128x256xf32>
    %135 = tpu.matmul %134, %124, %cst_130 {dimension_numbers = #tpu.dot_dimension_numbers<[1], [0], [0], [1], [0, 0, 1, 1], [], []>} : vector<128x384xbf16>, vector<384x256xbf16>, vector<128x256xf32> -> vector<128x256xf32>
    %136 = arith.addf %132, %135 : vector<128x256xf32>
    %137 = vector.broadcast %125 : vector<1x256xf32> to vector<128x256xf32>
    %138 = arith.addf %136, %137 : vector<128x256xf32>
    %cst_131 = arith.constant 0.000000e+00 : f32
    %139 = vector.broadcast %cst_131 : f32 to vector<128x256xf32>
    %140 = arith.maximumf %138, %139 : vector<128x256xf32>
    %141 = vector.shape_cast %140 : vector<128x256xf32> to vector<8x16x256xf32>
    %c0_132 = arith.constant 0 : index
    %c0_133 = arith.constant 0 : index
    %c0_134 = arith.constant 0 : index
    %c0_135 = arith.constant 0 : index
    %142 = vector.load %arg8[%c0_132, %c0_133, %c0_134, %c0_135] : memref<1x16x16x256xf32, #tpu.memory_space<vmem>>, vector<1x8x16x256xf32>
    %143 = vector.shape_cast %142 : vector<1x8x16x256xf32> to vector<8x16x256xf32>
    %144 = vector.shape_cast %141 : vector<8x16x256xf32> to vector<1x8x16x256xf32>
    tpu.vector_store %arg8[%c0_132, %c0_133, %c0_134, %c0_135], %144 {strides = array<i32>} : memref<1x16x16x256xf32, #tpu.memory_space<vmem>>, vector<1x8x16x256xf32>,
    %145 = vector.extract_strided_slice %118 {offsets = [8, 0, 0], sizes = [8, 16, 384], strides = [1, 1, 1]} : vector<18x16x384xbf16> to vector<8x16x384xbf16>
    %146 = vector.shape_cast %145 : vector<8x16x384xbf16> to vector<128x384xbf16>
    %cst_136 = arith.constant dense<0.000000e+00> : vector<128x256xf32>
    %147 = tpu.matmul %146, %120, %cst_136 {dimension_numbers = #tpu.dot_dimension_numbers<[1], [0], [0], [1], [0, 0, 1, 1], [], []>} : vector<128x384xbf16>, vector<384x256xbf16>, vector<128x256xf32> -> vector<128x256xf32>
    %148 = vector.extract_strided_slice %118 {offsets = [9, 0, 0], sizes = [8, 16, 384], strides = [1, 1, 1]} : vector<18x16x384xbf16> to vector<8x16x384xbf16>
    %149 = vector.shape_cast %148 : vector<8x16x384xbf16> to vector<128x384xbf16>
    %cst_137 = arith.constant dense<0.000000e+00> : vector<128x256xf32>
    %150 = tpu.matmul %149, %122, %cst_137 {dimension_numbers = #tpu.dot_dimension_numbers<[1], [0], [0], [1], [0, 0, 1, 1], [], []>} : vector<128x384xbf16>, vector<384x256xbf16>, vector<128x256xf32> -> vector<128x256xf32>
    %151 = arith.addf %147, %150 : vector<128x256xf32>
    %152 = vector.extract_strided_slice %118 {offsets = [10, 0, 0], sizes = [8, 16, 384], strides = [1, 1, 1]} : vector<18x16x384xbf16> to vector<8x16x384xbf16>
    %153 = vector.shape_cast %152 : vector<8x16x384xbf16> to vector<128x384xbf16>
    %cst_138 = arith.constant dense<0.000000e+00> : vector<128x256xf32>
    %154 = tpu.matmul %153, %124, %cst_138 {dimension_numbers = #tpu.dot_dimension_numbers<[1], [0], [0], [1], [0, 0, 1, 1], [], []>} : vector<128x384xbf16>, vector<384x256xbf16>, vector<128x256xf32> -> vector<128x256xf32>
    %155 = arith.addf %151, %154 : vector<128x256xf32>
    %156 = vector.broadcast %125 : vector<1x256xf32> to vector<128x256xf32>
    %157 = arith.addf %155, %156 : vector<128x256xf32>
    %cst_139 = arith.constant 0.000000e+00 : f32
    %158 = vector.broadcast %cst_139 : f32 to vector<128x256xf32>
    %159 = arith.maximumf %157, %158 : vector<128x256xf32>
    %160 = vector.shape_cast %159 : vector<128x256xf32> to vector<8x16x256xf32>
    %c0_140 = arith.constant 0 : index
    %c8_141 = arith.constant 8 : index
    %c0_142 = arith.constant 0 : index
    %c0_143 = arith.constant 0 : index
    %161 = vector.load %arg8[%c0_140, %c8_141, %c0_142, %c0_143] : memref<1x16x16x256xf32, #tpu.memory_space<vmem>>, vector<1x8x16x256xf32>
    %162 = vector.shape_cast %161 : vector<1x8x16x256xf32> to vector<8x16x256xf32>
    %163 = vector.shape_cast %160 : vector<8x16x256xf32> to vector<1x8x16x256xf32>
    tpu.vector_store %arg8[%c0_140, %c8_141, %c0_142, %c0_143], %163 {strides = array<i32>} : memref<1x16x16x256xf32, #tpu.memory_space<vmem>>, vector<1x8x16x256xf32>,
    return
  }
  func.func @transform_0(%arg0: i32) -> (i32, i32, i32, i32) {
    %c0_i32 = arith.constant 0 : i32
    %c0_i32_0 = arith.constant 0 : i32
    %c0_i32_1 = arith.constant 0 : i32
    %c0_i32_2 = arith.constant 0 : i32
    return %arg0, %c0_i32, %c0_i32_0, %c0_i32_1 : i32, i32, i32, i32
  }
  func.func @transform_1(%arg0: i32) -> (i32, i32, i32) {
    %c0_i32 = arith.constant 0 : i32
    %c0_i32_0 = arith.constant 0 : i32
    %c0_i32_1 = arith.constant 0 : i32
    %c0_i32_2 = arith.constant 0 : i32
    return %c0_i32, %c0_i32_0, %c0_i32_1 : i32, i32, i32
  }
  func.func @transform_2(%arg0: i32) -> (i32, i32) {
    %c0_i32 = arith.constant 0 : i32
    %c0_i32_0 = arith.constant 0 : i32
    %c0_i32_1 = arith.constant 0 : i32
    return %c0_i32, %c0_i32_0 : i32, i32
  }
  func.func @transform_3(%arg0: i32) -> (i32, i32, i32) {
    %c0_i32 = arith.constant 0 : i32
    %c0_i32_0 = arith.constant 0 : i32
    %c0_i32_1 = arith.constant 0 : i32
    %c0_i32_2 = arith.constant 0 : i32
    return %c0_i32, %c0_i32_0, %c0_i32_1 : i32, i32, i32
  }
  func.func @transform_4(%arg0: i32) -> (i32, i32) {
    %c0_i32 = arith.constant 0 : i32
    %c0_i32_0 = arith.constant 0 : i32
    %c0_i32_1 = arith.constant 0 : i32
    return %c0_i32, %c0_i32_0 : i32, i32
  }
  func.func @transform_5(%arg0: i32) -> (i32, i32, i32) {
    %c0_i32 = arith.constant 0 : i32
    %c0_i32_0 = arith.constant 0 : i32
    %c0_i32_1 = arith.constant 0 : i32
    %c0_i32_2 = arith.constant 0 : i32
    return %c0_i32, %c0_i32_0, %c0_i32_1 : i32, i32, i32
  }
  func.func @transform_6(%arg0: i32) -> (i32, i32) {
    %c0_i32 = arith.constant 0 : i32
    %c0_i32_0 = arith.constant 0 : i32
    %c0_i32_1 = arith.constant 0 : i32
    return %c0_i32, %c0_i32_0 : i32, i32
  }
  func.func @transform_7(%arg0: i32) -> (i32, i32, i32, i32) {
    %c0_i32 = arith.constant 0 : i32
    %c0_i32_0 = arith.constant 0 : i32
    %c0_i32_1 = arith.constant 0 : i32
    %c0_i32_2 = arith.constant 0 : i32
    return %arg0, %c0_i32, %c0_i32_0, %c0_i32_1 : i32, i32, i32, i32
  }
}

</mosaic_0001>

<bundles_post_ra>
// kernel: encoder_forward_nhwc.1
= control target key start
LH: loop header
LB: loop body
LE: loop exit
PB: predicated region body
PF: predicated region fallthrough
CT: control target
= control target key end

     0   :  { %12 = vsyncpa [#allocation6], 0  ;;  %s13648_s0 = inlined_call_operand.vmem [shape: bf16[2,16,16,8], index: 0, kind: input, shape index: {}]   ;;  %s13649_s1 = inlined_call_operand.vmem [shape: bf16[3,24,64], index: 1, kind: input, shape index: {}]   ;;  %s13650_s2 = inlined_call_operand.vmem [shape: f32[1,64], index: 2, kind: input, shape index: {}]   ;;  %s13651_s3 = inlined_call_operand.vmem [shape: bf16[3,192,128], index: 3, kind: input, shape index: {}]   ;;  %s13652_s4 = inlined_call_operand.vmem [shape: f32[1,128], index: 4, kind: input, shape index: {}]   ;;  %s13653_s5 = inlined_call_operand.vmem [shape: bf16[3,384,256], index: 5, kind: input, shape index: {}]   ;;  %s13654_s6 = inlined_call_operand.vmem [shape: f32[1,256], index: 6, kind: input, shape index: {}]   ;;  %s13655_s7 = inlined_call_operand.hbm [shape: f32[2,16,16,256], index: 7, kind: output, shape index: {}]  }
   0x1   :  { %14 = vsyncpa [#allocation6 + $0x1], 0  ;;  %s10311_s24 = smov 0   ;;  %s10313_s25 = smov 0  }
   0x2   :  { %s10315_s26 = smov 0   ;;  %s10317_s27 = smov 0  }
   0x3 LB: > { %s10332_s28 = sadd.s32 4294967295, %s10263_s27   ;;  %s8694_s29 = sadd.s32 4294967294, %s10263_s27   ;;  %s10263_s27 = sphi %s10317_s27, %s13813_s27   ;;  %s10259_s26 = sphi %s10315_s26, %s13812_s26   ;;  %s10255_s25 = sphi %s10313_s25, %s13811_s25   ;;  %s10251_s24 = sphi %s10311_s24, %s13810_s24  }
   0x4   : > { %s10336_s30 = sadd.s32 1, %s10263_s27   ;;  %s179_s8 = sadd.s32 1, %s10259_s26 }
   0x5   : > { %s176_s9 = ssub.s32 %s10263_s27, %s10336_s30  ;;  %p189_p0 = scmp.ne.s32.totalorder %s10259_s26, %s10255_s25 }
   0x6   : > { %p177_p1 = scmp.eq.s32.totalorder %s176_s9, 0  ;;  %p190_p2 = scmp.eq.s32.totalorder %s10332_s28, 1 }
   0x7   : > { %p195_p3 = scmp.ne.s32.totalorder %s10255_s25, %s10251_s24  ;;  %p196_p4 = scmp.eq.s32.totalorder %s8694_s29, 1 }
   0x8   : > { %s10347_s10 = scalar_select %p177_p1, %s10259_s26, %s179_s8  }
   0x9   : > { %p10349_p5 = por %p190_p2, %p189_p0  ;;  %p10353_p6 = por %p196_p4, %p195_p3 }
   0xa   : > { %p8697_p7 = scmp.ge.s32.totalorder %s10263_s27, 1  ;;  %p240_p8 = scmp.lt.s32.totalorder %s10263_s27, 3 }
   0xc   : > { %p241_p9 = pnand %p8697_p7, %p240_p8 }
   0xe   : > { %244 = sbr.rel (%p241_p9) target bundleno = 1698 (0x6a2), region = 48 }
  0x15   : > { %p272_p10 = scmp.lt.s32.totalorder %s10332_s28, 1  ;;  %vm284_vm0 = vcmask 60416   ;;  %vm303_vm1 = vcmask 64516   ;;  %v13656_v0 = vmov 0   ;;  %vm278_vm2 = vcmask 64512   ;;  %s10266_s18 = smov 16  }
  0x16   : > { %305 = vst.msk [vmem:[#allocation2 + $0x18] sm:$0xf0] %vm303_vm1, %v13656_v0  ;;  %306 = vst.msk [vmem:[#allocation2 + $0x28] sm:$0xf0] %vm303_vm1, %v13656_v0  ;;  %vm1051_vm3 = vcmask 1046528   ;;  %s10267_s19 = smov 8  }
  0x17   : > { %286 = vst.msk [vmem:[#allocation2 + $0x10] sm:$0xf] %vm284_vm0, %v13656_v0  ;;  %287 = vst.msk [vmem:[#allocation2 + $0x20] sm:$0xf] %vm284_vm0, %v13656_v0  ;;  %s273_s13 = scalar_select %p272_p10, %s10332_s28, 1  ;;  %vm1523_vm5 = vcmask 1043456  }
  0x18   : > { %288 = vst.msk [vmem:[#allocation2 + $0x30] sm:$0xf] %vm284_vm0, %v13656_v0  ;;  %289 = vst.msk [vmem:[#allocation2 + $0x40] sm:$0xf] %vm284_vm0, %v13656_v0  ;;  %vm672_vm4 = vsmask.f32 7424 }
  0x19   : > { %290 = vst.msk [vmem:[#allocation2 + $0x50] sm:$0xf] %vm284_vm0, %v13656_v0  ;;  %291 = vst.msk [vmem:[#allocation2 + $0x60] sm:$0xf] %vm284_vm0, %v13656_v0  ;;  %s9204_s14 = sshll.u32 %s273_s13, 7  ;;  %vm1268_vm6 = vcmask 130048  }
  0x1a   : > { %292 = vst.msk [vmem:[#allocation2 + $0x70] sm:$0xf] %vm284_vm0, %v13656_v0  ;;  %293 = vst.msk [vmem:[#allocation2 + $0x80] sm:$0xf] %vm284_vm0, %v13656_v0  ;;  %s10486_s17 = scalar_lea.vmem %s13648_s0, %s9204_s14  ;;  %vm1498_vm7 = vcmask 195584   ;;  %vm328_vm9 = vcmask 519168  }
  0x1b   : > { %294 = vst.msk [vmem:[#allocation2 + $0x90] sm:$0xf] %vm284_vm0, %v13656_v0  ;;  %295 = vst.msk [vmem:[#allocation2 + $0xa0] sm:$0xf] %vm284_vm0, %v13656_v0  ;;  %v9820_v1 = vld [vmem:[%s10486_s17 + $0x4] ss:$0 sps:$4 sm:$0xff]  }
  0x1c   : > { %296 = vst.msk [vmem:[#allocation2 + $0xb0] sm:$0xf] %vm284_vm0, %v13656_v0  ;;  %297 = vst.msk [vmem:[#allocation2 + $0xc0] sm:$0xf] %vm284_vm0, %v13656_v0  ;;  %v9821_v2 = vld [vmem:[%s10486_s17] ss:$0 sps:$4 sm:$0xff]  }
  0x1d   : > { %298 = vst.msk [vmem:[#allocation2 + $0xd0] sm:$0xf] %vm284_vm0, %v13656_v0  ;;  %299 = vst.msk [vmem:[#allocation2 + $0xe0] sm:$0xf] %vm284_vm0, %v13656_v0  ;;  %v9822_v3 = vld [vmem:[%s10486_s17 + $0xc] ss:$0 sps:$4 sm:$0xff]  }
  0x1e   : > { %300 = vst.msk [vmem:[#allocation2 + $0xf0] sm:$0xf] %vm284_vm0, %v13656_v0  ;;  %301 = vst.msk [vmem:[#allocation2 + $0x100] sm:$0xf] %vm284_vm0, %v13656_v0  ;;  %v9823_v4 = vld [vmem:[%s10486_s17 + $0x8] ss:$0 sps:$4 sm:$0xff]  }
  0x1f   : > { %307 = vst.msk [vmem:[#allocation2 + $0x38] sm:$0xf0] %vm303_vm1, %v13656_v0  ;;  %308 = vst.msk [vmem:[#allocation2 + $0x48] sm:$0xf0] %vm303_vm1, %v13656_v0  ;;  %v9824_v5 = vld [vmem:[%s10486_s17 + $0x10] ss:$0 sps:$4 sm:$0xff]  }
  0x20   : > { %309 = vst.msk [vmem:[#allocation2 + $0x58] sm:$0xf0] %vm303_vm1, %v13656_v0  ;;  %310 = vst.msk [vmem:[#allocation2 + $0x68] sm:$0xf0] %vm303_vm1, %v13656_v0  ;;  %v9825_v6 = vld [vmem:[%s10486_s17 + $0x14] ss:$0 sps:$4 sm:$0xff]  }
  0x21   : > { %311 = vst.msk [vmem:[#allocation2 + $0x78] sm:$0xf0] %vm303_vm1, %v13656_v0  ;;  %312 = vst.msk [vmem:[#allocation2 + $0x88] sm:$0xf0] %vm303_vm1, %v13656_v0  ;;  %v9826_v7 = vld [vmem:[%s10486_s17 + $0x1c] ss:$0 sps:$4 sm:$0xff]  }
  0x22   : > { %313 = vst.msk [vmem:[#allocation2 + $0x98] sm:$0xf0] %vm303_vm1, %v13656_v0  ;;  %314 = vst.msk [vmem:[#allocation2 + $0xa8] sm:$0xf0] %vm303_vm1, %v13656_v0  ;;  %v9827_v8 = vld [vmem:[%s10486_s17 + $0x18] ss:$0 sps:$4 sm:$0xff]  }
  0x23   : > { %315 = vst.msk [vmem:[#allocation2 + $0xb8] sm:$0xf0] %vm303_vm1, %v13656_v0  ;;  %316 = vst.msk [vmem:[#allocation2 + $0xc8] sm:$0xf0] %vm303_vm1, %v13656_v0  ;;  %v9828_v9 = vld [vmem:[%s10486_s17 + $0x24] ss:$0 sps:$4 sm:$0xff]  }
  0x24   : > { %317 = vst.msk [vmem:[#allocation2 + $0xd8] sm:$0xf0] %vm303_vm1, %v13656_v0  ;;  %318 = vst.msk [vmem:[#allocation2 + $0xe8] sm:$0xf0] %vm303_vm1, %v13656_v0  ;;  %v9829_v10 = vld [vmem:[%s10486_s17 + $0x20] ss:$0 sps:$4 sm:$0xff]  }
  0x25   : > { %319 = vst.msk [vmem:[#allocation2 + $0xf8] sm:$0xf0] %vm303_vm1, %v13656_v0  ;;  %320 = vst.msk [vmem:[#allocation2 + $0x108] sm:$0xf0] %vm303_vm1, %v13656_v0  ;;  %v9830_v11 = vld [vmem:[%s10486_s17 + $0x2c] ss:$0 sps:$4 sm:$0xff]  }
  0x26   : > { %366 = vst [vmem:[#allocation4] sm:$0xff] %v13656_v0  ;;  %367 = vst [vmem:[#allocation4 + $0x8] sm:$0xff] %v13656_v0  ;;  %v9831_v12 = vld [vmem:[%s10486_s17 + $0x28] ss:$0 sps:$4 sm:$0xff]   ;;  %v9832_v13 = vld [vmem:[%s10486_s17 + $0x34] ss:$0 sps:$4 sm:$0xff]  }
  0x27   : > { %369 = vst [vmem:[#allocation4 + $0x110] sm:$0xff] %v13656_v0  ;;  %370 = vst [vmem:[#allocation4 + $0x118] sm:$0xff] %v13656_v0  ;;  %v9833_v16 = vld [vmem:[%s10486_s17 + $0x30] ss:$0 sps:$4 sm:$0xff]   ;;  %v9834_v59 = vld [vmem:[%s10486_s17 + $0x3c] ss:$0 sps:$4 sm:$0xff]  }
  0x28   : > { %372 = vst [vmem:[#allocation4 + $0x10] sm:$0xf] %v13656_v0  ;;  %373 = vst [vmem:[#allocation4 + $0x20] sm:$0xf] %v13656_v0  ;;  %v9835_v61 = vld [vmem:[%s10486_s17 + $0x38] ss:$0 sps:$4 sm:$0xff]  }
  0x29   : > { %374 = vst [vmem:[#allocation4 + $0x30] sm:$0xf] %v13656_v0  ;;  %375 = vst [vmem:[#allocation4 + $0x40] sm:$0xf] %v13656_v0  ;;  %vm1353_vm8 = vsmask.f32 4352 }
  0x2a   : > { %376 = vst [vmem:[#allocation4 + $0x50] sm:$0xf] %v13656_v0  ;;  %377 = vst [vmem:[#allocation4 + $0x60] sm:$0xf] %v13656_v0  ;;  %vm347_vm10 = vcmask 523268   ;;  %vm322_vm11 = vcmask 523264  }
  0x2b   : > { %378 = vst [vmem:[#allocation4 + $0x70] sm:$0xf] %v13656_v0  ;;  %379 = vst [vmem:[#allocation4 + $0x80] sm:$0xf] %v13656_v0  ;;  %s10268_s16 = smov 64   ;;  %s269_s14 = sand.u32 1, %s10255_s25  }
  0x2c   : > { %380 = vst [vmem:[#allocation4 + $0x90] sm:$0xf] %v13656_v0  ;;  %381 = vst [vmem:[#allocation4 + $0xa0] sm:$0xf] %v13656_v0  ;;  %s8698_s15 = sshll.u32 %s269_s14, 9  ;;  %s10269_s29 = smov [#allocation5]  }
  0x2d   : > { %382 = vst [vmem:[#allocation4 + $0xb0] sm:$0xf] %v13656_v0  ;;  %383 = vst [vmem:[#allocation4 + $0xc0] sm:$0xf] %v13656_v0  ;;  %s10205_s8 = sshll.u32 %s10269_s29, 4  ;;  %s10206_s8 = int_to_ptr.vmem [resolvable:$false] %s10205_s8 }
  0x2e   : > { %384 = vst [vmem:[#allocation4 + $0xd0] sm:$0xf] %v13656_v0  ;;  %385 = vst [vmem:[#allocation4 + $0xe0] sm:$0xf] %v13656_v0  ;;  %s10207_s9 = scalar_lea.vmem %s10206_s8, 16384 }
  0x2f   : > { %386 = vst [vmem:[#allocation4 + $0xf0] sm:$0xf] %v13656_v0  ;;  %387 = vst [vmem:[#allocation4 + $0x100] sm:$0xf] %v13656_v0 }
  0x30   : > { %390 = vst [vmem:[#allocation4 + $0x18] sm:$0xf0] %v13656_v0  ;;  %391 = vst [vmem:[#allocation4 + $0x28] sm:$0xf0] %v13656_v0 }
  0x31   : > { %392 = vst [vmem:[#allocation4 + $0x38] sm:$0xf0] %v13656_v0  ;;  %393 = vst [vmem:[#allocation4 + $0x48] sm:$0xf0] %v13656_v0 }
  0x32   : > { %394 = vst [vmem:[#allocation4 + $0x58] sm:$0xf0] %v13656_v0  ;;  %395 = vst [vmem:[#allocation4 + $0x68] sm:$0xf0] %v13656_v0 }
  0x33   : > { %396 = vst [vmem:[#allocation4 + $0x78] sm:$0xf0] %v13656_v0  ;;  %397 = vst [vmem:[#allocation4 + $0x88] sm:$0xf0] %v13656_v0 }
  0x34   : > { %398 = vst [vmem:[#allocation4 + $0x98] sm:$0xf0] %v13656_v0  ;;  %399 = vst [vmem:[#allocation4 + $0xa8] sm:$0xf0] %v13656_v0 }
  0x35   : > { %400 = vst [vmem:[#allocation4 + $0xb8] sm:$0xf0] %v13656_v0  ;;  %401 = vst [vmem:[#allocation4 + $0xc8] sm:$0xf0] %v13656_v0 }
  0x36   : > { %402 = vst [vmem:[#allocation4 + $0xd8] sm:$0xf0] %v13656_v0  ;;  %403 = vst [vmem:[#allocation4 + $0xe8] sm:$0xf0] %v13656_v0 }
  0x37   : > { %404 = vst [vmem:[#allocation4 + $0xf8] sm:$0xf0] %v13656_v0  ;;  %405 = vst [vmem:[#allocation4 + $0x108] sm:$0xf0] %v13656_v0 }
  0x38   : > { %371 = vst [vmem:[#allocation4] sm:$0xf] %v13656_v0  ;;  %388 = vst [vmem:[#allocation4 + $0x110] sm:$0xf] %v13656_v0 }
  0x39   : > { %389 = vst [vmem:[#allocation4 + $0x8] sm:$0xf0] %v13656_v0  ;;  %406 = vst [vmem:[#allocation4 + $0x118] sm:$0xf0] %v13656_v0 }
  0x3a   : > { %280 = vst.msk [vmem:[#allocation2 + $0x8] sm:$0xff] %vm278_vm2, %v13656_v0  ;;  %279 = vst.msk [vmem:[#allocation2] sm:$0xff] %vm278_vm2, %v13656_v0 }
  0x3b   : > { %282 = vst.msk [vmem:[#allocation2 + $0x110] sm:$0xff] %vm278_vm2, %v13656_v0  ;;  %283 = vst.msk [vmem:[#allocation2 + $0x118] sm:$0xff] %vm278_vm2, %v13656_v0 }
  0x3c   : > { %304 = vst.msk [vmem:[#allocation2 + $0x8] sm:$0xf0] %vm303_vm1, %v13656_v0  ;;  %321 = vst.msk [vmem:[#allocation2 + $0x118] sm:$0xf0] %vm303_vm1, %v13656_v0 }
  0x3d   : > { %285 = vst.msk [vmem:[#allocation2] sm:$0xf] %vm284_vm0, %v13656_v0  ;;  %302 = vst.msk [vmem:[#allocation2 + $0x110] sm:$0xf] %vm284_vm0, %v13656_v0 }
  0x3e   : > { %569 = vst.msk [vmem:[#allocation2 + $0x18] sm:$0xf] %vm284_vm0, %v9820_v1  ;;  %571 = vst.msk [vmem:[#allocation2 + $0x28] sm:$0xf] %vm284_vm0, %v9822_v3  ;;  %v9852_v1 = vld [vmem:[%s13649_s1 + $0xc] sm:$0xff]  }
  0x3f   : > { %568 = vst.msk [vmem:[#allocation2 + $0x10] sm:$0xf0] %vm303_vm1, %v9821_v2  ;;  %570 = vst.msk [vmem:[#allocation2 + $0x20] sm:$0xf0] %vm303_vm1, %v9823_v4  ;;  %9266 = vmatprep.subr.bf16.mxu0 %v9852_v1  ;;  %9326 = vmatprep.subr.bf16.mxu1 %v9852_v1 }
  0x40   : > { %572 = vst.msk [vmem:[#allocation2 + $0x30] sm:$0xf0] %vm303_vm1, %v9824_v5  ;;  %574 = vst.msk [vmem:[#allocation2 + $0x40] sm:$0xf0] %vm303_vm1, %v9827_v8  ;;  %v9836_v8 = vld [vmem:[%s10486_s17 + $0x44] ss:$0 sps:$4 sm:$0xff]   ;;  %9267 = vmatpush3.bf16.msra.mxu0 %v9852_v1  ;;  %9327 = vmatpush3.bf16.msra.mxu1 %v9852_v1 }
  0x41   : > { %573 = vst.msk [vmem:[#allocation2 + $0x38] sm:$0xf] %vm284_vm0, %v9825_v6  ;;  %575 = vst.msk [vmem:[#allocation2 + $0x48] sm:$0xf] %vm284_vm0, %v9826_v7 }
  0x42   : > { %577 = vst.msk [vmem:[#allocation2 + $0x58] sm:$0xf] %vm284_vm0, %v9828_v9  ;;  %579 = vst.msk [vmem:[#allocation2 + $0x68] sm:$0xf] %vm284_vm0, %v9830_v11 }
  0x43   : > { %576 = vst.msk [vmem:[#allocation2 + $0x50] sm:$0xf0] %vm303_vm1, %v9829_v10  ;;  %578 = vst.msk [vmem:[#allocation2 + $0x60] sm:$0xf0] %vm303_vm1, %v9831_v12  ;;  %v9837_v10 = vld [vmem:[%s10486_s17 + $0x40] ss:$0 sps:$4 sm:$0xff]  }
  0x44   : > { %581 = vst.msk [vmem:[#allocation2 + $0x78] sm:$0xf] %vm284_vm0, %v9832_v13  ;;  %583 = vst.msk [vmem:[#allocation2 + $0x88] sm:$0xf] %vm284_vm0, %v9834_v59 }
  0x45   : > { %v655_v14 = vld [vmem:[#allocation2 + $0x18] sm:$0x1f]  ;;  %v656_v19 = vld [vmem:[#allocation2 + $0x28] sm:$0x1f]  ;;  %580 = vst.msk [vmem:[#allocation2 + $0x70] sm:$0xf0] %vm303_vm1, %v9833_v16 }
  0x46   : > { %v603_v15 = vld [vmem:[#allocation2 + $0x18] sm:$0xf]  ;;  %v1056_v17 = vrot.slane %v655_v14, 1  ;;  %v637_v18 = vld [vmem:[#allocation2 + $0x10] sm:$0xf0]  ;;  %v1059_v21 = vrot.slane %v656_v19, 1 }
  0x47   : > { %v1055_v20 = vrot.slane %v637_v18, 1  ;;  %v10515_v22 = vld [vmem:[#allocation2 + $0x20] sm:$0xf0]  ;;  %v605_v23 = vld [vmem:[#allocation2 + $0x28] sm:$0xf]  ;;  %v696_v33 = vshll.u32 %v603_v15, 16 }
  0x48   : > { %1112 = vrot.lane.b32.xlu1 %v1056_v17, %s10266_s18  ;;  %v1058_v24 = vrot.slane %v10515_v22, 1  ;;  %v711_v25 = vshll.u32 %v605_v23, 16  ;;  %v715_v26 = vshrl.u32 %v605_v23, 16  ;;  %v639_v27 = vld [vmem:[#allocation2 + $0x30] sm:$0xf0]  ;;  %v691_v42 = vshll.u32 %v637_v18, 16 }
  0x49   : > { %v1057_v28 = vsel %vm1051_vm3, %v1055_v20, %v1056_v17  ;;  %v10521_v29 = vld [vmem:[#allocation2 + $0x38] sm:$0x1f]  ;;  %v609_v34 = vld [vmem:[#allocation2 + $0x48] sm:$0xf]  ;;  %v1061_v36 = vrot.slane %v639_v27, 1  ;;  %v698_v43 = vrot.slane %v696_v33, 1 }
  0x4a   : > { %v607_v30 = vld [vmem:[#allocation2 + $0x38] sm:$0xf]  ;;  %1110 = vrot.lane.b32.xlu0 %v1057_v28, %s10266_s18  ;;  %v10524_v31 = vrot.slane %v711_v25, 1  ;;  %v1060_v35 = vsel %vm1051_vm3, %v1058_v24, %v1059_v21  ;;  %v1062_v37 = vrot.slane %v10521_v29, 1  ;;  %v741_v41 = vshll.u32 %v609_v34, 16  ;;  %324 = vst.msk [vmem:[#allocation3 + $0x8] sm:$0xff] %vm322_vm11, %v13656_v0 }
  0x4b   : > { %v726_v32 = vshll.u32 %v607_v30, 16  ;;  %v730_v40 = vshrl.u32 %v607_v30, 16  ;;  %v700_v44 = vshrl.u32 %v603_v15, 16  ;;  %v721_v45 = vshll.u32 %v639_v27, 16  ;;  %v10533_v52 = vld [vmem:[#allocation2 + $0x40] sm:$0xf0] }
  0x4c   : > { %1116 = vrot.lane.b32.xlu1 %v1059_v21, %s10266_s18  ;;  %v717_v38 = vor.u32 %v715_v26, %v10524_v31  ;;  %v1063_v46 = vsel %vm1051_vm3, %v1061_v36, %v1062_v37  ;;  %v689_v47 = vshrl.u32 %v637_v18, 16  ;;  %v693_v48 = vrot.slane %v691_v42, 1  ;;  %582 = vst.msk [vmem:[#allocation2 + $0x80] sm:$0xf0] %vm303_vm1, %v9835_v61  ;;  %v611_v6 = vld [vmem:[#allocation2 + $0x58] sm:$0xf] }
  0x4d   : > { %v728_v39 = vrot.slane %v726_v32, 1  ;;  %v743_v50 = vrot.slane %v741_v41, 1  ;;  %v745_v51 = vshrl.u32 %v609_v34, 16  ;;  %v706_v53 = vshll.u32 %v10515_v22, 16  ;;  %v10551_v7 = vld [vmem:[#allocation2 + $0x50] sm:$0xf0] }
  0x4e   : > { %1114 = vrot.lane.b32.xlu0 %v1060_v35, %s10266_s18  ;;  %v702_v54 = vor.u32 %v700_v44, %v698_v43  ;;  %v719_v55 = vshrl.u32 %v639_v27, 16  ;;  %v723_v56 = vrot.slane %v721_v45, 1  ;;  %v694_v57 = vor.u32 %v693_v48, %v689_v47  ;;  %v658_v11 = vld [vmem:[#allocation2 + $0x48] sm:$0x1f]  ;;  %585 = vst.msk [vmem:[#allocation2 + $0x98] sm:$0xf] %vm284_vm0, %v9836_v8 }
  0x4f   : > { %v732_v49 = vor.u32 %v730_v40, %v728_v39  ;;  %v736_v58 = vshll.u32 %v10533_v52, 16  ;;  %v747_v60 = vor.u32 %v745_v51, %v743_v50  ;;  %v704_v62 = vshrl.u32 %v10515_v22, 16  ;;  %584 = vst.msk [vmem:[#allocation2 + $0x90] sm:$0xf0] %vm303_vm1, %v9837_v10  ;;  %v9838_v15 = vld [vmem:[%s10486_s17 + $0x4c] ss:$0 sps:$4 sm:$0xff]  }
  0x50   : > { %953 = vrot.lane.b32.xlu1 %v717_v38, %s10267_s19  ;;  %v708_v63 = vrot.slane %v706_v53, 1  ;;  %v699_v2 = vsel %vm672_vm4, %v694_v57, %v698_v43  ;;  %v724_v3 = vor.u32 %v723_v56, %v719_v55  ;;  %v734_v4 = vshrl.u32 %v10533_v52, 16  ;;  %v10562_v17 = vld [vmem:[#allocation2 + $0x60] sm:$0xf0]  ;;  %v613_v19 = vld [vmem:[#allocation2 + $0x68] sm:$0xf] }
  0x51   : > { %v738_v5 = vrot.slane %v736_v58, 1  ;;  %v751_v14 = vshll.u32 %v10551_v7, 16  ;;  %v756_v16 = vshll.u32 %v611_v6, 16  ;;  %587 = vst.msk [vmem:[#allocation2 + $0xa8] sm:$0xf] %vm284_vm0, %v9838_v15  ;;  %v1065_v20 = vrot.slane %v658_v11, 1 }
  0x52   : > { %1118 = vrot.lane.b32.xlu0 %v1063_v46, %s10266_s18  ;;  %v709_v9 = vor.u32 %v708_v63, %v704_v62  ;;  %v729_v12 = vsel %vm672_vm4, %v724_v3, %v728_v39  ;;  %v1064_v21 = vrot.slane %v10533_v52, 1  ;;  %v760_v22 = vshrl.u32 %v611_v6, 16  ;;  %v9839_v23 = vld [vmem:[%s10486_s17 + $0x48] ss:$0 sps:$4 sm:$0xff]   ;;  %v9840_v30 = vld [vmem:[%s10486_s17 + $0x54] ss:$0 sps:$4 sm:$0xff]  }
  0x53   : > { %v739_v13 = vor.u32 %v738_v5, %v734_v4  ;;  %v749_v25 = vshrl.u32 %v10551_v7, 16  ;;  %v753_v26 = vrot.slane %v751_v14, 1  ;;  %v766_v27 = vshll.u32 %v10562_v17, 16  ;;  %586 = vst.msk [vmem:[#allocation2 + $0xa0] sm:$0xf0] %vm303_vm1, %v9839_v23 }
  0x54   : > { %957 = vrot.lane.b32.xlu1 %v732_v49, %s10267_s19  ;;  %v714_v18 = vsel %vm672_vm4, %v709_v9, %v10524_v31  ;;  %v758_v28 = vrot.slane %v756_v16, 1  ;;  %v771_v29 = vshll.u32 %v613_v19, 16  ;;  %v9841_v31 = vld [vmem:[%s10486_s17 + $0x50] ss:$0 sps:$4 sm:$0xff]   ;;  %589 = vst.msk [vmem:[#allocation2 + $0xb8] sm:$0xf] %vm284_vm0, %v9840_v30  ;;  %v1066_v32 = vsel %vm1051_vm3, %v1064_v21, %v1065_v20 }
  0x55   : > { %v744_v24 = vsel %vm672_vm4, %v739_v13, %v743_v50  ;;  %v754_v33 = vor.u32 %v753_v26, %v749_v25  ;;  %v764_v34 = vshrl.u32 %v10562_v17, 16  ;;  %v768_v35 = vrot.slane %v766_v27, 1  ;;  %588 = vst.msk [vmem:[#allocation2 + $0xb0] sm:$0xf0] %vm303_vm1, %v9841_v31  ;;  %v9842_v36 = vld [vmem:[%s10486_s17 + $0x5c] ss:$0 sps:$4 sm:$0xff]  }
  0x56   : > { %949 = vrot.lane.b32.xlu0 %v702_v54, %s10267_s19  ;;  %v773_v38 = vrot.slane %v771_v29, 1  ;;  %v775_v39 = vshrl.u32 %v613_v19, 16  ;;  %591 = vst.msk [vmem:[#allocation2 + $0xc8] sm:$0xf] %vm284_vm0, %v9842_v36  ;;  %v9843_v40 = vld [vmem:[%s10486_s17 + $0x58] ss:$0 sps:$4 sm:$0xff]  }
  0x57   : > { %v9844_v41 = vld [vmem:[%s10486_s17 + $0x64] ss:$0 sps:$4 sm:$0xff]   ;;  %v759_v42 = vsel %vm672_vm4, %v754_v33, %v758_v28  ;;  %v769_v43 = vor.u32 %v768_v35, %v764_v34  ;;  %v659_v45 = vld [vmem:[#allocation2 + $0x58] sm:$0x1f]  ;;  %v10590_v46 = vld [vmem:[#allocation2 + $0x70] sm:$0xf0] }
  0x58   : > { %961 = vrot.lane.b32.xlu1 %v747_v60, %s10267_s19  ;;  %v777_v44 = vor.u32 %v775_v39, %v773_v38  ;;  %590 = vst.msk [vmem:[#allocation2 + $0xc0] sm:$0xf0] %vm303_vm1, %v9843_v40  ;;  %v9845_v47 = vld [vmem:[%s10486_s17 + $0x60] ss:$0 sps:$4 sm:$0xff]   ;;  %v615_v48 = vld [vmem:[#allocation2 + $0x78] sm:$0xf] }
  0x59   : > { %593 = vst.msk [vmem:[#allocation2 + $0xd8] sm:$0xf] %vm284_vm0, %v9844_v41  ;;  %v660_v49 = vld [vmem:[#allocation2 + $0x68] sm:$0x1f]  ;;  %v774_v50 = vsel %vm672_vm4, %v769_v43, %v773_v38  ;;  %v1068_v51 = vrot.slane %v659_v45, 1  ;;  %v1067_v52 = vrot.slane %v10551_v7, 1 }
  0x5a   : > { %947 = vrot.lane.b32.xlu0 %v699_v2, %s10267_s19  ;;  %592 = vst.msk [vmem:[#allocation2 + $0xd0] sm:$0xf0] %vm303_vm1, %v9845_v47  ;;  %v781_v53 = vshll.u32 %v10590_v46, 16  ;;  %v9846_v54 = vld [vmem:[%s10486_s17 + $0x6c] ss:$0 sps:$4 sm:$0xff]   ;;  %v786_v55 = vshll.u32 %v615_v48, 16 }
  0x5b   : > { %v10602_v56 = vld [vmem:[#allocation2 + $0x80] sm:$0xf0]  ;;  %v617_v57 = vld [vmem:[#allocation2 + $0x88] sm:$0xf]  ;;  %595 = vst.msk [vmem:[#allocation2 + $0xe8] sm:$0xf] %vm284_vm0, %v9846_v54  ;;  %v1069_v61 = vsel %vm1051_vm3, %v1067_v52, %v1068_v51 }
  0x5c   : > { %1120 = vrot.lane.b32.xlu1 %v1062_v37, %s10266_s18  ;;  %v762_v37 = vor.u32 %v760_v22, %v758_v28  ;;  %v1071_v58 = vrot.slane %v660_v49, 1  ;;  %v1070_v59 = vrot.slane %v10562_v17, 1  ;;  %v9847_v60 = vld [vmem:[%s10486_s17 + $0x68] ss:$0 sps:$4 sm:$0xff]   ;;  %v779_v62 = vshrl.u32 %v10590_v46, 16  ;;  %v10642_v27 = vld [vmem:[%s13649_s1] sm:$0xff]  }
  0x5d   : > { %v783_v63 = vrot.slane %v781_v53, 1  ;;  %v796_v1 = vshll.u32 %v10602_v56, 16  ;;  %v788_v2 = vrot.slane %v786_v55, 1  ;;  %v790_v3 = vshrl.u32 %v615_v48, 16  ;;  %594 = vst.msk [vmem:[#allocation2 + $0xe0] sm:$0xf0] %vm303_vm1, %v9847_v60 }
  0x5e   : > { %955 = vrot.lane.b32.xlu0 %v729_v12, %s10267_s19  ;;  %v801_v4 = vshll.u32 %v617_v57, 16  ;;  %v9848_v5 = vld [vmem:[%s10486_s17 + $0x74] ss:$0 sps:$4 sm:$0xff]   ;;  %v1072_v6 = vsel %vm1051_vm3, %v1070_v59, %v1071_v58  ;;  %v794_v8 = vshrl.u32 %v10602_v56, 16  ;;  %v9849_v10 = vld [vmem:[%s10486_s17 + $0x70] ss:$0 sps:$4 sm:$0xff]  }
  0x5f   : > { %v784_v7 = vor.u32 %v783_v63, %v779_v62  ;;  %v798_v9 = vrot.slane %v796_v1, 1  ;;  %597 = vst.msk [vmem:[#allocation2 + $0xf8] sm:$0xf] %vm284_vm0, %v9848_v5  ;;  %v792_v11 = vor.u32 %v790_v3, %v788_v2  ;;  %v805_v13 = vshrl.u32 %v617_v57, 16  ;;  %v661_v14 = vld [vmem:[#allocation2 + $0x78] sm:$0x1f] }
  0x60   : > { %951 = vrot.lane.b32.xlu1 %v714_v18, %s10267_s19  ;;  %v803_v12 = vrot.slane %v801_v4, 1  ;;  %v9850_v15 = vld [vmem:[%s10486_s17 + $0x7c] ss:$0 sps:$4 sm:$0xff]   ;;  %v10621_v16 = vld [vmem:[#allocation2 + $0x8] sm:$0xf]  ;;  %v1074_v22 = vrot.slane %v661_v14, 1 }
  0x61   : > { %596 = vst.msk [vmem:[#allocation2 + $0xf0] sm:$0xf0] %vm303_vm1, %v9849_v10  ;;  %v9851_v17 = vld [vmem:[%s10486_s17 + $0x78] ss:$0 sps:$4 sm:$0xff]   ;;  %v789_v18 = vsel %vm672_vm4, %v784_v7, %v788_v2  ;;  %v799_v19 = vor.u32 %v798_v9, %v794_v8  ;;  %v681_v23 = vshll.u32 %v10621_v16, 16  ;;  %v685_v34 = vshrl.u32 %v10621_v16, 16 }
  0x62   : > { %959 = vrot.lane.b32.xlu0 %v744_v24, %s10267_s19  ;;  %599 = vst.msk [vmem:[#allocation2 + $0x108] sm:$0xf] %vm284_vm0, %v9850_v15  ;;  %v807_v21 = vor.u32 %v805_v13, %v803_v12  ;;  %v1073_v24 = vrot.slane %v10590_v46, 1  ;;  %v10634_v25 = vld [vmem:[#allocation2 + $0x98] sm:$0xf]  ;;  %v1076_v43 = vrot.slane %v10602_v56, 1 }
  0x63   : > { %598 = vst.msk [vmem:[#allocation2 + $0x100] sm:$0xf0] %vm303_vm1, %v9851_v17  ;;  %v9853_v26 = vld [vmem:[%s13649_s1 + $0x14] ss:$0 sps:$4 sm:$0xff]   ;;  %v804_v29 = vsel %vm672_vm4, %v799_v19, %v803_v12  ;;  %v662_v30 = vld [vmem:[#allocation2 + $0x88] sm:$0x1f] }
  0x64   : > { %1124 = vrot.lane.b32.xlu1 %v1065_v20, %s10266_s18  ;;  %v10628_v20 = vld [vmem:[#allocation2] sm:$0xf0]  ;;  %v10647_v31 = vld [vmem:[#allocation2 + $0x90] sm:$0xf0]  ;;  %9770 = vmatprep.subr.msk.bf16.mxu0 %vm1523_vm5, %v9853_v26  ;;  %v683_v33 = vrot.slane %v681_v23, 1  ;;  %v1075_v38 = vsel %vm1051_vm3, %v1073_v24, %v1074_v22  ;;  %v820_v48 = vshrl.u32 %v10634_v25, 16 }
  0x65   : > { %v676_v28 = vshll.u32 %v10628_v20, 16  ;;  %9773 = vmatprep.subr.msk.bf16.mxu1 %vm1523_vm5, %v9853_v26  ;;  %v674_v35 = vshrl.u32 %v10628_v20, 16  ;;  %v654_v36 = vld [vmem:[#allocation2 + $0x8] sm:$0x1f]  ;;  %v10657_v40 = vld [vmem:[#allocation2 + $0xa0] sm:$0xf0] }
  0x66   : > { %1122 = vrot.lane.b32.xlu0 %v1066_v32, %s10266_s18  ;;  %v1525_v32 = vsel %vm1523_vm5, %v9853_v26, 0  ;;  %v621_v39 = vld [vmem:[#allocation2 + $0xa8] sm:$0xf]  ;;  %v10659_v41 = vld [vmem:[#allocation2 + $0x98] sm:$0x1f]  ;;  %v811_v45 = vshll.u32 %v10647_v31, 16  ;;  %v687_v60 = vor.u32 %v685_v34, %v683_v33 }
  0x67   : > { %9269 = vmatpush3.bf16.msra.mxu0 %v1525_v32  ;;  %9329 = vmatpush3.bf16.msra.mxu1 %v1525_v32  ;;  %v1053_v46 = vrot.slane %v654_v36, 1  ;;  %v1052_v47 = vrot.slane %v10628_v20, 1  ;;  %v809_v49 = vshrl.u32 %v10647_v31, 16  ;;  %v826_v52 = vshll.u32 %v10657_v40, 16  ;;  %v664_v54 = vld [vmem:[#allocation2 + $0xa8] sm:$0x1f] }
  0x68   : > { %965 = vrot.lane.b32.xlu1 %v762_v37, %s10267_s19  ;;  %v816_v37 = vshll.u32 %v10634_v25, 16  ;;  %9286 = vmatprep.subr.bf16.mxu0 %v10642_v27  ;;  %v1080_v53 = vrot.slane %v10659_v41, 1  ;;  %v813_v55 = vrot.slane %v811_v45, 1  ;;  %v1079_v56 = vrot.slane %v10647_v31, 1  ;;  %v623_v59 = vld [vmem:[#allocation2 + $0xb8] sm:$0xf] }
  0x69   : > { %9346 = vmatprep.subr.bf16.mxu1 %v10642_v27  ;;  %v835_v62 = vshrl.u32 %v621_v39, 16  ;;  %v1083_v63 = vrot.slane %v664_v54, 1  ;;  %v824_v1 = vshrl.u32 %v10657_v40, 16  ;;  %v828_v2 = vrot.slane %v826_v52, 1  ;;  %v647_v7 = vld [vmem:[#allocation2 + $0xb0] sm:$0xf0] }
  0x6a   : > { %963 = vrot.lane.b32.xlu0 %v759_v42, %s10267_s19  ;;  %v1077_v42 = vrot.slane %v662_v30, 1  ;;  %v1082_v3 = vrot.slane %v10657_v40, 1  ;;  %v846_v4 = vshll.u32 %v623_v59, 16  ;;  %v850_v5 = vshrl.u32 %v623_v59, 16  ;;  %v625_v8 = vld [vmem:[#allocation2 + $0xc8] sm:$0xf] }
  0x6b   : > { %v1054_v9 = vsel %vm1051_vm3, %v1052_v47, %v1053_v46  ;;  %v814_v10 = vor.u32 %v813_v55, %v809_v49  ;;  %v841_v12 = vshll.u32 %v647_v7, 16  ;;  %v861_v15 = vshll.u32 %v625_v8, 16  ;;  %v648_v16 = vld [vmem:[#allocation2 + $0xc0] sm:$0xf0]  ;;  %v665_v32 = vld [vmem:[#allocation2 + $0xb8] sm:$0x1f] }
  0x6c   : > { %969 = vrot.lane.b32.xlu1 %v777_v44, %s10267_s19  ;;  %v678_v44 = vrot.slane %v676_v28, 1  ;;  %v1078_v57 = vsel %vm1051_vm3, %v1076_v43, %v1077_v42  ;;  %v848_v14 = vrot.slane %v846_v4, 1  ;;  %v865_v24 = vshrl.u32 %v625_v8, 16  ;;  %v627_v36 = vld [vmem:[#allocation2 + $0xd8] sm:$0xf]  ;;  %323 = vst.msk [vmem:[#allocation3] sm:$0xff] %vm322_vm11, %v13656_v0 }
  0x6d   : > { %v843_v20 = vrot.slane %v841_v12, 1  ;;  %v863_v23 = vrot.slane %v861_v15, 1  ;;  %v1081_v25 = vsel %vm1051_vm3, %v1079_v56, %v1080_v53  ;;  %v854_v26 = vshrl.u32 %v648_v16, 16  ;;  %v650_v41 = vld [vmem:[#allocation2 + $0xe0] sm:$0xf0]  ;;  %326 = vst.msk [vmem:[#allocation3 + $0x110] sm:$0xff] %vm322_vm11, %v13656_v0 }
  0x6e   : > { %967 = vrot.lane.b32.xlu0 %v774_v50, %s10267_s19  ;;  %v818_v50 = vrot.slane %v816_v37, 1  ;;  %v852_v31 = vor.u32 %v850_v5, %v848_v14  ;;  %v1085_v40 = vrot.slane %v647_v7, 1  ;;  %v629_v45 = vld [vmem:[#allocation2 + $0xe8] sm:$0xf]  ;;  %v10714_v8 = vld [vmem:[#allocation2 + $0x100] sm:$0xf0] }
  0x6f   : > { %v867_v37 = vor.u32 %v865_v24, %v863_v23  ;;  %v891_v54 = vshll.u32 %v629_v45, 16  ;;  %v668_v5 = vld [vmem:[#allocation2 + $0xe8] sm:$0x1f]  ;;  %v1094_v15 = vrot.slane %v650_v41, 1  ;;  %330 = vst.msk [vmem:[#allocation3 + $0x10] sm:$0xf] %vm328_vm9, %v13656_v0 }
  0x70   : > { %1128 = vrot.lane.b32.xlu1 %v1068_v51, %s10266_s18  ;;  %v831_v51 = vshll.u32 %v621_v39, 16  ;;  %v822_v13 = vor.u32 %v820_v48, %v818_v50  ;;  %v819_v17 = vsel %vm672_vm4, %v814_v10, %v818_v50  ;;  %v1086_v39 = vrot.slane %v665_v32, 1  ;;  %v10719_v12 = vld [vmem:[#allocation2 + $0x108] sm:$0xf]  ;;  %v669_v32 = vld [vmem:[#allocation2 + $0xf8] sm:$0x1f] }
  0x71   : > { %v1088_v48 = vrot.slane %v648_v16, 1  ;;  %331 = vst.msk [vmem:[#allocation3 + $0x20] sm:$0xf] %vm328_vm9, %v13656_v0  ;;  %332 = vst.msk [vmem:[#allocation3 + $0x30] sm:$0xf] %vm328_vm9, %v13656_v0  ;;  %s9205_s17 = sshll.u32 %s10332_s28, 13 }
  0x72   : > { %1126 = vrot.lane.b32.xlu0 %v1069_v61, %s10266_s18  ;;  %v833_v61 = vrot.slane %v831_v51, 1  ;;  %v886_v51 = vshll.u32 %v650_v41, 16  ;;  %333 = vst.msk [vmem:[#allocation3 + $0x40] sm:$0xf] %vm328_vm9, %v13656_v0  ;;  %334 = vst.msk [vmem:[#allocation3 + $0x50] sm:$0xf] %vm328_vm9, %v13656_v0  ;;  %s13597_s22 = scalar_lea.hbm %s13655_s7, %s9205_s17 }
  0x73   : > { %335 = vst.msk [vmem:[#allocation3 + $0x60] sm:$0xf] %vm328_vm9, %v13656_v0  ;;  %336 = vst.msk [vmem:[#allocation3 + $0x70] sm:$0xf] %vm328_vm9, %v13656_v0  ;;  %s13606_s28 = scalar_lea.sflag [#allocation6], %s269_s14 }
  0x74   : > { %1132 = vrot.lane.b32.xlu1 %v1071_v58, %s10266_s18  ;;  %v679_v58 = vor.u32 %v678_v44, %v674_v35  ;;  %v837_v19 = vor.u32 %v835_v62, %v833_v61  ;;  %v876_v44 = vshll.u32 %v627_v36, 16  ;;  %v667_v62 = vld [vmem:[#allocation2 + $0xd8] sm:$0x1f]  ;;  %337 = vst.msk [vmem:[#allocation3 + $0x80] sm:$0xf] %vm328_vm9, %v13656_v0 }
  0x75   : > { %338 = vst.msk [vmem:[#allocation3 + $0x90] sm:$0xf] %vm328_vm9, %v13656_v0  ;;  %339 = vst.msk [vmem:[#allocation3 + $0xa0] sm:$0xf] %vm328_vm9, %v13656_v0 }
  0x76   : > { %1130 = vrot.lane.b32.xlu0 %v1072_v6, %s10266_s18  ;;  %v684_v6 = vsel %vm672_vm4, %v679_v58, %v683_v33  ;;  %v649_v33 = vld [vmem:[#allocation2 + $0xd0] sm:$0xf0]  ;;  %v878_v52 = vrot.slane %v876_v44, 1  ;;  %v888_v58 = vrot.slane %v886_v51, 1  ;;  %v1100_v51 = vrot.slane %v10714_v8, 1  ;;  %327 = vst.msk [vmem:[#allocation3 + $0x118] sm:$0xff] %vm322_vm11, %v13656_v0 }
  0x77   : > { %v871_v43 = vshll.u32 %v649_v33, 16  ;;  %v869_v49 = vshrl.u32 %v649_v33, 16  ;;  %340 = vst.msk [vmem:[#allocation3 + $0xb0] sm:$0xf] %vm328_vm9, %v13656_v0  ;;  %341 = vst.msk [vmem:[#allocation3 + $0xc0] sm:$0xf] %vm328_vm9, %v13656_v0 }
  0x78   : > { %973 = vrot.lane.b32.xlu1 %v792_v11, %s10267_s19  ;;  %v839_v11 = vshrl.u32 %v647_v7, 16  ;;  %v1091_v7 = vrot.slane %v649_v33, 1  ;;  %342 = vst.msk [vmem:[#allocation3 + $0xd0] sm:$0xf] %vm328_vm9, %v13656_v0  ;;  %343 = vst.msk [vmem:[#allocation3 + $0xe0] sm:$0xf] %vm328_vm9, %v13656_v0 }
  0x79   : > { %v873_v50 = vrot.slane %v871_v43, 1  ;;  %v670_v43 = vld [vmem:[#allocation2 + $0x108] sm:$0x1f]  ;;  %344 = vst.msk [vmem:[#allocation3 + $0xf0] sm:$0xf] %vm328_vm9, %v13656_v0 }
  0x7a   : > { %971 = vrot.lane.b32.xlu0 %v789_v18, %s10267_s19  ;;  %v829_v18 = vor.u32 %v828_v2, %v824_v1  ;;  %v844_v30 = vor.u32 %v843_v20, %v839_v11  ;;  %345 = vst.msk [vmem:[#allocation3 + $0x100] sm:$0xf] %vm328_vm9, %v13656_v0  ;;  %329 = vst.msk [vmem:[#allocation3] sm:$0xf] %vm328_vm9, %v13656_v0 }
  0x7b   : > { %v874_v56 = vor.u32 %v873_v50, %v869_v49  ;;  %v1101_v50 = vrot.slane %v670_v43, 1  ;;  %349 = vst.msk [vmem:[#allocation3 + $0x18] sm:$0xf0] %vm347_vm10, %v13656_v0  ;;  %350 = vst.msk [vmem:[#allocation3 + $0x28] sm:$0xf0] %vm347_vm10, %v13656_v0 }
  0x7c   : > { %977 = vrot.lane.b32.xlu1 %v807_v21, %s10267_s19  ;;  %v856_v21 = vshll.u32 %v648_v16, 16  ;;  %v849_v34 = vsel %vm672_vm4, %v844_v30, %v848_v14  ;;  %v1095_v14 = vrot.slane %v668_v5, 1  ;;  %351 = vst.msk [vmem:[#allocation3 + $0x38] sm:$0xf0] %vm347_vm10, %v13656_v0  ;;  %352 = vst.msk [vmem:[#allocation3 + $0x48] sm:$0xf0] %vm347_vm10, %v13656_v0 }
  0x7d   : > { %v879_v1 = vsel %vm672_vm4, %v874_v56, %v878_v52  ;;  %353 = vst.msk [vmem:[#allocation3 + $0x58] sm:$0xf0] %vm347_vm10, %v13656_v0  ;;  %354 = vst.msk [vmem:[#allocation3 + $0x68] sm:$0xf0] %vm347_vm10, %v13656_v0 }
  0x7e   : > { %975 = vrot.lane.b32.xlu0 %v804_v29, %s10267_s19  ;;  %v858_v28 = vrot.slane %v856_v21, 1  ;;  %v1084_v29 = vsel %vm1051_vm3, %v1082_v3, %v1083_v63  ;;  %v10710_v3 = vld [vmem:[#allocation2 + $0xf8] sm:$0xf]  ;;  %v921_v21 = vshll.u32 %v10719_v12, 16  ;;  %355 = vst.msk [vmem:[#allocation3 + $0x78] sm:$0xf0] %vm347_vm10, %v13656_v0 }
  0x7f   : > { %v906_v11 = vshll.u32 %v10710_v3, 16  ;;  %v910_v20 = vshrl.u32 %v10710_v3, 16  ;;  %356 = vst.msk [vmem:[#allocation3 + $0x88] sm:$0xf0] %vm347_vm10, %v13656_v0  ;;  %357 = vst.msk [vmem:[#allocation3 + $0x98] sm:$0xf0] %vm347_vm10, %v13656_v0 }
  0x80   : > { %1136 = vrot.lane.b32.xlu1 %v1074_v22, %s10266_s18  ;;  %v834_v22 = vsel %vm672_vm4, %v829_v18, %v833_v61  ;;  %v859_v35 = vor.u32 %v858_v28, %v854_v26  ;;  %v895_v61 = vshrl.u32 %v629_v45, 16  ;;  %v916_v18 = vshll.u32 %v10714_v8, 16  ;;  %358 = vst.msk [vmem:[#allocation3 + $0xa8] sm:$0xf0] %vm347_vm10, %v13656_v0  ;;  %359 = vst.msk [vmem:[#allocation3 + $0xb8] sm:$0xf0] %vm347_vm10, %v13656_v0 }
  0x81   : > { %v923_v30 = vrot.slane %v921_v21, 1  ;;  %360 = vst.msk [vmem:[#allocation3 + $0xc8] sm:$0xf0] %vm347_vm10, %v13656_v0  ;;  %361 = vst.msk [vmem:[#allocation3 + $0xd8] sm:$0xf0] %vm347_vm10, %v13656_v0 }
  0x82   : > { %1134 = vrot.lane.b32.xlu0 %v1075_v38, %s10266_s18  ;;  %v666_v38 = vld [vmem:[#allocation2 + $0xc8] sm:$0x1f]  ;;  %v918_v26 = vrot.slane %v916_v18, 1  ;;  %362 = vst.msk [vmem:[#allocation3 + $0xe8] sm:$0xf0] %vm347_vm10, %v13656_v0 }
  0x83   : > { %v1089_v47 = vrot.slane %v666_v38, 1  ;;  %363 = vst.msk [vmem:[#allocation3 + $0xf8] sm:$0xf0] %vm347_vm10, %v13656_v0  ;;  %364 = vst.msk [vmem:[#allocation3 + $0x108] sm:$0xf0] %vm347_vm10, %v13656_v0 }
  0x84   : > { %1140 = vrot.lane.b32.xlu1 %v1077_v42, %s10266_s18  ;;  %v864_v42 = vsel %vm672_vm4, %v859_v35, %v863_v23  ;;  %v1096_v23 = vsel %vm1051_vm3, %v1094_v15, %v1095_v14  ;;  %348 = vst.msk [vmem:[#allocation3 + $0x8] sm:$0xf0] %vm347_vm10, %v13656_v0  ;;  %365 = vst.msk [vmem:[#allocation3 + $0x118] sm:$0xf0] %vm347_vm10, %v13656_v0 }
  0x85   : > { %v1090_v55 = vsel %vm1051_vm3, %v1088_v48, %v1089_v47  ;;  %346 = vst.msk [vmem:[#allocation3 + $0x110] sm:$0xf] %vm328_vm9, %v13656_v0 }
  0x86   : > { %1138 = vrot.lane.b32.xlu0 %v1078_v57, %s10266_s18  ;;  %v884_v57 = vshrl.u32 %v650_v41, 16  ;;  %v1098_v41 = vrot.slane %v669_v32, 1 }
  0x88   : > { %945 = vrot.lane.b32.xlu1 %v687_v60, %s10267_s19  ;;  %v893_v60 = vrot.slane %v891_v54, 1  ;;  %v889_v2 = vor.u32 %v888_v58, %v884_v57  ;;  %v10110_v57 = vld [vmem:[#allocation2 + $0x18] sm:$0xf] }
  0x8a   : > { %943 = vrot.lane.b32.xlu0 %v684_v6, %s10267_s19  ;;  %v897_v4 = vor.u32 %v895_v61, %v893_v60  ;;  %v1092_v6 = vrot.slane %v667_v62, 1 }
  0x8c   : > { %1108 = vrot.lane.b32.xlu1 %v1053_v46, %s10266_s18  ;;  %v1087_v46 = vsel %vm1051_vm3, %v1085_v40, %v1086_v39 }
  0x8e   : > { %1106 = vrot.lane.b32.xlu0 %v1054_v9, %s10266_s18  ;;  %v894_v9 = vsel %vm672_vm4, %v889_v2, %v893_v60 }
  0x90   : > { %981 = vrot.lane.b32.xlu1 %v822_v13, %s10267_s19  ;;  %v1093_v13 = vsel %vm1051_vm3, %v1091_v7, %v1092_v6 }
  0x92   : > { %979 = vrot.lane.b32.xlu0 %v819_v17, %s10267_s19 }
  0x94   : > { %985 = vrot.lane.b32.xlu1 %v837_v19, %s10267_s19  ;;  %v908_v19 = vrot.slane %v906_v11, 1  ;;  %v10112_v11 = vld [vmem:[#allocation2 + $0x38] sm:$0xf] }
  0x96   : > { %983 = vrot.lane.b32.xlu0 %v834_v22, %s10267_s19 }
  0x98   : > { %1144 = vrot.lane.b32.xlu1 %v1080_v53, %s10266_s18  ;;  %v880_v53 = vshrl.u32 %v627_v36, 16 }
  0x9a   : > { %1142 = vrot.lane.b32.xlu0 %v1081_v25, %s10266_s18  ;;  %v882_v59 = vor.u32 %v880_v53, %v878_v52  ;;  %v914_v25 = vshrl.u32 %v10714_v8, 16 }
  0x9c   : > { %1148 = vrot.lane.b32.xlu1 %v1083_v63, %s10266_s18  ;;  %v651_v63 = vld [vmem:[#allocation2 + $0xf0] sm:$0xf0]  ;;  %v919_v36 = vor.u32 %v918_v26, %v914_v25 }
  0x9d   : > { %v901_v10 = vshll.u32 %v651_v63, 16  ;;  %v899_v16 = vshrl.u32 %v651_v63, 16 }
  0x9e   : > { %1146 = vrot.lane.b32.xlu0 %v1084_v29, %s10266_s18  ;;  %v912_v29 = vor.u32 %v910_v20, %v908_v19  ;;  %v924_v44 = vsel %vm672_vm4, %v919_v36, %v923_v30 }
  0x9f   : > { %v903_v17 = vrot.slane %v901_v10, 1 }
  0xa0   : > { %989 = vrot.lane.b32.xlu1 %v852_v31, %s10267_s19  ;;  %v925_v31 = vshrl.u32 %v10719_v12, 16 }
  0xa1   : > { %v904_v24 = vor.u32 %v903_v17, %v899_v16  ;;  %v606_v16 = vld [vmem:[#allocation2 + $0x30] sm:$0xf8] }
  0xa2   : > { %987 = vrot.lane.b32.xlu0 %v849_v34, %s10267_s19  ;;  %v10733_v34 = vld [vmem:[#allocation2 + $0x110] sm:$0xf0] }
  0xa3   : > { %v909_v35 = vsel %vm672_vm4, %v904_v24, %v908_v19  ;;  %v931_v45 = vshll.u32 %v10733_v34, 16  ;;  %v929_v52 = vshrl.u32 %v10733_v34, 16  ;;  %v1103_v18 = vrot.slane %v10733_v34, 1 }
  0xa4   : > { %993 = vrot.lane.b32.xlu1 %v867_v37, %s10267_s19  ;;  %v10736_v37 = vld [vmem:[#allocation2 + $0x118] sm:$0xf] }
  0xa5   : > { %v933_v53 = vrot.slane %v931_v45, 1  ;;  %v940_v56 = vshrl.u32 %v10736_v37, 16 }
  0xa6   : > { %991 = vrot.lane.b32.xlu0 %v864_v42, %s10267_s19  ;;  %v1097_v42 = vrot.slane %v651_v63, 1  ;;  %v602_v63 = vld [vmem:[#allocation2 + $0x10] sm:$0xf8] }
  0xa7   : > { %v934_v2 = vor.u32 %v933_v53, %v929_v52  ;;  %v608_v53 = vld [vmem:[#allocation2 + $0x40] sm:$0xf8] }
  0xa8   : > { %1152 = vrot.lane.b32.xlu1 %v1086_v39, %s10266_s18  ;;  %v927_v39 = vor.u32 %v925_v31, %v923_v30  ;;  %v1099_v49 = vsel %vm1051_vm3, %v1097_v42, %v1098_v41  ;;  %v604_v30 = vld [vmem:[#allocation2 + $0x20] sm:$0xf8] }
  0xaa   : > { %1150 = vrot.lane.b32.xlu0 %v1087_v46, %s10266_s18 }
  0xac   : > { %1156 = vrot.lane.b32.xlu1 %v1089_v47, %s10266_s18  ;;  %v936_v47 = vshll.u32 %v10736_v37, 16 }
  0xae   : > { %1154 = vrot.lane.b32.xlu0 %v1090_v55, %s10266_s18  ;;  %v938_v55 = vrot.slane %v936_v47, 1 }
  0xb0   : > { %997 = vrot.lane.b32.xlu1 %v882_v59, %s10267_s19  ;;  %v10111_v59 = vld [vmem:[#allocation2 + $0x28] sm:$0xf]  ;;  %v942_v8 = vor.u32 %v940_v56, %v938_v55 }
  0xb2   : > { %995 = vrot.lane.b32.xlu0 %v879_v1, %s10267_s19  ;;  %v1102_v1 = vsel %vm1051_vm3, %v1100_v51, %v1101_v50 }
  0xb4   : > { %1001 = vrot.lane.b32.xlu1 %v897_v4, %s10267_s19  ;;  %v671_v4 = vld [vmem:[#allocation2 + $0x118] sm:$0x1f] }
  0xb5   : > { %v1104_v17 = vrot.slane %v671_v4, 1 }
  0xb6   : > { %999 = vrot.lane.b32.xlu0 %v894_v9, %s10267_s19 }
  0xb8   : > { %1160 = vrot.lane.b32.xlu1 %v1092_v6, %s10266_s18 }
  0xba   : > { %1158 = vrot.lane.b32.xlu0 %v1093_v13, %s10266_s18  ;;  %v1113_v22 = vpop.permute.xlu1 %1112 }
  0xbc   : > { %v1111_v28 = vpop.permute.xlu0 %1110  ;;  %1164 = vrot.lane.b32.xlu1 %v1095_v14, %s10266_s18 }
  0xbe   : > { %1162 = vrot.lane.b32.xlu0 %v1096_v23, %s10266_s18  ;;  %v1117_v33 = vpop.permute.xlu1 %1116 }
  0xc0   : > { %v10738_v38 = vpop.permute.xlu0 %1114  ;;  %1005 = vrot.lane.b32.xlu1 %v912_v29, %s10267_s19 }
  0xc2   : > { %1003 = vrot.lane.b32.xlu0 %v909_v35, %s10267_s19  ;;  %v954_v40 = vpop.permute.xlu1 %953 }
  0xc3   : > { %v1192_v60 = vsel %vm278_vm2, %v10111_v59, %v954_v40 }
  0xc4   : > { %v1119_v46 = vpop.permute.xlu0 %1118  ;;  %1009 = vrot.lane.b32.xlu1 %v927_v39, %s10267_s19  ;;  %v1280_v9 = vsel %vm1268_vm6, %v1192_v60, %v1117_v33  ;;  %v1105_v39 = vsel %vm1051_vm3, %v1103_v18, %v1104_v17 }
  0xc5   : > { %v1391_v23 = vshrl.u32 %v1280_v9, 16  ;;  %v1394_v24 = vshll.u32 %v1280_v9, 16 }
  0xc6   : > { %1007 = vrot.lane.b32.xlu0 %v924_v44, %s10267_s19  ;;  %v958_v48 = vpop.permute.xlu1 %957 }
  0xc7   : > { %v1197_v13 = vsel %vm278_vm2, %v10112_v11, %v958_v48  ;;  %v1393_v44 = vrot.slane %v1391_v23, 3  ;;  %v1396_v45 = vrot.slane %v1394_v24, 4  ;;  %v10810_v23 = vld [vmem:[%s13649_s1 + $0x18] sm:$0xff]  }
  0xc8   : > { %v950_v54 = vpop.permute.xlu0 %949  ;;  %1168 = vrot.lane.b32.xlu1 %v1098_v41, %s10266_s18 }
  0xc9   : > { %v1187_v58 = vsel %vm278_vm2, %v10110_v57, %v950_v54  ;;  %v10113_v54 = vld [vmem:[#allocation2 + $0x48] sm:$0xf] }
  0xca   : > { %v1276_v61 = vsel %vm1268_vm6, %v1187_v58, %v1113_v22  ;;  %1166 = vrot.lane.b32.xlu0 %v1099_v49, %s10266_s18  ;;  %v962_v62 = vpop.permute.xlu1 %961  ;;  %v939_v22 = vsel %vm672_vm4, %v934_v2, %v938_v55 }
  0xcb   : > { %v1376_v5 = vshrl.u32 %v1276_v61, 16  ;;  %v1379_v6 = vshll.u32 %v1276_v61, 16  ;;  %v1202_v55 = vsel %vm278_vm2, %v10113_v54, %v962_v62 }
  0xcc   : > { %v948_v7 = vpop.permute.xlu0 %947  ;;  %1172 = vrot.lane.b32.xlu1 %v1101_v50, %s10266_s18 }
  0xcd   : > { %v1185_v10 = vsel %vm278_vm2, %v602_v63, %v948_v7  ;;  %v1378_v25 = vrot.slane %v1376_v5, 3  ;;  %v1381_v26 = vrot.slane %v1379_v6, 4  ;;  %v1397_v5 = vor.u32 %v1396_v45, %v1393_v44 }
  0xce   : > { %v1274_v14 = vsel %vm1268_vm6, %v1185_v10, %v1111_v28  ;;  %1170 = vrot.lane.b32.xlu0 %v1102_v1, %s10266_s18  ;;  %v1121_v15 = vpop.permute.xlu1 %1120 }
  0xcf   : > { %v1369_v19 = vshrl.u32 %v1274_v14, 16  ;;  %v1372_v20 = vshll.u32 %v1274_v14, 16  ;;  %v1284_v21 = vsel %vm1268_vm6, %v1197_v13, %v1121_v15  ;;  %v1382_v49 = vor.u32 %v1381_v26, %v1378_v25  ;;  %v10788_v13 = vld [vmem:[%s13649_s1 + $0x8] ss:$0 sps:$4 sm:$0xff]  }
  0xd0   : > { %v956_v29 = vpop.permute.xlu0 %955  ;;  %1013 = vrot.lane.b32.xlu1 %v942_v8, %s10267_s19  ;;  %v1406_v33 = vshrl.u32 %v1284_v21, 16  ;;  %v1409_v34 = vshll.u32 %v1284_v21, 16 }
  0xd1   : > { %v1371_v28 = vrot.slane %v1369_v19, 3  ;;  %v1374_v31 = vrot.slane %v1372_v20, 4  ;;  %v1195_v32 = vsel %vm278_vm2, %v606_v16, %v956_v29  ;;  %v610_v29 = vld [vmem:[#allocation2 + $0x50] sm:$0xf8] }
  0xd2   : > { %v1282_v35 = vsel %vm1268_vm6, %v1195_v32, %v1119_v46  ;;  %v952_v36 = vpop.permute.xlu1 %951  ;;  %1011 = vrot.lane.b32.xlu0 %v939_v22, %s10267_s19  ;;  %v1408_v56 = vrot.slane %v1406_v33, 3  ;;  %v1411_v57 = vrot.slane %v1409_v34, 4  ;;  %v10805_v22 = vsel %vm1523_vm5, %v10788_v13, 0  ;;  %v612_v34 = vld [vmem:[#allocation2 + $0x60] sm:$0xf8] }
  0xd3   : > { %v1399_v40 = vshrl.u32 %v1282_v35, 16  ;;  %v1402_v41 = vshll.u32 %v1282_v35, 16  ;;  %v1190_v42 = vsel %vm278_vm2, %v604_v30, %v952_v36  ;;  %v1375_v43 = vor.u32 %v1374_v31, %v1371_v28 }
  0xd4   : > { %v1278_v47 = vsel %vm1268_vm6, %v1190_v42, %v10738_v38  ;;  %v960_v48 = vpop.permute.xlu0 %959  ;;  %1176 = vrot.lane.b32.xlu1 %v1104_v17, %s10266_s18  ;;  %v1412_v8 = vor.u32 %v1411_v57, %v1408_v56 }
  0xd5   : > { %v1401_v46 = vrot.slane %v1399_v40, 3  ;;  %v1404_v50 = vrot.slane %v1402_v41, 4  ;;  %v1384_v51 = vshrl.u32 %v1278_v47, 16  ;;  %v1387_v52 = vshll.u32 %v1278_v47, 16  ;;  %v10115_v40 = vld [vmem:[#allocation2 + $0x68] sm:$0xf] }
  0xd6   : > { %v10777_v58 = vsel %vm1353_vm8, %v1375_v43, %v1382_v49  ;;  %v1125_v59 = vpop.permute.xlu1 %1124  ;;  %1174 = vrot.lane.b32.xlu0 %v1105_v39, %s10266_s18  ;;  %v1200_v1 = vsel %vm278_vm2, %v608_v53, %v960_v48 }
  0xd7   : > { %v1386_v38 = vrot.slane %v1384_v51, 3  ;;  %v1389_v60 = vrot.slane %v1387_v52, 4  ;;  %9270 = vmatprep.mubr.msk.bf16.mxu0 %vm1498_vm7, %v10777_v58  ;;  %v1288_v61 = vsel %vm1268_vm6, %v1202_v55, %v1125_v59  ;;  %v1405_v63 = vor.u32 %v1404_v50, %v1401_v46 }
  0xd8   : > { %v1421_v2 = vshrl.u32 %v1288_v61, 16  ;;  %v1424_v62 = vshll.u32 %v1288_v61, 16  ;;  %v1123_v4 = vpop.permute.xlu0 %1122 }
  0xd9   : > { %v1390_v6 = vor.u32 %v1389_v60, %v1386_v38  ;;  %v1286_v7 = vsel %vm1268_vm6, %v1200_v1, %v1123_v4  ;;  %v10796_v20 = vsel %vm1353_vm8, %v1405_v63, %v1412_v8 }
  0xda   : > { %v1414_v9 = vshrl.u32 %v1286_v7, 16  ;;  %v1417_v10 = vshll.u32 %v1286_v7, 16  ;;  %v966_v11 = vpop.permute.xlu1 %965  ;;  %v1423_v14 = vrot.slane %v1421_v2, 3  ;;  %v1426_v15 = vrot.slane %v1424_v62, 4 }
  0xdb   : > { %v10791_v16 = vsel %vm1353_vm8, %v1390_v6, %v1397_v5 }
  0xdc   : > { %v1416_v17 = vrot.slane %v1414_v9, 3  ;;  %v1419_v18 = vrot.slane %v1417_v10, 4  ;;  %v964_v19 = vpop.permute.xlu0 %963  ;;  %9271 = vmatmul.mubr.msk.bf16.vlgmr.msra.gmra.mrb[0].mxu0 %vm1498_vm7, %v10791_v16  ;;  %v1427_v24 = vor.u32 %v1426_v15, %v1423_v14  ;;  %v614_v10 = vld [vmem:[#allocation2 + $0x70] sm:$0xf8] }
  0xdd   : > { %9274 = vmatprep.mubr.msk.bf16.mxu0 %vm1498_vm7, %v10796_v20  ;;  %9287 = vmatpush3.bf16.msra.mxu0 %v10642_v27  ;;  %v10114_v27 = vld [vmem:[#allocation2 + $0x58] sm:$0xf]  ;;  %v1205_v33 = vsel %vm278_vm2, %v610_v29, %v964_v19  ;;  %v616_v19 = vld [vmem:[#allocation2 + $0x80] sm:$0xf8] }
  0xde   : > { %v970_v21 = vpop.permute.xlu1 %969  ;;  %9771 = vmatprep.subr.msk.bf16.mxu0 %vm1523_vm5, %v10788_v13  ;;  %v1420_v25 = vor.u32 %v1419_v18, %v1416_v17  ;;  %v1207_v30 = vsel %vm278_vm2, %v10114_v27, %v966_v11  ;;  %v10116_v11 = vld [vmem:[#allocation2 + $0x78] sm:$0xf] }
  0xdf   : > { %v1212_v41 = vsel %vm278_vm2, %v10115_v40, %v970_v21 }
  0xe0   : > { %v968_v26 = vpop.permute.xlu0 %967  ;;  %v10817_v32 = vsel %vm1353_vm8, %v1420_v25, %v1427_v24 }
  0xe1   : > { %9289 = vmatpush3.bf16.msra.mxu0 %v10805_v22  ;;  %v1210_v49 = vsel %vm278_vm2, %v612_v34, %v968_v26  ;;  %v10117_v26 = vld [vmem:[#allocation2 + $0x88] sm:$0xf] }
  0xe2   : > { %v1129_v28 = vpop.permute.xlu1 %1128  ;;  %9306 = vmatprep.subr.bf16.mxu0 %v10810_v23 }
  0xe3   : > { %v1292_v31 = vsel %vm1268_vm6, %v1207_v30, %v1129_v28 }
  0xe4   : > { %v1436_v35 = vshrl.u32 %v1292_v31, 16  ;;  %v1439_v36 = vshll.u32 %v1292_v31, 16  ;;  %v1127_v39 = vpop.permute.xlu0 %1126  ;;  %9275 = vmatmul.mubr.msk.bf16.gmra.mrb[4].mxu0 %vm1498_vm7, %v10817_v32 }
  0xe5   : > { %v1290_v42 = vsel %vm1268_vm6, %v1205_v33, %v1127_v39 }
  0xe6   : > { %v1438_v43 = vrot.slane %v1436_v35, 3  ;;  %v1441_v44 = vrot.slane %v1439_v36, 4  ;;  %v1429_v45 = vshrl.u32 %v1290_v42, 16  ;;  %v1432_v47 = vshll.u32 %v1290_v42, 16  ;;  %v1133_v48 = vpop.permute.xlu1 %1132 }
  0xe7   : > { %v1296_v46 = vsel %vm1268_vm6, %v1212_v41, %v1133_v48 }
  0xe8   : > { %v1442_v50 = vor.u32 %v1441_v44, %v1438_v43  ;;  %v1431_v51 = vrot.slane %v1429_v45, 3  ;;  %v1434_v52 = vrot.slane %v1432_v47, 4  ;;  %v1451_v53 = vshrl.u32 %v1296_v46, 16  ;;  %v1131_v54 = vpop.permute.xlu0 %1130 }
  0xe9   : > { %v1454_v55 = vshll.u32 %v1296_v46, 16  ;;  %v1294_v56 = vsel %vm1268_vm6, %v1210_v49, %v1131_v54 }
  0xea   : > { %v1435_v57 = vor.u32 %v1434_v52, %v1431_v51  ;;  %v1453_v59 = vrot.slane %v1451_v53, 3  ;;  %v1444_v38 = vshrl.u32 %v1294_v56, 16  ;;  %v1447_v60 = vshll.u32 %v1294_v56, 16  ;;  %v974_v61 = vpop.permute.xlu1 %973 }
  0xeb   : > { %v1456_v63 = vrot.slane %v1454_v55, 4  ;;  %v1217_v14 = vsel %vm278_vm2, %v10116_v11, %v974_v61 }
  0xec   : > { %v1446_v1 = vrot.slane %v1444_v38, 3  ;;  %v1449_v2 = vrot.slane %v1447_v60, 4  ;;  %v972_v62 = vpop.permute.xlu0 %971  ;;  %v10828_v4 = vsel %vm1353_vm8, %v1435_v57, %v1442_v50  ;;  %v600_v57 = vld [vmem:[#allocation2] sm:$0xf8]  ;;  %v10118_v38 = vld [vmem:[#allocation2 + $0x8] sm:$0xf] }
  0xed   : > { %v1457_v5 = vor.u32 %v1456_v63, %v1453_v59  ;;  %9278 = vmatprep.mubr.msk.bf16.mxu0 %vm1498_vm7, %v10828_v4  ;;  %v1215_v18 = vsel %vm278_vm2, %v614_v10, %v972_v62 }
  0xee   : > { %v1450_v6 = vor.u32 %v1449_v2, %v1446_v1  ;;  %v978_v7 = vpop.permute.xlu1 %977 }
  0xef   : > { %v1222_v29 = vsel %vm278_vm2, %v10117_v26, %v978_v7 }
  0xf0   : > { %v976_v8 = vpop.permute.xlu0 %975  ;;  %v10833_v9 = vsel %vm1353_vm8, %v1450_v6, %v1457_v5 }
  0xf1   : > { %9279 = vmatmul.mubr.msk.bf16.gmra.mrb[8].mxu0 %vm1498_vm7, %v10833_v9  ;;  %v1220_v35 = vsel %vm278_vm2, %v616_v19, %v976_v8 }
  0xf2   : > { %v1137_v15 = vpop.permute.xlu1 %1136 }
  0xf3   : > { %v1300_v17 = vsel %vm1268_vm6, %v1217_v14, %v1137_v15 }
  0xf4   : > { %v1466_v21 = vshrl.u32 %v1300_v17, 16  ;;  %v1469_v24 = vshll.u32 %v1300_v17, 16  ;;  %v1135_v25 = vpop.permute.xlu0 %1134 }
  0xf5   : > { %v1298_v27 = vsel %vm1268_vm6, %v1215_v18, %v1135_v25 }
  0xf6   : > { %v1468_v30 = vrot.slane %v1466_v21, 3  ;;  %v1471_v28 = vrot.slane %v1469_v24, 4  ;;  %v1459_v31 = vshrl.u32 %v1298_v27, 16  ;;  %v1462_v33 = vshll.u32 %v1298_v27, 16  ;;  %v1141_v34 = vpop.permute.xlu1 %1140  ;;  %v10863_v27 = vld [vmem:[%s13649_s1 + $0x20] ss:$0 sps:$4 sm:$0xff]  }
  0xf7   : > { %v1304_v36 = vsel %vm1268_vm6, %v1222_v29, %v1141_v34 }
  0xf8   : > { %v1472_v39 = vor.u32 %v1471_v28, %v1468_v30  ;;  %v1461_v40 = vrot.slane %v1459_v31, 3  ;;  %v1464_v41 = vrot.slane %v1462_v33, 4  ;;  %v1481_v42 = vshrl.u32 %v1304_v36, 16  ;;  %v1139_v43 = vpop.permute.xlu0 %1138  ;;  %v618_v30 = vld [vmem:[#allocation2 + $0x90] sm:$0xf8] }
  0xf9   : > { %v1484_v44 = vshll.u32 %v1304_v36, 16  ;;  %v1302_v45 = vsel %vm1268_vm6, %v1220_v35, %v1139_v43  ;;  %v10119_v28 = vld [vmem:[#allocation2 + $0x98] sm:$0xf]  ;;  %v620_v36 = vld [vmem:[#allocation2 + $0xa0] sm:$0xf8] }
  0xfa   : > { %v1465_v47 = vor.u32 %v1464_v41, %v1461_v40  ;;  %v1483_v48 = vrot.slane %v1481_v42, 3  ;;  %v1474_v49 = vshrl.u32 %v1302_v45, 16  ;;  %v1477_v46 = vshll.u32 %v1302_v45, 16  ;;  %v946_v50 = vpop.permute.xlu1 %945  ;;  %v10120_v42 = vld [vmem:[#allocation2 + $0xa8] sm:$0xf] }
  0xfb   : > { %v1486_v51 = vrot.slane %v1484_v44, 4  ;;  %v1182_v60 = vsel %vm278_vm2, %v10118_v38, %v946_v50 }
  0xfc   : > { %v1476_v52 = vrot.slane %v1474_v49, 3  ;;  %v1479_v53 = vrot.slane %v1477_v46, 4  ;;  %v944_v54 = vpop.permute.xlu0 %943  ;;  %v10846_v55 = vsel %vm1353_vm8, %v1465_v47, %v1472_v39 }
  0xfd   : > { %v1487_v56 = vor.u32 %v1486_v51, %v1483_v48  ;;  %9282 = vmatprep.mubr.msk.bf16.mxu0 %vm1498_vm7, %v10846_v55  ;;  %v1180_v1 = vsel %vm278_vm2, %v600_v57, %v944_v54 }
  0xfe   : > { %v1480_v59 = vor.u32 %v1479_v53, %v1476_v52  ;;  %v1109_v61 = vpop.permute.xlu1 %1108 }
  0xff   : > { %v1272_v63 = vsel %vm1268_vm6, %v1182_v60, %v1109_v61 }
 0x100   : > { %v1361_v2 = vshrl.u32 %v1272_v63, 16  ;;  %v1364_v62 = vshll.u32 %v1272_v63, 16  ;;  %v1107_v5 = vpop.permute.xlu0 %1106  ;;  %v10854_v6 = vsel %vm1353_vm8, %v1480_v59, %v1487_v56 }
 0x101   : > { %v1270_v7 = vsel %vm1268_vm6, %v1180_v1, %v1107_v5  ;;  %9283 = vmatmul.mubr.msk.bf16.gmra.mrb[12].mxu0 %vm1498_vm7, %v10854_v6 }
 0x102   : > { %v1363_v8 = vrot.slane %v1361_v2, 3  ;;  %v1366_v10 = vrot.slane %v1364_v62, 4  ;;  %v1354_v11 = vshrl.u32 %v1270_v7, 16  ;;  %v1357_v14 = vshll.u32 %v1270_v7, 16  ;;  %v982_v15 = vpop.permute.xlu1 %981 }
 0x103   : > { %v1227_v31 = vsel %vm278_vm2, %v10119_v28, %v982_v15  ;;  %v624_v28 = vld [vmem:[#allocation2 + $0xc0] sm:$0xf8] }
 0x104   : > { %v1367_v17 = vor.u32 %v1366_v10, %v1363_v8  ;;  %v1356_v18 = vrot.slane %v1354_v11, 3  ;;  %v1359_v19 = vrot.slane %v1357_v14, 4  ;;  %v980_v21 = vpop.permute.xlu0 %979 }
 0x105   : > { %v1225_v35 = vsel %vm278_vm2, %v618_v30, %v980_v21  ;;  %v10121_v21 = vld [vmem:[#allocation2 + $0xb8] sm:$0xf] }
 0x106   : > { %v1360_v24 = vor.u32 %v1359_v19, %v1356_v18  ;;  %v986_v25 = vpop.permute.xlu1 %985  ;;  %v622_v19 = vld [vmem:[#allocation2 + $0xb0] sm:$0xf8] }
 0x107   : > { %v1232_v43 = vsel %vm278_vm2, %v10120_v42, %v986_v25 }
 0x108   : > { %v984_v26 = vpop.permute.xlu0 %983  ;;  %v1368_v29 = vsel %vm1353_vm8, %v1360_v24, %v1367_v17 }
 0x109   : > { %9290 = vmatprep.mubr.msk.bf16.mxu0 %vm1498_vm7, %v1368_v29  ;;  %v1230_v50 = vsel %vm278_vm2, %v620_v36, %v984_v26  ;;  %v10122_v26 = vld [vmem:[%s13649_s1] sm:$0xff]  }
 0x10a   : > { %9291 = vmatmul.mubr.msk.bf16.vlgmr.msra.gmra.mrb[0].mxu0 %vm1498_vm7, %v10777_v58  ;;  %v1145_v33 = vpop.permute.xlu1 %1144  ;;  %v10878_v58 = vsel %vm1523_vm5, %v10863_v27, 0 }
 0x10b   : > { %v1308_v34 = vsel %vm1268_vm6, %v1227_v31, %v1145_v33  ;;  %9294 = vmatprep.mubr.msk.bf16.mxu0 %vm1498_vm7, %v10791_v16  ;;  %9307 = vmatpush3.bf16.msra.mxu0 %v10810_v23 }
 0x10c   : > { %v1743_v39 = vshrl.u32 %v1308_v34, 16  ;;  %v1746_v40 = vshll.u32 %v1308_v34, 16  ;;  %v1143_v41 = vpop.permute.xlu0 %1142  ;;  %9772 = vmatprep.subr.msk.bf16.mxu0 %vm1523_vm5, %v10863_v27 }
 0x10d   : > { %v1306_v44 = vsel %vm1268_vm6, %v1225_v35, %v1143_v41  ;;  %v10123_v35 = vld [vmem:[#allocation2 + $0xc8] sm:$0xf] }
 0x10e   : > { %v1745_v45 = vrot.slane %v1743_v39, 3  ;;  %v1748_v47 = vrot.slane %v1746_v40, 4  ;;  %v1736_v48 = vshrl.u32 %v1306_v44, 16  ;;  %v1739_v49 = vshll.u32 %v1306_v44, 16  ;;  %v1149_v46 = vpop.permute.xlu1 %1148 }
 0x10f   : > { %v1312_v51 = vsel %vm1268_vm6, %v1232_v43, %v1149_v46  ;;  %9309 = vmatpush3.bf16.msra.mxu0 %v10878_v58 }
 0x110   : > { %v1749_v52 = vor.u32 %v1748_v47, %v1745_v45  ;;  %v1738_v53 = vrot.slane %v1736_v48, 3  ;;  %v1741_v54 = vrot.slane %v1739_v49, 4  ;;  %v1973_v56 = vshrl.u32 %v1312_v51, 16  ;;  %v1147_v57 = vpop.permute.xlu0 %1146  ;;  %3560 = vmatprep.subr.bf16.mxu0 %v13656_v0 }
 0x111   : > { %v1976_v59 = vshll.u32 %v1312_v51, 16  ;;  %v1310_v38 = vsel %vm1268_vm6, %v1230_v50, %v1147_v57 }
 0x112   : > { %v1742_v60 = vor.u32 %v1741_v54, %v1738_v53  ;;  %v1975_v61 = vrot.slane %v1973_v56, 3  ;;  %v1966_v63 = vshrl.u32 %v1310_v38, 16  ;;  %v1969_v1 = vshll.u32 %v1310_v38, 16  ;;  %9295 = vmatmul.mubr.msk.bf16.gmra.mrb[4].mxu0 %vm1498_vm7, %v10796_v20  ;;  %v990_v2 = vpop.permute.xlu1 %989 }
 0x113   : > { %v1978_v62 = vrot.slane %v1976_v59, 4  ;;  %9298 = vmatprep.mubr.msk.bf16.mxu0 %vm1498_vm7, %v10817_v32  ;;  %v1237_v24 = vsel %vm278_vm2, %v10121_v21, %v990_v2 }
 0x114   : > { %v1968_v5 = vrot.slane %v1966_v63, 3  ;;  %v1971_v7 = vrot.slane %v1969_v1, 4  ;;  %v988_v8 = vpop.permute.xlu0 %987  ;;  %v10892_v10 = vsel %vm1353_vm8, %v1742_v60, %v1749_v52 }
 0x115   : > { %v1979_v11 = vor.u32 %v1978_v62, %v1975_v61  ;;  %9330 = vmatprep.mubr.msk.bf16.mxu1 %vm1498_vm7, %v10892_v10  ;;  %v1235_v30 = vsel %vm278_vm2, %v622_v19, %v988_v8  ;;  %v626_v8 = vld [vmem:[#allocation2 + $0xd0] sm:$0xf8]  ;;  %v628_v19 = vld [vmem:[#allocation2 + $0xe0] sm:$0xf8] }
 0x116   : > { %v1972_v14 = vor.u32 %v1971_v7, %v1968_v5  ;;  %v994_v15 = vpop.permute.xlu1 %993 }
 0x117   : > { %v1242_v36 = vsel %vm278_vm2, %v10123_v35, %v994_v15 }
 0x118   : > { %v992_v17 = vpop.permute.xlu0 %991  ;;  %v10897_v18 = vsel %vm1353_vm8, %v1972_v14, %v1979_v11 }
 0x119   : > { %9331 = vmatmul.mubr.msk.bf16.vlgmr.msra.gmra.mrb[0].mxu1 %vm1498_vm7, %v10897_v18 }
 0x11a   : > { %9299 = vmatmul.mubr.msk.bf16.gmra.mrb[8].mxu0 %vm1498_vm7, %v10828_v4  ;;  %v1153_v25 = vpop.permute.xlu1 %1152  ;;  %9347 = vmatpush3.bf16.msra.mxu1 %v10122_v26  ;;  %v10125_v26 = vld [vmem:[#allocation2 + $0xe8] sm:$0xf] }
 0x11b   : > { %v1316_v29 = vsel %vm1268_vm6, %v1237_v24, %v1153_v25  ;;  %9302 = vmatprep.mubr.msk.bf16.mxu0 %vm1498_vm7, %v10833_v9  ;;  %9774 = vmatprep.subr.msk.bf16.mxu1 %vm1523_vm5, %v10788_v13  ;;  %v1240_v13 = vsel %vm278_vm2, %v624_v28, %v992_v17 }
 0x11c   : > { %v1988_v31 = vshrl.u32 %v1316_v29, 16  ;;  %v1991_v33 = vshll.u32 %v1316_v29, 16  ;;  %v1151_v34 = vpop.permute.xlu0 %1150 }
 0x11d   : > { %v1314_v39 = vsel %vm1268_vm6, %v1235_v30, %v1151_v34 }
 0x11e   : > { %v1990_v40 = vrot.slane %v1988_v31, 3  ;;  %v1993_v41 = vrot.slane %v1991_v33, 4  ;;  %v1981_v42 = vshrl.u32 %v1314_v39, 16  ;;  %v1984_v43 = vshll.u32 %v1314_v39, 16  ;;  %v1157_v44 = vpop.permute.xlu1 %1156  ;;  %9349 = vmatpush3.bf16.msra.mxu1 %v10805_v22 }
 0x11f   : > { %v1320_v45 = vsel %vm1268_vm6, %v1242_v36, %v1157_v44  ;;  %9366 = vmatprep.subr.bf16.mxu1 %v10810_v23 }
 0x120   : > { %v1994_v47 = vor.u32 %v1993_v41, %v1990_v40  ;;  %v1983_v48 = vrot.slane %v1981_v42, 3  ;;  %v1986_v49 = vrot.slane %v1984_v43, 4  ;;  %v2003_v46 = vshrl.u32 %v1320_v45, 16  ;;  %v1155_v50 = vpop.permute.xlu0 %1154 }
 0x121   : > { %v2006_v51 = vshll.u32 %v1320_v45, 16  ;;  %v1318_v52 = vsel %vm1268_vm6, %v1240_v13, %v1155_v50 }
 0x122   : > { %v1987_v53 = vor.u32 %v1986_v49, %v1983_v48  ;;  %v2005_v54 = vrot.slane %v2003_v46, 3  ;;  %v1996_v56 = vshrl.u32 %v1318_v52, 16  ;;  %v1999_v57 = vshll.u32 %v1318_v52, 16  ;;  %9303 = vmatmul.mubr.msk.bf16.gmra.mrb[12].mxu0 %vm1498_vm7, %v10846_v55  ;;  %v998_v22 = vpop.permute.xlu1 %997 }
 0x123   : > { %v2008_v59 = vrot.slane %v2006_v51, 4  ;;  %9310 = vmatprep.mubr.msk.bf16.mxu0 %vm1498_vm7, %v10791_v16  ;;  %v10124_v16 = vld [vmem:[#allocation2 + $0xd8] sm:$0xf] }
 0x124   : > { %v1998_v38 = vrot.slane %v1996_v56, 3  ;;  %v2001_v60 = vrot.slane %v1999_v57, 4  ;;  %v996_v61 = vpop.permute.xlu0 %995  ;;  %v10925_v63 = vsel %vm1353_vm8, %v1987_v53, %v1994_v47  ;;  %v1247_v11 = vsel %vm278_vm2, %v10124_v16, %v998_v22 }
 0x125   : > { %v2009_v1 = vor.u32 %v2008_v59, %v2005_v54  ;;  %9334 = vmatprep.mubr.msk.bf16.mxu1 %vm1498_vm7, %v10925_v63  ;;  %v1245_v17 = vsel %vm278_vm2, %v626_v8, %v996_v61  ;;  %v630_v59 = vld [vmem:[#allocation2 + $0xf0] sm:$0xf8] }
 0x126   : > { %v2002_v2 = vor.u32 %v2001_v60, %v1998_v38  ;;  %v1002_v62 = vpop.permute.xlu1 %1001 }
 0x127   : > { %v1252_v29 = vsel %vm278_vm2, %v10125_v26, %v1002_v62 }
 0x128   : > { %v1000_v5 = vpop.permute.xlu0 %999  ;;  %v10930_v7 = vsel %vm1353_vm8, %v2002_v2, %v2009_v1  ;;  %v632_v1 = vld [vmem:[#allocation2 + $0x100] sm:$0xf8] }
 0x129   : > { %9335 = vmatmul.mubr.msk.bf16.gmra.mrb[4].mxu1 %vm1498_vm7, %v10930_v7  ;;  %v1250_v35 = vsel %vm278_vm2, %v628_v19, %v1000_v5 }
 0x12a   : > { %9311 = vmatmul.mubr.msk.bf16.vlgmr.msra.gmra.mrb[0].mxu0 %vm1498_vm7, %v10796_v20  ;;  %v1161_v14 = vpop.permute.xlu1 %1160 }
 0x12b   : > { %v1324_v15 = vsel %vm1268_vm6, %v1247_v11, %v1161_v14  ;;  %9314 = vmatprep.mubr.msk.bf16.mxu0 %vm1498_vm7, %v10817_v32 }
 0x12c   : > { %v2018_v21 = vshrl.u32 %v1324_v15, 16  ;;  %v2021_v24 = vshll.u32 %v1324_v15, 16  ;;  %v1159_v25 = vpop.permute.xlu0 %1158 }
 0x12d   : > { %v1322_v30 = vsel %vm1268_vm6, %v1245_v17, %v1159_v25 }
 0x12e   : > { %v2020_v28 = vrot.slane %v2018_v21, 3  ;;  %v2023_v31 = vrot.slane %v2021_v24, 4  ;;  %v2011_v20 = vshrl.u32 %v1322_v30, 16  ;;  %v2014_v33 = vshll.u32 %v1322_v30, 16  ;;  %v1165_v34 = vpop.permute.xlu1 %1164 }
 0x12f   : > { %v1328_v32 = vsel %vm1268_vm6, %v1252_v29, %v1165_v34 }
 0x130   : > { %v2024_v36 = vor.u32 %v2023_v31, %v2020_v28  ;;  %v2013_v39 = vrot.slane %v2011_v20, 3  ;;  %v2016_v40 = vrot.slane %v2014_v33, 4  ;;  %v2033_v41 = vshrl.u32 %v1328_v32, 16  ;;  %v1163_v42 = vpop.permute.xlu0 %1162 }
 0x131   : > { %v2036_v43 = vshll.u32 %v1328_v32, 16  ;;  %v1326_v44 = vsel %vm1268_vm6, %v1250_v35, %v1163_v42 }
 0x132   : > { %v2017_v13 = vor.u32 %v2016_v40, %v2013_v39  ;;  %v2035_v45 = vrot.slane %v2033_v41, 3  ;;  %v2026_v47 = vshrl.u32 %v1326_v44, 16  ;;  %v2029_v48 = vshll.u32 %v1326_v44, 16  ;;  %9315 = vmatmul.mubr.msk.bf16.gmra.mrb[4].mxu0 %vm1498_vm7, %v10828_v4  ;;  %v1006_v49 = vpop.permute.xlu1 %1005 }
 0x133   : > { %v2038_v46 = vrot.slane %v2036_v43, 4  ;;  %9318 = vmatprep.mubr.msk.bf16.mxu0 %vm1498_vm7, %v10833_v9  ;;  %v1257_v9 = vsel %vm278_vm2, %v10710_v3, %v1006_v49 }
 0x134   : > { %v2028_v50 = vrot.slane %v2026_v47, 3  ;;  %v2031_v51 = vrot.slane %v2029_v48, 4  ;;  %v1004_v52 = vpop.permute.xlu0 %1003  ;;  %v10951_v53 = vsel %vm1353_vm8, %v2017_v13, %v2024_v36 }
 0x135   : > { %v2039_v54 = vor.u32 %v2038_v46, %v2035_v45  ;;  %9338 = vmatprep.mubr.msk.bf16.mxu1 %vm1498_vm7, %v10951_v53  ;;  %v1255_v61 = vsel %vm278_vm2, %v630_v59, %v1004_v52  ;;  %v9858_v52 = vld [vmem:[%s13651_s3 + $0x60] sm:$0xff]   ;;  %v9866_v59 = vld [vmem:[%s13651_s3 + $0x18] sm:$0xff]  }
 0x136   : > { %v2032_v56 = vor.u32 %v2031_v51, %v2028_v50  ;;  %v1010_v57 = vpop.permute.xlu1 %1009  ;;  %3561 = vmatpush1.bf16.msra.mxu0 %v9858_v52 }
 0x137   : > { %v1262_v8 = vsel %vm278_vm2, %v10719_v12, %v1010_v57  ;;  %3562 = vmatprep.subr.bf16.mxu0 %v13656_v0  ;;  %v9861_v57 = vld [vmem:[%s13651_s3 + $0x70] sm:$0xff]  }
 0x138   : > { %v1008_v22 = vpop.permute.xlu0 %1007  ;;  %v10956_v4 = vsel %vm1353_vm8, %v2032_v56, %v2039_v54  ;;  %v9859_v54 = vld [vmem:[%s13651_s3 + $0x68] sm:$0xff]  }
 0x139   : > { %9339 = vmatmul.mubr.msk.bf16.gmra.mrb[8].mxu1 %vm1498_vm7, %v10956_v4  ;;  %v1260_v17 = vsel %vm278_vm2, %v632_v1, %v1008_v22  ;;  %v9862_v56 = vld [vmem:[%s13651_s3 + $0x8] sm:$0xff]   ;;  %v9864_v22 = vld [vmem:[%s13651_s3 + $0x10] sm:$0xff]  }
 0x13a   : > { %9319 = vmatmul.mubr.msk.bf16.gmra.mrb[8].mxu0 %vm1498_vm7, %v10846_v55  ;;  %v1169_v38 = vpop.permute.xlu1 %1168  ;;  %v9870_v1 = vld [vmem:[%s13651_s3 + $0x28] sm:$0xff]  }
 0x13b   : > { %v1332_v60 = vsel %vm1268_vm6, %v1257_v9, %v1169_v38  ;;  %9322 = vmatprep.mubr.msk.bf16.mxu0 %vm1498_vm7, %v10854_v6  ;;  %3563 = vmatpush1.bf16.msra.mxu0 %v9859_v54  ;;  %v9865_v9 = vld [vmem:[%s13651_s3 + $0x80] sm:$0xff]  }
 0x13c   : > { %v2048_v2 = vshrl.u32 %v1332_v60, 16  ;;  %v2051_v62 = vshll.u32 %v1332_v60, 16  ;;  %v1167_v5 = vpop.permute.xlu0 %1166  ;;  %3564 = vmatprep.subr.bf16.mxu0 %v13656_v0  ;;  %v9868_v38 = vld [vmem:[%s13651_s3 + $0x20] sm:$0xff]   ;;  %v9867_v60 = vld [vmem:[%s13651_s3 + $0x88] sm:$0xff]  }
 0x13d   : > { %v1330_v3 = vsel %vm1268_vm6, %v1255_v61, %v1167_v5  ;;  %v11143_v61 = vld [vmem:[%s13650_s2] ss:$0 sm:$0xff] }
 0x13e   : > { %v2050_v16 = vrot.slane %v2048_v2, 3  ;;  %v2053_v11 = vrot.slane %v2051_v62, 4  ;;  %v2041_v55 = vshrl.u32 %v1330_v3, 16  ;;  %v2044_v14 = vshll.u32 %v1330_v3, 16  ;;  %v1173_v15 = vpop.permute.xlu1 %1172  ;;  %v9872_v3 = vld [vmem:[%s13651_s3 + $0x30] sm:$0xff]  }
 0x13f   : > { %v1336_v19 = vsel %vm1268_vm6, %v1262_v8, %v1173_v15  ;;  %3565 = vmatpush1.bf16.msra.mxu0 %v9861_v57  ;;  %v9869_v8 = vld [vmem:[%s13651_s3 + $0x90] sm:$0xff]  }
 0x140   : > { %v2054_v21 = vor.u32 %v2053_v11, %v2050_v16  ;;  %v2043_v24 = vrot.slane %v2041_v55, 3  ;;  %v2046_v25 = vrot.slane %v2044_v14, 4  ;;  %v2063_v26 = vshrl.u32 %v1336_v19, 16  ;;  %v1171_v29 = vpop.permute.xlu0 %1170  ;;  %3566 = vmatprep.subr.bf16.mxu0 %v13656_v0 }
 0x141   : > { %v2066_v30 = vshll.u32 %v1336_v19, 16  ;;  %v1334_v28 = vsel %vm1268_vm6, %v1260_v17, %v1171_v29 }
 0x142   : > { %v2047_v12 = vor.u32 %v2046_v25, %v2043_v24  ;;  %v2065_v31 = vrot.slane %v2063_v26, 3  ;;  %v2056_v20 = vshrl.u32 %v1334_v28, 16  ;;  %v2059_v33 = vshll.u32 %v1334_v28, 16  ;;  %9323 = vmatmul.mubr.msk.bf16.gmra.mrb[12].mxu0 %vm1498_vm7, %v10892_v10  ;;  %v9871_v24 = vld [vmem:[%s13651_s3 + $0x98] sm:$0xff]  }
 0x143   : > { %v2068_v34 = vrot.slane %v2066_v30, 4  ;;  %v9874_v25 = vld [vmem:[%s13651_s3 + $0x38] sm:$0xff]  }
 0x144   : > { %v2058_v35 = vrot.slane %v2056_v20, 3  ;;  %v2061_v32 = vrot.slane %v2059_v33, 4  ;;  %v2055_v36 = vsel %vm1353_vm8, %v2047_v12, %v2054_v21  ;;  %v11162_v21 = vld [vmem:[#allocation3] sm:$0xf0] }
 0x145   : > { %v2069_v39 = vor.u32 %v2068_v34, %v2065_v31  ;;  %9342 = vmatprep.mubr.msk.bf16.mxu1 %vm1498_vm7, %v2055_v36  ;;  %v11172_v31 = vld [vmem:[#allocation3 + $0x8] sm:$0xf]  ;;  %v2573_v20 = vshll.u32 %v11162_v21, 16 }
 0x146   : > { %v2062_v40 = vor.u32 %v2061_v32, %v2058_v35  ;;  %v9873_v32 = vld [vmem:[%s13651_s3 + $0xa0] sm:$0xff]  }
 0x148   : > { %v2070_v41 = vsel %vm1353_vm8, %v2062_v40, %v2069_v39 }
 0x149   : > { %9343 = vmatmul.mubr.msk.bf16.gmra.mrb[12].mxu1 %vm1498_vm7, %v2070_v41 }
 0x14a   : > { %9350 = vmatprep.mubr.msk.bf16.mxu1 %vm1498_vm7, %v10854_v6  ;;  %v1012_v6 = vpop.permute.xlu0 %1011 }
 0x14e   : > { %v1175_v43 = vpop.permute.xlu0 %1174 }
 0x151   : > { %9351 = vmatmul.mubr.msk.bf16.vlgmr.msra.gmra.mrb[0].mxu1 %vm1498_vm7, %v10892_v10 }
 0x152   : > { %9367 = vmatpush3.bf16.msra.mxu1 %v10810_v23  ;;  %9354 = vmatprep.mubr.msk.bf16.mxu1 %vm1498_vm7, %v10897_v18  ;;  %v1014_v23 = vpop.permute.xlu1 %1013 }
 0x153   : > { %9775 = vmatprep.subr.msk.bf16.mxu1 %vm1523_vm5, %v10863_v27  ;;  %v634_v27 = vld [vmem:[#allocation2 + $0x110] sm:$0xf8] }
 0x154   : > { %v1265_v10 = vsel %vm278_vm2, %v634_v27, %v1012_v6  ;;  %v2578_v27 = vshll.u32 %v11172_v31, 16 }
 0x156   : > { %9369 = vmatpush3.bf16.msra.mxu1 %v10878_v58  ;;  %v1267_v58 = vsel %vm278_vm2, %v10736_v37, %v1014_v23  ;;  %v1177_v42 = vpop.permute.xlu1 %1176 }
 0x157   : > { %3732 = vmatprep.subr.bf16.mxu1 %v13656_v0  ;;  %v1340_v44 = vsel %vm1268_vm6, %v1267_v58, %v1177_v42  ;;  %v2575_v42 = vrot.slane %v2573_v20, 1 }
 0x158   : > { %v2296_v13 = vshll.u32 %v1340_v44, 16 }
 0x159   : > { %9355 = vmatmul.mubr.msk.bf16.gmra.mrb[4].mxu1 %vm1498_vm7, %v10925_v63 }
 0x15a   : > { %9358 = vmatprep.mubr.msk.bf16.mxu1 %vm1498_vm7, %v10930_v7  ;;  %v2298_v37 = vrot.slane %v2296_v13, 4 }
 0x161   : > { %9359 = vmatmul.mubr.msk.bf16.gmra.mrb[8].mxu1 %vm1498_vm7, %v10951_v53 }
 0x162   : > { %9362 = vmatprep.mubr.msk.bf16.mxu1 %vm1498_vm7, %v10956_v4 }
 0x169   : > { %9363 = vmatmul.mubr.msk.bf16.gmra.mrb[12].mxu1 %vm1498_vm7, %v2055_v36 }
 0x16a   : > { %9370 = vmatprep.mubr.msk.bf16.mxu1 %vm1498_vm7, %v10897_v18  ;;  %v1338_v18 = vsel %vm1268_vm6, %v1265_v10, %v1175_v43  ;;  %v2571_v10 = vshrl.u32 %v11162_v21, 16 }
 0x16b   : > { %v2289_v45 = vshll.u32 %v1338_v18, 16 }
 0x16d   : > { %v2291_v49 = vrot.slane %v2289_v45, 4  ;;  %v2580_v45 = vrot.slane %v2578_v27, 1 }
 0x171   : > { %9371 = vmatmul.mubr.msk.bf16.vlgmr.msra.gmra.mrb[0].mxu1 %vm1498_vm7, %v10925_v63  ;;  %v2293_v63 = vshrl.u32 %v1340_v44, 16 }
 0x172   : > { %9374 = vmatprep.mubr.msk.bf16.mxu1 %vm1498_vm7, %v10930_v7  ;;  %v2286_v7 = vshrl.u32 %v1338_v18, 16  ;;  %v9875_v18 = vld [vmem:[%s13651_s3 + $0xa8] sm:$0xff]  }
 0x173   : > { %v2295_v47 = vrot.slane %v2293_v63, 3 }
 0x174   : > { %v2288_v48 = vrot.slane %v2286_v7, 3 }
 0x175   : > { %v2299_v46 = vor.u32 %v2298_v37, %v2295_v47  ;;  %v2582_v47 = vshrl.u32 %v11172_v31, 16 }
 0x176   : > { %v2292_v50 = vor.u32 %v2291_v49, %v2288_v48  ;;  %v2576_v49 = vor.u32 %v2575_v42, %v2571_v10 }
 0x178   : > { %v2300_v51 = vsel %vm1353_vm8, %v2292_v50, %v2299_v46 }
 0x179   : > { %9375 = vmatmul.mubr.msk.bf16.gmra.mrb[4].mxu1 %vm1498_vm7, %v10951_v53  ;;  %v9860_v53 = vld [vmem:[%s13651_s3] sm:$0xff]  }
 0x17a   : > { %9378 = vmatprep.mubr.msk.bf16.mxu1 %vm1498_vm7, %v10956_v4  ;;  %3733 = vmatpush1.bf16.msra.mxu1 %v9860_v53  ;;  %v9863_v4 = vld [vmem:[%s13651_s3 + $0x78] sm:$0xff]  }
 0x17b   : > { %3734 = vmatprep.subr.bf16.mxu1 %v13656_v0  ;;  %3567 = vmatpush1.bf16.msra.mxu0 %v9863_v4 }
 0x17c   : > { %3568 = vmatprep.subr.bf16.mxu0 %v13656_v0 }
 0x17e   : > { %3735 = vmatpush1.bf16.msra.mxu1 %v9862_v56 }
 0x17f   : > { %3736 = vmatprep.subr.bf16.mxu1 %v13656_v0  ;;  %3569 = vmatpush1.bf16.msra.mxu0 %v9865_v9  ;;  %v11209_v9 = vor.u32 %v2582_v47, %v2580_v45 }
 0x180   : > { %3570 = vmatprep.subr.bf16.mxu0 %v13656_v0 }
 0x181   : > { %9379 = vmatmul.mubr.msk.bf16.gmra.mrb[8].mxu1 %vm1498_vm7, %v2055_v36  ;;  %v9876_v36 = vld [vmem:[%s13651_s3 + $0x40] sm:$0xff]  }
 0x182   : > { %9382 = vmatprep.mubr.msk.bf16.mxu1 %vm1498_vm7, %v2070_v41  ;;  %3737 = vmatpush1.bf16.msra.mxu1 %v9864_v22 }
 0x183   : > { %3738 = vmatprep.subr.bf16.mxu1 %v13656_v0  ;;  %3571 = vmatpush1.bf16.msra.mxu0 %v9867_v60 }
 0x184   : > { %3572 = vmatprep.subr.bf16.mxu0 %v13656_v0 }
 0x186   : > { %3739 = vmatpush1.bf16.msra.mxu1 %v9866_v59 }
 0x187   : > { %3740 = vmatprep.subr.bf16.mxu1 %v13656_v0  ;;  %3573 = vmatpush1.bf16.msra.mxu0 %v9869_v8 }
 0x188   : > { %3574 = vmatprep.subr.bf16.mxu0 %v13656_v0 }
 0x189   : > { %9383 = vmatmul.mubr.msk.bf16.gmra.mrb[12].mxu1 %vm1498_vm7, %v2300_v51 }
 0x18a   : > { %3741 = vmatpush1.bf16.msra.mxu1 %v9868_v38 }
 0x18b   : > { %3742 = vmatprep.subr.bf16.mxu1 %v13656_v0  ;;  %3575 = vmatpush1.bf16.msra.mxu0 %v9871_v24 }
 0x18c   : > { %3576 = vmatprep.subr.bf16.mxu0 %v13656_v0 }
 0x18e   : > { %3743 = vmatpush1.bf16.msra.mxu1 %v9870_v1 }
 0x18f   : > { %3744 = vmatprep.subr.bf16.mxu1 %v13656_v0  ;;  %3577 = vmatpush1.bf16.msra.mxu0 %v9873_v32 }
 0x190   : > { %3578 = vmatprep.subr.bf16.mxu0 %v13656_v0 }
 0x192   : > { %3745 = vmatpush1.bf16.msra.mxu1 %v9872_v3 }
 0x193   : > { %3746 = vmatprep.subr.bf16.mxu1 %v13656_v0  ;;  %3579 = vmatpush1.bf16.msra.mxu0 %v9875_v18 }
 0x194   : > { %3580 = vmatprep.subr.bf16.mxu0 %v13656_v0 }
 0x196   : > { %3747 = vmatpush1.bf16.msra.mxu1 %v9874_v25 }
 0x197   : > { %3748 = vmatprep.subr.bf16.mxu1 %v13656_v0 }
 0x19a   : > { %3749 = vmatpush1.bf16.msra.mxu1 %v9876_v36 }
 0x19b   : > { %3750 = vmatprep.subr.bf16.mxu1 %v13656_v0 }
 0x1fd   : > { %v9312_v2 = vpop.f32.mrb[0].mxu0 }
 0x1fe   : > { %v1887_v62 = vadd.f32 %v9312_v2, %v11143_v61  ;;  %v1800_v5 = vpop.f32.mrb[1].mxu0 }
 0x1ff   : > { %v1885_v16 = vadd.f32 %v11143_v61, %v1800_v5  ;;  %v9313_v11 = vpop.f32.mrb[2].mxu0  ;;  %v9877_v5 = vld [vmem:[%s13651_s3 + $0xb0] sm:$0xff]  }
 0x200   : > { %v1888_v55 = vadd.f32 %v9313_v11, %v11143_v61  ;;  %v1803_v14 = vpop.f32.mrb[3].mxu0  ;;  %v1903_v17 = vmax.f32 %v1887_v62, 0.0  ;;  %v11216_v62 = vsel %vm672_vm4, %v2576_v49, %v2580_v45  ;;  %3581 = vmatpush1.bf16.msra.mxu0 %v9877_v5 }
 0x201   : > { %v1886_v15 = vadd.f32 %v11143_v61, %v1803_v14  ;;  %v1901_v26 = vmax.f32 %v1885_v16, 0.0  ;;  %3582 = vmatprep.subr.bf16.mxu0 %v13656_v0 }
 0x202   : > { %v1904_v19 = vmax.f32 %v1888_v55, 0.0 }
 0x203   : > { %v1902_v29 = vmax.f32 %v1886_v15, 0.0 }
 0x204   : > { %v1918_v30 = vpack.c.bf16 %v1904_v19, %v1903_v17  ;;  %v9878_v19 = vld [vmem:[%s13651_s3 + $0x48] sm:$0xff]  }
 0x205   : > { %v1917_v28 = vpack.c.bf16 %v1902_v29, %v1901_v26  ;;  %v9316_v12 = vpop.f32.mrb[4].mxu0  ;;  %3751 = vmatpush1.bf16.msra.mxu1 %v9878_v19 }
 0x206   : > { %v1934_v33 = vrot.slane %v1918_v30, 4  ;;  %v1891_v34 = vadd.f32 %v9316_v12, %v11143_v61  ;;  %v1816_v35 = vpop.f32.mrb[5].mxu0  ;;  %3752 = vmatprep.subr.bf16.mxu1 %v13656_v0 }
 0x207   : > { %v1933_v39 = vrot.slane %v1917_v28, 4  ;;  %v1889_v40 = vadd.f32 %v11143_v61, %v1816_v35  ;;  %v9317_v41 = vpop.f32.mrb[6].mxu0  ;;  %v9880_v35 = vld [vmem:[%s13651_s3 + $0x50] sm:$0xff]  }
 0x208   : > { %1952 = vst.msk [vmem:[#allocation3 + $0x20] sm:$0xf0] %vm347_vm10, %v1934_v33  ;;  %v1892_v23 = vadd.f32 %v9317_v41, %v11143_v61  ;;  %v1819_v6 = vpop.f32.mrb[7].mxu0  ;;  %v1907_v43 = vmax.f32 %v1891_v34, 0.0  ;;  %v9879_v34 = vld [vmem:[%s13651_s3 + $0xb8] sm:$0xff]  }
 0x209   : > { %1953 = vst.msk [vmem:[#allocation3 + $0x28] sm:$0xf] %vm328_vm9, %v1934_v33  ;;  %1951 = vst.msk [vmem:[#allocation3 + $0x18] sm:$0xf] %vm328_vm9, %v1933_v39  ;;  %v1890_v58 = vadd.f32 %v11143_v61, %v1819_v6  ;;  %v1905_v63 = vmax.f32 %v1889_v40, 0.0  ;;  %3583 = vmatpush1.bf16.msra.mxu0 %v9879_v34  ;;  %3753 = vmatpush1.bf16.msra.mxu1 %v9880_v35 }
 0x20a   : > { %1950 = vst.msk [vmem:[#allocation3 + $0x10] sm:$0xf0] %vm347_vm10, %v1933_v39  ;;  %v1908_v44 = vmax.f32 %v1892_v23, 0.0  ;;  %3937 = vmatprep.subr.bf16.mxu0 %v13656_v0  ;;  %3754 = vmatprep.subr.bf16.mxu1 %v13656_v0 }
 0x20b   : > { %v1906_v13 = vmax.f32 %v1890_v58, 0.0 }
 0x20c   : > { %v1920_v7 = vpack.c.bf16 %v1908_v44, %v1907_v43 }
 0x20d   : > { %v1919_v37 = vpack.c.bf16 %v1906_v13, %v1905_v63  ;;  %v9320_v48 = vpop.f32.mrb[8].mxu0 }
 0x20e   : > { %v1936_v46 = vrot.slane %v1920_v7, 4  ;;  %v1895_v50 = vadd.f32 %v9320_v48, %v11143_v61  ;;  %v1832_v51 = vpop.f32.mrb[9].mxu0 }
 0x20f   : > { %v1935_v52 = vrot.slane %v1919_v37, 4  ;;  %v1893_v53 = vadd.f32 %v11143_v61, %v1832_v51  ;;  %v9321_v54 = vpop.f32.mrb[10].mxu0  ;;  %v11239_v42 = vld [vmem:[#allocation3 + $0x20] sm:$0xf0] }
 0x210   : > { %v11201_v56 = vld [vmem:[#allocation3 + $0x28] sm:$0xf]  ;;  %1956 = vst.msk [vmem:[#allocation3 + $0x40] sm:$0xf0] %vm347_vm10, %v1936_v46  ;;  %v1896_v57 = vadd.f32 %v9321_v54, %v11143_v61  ;;  %v1835_v22 = vpop.f32.mrb[11].mxu0  ;;  %v1911_v38 = vmax.f32 %v1895_v50, 0.0 }
 0x211   : > { %1957 = vst.msk [vmem:[#allocation3 + $0x48] sm:$0xf] %vm328_vm9, %v1936_v46  ;;  %v11207_v4 = vld [vmem:[#allocation3 + $0x18] sm:$0xf]  ;;  %v2535_v59 = vld [vmem:[#allocation3 + $0x10] sm:$0xf0]  ;;  %v1894_v60 = vadd.f32 %v11143_v61, %v1835_v22 }
 0x212   : > { %1954 = vst.msk [vmem:[#allocation3 + $0x30] sm:$0xf0] %vm347_vm10, %v1935_v52  ;;  %v2593_v1 = vshll.u32 %v11207_v4, 16  ;;  %v2553_v2 = vld [vmem:[#allocation3 + $0x18] sm:$0x1f]  ;;  %v1909_v8 = vmax.f32 %v1893_v53, 0.0 }
 0x213   : > { %1955 = vst.msk [vmem:[#allocation3 + $0x38] sm:$0xf] %vm328_vm9, %v1935_v52  ;;  %v1912_v3 = vmax.f32 %v1896_v57, 0.0  ;;  %v2588_v16 = vshll.u32 %v2535_v59, 16  ;;  %v2951_v11 = vrot.slane %v2535_v59, 1  ;;  %v1910_v55 = vmax.f32 %v1894_v60, 0.0 }
 0x214   : > { %v2595_v14 = vrot.slane %v2593_v1, 1  ;;  %v2597_v15 = vshrl.u32 %v11207_v4, 16  ;;  %v2952_v17 = vrot.slane %v2553_v2, 1  ;;  %v2586_v25 = vshrl.u32 %v2535_v59, 16  ;;  %v9881_v59 = vld [vmem:[%s13651_s3 + $0x58] sm:$0xff]  }
 0x215   : > { %v1922_v24 = vpack.c.bf16 %v1912_v3, %v1911_v38  ;;  %v2590_v26 = vrot.slane %v2588_v16, 1  ;;  %v2608_v29 = vshll.u32 %v11201_v56, 16  ;;  %v1921_v30 = vpack.c.bf16 %v1910_v55, %v1909_v8  ;;  %v9324_v28 = vpop.f32.mrb[12].mxu0  ;;  %3755 = vmatpush1.bf16.msra.mxu1 %v9881_v59 }
 0x216   : > { %v2599_v12 = vor.u32 %v2597_v15, %v2595_v14  ;;  %v2953_v20 = vsel %vm1051_vm3, %v2951_v11, %v2952_v17  ;;  %v3223_v33 = vshrl.u32 %v2952_v17, 16  ;;  %v1899_v36 = vadd.f32 %v9324_v28, %v11143_v61  ;;  %v1848_v39 = vpop.f32.mrb[13].mxu0  ;;  %4389 = vmatprep.subr.bf16.mxu1 %v13656_v0 }
 0x217   : > { %v1938_v32 = vrot.slane %v1922_v24, 4  ;;  %v2591_v40 = vor.u32 %v2590_v26, %v2586_v25  ;;  %v3215_v41 = vshrl.u32 %v2953_v20, 16  ;;  %v1937_v23 = vrot.slane %v1921_v30, 4  ;;  %v9325_v27 = vpop.f32.mrb[14].mxu0 }
 0x218   : > { %v1897_v6 = vadd.f32 %v11143_v61, %v1848_v39  ;;  %2846 = vrot.lane.b32.xlu1 %v2599_v12, %s10268_s16  ;;  %v3218_v58 = vshll.u32 %v2953_v20, 16  ;;  %v2612_v10 = vshrl.u32 %v11201_v56, 16  ;;  %v1900_v43 = vadd.f32 %v9325_v27, %v11143_v61  ;;  %v1851_v18 = vpop.f32.mrb[15].mxu0  ;;  %v11263_v2 = vld [vmem:[#allocation3 + $0x48] sm:$0xf] }
 0x219   : > { %1960 = vst.msk [vmem:[#allocation3 + $0x60] sm:$0xf0] %vm347_vm10, %v1938_v32  ;;  %v2596_v44 = vsel %vm672_vm4, %v2591_v40, %v2595_v14  ;;  %v3217_v63 = vrot.slane %v3215_v41, 3  ;;  %v3225_v13 = vrot.slane %v3223_v33, 3  ;;  %1958 = vst.msk [vmem:[#allocation3 + $0x50] sm:$0xf0] %vm347_vm10, %v1937_v23  ;;  %v1898_v47 = vadd.f32 %v11143_v61, %v1851_v18 }
 0x21a   : > { %1961 = vst.msk [vmem:[#allocation3 + $0x68] sm:$0xf] %vm328_vm9, %v1938_v32  ;;  %v11245_v7 = vld [vmem:[#allocation3 + $0x38] sm:$0xf]  ;;  %1959 = vst.msk [vmem:[#allocation3 + $0x58] sm:$0xf] %vm328_vm9, %v1937_v23  ;;  %2844 = vrot.lane.b32.xlu0 %v2596_v44, %s10268_s16 }
 0x21b   : > { %v1915_v45 = vmax.f32 %v1899_v36, 0.0  ;;  %v3220_v37 = vrot.slane %v3218_v58, 4  ;;  %v3226_v48 = vshll.u32 %v2952_v17, 16  ;;  %v1913_v49 = vmax.f32 %v1897_v6, 0.0  ;;  %v11257_v22 = vld [vmem:[#allocation3 + $0x30] sm:$0xf0] }
 0x21c   : > { %v1916_v46 = vmax.f32 %v1900_v43, 0.0  ;;  %v2610_v50 = vrot.slane %v2608_v29, 1  ;;  %v2603_v51 = vshll.u32 %v11239_v42, 16  ;;  %v1914_v52 = vmax.f32 %v1898_v47, 0.0  ;;  %2842 = vrot.lane.b32.xlu1 %v11209_v9, %s10268_s16  ;;  %v11268_v14 = vld [vmem:[#allocation3 + $0x40] sm:$0xf0] }
 0x21d   : > { %v3221_v53 = vor.u32 %v3220_v37, %v3217_v63  ;;  %v3228_v54 = vrot.slane %v3226_v48, 4  ;;  %v2623_v57 = vshll.u32 %v11245_v7, 16  ;;  %v2601_v60 = vshrl.u32 %v11239_v42, 16 }
 0x21e   : > { %v1924_v38 = vpack.c.bf16 %v1916_v46, %v1915_v45  ;;  %v2605_v1 = vrot.slane %v2603_v51, 1  ;;  %v1923_v5 = vpack.c.bf16 %v1914_v52, %v1913_v49  ;;  %2840 = vrot.lane.b32.xlu0 %v11216_v62, %s10268_s16  ;;  %v2614_v9 = vor.u32 %v2612_v10, %v2610_v50  ;;  %v2552_v45 = vld [vmem:[#allocation3 + $0x8] sm:$0x1f] }
 0x21f   : > { %v3229_v8 = vor.u32 %v3228_v54, %v3225_v13  ;;  %v2625_v3 = vrot.slane %v2623_v57, 1  ;;  %v2618_v55 = vshll.u32 %v11257_v22, 16  ;;  %v2627_v19 = vshrl.u32 %v11245_v7, 16 }
 0x220   : > { %v1940_v16 = vrot.slane %v1924_v38, 4  ;;  %v2606_v11 = vor.u32 %v2605_v1, %v2601_v60  ;;  %v1939_v15 = vrot.slane %v1923_v5, 4  ;;  %2850 = vrot.lane.b32.xlu1 %v2614_v9, %s10268_s16  ;;  %v2638_v62 = vshll.u32 %v11263_v2, 16  ;;  %v11290_v33 = vld [vmem:[#allocation3 + $0x50] sm:$0xf0] }
 0x221   : > { %v11272_v17 = vsel %vm1353_vm8, %v3221_v53, %v3229_v8  ;;  %v2616_v25 = vshrl.u32 %v11257_v22, 16  ;;  %v2620_v26 = vrot.slane %v2618_v55, 1  ;;  %v11283_v29 = vld [vmem:[#allocation3 + $0x58] sm:$0xf]  ;;  %v2629_v30 = vor.u32 %v2627_v19, %v2625_v3  ;;  %v11294_v36 = vld [vmem:[#allocation3 + $0x68] sm:$0xf] }
 0x222   : > { %1964 = vst.msk [vmem:[#allocation3 + $0x80] sm:$0xf0] %vm347_vm10, %v1940_v16  ;;  %8854 = vmatprep.mubr.msk.bf16.mxu0 %vm322_vm11, %v11272_v17  ;;  %v2611_v24 = vsel %vm672_vm4, %v2606_v11, %v2610_v50  ;;  %1962 = vst.msk [vmem:[#allocation3 + $0x70] sm:$0xf0] %vm347_vm10, %v1939_v15  ;;  %v2640_v28 = vrot.slane %v2638_v62, 1  ;;  %v2633_v12 = vshll.u32 %v11268_v14, 16 }
 0x223   : > { %1965 = vst.msk [vmem:[#allocation3 + $0x88] sm:$0xf] %vm328_vm9, %v1940_v16  ;;  %1963 = vst.msk [vmem:[#allocation3 + $0x78] sm:$0xf] %vm328_vm9, %v1939_v15  ;;  %2848 = vrot.lane.b32.xlu0 %v2611_v24, %s10268_s16  ;;  %v2653_v20 = vshll.u32 %v11283_v29, 16  ;;  %v2621_v34 = vor.u32 %v2620_v26, %v2616_v25  ;;  %v2642_v35 = vshrl.u32 %v11263_v2, 16 }
 0x224   : > { %v2648_v32 = vshll.u32 %v11290_v33, 16  ;;  %v11296_v39 = vld [vmem:[#allocation3 + $0x60] sm:$0xf0]  ;;  %2854 = vrot.lane.b32.xlu1 %v2629_v30, %s10268_s16  ;;  %v2631_v40 = vshrl.u32 %v11268_v14, 16  ;;  %v2635_v41 = vrot.slane %v2633_v12, 1  ;;  %v2668_v43 = vshll.u32 %v11294_v36, 16 }
 0x225   : > { %v2626_v23 = vsel %vm672_vm4, %v2621_v34, %v2625_v3  ;;  %v2644_v6 = vor.u32 %v2642_v35, %v2640_v28  ;;  %v2655_v10 = vrot.slane %v2653_v20, 1  ;;  %v2663_v44 = vshll.u32 %v11296_v39, 16 }
 0x226   : > { %v2650_v27 = vrot.slane %v2648_v32, 1  ;;  %v2636_v58 = vor.u32 %v2635_v41, %v2631_v40  ;;  %v2646_v18 = vshrl.u32 %v11290_v33, 16  ;;  %v2657_v63 = vshrl.u32 %v11283_v29, 16 }
 0x227   : > { %2852 = vrot.lane.b32.xlu0 %v2626_v23, %s10268_s16  ;;  %v2665_v13 = vrot.slane %v2663_v44, 1  ;;  %v2670_v50 = vrot.slane %v2668_v43, 1  ;;  %v2661_v51 = vshrl.u32 %v11296_v39, 16  ;;  %v2948_v54 = vrot.slane %v11162_v21, 1 }
 0x228   : > { %2858 = vrot.lane.b32.xlu1 %v2644_v6, %s10268_s16  ;;  %v2641_v47 = vsel %vm672_vm4, %v2636_v58, %v2640_v28  ;;  %v2651_v37 = vor.u32 %v2650_v27, %v2646_v18  ;;  %v2659_v46 = vor.u32 %v2657_v63, %v2655_v10  ;;  %v2949_v38 = vrot.slane %v2552_v45, 1 }
 0x229   : > { %v11310_v49 = vld [vmem:[#allocation3 + $0x70] sm:$0xf0]  ;;  %v11315_v53 = vld [vmem:[#allocation3 + $0x80] sm:$0xf0]  ;;  %v2672_v60 = vshrl.u32 %v11294_v36, 16  ;;  %v2666_v1 = vor.u32 %v2665_v13, %v2661_v51 }
 0x22a   : > { %v11308_v48 = vld [vmem:[#allocation3 + $0x78] sm:$0xf]  ;;  %v2678_v57 = vshll.u32 %v11310_v49, 16  ;;  %v2515_v59 = vld [vmem:[#allocation3 + $0x88] sm:$0xf]  ;;  %v2656_v5 = vsel %vm672_vm4, %v2651_v37, %v2655_v10  ;;  %v2693_v9 = vshll.u32 %v11315_v53, 16  ;;  %v2950_v55 = vsel %vm1051_vm3, %v2948_v54, %v2949_v38 }
 0x22b   : > { %2856 = vrot.lane.b32.xlu0 %v2641_v47, %s10268_s16  ;;  %v2683_v52 = vshll.u32 %v11308_v48, 16  ;;  %v2674_v3 = vor.u32 %v2672_v60, %v2670_v50  ;;  %v2698_v11 = vshll.u32 %v2515_v59, 16  ;;  %v2676_v21 = vshrl.u32 %v11310_v49, 16 }
 0x22c   : > { %2862 = vrot.lane.b32.xlu1 %v2659_v46, %s10268_s16  ;;  %v2680_v8 = vrot.slane %v2678_v57, 1  ;;  %v2671_v15 = vsel %vm672_vm4, %v2666_v1, %v2670_v50  ;;  %v2687_v19 = vshrl.u32 %v11308_v48, 16  ;;  %v3183_v62 = vshrl.u32 %v2950_v55, 16 }
 0x22d   : > { %v2685_v16 = vrot.slane %v2683_v52, 1  ;;  %v2695_v25 = vrot.slane %v2693_v9, 1  ;;  %v3186_v26 = vshll.u32 %v2950_v55, 16  ;;  %v3191_v30 = vshrl.u32 %v2949_v38, 16 }
 0x22e   : > { %v2681_v24 = vor.u32 %v2680_v8, %v2676_v21  ;;  %v2700_v12 = vrot.slane %v2698_v11, 1  ;;  %v3185_v20 = vrot.slane %v3183_v62, 3  ;;  %v3194_v34 = vshll.u32 %v2949_v38, 16 }
 0x22f   : > { %2860 = vrot.lane.b32.xlu0 %v2656_v5, %s10268_s16  ;;  %v2689_v28 = vor.u32 %v2687_v19, %v2685_v16  ;;  %v2691_v35 = vshrl.u32 %v11315_v53, 16  ;;  %v3188_v32 = vrot.slane %v3186_v26, 4  ;;  %v3193_v40 = vrot.slane %v3191_v30, 3 }
 0x230   : > { %2866 = vrot.lane.b32.xlu1 %v2674_v3, %s10268_s16  ;;  %v2702_v41 = vshrl.u32 %v2515_v59, 16  ;;  %v3196_v23 = vrot.slane %v3194_v34, 4  ;;  %v2686_v6 = vsel %vm672_vm4, %v2681_v24, %v2685_v16 }
 0x231   : > { %v2696_v27 = vor.u32 %v2695_v25, %v2691_v35  ;;  %v3189_v58 = vor.u32 %v3188_v32, %v3185_v20 }
 0x232   : > { %v2704_v10 = vor.u32 %v2702_v41, %v2700_v12  ;;  %v3197_v43 = vor.u32 %v3196_v23, %v3193_v40 }
 0x233   : > { %2864 = vrot.lane.b32.xlu0 %v2671_v15, %s10268_s16  ;;  %v2701_v18 = vsel %vm672_vm4, %v2696_v27, %v2700_v12 }
 0x234   : > { %2870 = vrot.lane.b32.xlu1 %v2689_v28, %s10268_s16  ;;  %v3198_v44 = vsel %vm1353_vm8, %v3189_v58, %v3197_v43 }
 0x235   : > { %8874 = vmatprep.mubr.msk.bf16.mxu1 %vm322_vm11, %v3198_v44 }
 0x237   : > { %2868 = vrot.lane.b32.xlu0 %v2686_v6, %s10268_s16 }
 0x238   : > { %2874 = vrot.lane.b32.xlu1 %v2704_v10, %s10268_s16 }
 0x23b   : > { %2872 = vrot.lane.b32.xlu0 %v2701_v18, %s10268_s16 }
 0x244   : > { %v9372_v63 = vpop.f32.mrb[0].mxu1 }
 0x245   : > { %v2419_v13 = vadd.f32 %v9372_v63, %v11143_v61  ;;  %v2338_v45 = vpop.f32.mrb[1].mxu1 }
 0x246   : > { %v2417_v47 = vadd.f32 %v11143_v61, %v2338_v45  ;;  %v9373_v37 = vpop.f32.mrb[2].mxu1 }
 0x247   : > { %v2420_v46 = vadd.f32 %v9373_v37, %v11143_v61  ;;  %v2341_v50 = vpop.f32.mrb[3].mxu1  ;;  %v2435_v52 = vmax.f32 %v2419_v13, 0.0 }
 0x248   : > { %v2418_v51 = vadd.f32 %v11143_v61, %v2341_v50  ;;  %v2433_v57 = vmax.f32 %v2417_v47, 0.0 }
 0x249   : > { %v2436_v54 = vmax.f32 %v2420_v46, 0.0 }
 0x24a   : > { %v2434_v59 = vmax.f32 %v2418_v51, 0.0 }
 0x24b   : > { %v2450_v38 = vpack.c.bf16 %v2436_v54, %v2435_v52 }
 0x24c   : > { %v2449_v60 = vpack.c.bf16 %v2434_v59, %v2433_v57  ;;  %v9376_v1 = vpop.f32.mrb[4].mxu1 }
 0x24d   : > { %v2466_v5 = vrot.slane %v2450_v38, 4  ;;  %v2423_v8 = vadd.f32 %v9376_v1, %v11143_v61  ;;  %v2354_v9 = vpop.f32.mrb[5].mxu1 }
 0x24e   : > { %v2465_v3 = vrot.slane %v2449_v60, 4  ;;  %v2421_v16 = vadd.f32 %v11143_v61, %v2354_v9  ;;  %v9377_v11 = vpop.f32.mrb[6].mxu1 }
 0x24f   : > { %2484 = vst.msk [vmem:[#allocation3 + $0xa0] sm:$0xf0] %vm347_vm10, %v2466_v5  ;;  %v2424_v21 = vadd.f32 %v9377_v11, %v11143_v61  ;;  %v2357_v55 = vpop.f32.mrb[7].mxu1  ;;  %v2439_v19 = vmax.f32 %v2423_v8, 0.0 }
 0x250   : > { %2485 = vst.msk [vmem:[#allocation3 + $0xa8] sm:$0xf] %vm328_vm9, %v2466_v5  ;;  %2483 = vst.msk [vmem:[#allocation3 + $0x98] sm:$0xf] %vm328_vm9, %v2465_v3  ;;  %v2422_v15 = vadd.f32 %v11143_v61, %v2357_v55  ;;  %v2437_v24 = vmax.f32 %v2421_v16, 0.0 }
 0x251   : > { %2482 = vst.msk [vmem:[#allocation3 + $0x90] sm:$0xf0] %vm347_vm10, %v2465_v3  ;;  %v2440_v62 = vmax.f32 %v2424_v21, 0.0 }
 0x252   : > { %v2438_v25 = vmax.f32 %v2422_v15, 0.0 }
 0x253   : > { %v2452_v26 = vpack.c.bf16 %v2440_v62, %v2439_v19 }
 0x254   : > { %v2451_v30 = vpack.c.bf16 %v2438_v25, %v2437_v24  ;;  %v9380_v28 = vpop.f32.mrb[8].mxu1 }
 0x255   : > { %v2468_v12 = vrot.slane %v2452_v26, 4  ;;  %v2427_v20 = vadd.f32 %v9380_v28, %v11143_v61  ;;  %v2370_v34 = vpop.f32.mrb[9].mxu1 }
 0x256   : > { %v2467_v35 = vrot.slane %v2451_v30, 4  ;;  %v2425_v32 = vadd.f32 %v11143_v61, %v2370_v34  ;;  %v9381_v40 = vpop.f32.mrb[10].mxu1  ;;  %v11361_v44 = vld [vmem:[#allocation3 + $0xa0] sm:$0xf0] }
 0x257   : > { %v2519_v41 = vld [vmem:[#allocation3 + $0xa8] sm:$0xf]  ;;  %2488 = vst.msk [vmem:[#allocation3 + $0xc0] sm:$0xf0] %vm347_vm10, %v2468_v12  ;;  %v2428_v23 = vadd.f32 %v9381_v40, %v11143_v61  ;;  %v2373_v6 = vpop.f32.mrb[11].mxu1  ;;  %v2443_v18 = vmax.f32 %v2427_v20, 0.0 }
 0x258   : > { %2489 = vst.msk [vmem:[#allocation3 + $0xc8] sm:$0xf] %vm328_vm9, %v2468_v12  ;;  %v2517_v27 = vld [vmem:[#allocation3 + $0x98] sm:$0xf]  ;;  %v11356_v58 = vld [vmem:[#allocation3 + $0x90] sm:$0xf0]  ;;  %v2426_v10 = vadd.f32 %v11143_v61, %v2373_v6 }
 0x259   : > { %2486 = vst.msk [vmem:[#allocation3 + $0xb0] sm:$0xf0] %vm347_vm10, %v2467_v35  ;;  %v2713_v43 = vshll.u32 %v2517_v27, 16  ;;  %v2441_v63 = vmax.f32 %v2425_v32, 0.0  ;;  %v2444_v13 = vmax.f32 %v2428_v23, 0.0  ;;  %v2708_v45 = vshll.u32 %v11356_v58, 16 }
 0x25a   : > { %2487 = vst.msk [vmem:[#allocation3 + $0xb8] sm:$0xf] %vm328_vm9, %v2467_v35  ;;  %v2442_v47 = vmax.f32 %v2426_v10, 0.0  ;;  %v2717_v46 = vshrl.u32 %v2517_v27, 16  ;;  %v2728_v50 = vshll.u32 %v2519_v41, 16  ;;  %v2706_v52 = vshrl.u32 %v11356_v58, 16 }
 0x25b   : > { %v2715_v37 = vrot.slane %v2713_v43, 1  ;;  %v2454_v51 = vpack.c.bf16 %v2444_v13, %v2443_v18  ;;  %v2710_v54 = vrot.slane %v2708_v45, 1  ;;  %v2723_v57 = vshll.u32 %v11361_v44, 16 }
 0x25c   : > { %v2453_v59 = vpack.c.bf16 %v2442_v47, %v2441_v63  ;;  %v9384_v38 = vpop.f32.mrb[12].mxu1  ;;  %v2730_v1 = vrot.slane %v2728_v50, 1  ;;  %v2721_v5 = vshrl.u32 %v11361_v44, 16  ;;  %v2732_v19 = vshrl.u32 %v2519_v41, 16 }
 0x25d   : > { %v2719_v60 = vor.u32 %v2717_v46, %v2715_v37  ;;  %v2470_v8 = vrot.slane %v2454_v51, 4  ;;  %v2431_v9 = vadd.f32 %v9384_v38, %v11143_v61  ;;  %v2386_v3 = vpop.f32.mrb[13].mxu1  ;;  %v2711_v16 = vor.u32 %v2710_v54, %v2706_v52 }
 0x25e   : > { %v2725_v11 = vrot.slane %v2723_v57, 1  ;;  %v2469_v21 = vrot.slane %v2453_v59, 4  ;;  %v2429_v55 = vadd.f32 %v11143_v61, %v2386_v3  ;;  %v9385_v15 = vpop.f32.mrb[14].mxu1  ;;  %v2734_v34 = vor.u32 %v2732_v19, %v2730_v1  ;;  %v11381_v6 = vld [vmem:[#allocation3 + $0xc0] sm:$0xf0] }
 0x25f   : > { %2878 = vrot.lane.b32.xlu1 %v2719_v60, %s10268_s16  ;;  %v2523_v62 = vld [vmem:[#allocation3 + $0xc8] sm:$0xf]  ;;  %2492 = vst.msk [vmem:[#allocation3 + $0xe0] sm:$0xf0] %vm347_vm10, %v2470_v8  ;;  %v2432_v24 = vadd.f32 %v9385_v15, %v11143_v61  ;;  %v2389_v25 = vpop.f32.mrb[15].mxu1  ;;  %v2716_v26 = vsel %vm672_vm4, %v2711_v16, %v2715_v37  ;;  %v2447_v32 = vmax.f32 %v2431_v9, 0.0 }
 0x260   : > { %2493 = vst.msk [vmem:[#allocation3 + $0xe8] sm:$0xf] %vm328_vm9, %v2470_v8  ;;  %v2726_v30 = vor.u32 %v2725_v11, %v2721_v5  ;;  %v11374_v12 = vld [vmem:[#allocation3 + $0xb0] sm:$0xf0]  ;;  %2491 = vst.msk [vmem:[#allocation3 + $0xd8] sm:$0xf] %vm328_vm9, %v2469_v21  ;;  %v2430_v20 = vadd.f32 %v11143_v61, %v2389_v25  ;;  %2876 = vrot.lane.b32.xlu0 %v2716_v26, %s10268_s16 }
 0x261   : > { %v2521_v28 = vld [vmem:[#allocation3 + $0xb8] sm:$0xf]  ;;  %2490 = vst.msk [vmem:[#allocation3 + $0xd0] sm:$0xf0] %vm347_vm10, %v2469_v21  ;;  %v2445_v40 = vmax.f32 %v2429_v55, 0.0  ;;  %v2448_v41 = vmax.f32 %v2432_v24, 0.0 }
 0x262   : > { %v2743_v35 = vshll.u32 %v2521_v28, 16  ;;  %v2738_v23 = vshll.u32 %v11374_v12, 16  ;;  %v2446_v27 = vmax.f32 %v2430_v20, 0.0  ;;  %v2747_v43 = vshrl.u32 %v2521_v28, 16 }
 0x263   : > { %2882 = vrot.lane.b32.xlu1 %v2734_v34, %s10268_s16  ;;  %v2758_v18 = vshll.u32 %v2523_v62, 16  ;;  %v2456_v63 = vpack.c.bf16 %v2448_v41, %v2447_v32  ;;  %v2731_v61 = vsel %vm672_vm4, %v2726_v30, %v2730_v1  ;;  %v2736_v13 = vshrl.u32 %v11374_v12, 16  ;;  %v2533_v41 = vld [vmem:[#allocation3 + $0x118] sm:$0xf] }
 0x264   : > { %v2745_v10 = vrot.slane %v2743_v35, 1  ;;  %v2740_v45 = vrot.slane %v2738_v23, 1  ;;  %v2455_v47 = vpack.c.bf16 %v2446_v27, %v2445_v40  ;;  %2880 = vrot.lane.b32.xlu0 %v2731_v61, %s10268_s16  ;;  %v2753_v50 = vshll.u32 %v11381_v6, 16 }
 0x265   : > { %v2760_v46 = vrot.slane %v2758_v18, 1  ;;  %v2472_v51 = vrot.slane %v2456_v63, 4  ;;  %v2762_v57 = vshrl.u32 %v2523_v62, 16  ;;  %v2751_v59 = vshrl.u32 %v11381_v6, 16 }
 0x266   : > { %v2749_v37 = vor.u32 %v2747_v43, %v2745_v10  ;;  %v2741_v52 = vor.u32 %v2740_v45, %v2736_v13  ;;  %v2471_v54 = vrot.slane %v2455_v47, 4  ;;  %v2755_v38 = vrot.slane %v2753_v50, 1  ;;  %v2548_v9 = vld [vmem:[#allocation3 + $0xe0] sm:$0xf0] }
 0x267   : > { %v2527_v60 = vld [vmem:[#allocation3 + $0xe8] sm:$0xf]  ;;  %2496 = vst.msk [vmem:[#allocation3 + $0x100] sm:$0xf0] %vm347_vm10, %v2472_v51  ;;  %v2525_v5 = vld [vmem:[#allocation3 + $0xd8] sm:$0xf]  ;;  %v2764_v3 = vor.u32 %v2762_v57, %v2760_v46 }
 0x268   : > { %2886 = vrot.lane.b32.xlu1 %v2749_v37, %s10268_s16  ;;  %2497 = vst.msk [vmem:[#allocation3 + $0x108] sm:$0xf] %vm328_vm9, %v2472_v51  ;;  %v2746_v1 = vsel %vm672_vm4, %v2741_v52, %v2745_v10  ;;  %v11393_v8 = vld [vmem:[#allocation3 + $0xd0] sm:$0xf0]  ;;  %2495 = vst.msk [vmem:[#allocation3 + $0xf8] sm:$0xf] %vm328_vm9, %v2471_v54  ;;  %v2756_v16 = vor.u32 %v2755_v38, %v2751_v59 }
 0x269   : > { %2494 = vst.msk [vmem:[#allocation3 + $0xf0] sm:$0xf0] %vm347_vm10, %v2471_v54  ;;  %2884 = vrot.lane.b32.xlu0 %v2746_v1, %s10268_s16  ;;  %v2773_v11 = vshll.u32 %v2525_v5, 16  ;;  %v2788_v21 = vshll.u32 %v2527_v60, 16  ;;  %v2768_v55 = vshll.u32 %v11393_v8, 16  ;;  %v2777_v19 = vshrl.u32 %v2525_v5, 16 }
 0x26a   : > { %v2783_v62 = vshll.u32 %v2548_v9, 16  ;;  %v2761_v24 = vsel %vm672_vm4, %v2756_v16, %v2760_v46  ;;  %v2766_v25 = vshrl.u32 %v11393_v8, 16  ;;  %v2781_v35 = vshrl.u32 %v2548_v9, 16  ;;  %v2551_v51 = vld [vmem:[#allocation3 + $0x110] sm:$0xf0] }
 0x26b   : > { %v2775_v15 = vrot.slane %v2773_v11, 1  ;;  %v2770_v26 = vrot.slane %v2768_v55, 1  ;;  %v2790_v28 = vrot.slane %v2788_v21, 1  ;;  %v2792_v32 = vshrl.u32 %v2527_v60, 16  ;;  %v2554_v11 = vld [vmem:[#allocation3 + $0x28] sm:$0x1f] }
 0x26c   : > { %2890 = vrot.lane.b32.xlu1 %v2764_v3, %s10268_s16  ;;  %v2785_v20 = vrot.slane %v2783_v62, 1  ;;  %v2833_v50 = vshll.u32 %v2533_v41, 16  ;;  %v2826_v9 = vshrl.u32 %v2551_v51, 16  ;;  %v2828_v3 = vshll.u32 %v2551_v51, 16 }
 0x26d   : > { %2888 = vrot.lane.b32.xlu0 %v2761_v24, %s10268_s16  ;;  %v2779_v30 = vor.u32 %v2777_v19, %v2775_v15  ;;  %v2771_v34 = vor.u32 %v2770_v26, %v2766_v25  ;;  %v2794_v63 = vor.u32 %v2792_v32, %v2790_v28  ;;  %v2837_v55 = vshrl.u32 %v2533_v41, 16 }
 0x26e   : > { %v2786_v27 = vor.u32 %v2785_v20, %v2781_v35  ;;  %v2550_v18 = vld [vmem:[#allocation3 + $0x100] sm:$0xf0]  ;;  %v2835_v21 = vrot.slane %v2833_v50, 1  ;;  %v2830_v62 = vrot.slane %v2828_v3, 1  ;;  %v2954_v25 = vrot.slane %v11239_v42, 1 }
 0x26f   : > { %v2531_v40 = vld [vmem:[#allocation3 + $0x108] sm:$0xf]  ;;  %v2776_v23 = vsel %vm672_vm4, %v2771_v34, %v2775_v15  ;;  %v2529_v10 = vld [vmem:[#allocation3 + $0xf8] sm:$0xf]  ;;  %v2813_v46 = vshll.u32 %v2550_v18, 16  ;;  %v2811_v5 = vshrl.u32 %v2550_v18, 16 }
 0x270   : > { %2894 = vrot.lane.b32.xlu1 %v2779_v30, %s10268_s16  ;;  %v2549_v43 = vld [vmem:[#allocation3 + $0xf0] sm:$0xf0]  ;;  %v2803_v61 = vshll.u32 %v2529_v10, 16  ;;  %v2818_v13 = vshll.u32 %v2531_v40, 16  ;;  %v2807_v37 = vshrl.u32 %v2529_v10, 16  ;;  %v2791_v52 = vsel %vm672_vm4, %v2786_v27, %v2790_v28 }
 0x271   : > { %2892 = vrot.lane.b32.xlu0 %v2776_v23, %s10268_s16  ;;  %v2798_v45 = vshll.u32 %v2549_v43, 16  ;;  %v2796_v54 = vshrl.u32 %v2549_v43, 16  ;;  %v2815_v60 = vrot.slane %v2813_v46, 1  ;;  %v2822_v16 = vshrl.u32 %v2531_v40, 16  ;;  %v2555_v42 = vld [vmem:[#allocation3 + $0x38] sm:$0x1f] }
 0x272   : > { %v2805_v47 = vrot.slane %v2803_v61, 1  ;;  %v2820_v38 = vrot.slane %v2818_v13, 1  ;;  %v2955_v26 = vrot.slane %v2554_v11, 1  ;;  %v2831_v30 = vor.u32 %v2830_v62, %v2826_v9  ;;  %v2557_v50 = vld [vmem:[#allocation3 + $0x58] sm:$0x1f] }
 0x273   : > { %v2800_v57 = vrot.slane %v2798_v45, 1  ;;  %v2816_v19 = vor.u32 %v2815_v60, %v2811_v5  ;;  %v2839_v28 = vor.u32 %v2837_v55, %v2835_v21  ;;  %v2958_v61 = vrot.slane %v2555_v42, 1 }
 0x274   : > { %2898 = vrot.lane.b32.xlu1 %v2794_v63, %s10268_s16  ;;  %v2809_v59 = vor.u32 %v2807_v37, %v2805_v47  ;;  %v2824_v24 = vor.u32 %v2822_v16, %v2820_v38  ;;  %v2956_v34 = vsel %vm1051_vm3, %v2954_v25, %v2955_v26  ;;  %v2836_v35 = vsel %vm672_vm4, %v2831_v30, %v2835_v21 }
 0x275   : > { %2896 = vrot.lane.b32.xlu0 %v2791_v52, %s10268_s16  ;;  %v2801_v1 = vor.u32 %v2800_v57, %v2796_v54  ;;  %v2821_v20 = vsel %vm672_vm4, %v2816_v19, %v2820_v38  ;;  %v3247_v32 = vshrl.u32 %v2956_v34, 16  ;;  %v3250_v40 = vshll.u32 %v2956_v34, 16 }
 0x276   : > { %v3255_v41 = vshrl.u32 %v2955_v26, 16  ;;  %v3258_v23 = vshll.u32 %v2955_v26, 16  ;;  %v2957_v63 = vrot.slane %v11257_v22, 1  ;;  %v2960_v51 = vrot.slane %v11268_v14, 1  ;;  %v2500_v22 = vld [vmem:[#allocation3 + $0x10] sm:$0xf8] }
 0x277   : > { %v2806_v15 = vsel %vm672_vm4, %v2801_v1, %v2805_v47  ;;  %v3249_v27 = vrot.slane %v3247_v32, 3  ;;  %v3252_v10 = vrot.slane %v3250_v40, 4  ;;  %v2556_v47 = vld [vmem:[#allocation3 + $0x48] sm:$0x1f]  ;;  %v3287_v54 = vshrl.u32 %v2958_v61, 16 }
 0x278   : > { %2902 = vrot.lane.b32.xlu1 %v2809_v59, %s10268_s16  ;;  %v3257_v43 = vrot.slane %v3255_v41, 3  ;;  %v3260_v18 = vrot.slane %v3258_v23, 4  ;;  %v2959_v46 = vsel %vm1051_vm3, %v2957_v63, %v2958_v61  ;;  %v2963_v57 = vrot.slane %v11290_v33, 1  ;;  %v11449_v63 = vld [vmem:[%s13651_s3 + $0xc0] sm:$0xff]  }
 0x279   : > { %2900 = vrot.lane.b32.xlu0 %v2806_v15, %s10268_s16  ;;  %v3253_v13 = vor.u32 %v3252_v10, %v3249_v27  ;;  %v11426_v1 = vrot.slane %v2556_v47, 1  ;;  %v3279_v3 = vshrl.u32 %v2959_v46, 16  ;;  %v11432_v16 = vrot.slane %v2557_v50, 1  ;;  %v2498_v15 = vld [vmem:[#allocation3] sm:$0xf8] }
 0x27a   : > { %v3261_v45 = vor.u32 %v3260_v18, %v3257_v43  ;;  %v3282_v62 = vshll.u32 %v2959_v46, 16  ;;  %v3290_v25 = vshll.u32 %v2958_v61, 16  ;;  %v2502_v50 = vld [vmem:[#allocation3 + $0x20] sm:$0xf8] }
 0x27b   : > { %v11440_v34 = vsel %vm1051_vm3, %v2960_v51, %v11426_v1  ;;  %v3319_v41 = vshrl.u32 %v11426_v1, 16  ;;  %v11451_v61 = vrot.slane %v3279_v3, 3 }
 0x27c   : > { %2906 = vrot.lane.b32.xlu1 %v2824_v24, %s10268_s16  ;;  %v11430_v9 = vsel %vm1353_vm8, %v3253_v13, %v3261_v45  ;;  %v11436_v24 = vrot.slane %v3287_v54, 3  ;;  %v11453_v13 = vrot.slane %v3282_v62, 4 }
 0x27d   : > { %2904 = vrot.lane.b32.xlu0 %v2821_v20, %s10268_s16 }
 0x280   : > { %2910 = vrot.lane.b32.xlu1 %v2839_v28, %s10268_s16 }
 0x281   : > { %2908 = vrot.lane.b32.xlu0 %v2836_v35, %s10268_s16  ;;  %s13469_s16 = scalar_lea.vmem [#allocation5], %s8698_s15 }
 0x282   : > { %s8632_s19 = sshll.u32 %s13469_s16, 4  ;;  %s13600_s19 = int_to_ptr.vmem [resolvable:$true] %s8632_s19 }
 0x283   : > { %s10201_s23 = scalar_lea.vmem %s13600_s19, 8192  ;;  %p10208_p0 = scmp.lt.s32.totalorder %s13600_s19, %s10206_s8 }
 0x284   : > { %p10202_p11 = scmp.ne.s32.totalorder %s13600_s19, %s10201_s23  ;;  %p10209_p1 = scmp.lt.s32.totalorder %s10207_s9, %s10201_s23 }
 0x286   : > { %p10203_p12 = pnand %p10202_p11, %p10349_p5  ;;  %p10210_p2 = por %p10209_p1, %p10208_p0 }
 0x288   : > { %p10204_p13 = pneg %p10203_p12 }
 0x28a   : > { %v2847_v37 = vpop.permute.xlu1 %2846  ;;  %p10211_p3 = pnand %p10210_p2, %p10204_p13 }
 0x28b   : > { %v3011_v52 = vsel %vm322_vm11, %v11207_v4, %v2847_v37 }
 0x28c   : > { %v3206_v59 = vshrl.u32 %v3011_v52, 16  ;;  %v3209_v38 = vshll.u32 %v3011_v52, 16  ;;  %v2845_v60 = vpop.permute.xlu0 %2844 }
 0x28d   : > { %v3009_v5 = vsel %vm322_vm11, %v2500_v22, %v2845_v60 }
 0x28e   : > { %v3208_v14 = vrot.slane %v3206_v59, 3  ;;  %v3211_v11 = vrot.slane %v3209_v38, 4  ;;  %v3199_v4 = vshrl.u32 %v3009_v5, 16  ;;  %v3202_v21 = vshll.u32 %v3009_v5, 16  ;;  %v2843_v55 = vpop.permute.xlu1 %2842 }
 0x28f   : > { %v3006_v19 = vsel %vm322_vm11, %v11172_v31, %v2843_v55  ;;  %v3292_v59 = vrot.slane %v3290_v25, 4  ;;  %v3322_v55 = vshll.u32 %v11426_v1, 16 }
 0x290   : > { %v3201_v26 = vrot.slane %v3199_v4, 3  ;;  %v3204_v30 = vrot.slane %v3202_v21, 4  ;;  %v3174_v28 = vshrl.u32 %v3006_v19, 16  ;;  %v2841_v20 = vpop.permute.xlu0 %2840  ;;  %v3212_v35 = vor.u32 %v3211_v11, %v3208_v14  ;;  %v2504_v4 = vld [vmem:[#allocation3 + $0x30] sm:$0xf8] }
 0x291   : > { %v3177_v32 = vshll.u32 %v3006_v19, 16  ;;  %v3004_v40 = vsel %vm322_vm11, %v2498_v15, %v2841_v20  ;;  %v3311_v21 = vshrl.u32 %v11440_v34, 16 }
 0x292   : > { %v3205_v23 = vor.u32 %v3204_v30, %v3201_v26  ;;  %v3176_v31 = vrot.slane %v3174_v28, 3  ;;  %v3167_v42 = vshrl.u32 %v3004_v40, 16  ;;  %v3170_v27 = vshll.u32 %v3004_v40, 16  ;;  %v2851_v10 = vpop.permute.xlu1 %2850  ;;  %v11471_v26 = vld [vmem:[%s13651_s3 + $0xc8] sm:$0xff]  }
 0x293   : > { %v3179_v43 = vrot.slane %v3177_v32, 4  ;;  %v3016_v18 = vsel %vm322_vm11, %v11201_v56, %v2851_v10 }
 0x294   : > { %v3169_v45 = vrot.slane %v3167_v42, 3  ;;  %v3172_v47 = vrot.slane %v3170_v27, 4  ;;  %v3238_v37 = vshrl.u32 %v3016_v18, 16  ;;  %v3241_v46 = vshll.u32 %v3016_v18, 16 }
 0x295   : > { %v2849_v51 = vpop.permute.xlu0 %2848  ;;  %v3180_v52 = vor.u32 %v3179_v43, %v3176_v31  ;;  %v11457_v56 = vsel %vm1353_vm8, %v3205_v23, %v3212_v35  ;;  %v3285_v23 = vor.u32 %v11453_v13, %v11451_v61  ;;  %v3293_v31 = vor.u32 %v3292_v59, %v11436_v24  ;;  %v11491_v24 = vld [vmem:[%s13651_s3 + $0xd0] sm:$0xff]  }
 0x296   : > { %v3014_v54 = vsel %vm322_vm11, %v2502_v50, %v2849_v51  ;;  %v3173_v38 = vor.u32 %v3172_v47, %v3169_v45  ;;  %v3240_v60 = vrot.slane %v3238_v37, 3  ;;  %v3243_v22 = vrot.slane %v3241_v46, 4  ;;  %3593 = vmatmul.mubr.bf16.vlgmr.msra.gmra.mrb[16].mxu0 %v11457_v56  ;;  %v2855_v3 = vpop.permute.xlu1 %2854  ;;  %v2506_v47 = vld [vmem:[#allocation3 + $0x40] sm:$0xf8]  ;;  %v2558_v46 = vld [vmem:[#allocation3 + $0x68] sm:$0x1f] }
 0x297   : > { %v3231_v5 = vshrl.u32 %v3014_v54, 16  ;;  %v3234_v14 = vshll.u32 %v3014_v54, 16  ;;  %8855 = vmatprep.mubr.msk.bf16.mxu0 %vm322_vm11, %v11430_v9  ;;  %v3021_v11 = vsel %vm322_vm11, %v11245_v7, %v2855_v3  ;;  %3938 = vmatpush1.bf16.msra.mxu0 %v11449_v63  ;;  %v3314_v7 = vshll.u32 %v11440_v34, 16  ;;  %v10126_v34 = vld [vmem:[%s13651_s3 + $0x60] sm:$0xff]  }
 0x298   : > { %v3270_v19 = vshrl.u32 %v3021_v11, 16  ;;  %v3273_v62 = vshll.u32 %v3021_v11, 16  ;;  %3939 = vmatprep.subr.bf16.mxu0 %v13656_v0  ;;  %v3244_v30 = vor.u32 %v3243_v22, %v3240_v60  ;;  %v3181_v35 = vsel %vm1353_vm8, %v3173_v38, %v3180_v52 }
 0x299   : > { %v3233_v15 = vrot.slane %v3231_v5, 3  ;;  %v2853_v25 = vpop.permute.xlu0 %2852  ;;  %v3236_v28 = vrot.slane %v3234_v14, 4  ;;  %3765 = vmatmul.mubr.bf16.vlgmr.msra.gmra.mrb[16].mxu1 %v3181_v35  ;;  %v11484_v27 = vrot.slane %v3319_v41, 3  ;;  %v2965_v61 = vsel %vm1051_vm3, %v2963_v57, %v11432_v16 }
 0x29a   : > { %v3019_v20 = vsel %vm322_vm11, %v2504_v4, %v2853_v25  ;;  %v2859_v40 = vpop.permute.xlu1 %2858  ;;  %8875 = vmatprep.mubr.msk.bf16.mxu1 %vm322_vm11, %v11272_v17  ;;  %4390 = vmatpush1.bf16.msra.mxu1 %v10126_v34  ;;  %v3272_v10 = vrot.slane %v3270_v19, 3  ;;  %v3275_v43 = vrot.slane %v3273_v62, 4  ;;  %v3324_v17 = vrot.slane %v3322_v55, 4  ;;  %v10128_v25 = vld [vmem:[%s13651_s3 + $0x70] sm:$0xff]  }
 0x29b   : > { %v3263_v1 = vshrl.u32 %v3019_v20, 16  ;;  %v3266_v32 = vshll.u32 %v3019_v20, 16  ;;  %v3237_v42 = vor.u32 %v3236_v28, %v3233_v15  ;;  %3940 = vmatpush1.bf16.msra.mxu0 %v11471_v26  ;;  %4391 = vmatprep.subr.bf16.mxu1 %v13656_v0  ;;  %v3026_v45 = vsel %vm322_vm11, %v11263_v2, %v2859_v40  ;;  %v10127_v2 = vld [vmem:[%s13651_s3 + $0x68] sm:$0xff]   ;;  %v2508_v40 = vld [vmem:[#allocation3 + $0x50] sm:$0xf8] }
 0x29c   : > { %3941 = vmatprep.subr.bf16.mxu0 %v13656_v0  ;;  %v11506_v33 = vsel %vm1353_vm8, %v3285_v23, %v3293_v31  ;;  %v3313_v57 = vrot.slane %v3311_v21, 3  ;;  %v3316_v51 = vrot.slane %v3314_v7, 4  ;;  %v2966_v52 = vrot.slane %v11296_v39, 1  ;;  %v11520_v39 = vld [vmem:[%s13651_s3 + $0xd8] sm:$0xff]  }
 0x29d   : > { %v2857_v18 = vpop.permute.xlu0 %2856  ;;  %v3265_v41 = vrot.slane %v3263_v1, 3  ;;  %v3268_v13 = vrot.slane %v3266_v32, 4  ;;  %v11500_v37 = vsel %vm1353_vm8, %v3237_v42, %v3244_v30  ;;  %v3351_v54 = vshrl.u32 %v11432_v16, 16 }
 0x29e   : > { %v3024_v50 = vsel %vm322_vm11, %v2506_v47, %v2857_v18  ;;  %3601 = vmatmul.mubr.bf16.gmra.mrb[20].mxu0 %v11500_v37  ;;  %4392 = vmatpush1.bf16.msra.mxu1 %v10127_v2  ;;  %v3302_v59 = vshrl.u32 %v3026_v45, 16  ;;  %v3305_v38 = vshll.u32 %v3026_v45, 16  ;;  %v3343_v60 = vshrl.u32 %v2965_v61, 16  ;;  %v2863_v4 = vpop.permute.xlu1 %2862 }
 0x29f   : > { %8856 = vmatprep.mubr.msk.bf16.mxu0 %vm322_vm11, %v11506_v33  ;;  %3942 = vmatpush1.bf16.msra.mxu0 %v11491_v24  ;;  %v11522_v22 = vrot.slane %v2558_v46, 1  ;;  %v3276_v5 = vor.u32 %v3275_v43, %v3272_v10  ;;  %v3269_v3 = vor.u32 %v3268_v13, %v3265_v41  ;;  %v3295_v14 = vshrl.u32 %v3024_v50, 16  ;;  %v2559_v10 = vld [vmem:[#allocation3 + $0x78] sm:$0x1f] }
 0x2a0   : > { %4393 = vmatprep.subr.bf16.mxu1 %v13656_v0  ;;  %v3298_v11 = vshll.u32 %v3024_v50, 16  ;;  %3943 = vmatprep.subr.bf16.mxu0 %v13656_v0  ;;  %v3317_v21 = vor.u32 %v3316_v51, %v3313_v57  ;;  %v3325_v55 = vor.u32 %v3324_v17, %v11484_v27  ;;  %v3346_v15 = vshll.u32 %v2965_v61, 16  ;;  %v11565_v17 = vld [vmem:[%s13651_s3 + $0xe8] sm:$0xff]  }
 0x2a1   : > { %3773 = vmatmul.mubr.bf16.gmra.mrb[20].mxu1 %v11457_v56  ;;  %v3354_v19 = vshll.u32 %v11432_v16, 16  ;;  %v2861_v62 = vpop.permute.xlu0 %2860  ;;  %v11533_v7 = vrot.slane %v3351_v54, 3  ;;  %v3304_v30 = vrot.slane %v3302_v59, 3  ;;  %v3307_v28 = vrot.slane %v3305_v38, 4  ;;  %v11540_v16 = vld [vmem:[%s13651_s3 + $0xe0] sm:$0xff]  }
 0x2a2   : > { %8876 = vmatprep.mubr.msk.bf16.mxu1 %vm322_vm11, %v11430_v9  ;;  %4394 = vmatpush1.bf16.msra.mxu1 %v10128_v25  ;;  %v3345_v56 = vrot.slane %v3343_v60, 3  ;;  %v2968_v20 = vsel %vm1051_vm3, %v2966_v52, %v11522_v22  ;;  %v3297_v35 = vrot.slane %v3295_v14, 3  ;;  %v3300_v1 = vrot.slane %v3298_v11, 4  ;;  %v2867_v50 = vpop.permute.xlu1 %2866  ;;  %v10130_v38 = vld [vmem:[%s13651_s3 + $0x80] sm:$0xff]  }
 0x2a3   : > { %3944 = vmatpush1.bf16.msra.mxu0 %v11520_v39  ;;  %4395 = vmatprep.subr.bf16.mxu1 %v13656_v0  ;;  %v3031_v32 = vsel %vm322_vm11, %v11283_v29, %v2863_v4  ;;  %v11547_v23 = vsel %vm1353_vm8, %v3269_v3, %v3276_v5  ;;  %v3029_v31 = vsel %vm322_vm11, %v2508_v40, %v2861_v62  ;;  %v3348_v34 = vrot.slane %v3346_v15, 4  ;;  %v10129_v29 = vld [vmem:[%s13651_s3 + $0x78] sm:$0xff]  }
 0x2a4   : > { %3945 = vmatprep.subr.bf16.mxu0 %v13656_v0  ;;  %v11553_v42 = vsel %vm1353_vm8, %v3317_v21, %v3325_v55  ;;  %v3356_v27 = vrot.slane %v3354_v19, 4  ;;  %v3334_v43 = vshrl.u32 %v3031_v32, 16  ;;  %v3337_v18 = vshll.u32 %v3031_v32, 16  ;;  %v2510_v55 = vld [vmem:[#allocation3 + $0x60] sm:$0xf8] }
 0x2a5   : > { %v3375_v61 = vshrl.u32 %v2968_v20, 16  ;;  %v3383_v41 = vshrl.u32 %v11522_v22, 16  ;;  %v3308_v13 = vor.u32 %v3307_v28, %v3304_v30  ;;  %v3301_v45 = vor.u32 %v3300_v1, %v3297_v35  ;;  %v2865_v59 = vpop.permute.xlu0 %2864  ;;  %v2560_v19 = vld [vmem:[#allocation3 + $0x88] sm:$0x1f] }
 0x2a6   : > { %3609 = vmatmul.mubr.bf16.gmra.mrb[24].mxu0 %v11547_v23  ;;  %4396 = vmatpush1.bf16.msra.mxu1 %v10129_v29  ;;  %v3327_v47 = vshrl.u32 %v3029_v31, 16  ;;  %v3330_v46 = vshll.u32 %v3029_v31, 16  ;;  %v3349_v57 = vor.u32 %v3348_v34, %v3345_v56  ;;  %v3357_v51 = vor.u32 %v3356_v27, %v11533_v7 }
 0x2a7   : > { %8857 = vmatprep.mubr.msk.bf16.mxu0 %vm322_vm11, %v11553_v42  ;;  %3946 = vmatpush1.bf16.msra.mxu0 %v11540_v16  ;;  %v3378_v52 = vshll.u32 %v2968_v20, 16  ;;  %v3386_v2 = vshll.u32 %v11522_v22, 16  ;;  %v2969_v54 = vrot.slane %v11310_v49, 1  ;;  %v2970_v60 = vrot.slane %v2559_v10, 1  ;;  %v11583_v49 = vld [vmem:[%s13651_s3 + $0xf0] sm:$0xff]   ;;  %v2871_v10 = vpop.permute.xlu1 %2870 }
 0x2a8   : > { %4397 = vmatprep.subr.bf16.mxu1 %v13656_v0  ;;  %3947 = vmatprep.subr.bf16.mxu0 %v13656_v0  ;;  %v3336_v5 = vrot.slane %v3334_v43, 3  ;;  %v3339_v3 = vrot.slane %v3337_v18, 4  ;;  %v3377_v14 = vrot.slane %v3375_v61, 3  ;;  %v3385_v11 = vrot.slane %v3383_v41, 3 }
 0x2a9   : > { %3781 = vmatmul.mubr.bf16.gmra.mrb[24].mxu1 %v11500_v37  ;;  %v3329_v22 = vrot.slane %v3327_v47, 3  ;;  %v3332_v4 = vrot.slane %v3330_v46, 4  ;;  %v3036_v21 = vsel %vm322_vm11, %v11294_v36, %v2867_v50  ;;  %v11588_v15 = vsel %vm1353_vm8, %v3301_v45, %v3308_v13  ;;  %v10131_v36 = vld [vmem:[%s13651_s3 + $0x88] sm:$0xff]   ;;  %v2869_v13 = vpop.permute.xlu0 %2868  ;;  %v10132_v45 = vld [vmem:[%s13651_s3 + $0x90] sm:$0xff]  }
 0x2aa   : > { %8877 = vmatprep.mubr.msk.bf16.mxu1 %vm322_vm11, %v11506_v33  ;;  %4398 = vmatpush1.bf16.msra.mxu1 %v10130_v38  ;;  %v3034_v62 = vsel %vm322_vm11, %v2510_v55, %v2865_v59  ;;  %v11594_v25 = vsel %vm1353_vm8, %v3349_v57, %v3357_v51  ;;  %v3380_v7 = vrot.slane %v3378_v52, 4  ;;  %v3388_v30 = vrot.slane %v3386_v2, 4  ;;  %v11626_v51 = vld [vmem:[%s13651_s3 + $0x100] sm:$0xff]   ;;  %v2512_v38 = vld [vmem:[#allocation3 + $0x70] sm:$0xf8] }
 0x2ab   : > { %3948 = vmatpush1.bf16.msra.mxu0 %v11565_v17  ;;  %4399 = vmatprep.subr.bf16.mxu1 %v13656_v0  ;;  %v2972_v28 = vrot.slane %v11315_v53, 1  ;;  %v2971_v56 = vsel %vm1051_vm3, %v2969_v54, %v2970_v60  ;;  %v3415_v20 = vshrl.u32 %v2970_v60, 16  ;;  %v3366_v35 = vshrl.u32 %v3036_v21, 16  ;;  %v11608_v53 = vld [vmem:[%s13651_s3 + $0xf8] sm:$0xff]  }
 0x2ac   : > { %3949 = vmatprep.subr.bf16.mxu0 %v13656_v0  ;;  %v3369_v1 = vshll.u32 %v3036_v21, 16  ;;  %v3418_v32 = vshll.u32 %v2970_v60, 16  ;;  %v11610_v40 = vrot.slane %v2560_v19, 1  ;;  %v3340_v31 = vor.u32 %v3339_v3, %v3336_v5 }
 0x2ad   : > { %v3333_v34 = vor.u32 %v3332_v4, %v3329_v22  ;;  %v3359_v27 = vshrl.u32 %v3034_v62, 16  ;;  %v3362_v29 = vshll.u32 %v3034_v62, 16  ;;  %v3381_v43 = vor.u32 %v3380_v7, %v3377_v14  ;;  %v11653_v7 = vld [vmem:[%s13651_s3 + $0x108] sm:$0xff]  }
 0x2ae   : > { %3617 = vmatmul.mubr.bf16.gmra.mrb[28].mxu0 %v11588_v15  ;;  %4400 = vmatpush1.bf16.msra.mxu1 %v10131_v36  ;;  %v3389_v18 = vor.u32 %v3388_v30, %v3385_v11  ;;  %v3407_v61 = vshrl.u32 %v2971_v56, 16  ;;  %v3410_v41 = vshll.u32 %v2971_v56, 16  ;;  %v11619_v47 = vrot.slane %v3415_v20, 3  ;;  %v2875_v20 = vpop.permute.xlu1 %2874 }
 0x2af   : > { %8858 = vmatprep.mubr.msk.bf16.mxu0 %vm322_vm11, %v11594_v25  ;;  %3950 = vmatpush1.bf16.msra.mxu0 %v11583_v49  ;;  %v3368_v46 = vrot.slane %v3366_v35, 3  ;;  %v3371_v50 = vrot.slane %v3369_v1, 4  ;;  %v3420_v57 = vrot.slane %v3418_v32, 4  ;;  %v2974_v52 = vsel %vm1051_vm3, %v2972_v28, %v11610_v40  ;;  %v2873_v32 = vpop.permute.xlu0 %2872 }
 0x2b0   : > { %4401 = vmatprep.subr.bf16.mxu1 %v13656_v0  ;;  %3951 = vmatprep.subr.bf16.mxu0 %v13656_v0  ;;  %v3361_v2 = vrot.slane %v3359_v27, 3  ;;  %v3364_v54 = vrot.slane %v3362_v29, 4  ;;  %v3041_v59 = vsel %vm322_vm11, %v11308_v48, %v2871_v10  ;;  %v11633_v60 = vsel %vm1353_vm8, %v3333_v34, %v3340_v31  ;;  %v10133_v48 = vld [vmem:[%s13651_s3 + $0x98] sm:$0xff]   ;;  %v10134_v27 = vld [vmem:[%s13651_s3 + $0xa0] sm:$0xff]  }
 0x2b1   : > { %3789 = vmatmul.mubr.bf16.gmra.mrb[28].mxu1 %v11547_v23  ;;  %v3039_v5 = vsel %vm322_vm11, %v2512_v38, %v2869_v13  ;;  %v11639_v3 = vsel %vm1353_vm8, %v3381_v43, %v3389_v18  ;;  %v3409_v14 = vrot.slane %v3407_v61, 3  ;;  %v3412_v11 = vrot.slane %v3410_v41, 4  ;;  %v11668_v18 = vld [vmem:[%s13651_s3 + $0x110] sm:$0xff]   ;;  %v2561_v61 = vld [vmem:[#allocation3 + $0x98] sm:$0x1f] }
 0x2b2   : > { %8878 = vmatprep.mubr.msk.bf16.mxu1 %vm322_vm11, %v11553_v42  ;;  %4402 = vmatpush1.bf16.msra.mxu1 %v10132_v45  ;;  %v3447_v22 = vshrl.u32 %v2974_v52, 16  ;;  %v3450_v4 = vshll.u32 %v2974_v52, 16  ;;  %v3455_v21 = vshrl.u32 %v11610_v40, 16  ;;  %v3398_v55 = vshrl.u32 %v3041_v59, 16  ;;  %v10135_v45 = vld [vmem:[#allocation3 + $0x88] sm:$0xf] }
 0x2b3   : > { %3952 = vmatpush1.bf16.msra.mxu0 %v11608_v53  ;;  %4403 = vmatprep.subr.bf16.mxu1 %v13656_v0  ;;  %v3401_v19 = vshll.u32 %v3041_v59, 16  ;;  %v3458_v62 = vshll.u32 %v11610_v40, 16  ;;  %v3372_v30 = vor.u32 %v3371_v50, %v3368_v46  ;;  %v3365_v28 = vor.u32 %v3364_v54, %v3361_v2  ;;  %v2514_v46 = vld [vmem:[#allocation3 + $0x80] sm:$0xf8]  ;;  %v10136_v54 = vld [vmem:[%s13651_s3 + $0xa8] sm:$0xff]  }
 0x2b4   : > { %3953 = vmatprep.subr.bf16.mxu0 %v13656_v0  ;;  %v3391_v36 = vshrl.u32 %v3039_v5, 16  ;;  %v3394_v56 = vshll.u32 %v3039_v5, 16  ;;  %v3413_v35 = vor.u32 %v3412_v11, %v3409_v14  ;;  %v3421_v1 = vor.u32 %v3420_v57, %v11619_v47 }
 0x2b5   : > { %v3449_v40 = vrot.slane %v3447_v22, 3  ;;  %v3452_v31 = vrot.slane %v3450_v4, 4  ;;  %v3457_v34 = vrot.slane %v3455_v21, 3  ;;  %v3400_v29 = vrot.slane %v3398_v55, 3  ;;  %v10137_v55 = vld [vmem:[%s13651_s3 + $0xb0] sm:$0xff]  }
 0x2b6   : > { %3625 = vmatmul.mubr.bf16.gmra.mrb[32].mxu0 %v11633_v60  ;;  %4404 = vmatpush1.bf16.msra.mxu1 %v10133_v48  ;;  %v3403_v10 = vrot.slane %v3401_v19, 4  ;;  %v3460_v43 = vrot.slane %v3458_v62, 4  ;;  %v3393_v41 = vrot.slane %v3391_v36, 3  ;;  %v3396_v13 = vrot.slane %v3394_v56, 4 }
 0x2b7   : > { %8859 = vmatprep.mubr.msk.bf16.mxu0 %vm322_vm11, %v11639_v3  ;;  %3954 = vmatpush1.bf16.msra.mxu0 %v11626_v51  ;;  %v3046_v47 = vsel %vm322_vm11, %v10135_v45, %v2875_v20  ;;  %v11672_v50 = vsel %vm1353_vm8, %v3365_v28, %v3372_v30  ;;  %v3044_v57 = vsel %vm322_vm11, %v2514_v46, %v2873_v32  ;;  %v2975_v2 = vrot.slane %v11356_v58, 1  ;;  %v11691_v58 = vld [vmem:[%s13651_s3 + $0x118] sm:$0xff]  }
 0x2b8   : > { %4405 = vmatprep.subr.bf16.mxu1 %v13656_v0  ;;  %3955 = vmatprep.subr.bf16.mxu0 %v13656_v0  ;;  %v11678_v52 = vsel %vm1353_vm8, %v3413_v35, %v3421_v1  ;;  %v2976_v59 = vrot.slane %v2561_v61, 1  ;;  %v3438_v38 = vshrl.u32 %v3046_v47, 16  ;;  %v3441_v5 = vshll.u32 %v3046_v47, 16  ;;  %v2563_v47 = vld [vmem:[#allocation3 + $0xb8] sm:$0x1f] }
 0x2b9   : > { %3797 = vmatmul.mubr.bf16.gmra.mrb[32].mxu1 %v11588_v15  ;;  %v3453_v14 = vor.u32 %v3452_v31, %v3449_v40  ;;  %v3461_v11 = vor.u32 %v3460_v43, %v3457_v34  ;;  %v3404_v48 = vor.u32 %v3403_v10, %v3400_v29  ;;  %v3397_v22 = vor.u32 %v3396_v13, %v3393_v41  ;;  %v10138_v31 = vld [vmem:[%s13651_s3 + $0xb8] sm:$0xff]   ;;  %v2562_v34 = vld [vmem:[#allocation3 + $0xa8] sm:$0x1f] }
 0x2ba   : > { %8879 = vmatprep.mubr.msk.bf16.mxu1 %vm322_vm11, %v11594_v25  ;;  %4406 = vmatpush1.bf16.msra.mxu1 %v10134_v27  ;;  %v3431_v4 = vshrl.u32 %v3044_v57, 16  ;;  %v3434_v21 = vshll.u32 %v3044_v57, 16  ;;  %v2977_v19 = vsel %vm1051_vm3, %v2975_v2, %v2976_v59  ;;  %v3440_v62 = vrot.slane %v3438_v38, 3 }
 0x2bb   : > { %3956 = vmatpush1.bf16.msra.mxu0 %v11653_v7  ;;  %4407 = vmatprep.subr.bf16.mxu1 %v13656_v0  ;;  %v11702_v30 = vsel %vm1353_vm8, %v3453_v14, %v3461_v11  ;;  %v3443_v28 = vrot.slane %v3441_v5, 4  ;;  %v11707_v20 = vsel %vm1353_vm8, %v3397_v22, %v3404_v48  ;;  %v3845_v35 = vshrl.u32 %v2977_v19, 16  ;;  %v2564_v11 = vld [vmem:[#allocation3 + $0xc8] sm:$0x1f]  ;;  %v10139_v48 = vld [vmem:[#allocation3 + $0x98] sm:$0xf] }
 0x2bc   : > { %3957 = vmatprep.subr.bf16.mxu0 %v13656_v0  ;;  %v3433_v36 = vrot.slane %v3431_v4, 3  ;;  %v3436_v56 = vrot.slane %v3434_v21, 4  ;;  %v3848_v1 = vshll.u32 %v2977_v19, 16  ;;  %v3853_v32 = vshrl.u32 %v2976_v59, 16 }
 0x2bd   : > { %v3856_v40 = vshll.u32 %v2976_v59, 16  ;;  %v3444_v27 = vor.u32 %v3443_v28, %v3440_v62  ;;  %v3847_v10 = vrot.slane %v3845_v35, 3  ;;  %v2978_v13 = vrot.slane %v11361_v44, 1  ;;  %v2516_v62 = vld [vmem:[#allocation3 + $0x90] sm:$0xf8] }
 0x2be   : > { %3633 = vmatmul.mubr.bf16.gmra.mrb[36].mxu0 %v11672_v50  ;;  %4408 = vmatpush1.bf16.msra.mxu1 %v10136_v54  ;;  %v3437_v29 = vor.u32 %v3436_v56, %v3433_v36  ;;  %v3850_v43 = vrot.slane %v3848_v1, 4  ;;  %v3855_v61 = vrot.slane %v3853_v32, 3  ;;  %v2979_v45 = vrot.slane %v2562_v34, 1 }
 0x2bf   : > { %8860 = vmatprep.mubr.msk.bf16.mxu0 %vm322_vm11, %v11678_v52  ;;  %3958 = vmatpush1.bf16.msra.mxu0 %v11668_v18  ;;  %v3858_v41 = vrot.slane %v3856_v40, 4  ;;  %v2981_v54 = vrot.slane %v11374_v12, 1  ;;  %v11729_v44 = vrot.slane %v2563_v47, 1  ;;  %v11742_v32 = vrot.slane %v2564_v11, 1 }
 0x2c0   : > { %4409 = vmatprep.subr.bf16.mxu1 %v13656_v0  ;;  %3959 = vmatprep.subr.bf16.mxu0 %v13656_v0  ;;  %v11722_v46 = vsel %vm1353_vm8, %v3437_v29, %v3444_v27  ;;  %v3851_v57 = vor.u32 %v3850_v43, %v3847_v10  ;;  %v2980_v59 = vsel %vm1051_vm3, %v2978_v13, %v2979_v45  ;;  %v4161_v38 = vshrl.u32 %v2979_v45, 16  ;;  %v10140_v29 = vld [vmem:[#allocation3 + $0xa8] sm:$0xf] }
 0x2c1   : > { %3805 = vmatmul.mubr.bf16.gmra.mrb[36].mxu1 %v11633_v60  ;;  %v3859_v2 = vor.u32 %v3858_v41, %v3855_v61  ;;  %v4164_v5 = vshll.u32 %v2979_v45, 16  ;;  %v4153_v12 = vshrl.u32 %v2980_v59, 16  ;;  %v4156_v21 = vshll.u32 %v2980_v59, 16 }
 0x2c2   : > { %8880 = vmatprep.mubr.msk.bf16.mxu1 %vm322_vm11, %v11639_v3  ;;  %4410 = vmatpush1.bf16.msra.mxu1 %v10137_v55  ;;  %v2983_v36 = vsel %vm1051_vm3, %v2981_v54, %v11729_v44  ;;  %v4163_v35 = vrot.slane %v4161_v38, 3  ;;  %v10141_v54 = vld [vmem:[%s13651_s3] sm:$0xff]  }
 0x2c3   : > { %3960 = vmatpush1.bf16.msra.mxu0 %v11691_v58  ;;  %4411 = vmatprep.subr.bf16.mxu1 %v13656_v0  ;;  %v11734_v4 = vsel %vm1353_vm8, %v3851_v57, %v3859_v2  ;;  %v4166_v1 = vrot.slane %v4164_v5, 4  ;;  %v4155_v43 = vrot.slane %v4153_v12, 3  ;;  %v4158_v61 = vrot.slane %v4156_v21, 4  ;;  %v2518_v57 = vld [vmem:[#allocation3 + $0xa0] sm:$0xf8] }
 0x2c4   : > { %4486 = vmatprep.subr.bf16.mxu0 %v13656_v0  ;;  %v4185_v41 = vshrl.u32 %v2983_v36, 16  ;;  %v4196_v12 = vshll.u32 %v11729_v44, 16 }
 0x2c5   : > { %v4159_v21 = vor.u32 %v4158_v61, %v4155_v43 }
 0x2c6   : > { %3641 = vmatmul.mubr.bf16.gmra.mrb[40].mxu0 %v11707_v20  ;;  %4412 = vmatpush1.bf16.msra.mxu1 %v10138_v31  ;;  %v4198_v61 = vrot.slane %v4196_v12, 4 }
 0x2c7   : > { %8861 = vmatprep.mubr.msk.bf16.mxu0 %vm322_vm11, %v11702_v30  ;;  %4619 = vmatprep.subr.bf16.mxu1 %v13656_v0 }
 0x2c9   : > { %3813 = vmatmul.mubr.bf16.gmra.mrb[40].mxu1 %v11672_v50 }
 0x2ca   : > { %8881 = vmatprep.mubr.msk.bf16.mxu1 %vm322_vm11, %v11678_v52 }
 0x2ce   : > { %3649 = vmatmul.mubr.bf16.gmra.mrb[44].mxu0 %v11722_v46 }
 0x2cf   : > { %8894 = vmatprep.mubr.msk.bf16.mxu0 %vm322_vm11, %v11430_v9  ;;  %v2984_v9 = vrot.slane %v11381_v6, 1 }
 0x2d1   : > { %v2879_v14 = vpop.permute.xlu1 %2878  ;;  %3821 = vmatmul.mubr.bf16.gmra.mrb[44].mxu1 %v11707_v20 }
 0x2d2   : > { %v3051_v22 = vsel %vm322_vm11, %v10139_v48, %v2879_v14  ;;  %8903 = vmatprep.mubr.msk.bf16.mxu1 %vm322_vm11, %v11734_v4  ;;  %v2877_v28 = vpop.permute.xlu0 %2876  ;;  %v4193_v14 = vshrl.u32 %v11729_v44, 16  ;;  %v2520_v44 = vld [vmem:[#allocation3 + $0xb0] sm:$0xf8] }
 0x2d3   : > { %v3836_v55 = vshrl.u32 %v3051_v22, 16  ;;  %v3839_v19 = vshll.u32 %v3051_v22, 16  ;;  %v3049_v56 = vsel %vm322_vm11, %v2516_v62, %v2877_v28 }
 0x2d4   : > { %v3829_v34 = vshrl.u32 %v3049_v56, 16  ;;  %v3832_v6 = vshll.u32 %v3049_v56, 16  ;;  %v4187_v56 = vrot.slane %v4185_v41, 3  ;;  %v4195_v43 = vrot.slane %v4193_v14, 3 }
 0x2d5   : > { %v3838_v40 = vrot.slane %v3836_v55, 3  ;;  %v3841_v31 = vrot.slane %v3839_v19, 4  ;;  %v2883_v27 = vpop.permute.xlu1 %2882  ;;  %v4167_v55 = vor.u32 %v4166_v1, %v4163_v35  ;;  %v2565_v1 = vld [vmem:[#allocation3 + $0xd8] sm:$0x1f]  ;;  %v4228_v14 = vshll.u32 %v11742_v32, 16 }
 0x2d6   : > { %3970 = vmatmul.mubr.bf16.vlgmr.msra.gmra.mrb[48].mxu0 %v11500_v37  ;;  %v3056_v10 = vsel %vm322_vm11, %v10140_v29, %v2883_v27  ;;  %v3831_v13 = vrot.slane %v3829_v34, 3  ;;  %v3834_v45 = vrot.slane %v3832_v6, 4  ;;  %v2881_v2 = vpop.permute.xlu0 %2880  ;;  %v4188_v37 = vshll.u32 %v2983_v36, 16  ;;  %v10142_v36 = vld [vmem:[%s13651_s3 + $0x8] sm:$0xff]   ;;  %v10143_v6 = vld [vmem:[#allocation3 + $0xb8] sm:$0xf] }
 0x2d7   : > { %v4144_v47 = vshrl.u32 %v3056_v10, 16  ;;  %8895 = vmatprep.mubr.msk.bf16.mxu0 %vm322_vm11, %v11506_v33  ;;  %4487 = vmatpush1.bf16.msra.mxu0 %v10141_v54  ;;  %v3842_v59 = vor.u32 %v3841_v31, %v3838_v40  ;;  %v4147_v38 = vshll.u32 %v3056_v10, 16  ;;  %v3054_v5 = vsel %vm322_vm11, %v2518_v57, %v2881_v2 }
 0x2d8   : > { %4488 = vmatprep.subr.bf16.mxu0 %v13656_v0  ;;  %v3835_v11 = vor.u32 %v3834_v45, %v3831_v13  ;;  %v4137_v48 = vshrl.u32 %v3054_v5, 16  ;;  %v4140_v22 = vshll.u32 %v3054_v5, 16  ;;  %v2986_v40 = vsel %vm1051_vm3, %v2984_v9, %v11742_v32 }
 0x2d9   : > { %v4146_v19 = vrot.slane %v4144_v47, 3  ;;  %v4149_v62 = vrot.slane %v4147_v38, 4  ;;  %v4190_v10 = vrot.slane %v4188_v37, 4  ;;  %v2987_v9 = vrot.slane %v11393_v8, 1  ;;  %v10144_v37 = vld [vmem:[%s13651_s3 + $0x10] sm:$0xff]  }
 0x2da   : > { %v2887_v33 = vpop.permute.xlu1 %2886  ;;  %v4139_v31 = vrot.slane %v4137_v48, 3  ;;  %v4142_v34 = vrot.slane %v4140_v22, 4  ;;  %v11762_v35 = vsel %vm1353_vm8, %v3835_v11, %v3842_v59  ;;  %v11771_v41 = vsel %vm1353_vm8, %v4159_v21, %v4167_v55 }
 0x2db   : > { %v2885_v28 = vpop.permute.xlu0 %2884  ;;  %4489 = vmatpush1.bf16.msra.mxu0 %v10142_v36  ;;  %v3061_v27 = vsel %vm322_vm11, %v10143_v6, %v2887_v33  ;;  %4422 = vmatmul.mubr.bf16.vlgmr.msra.gmra.mrb[48].mxu1 %v11762_v35  ;;  %v4225_v13 = vshrl.u32 %v11742_v32, 16  ;;  %v4217_v57 = vshrl.u32 %v2986_v40, 16  ;;  %v11778_v2 = vrot.slane %v2565_v1, 1  ;;  %v2522_v36 = vld [vmem:[#allocation3 + $0xc0] sm:$0xf8] }
 0x2dc   : > { %4490 = vmatprep.subr.bf16.mxu0 %v13656_v0  ;;  %v3059_v29 = vsel %vm322_vm11, %v2520_v44, %v2885_v28  ;;  %4620 = vmatpush1.bf16.msra.mxu1 %v11449_v63  ;;  %v4176_v45 = vshrl.u32 %v3061_v27, 16  ;;  %v4179_v47 = vshll.u32 %v3061_v27, 16  ;;  %v4150_v8 = vor.u32 %v4149_v62, %v4146_v19  ;;  %v10145_v62 = vld [vmem:[#allocation3 + $0xc8] sm:$0xf]  ;;  %v10147_v27 = vld [vmem:[#allocation3 + $0xe0] sm:$0xf0] }
 0x2dd   : > { %8904 = vmatprep.mubr.msk.bf16.mxu1 %vm322_vm11, %v11771_v41  ;;  %v4143_v63 = vor.u32 %v4142_v34, %v4139_v31  ;;  %v4169_v54 = vshrl.u32 %v3059_v29, 16  ;;  %4621 = vmatprep.subr.bf16.mxu1 %v13656_v0  ;;  %v4191_v38 = vor.u32 %v4190_v10, %v4187_v56  ;;  %v4199_v5 = vor.u32 %v4198_v61, %v4195_v43  ;;  %v2566_v56 = vld [vmem:[#allocation3 + $0xe8] sm:$0x1f] }
 0x2de   : > { %3978 = vmatmul.mubr.bf16.gmra.mrb[52].mxu0 %v11547_v23  ;;  %v4172_v23 = vshll.u32 %v3059_v29, 16  ;;  %v2891_v59 = vpop.permute.xlu1 %2890  ;;  %v11787_v48 = vrot.slane %v4225_v13, 3  ;;  %v4178_v22 = vrot.slane %v4176_v45, 3  ;;  %v4181_v33 = vrot.slane %v4179_v47, 4 }
 0x2df   : > { %8896 = vmatprep.mubr.msk.bf16.mxu0 %vm322_vm11, %v11553_v42  ;;  %4491 = vmatpush1.bf16.msra.mxu0 %v10144_v37  ;;  %v4220_v42 = vshll.u32 %v2986_v40, 16  ;;  %v2889_v11 = vpop.permute.xlu0 %2888  ;;  %v4219_v12 = vrot.slane %v4217_v57, 3  ;;  %v2989_v21 = vsel %vm1051_vm3, %v2987_v9, %v11778_v2  ;;  %v4171_v55 = vrot.slane %v4169_v54, 3 }
 0x2e0   : > { %4492 = vmatprep.subr.bf16.mxu0 %v13656_v0  ;;  %4622 = vmatpush1.bf16.msra.mxu1 %v11471_v26  ;;  %v4174_v19 = vrot.slane %v4172_v23, 4  ;;  %v3066_v28 = vsel %vm322_vm11, %v10145_v62, %v2891_v59  ;;  %v11794_v32 = vsel %vm1353_vm8, %v4143_v63, %v4150_v8  ;;  %v10146_v26 = vld [vmem:[%s13651_s3 + $0x18] sm:$0xff]   ;;  %v3064_v40 = vsel %vm322_vm11, %v2522_v36, %v2889_v11  ;;  %v10151_v62 = vld [vmem:[#allocation3 + $0xf0] sm:$0xf0] }
 0x2e1   : > { %4623 = vmatprep.subr.bf16.mxu1 %v13656_v0  ;;  %v11802_v31 = vsel %vm1353_vm8, %v4191_v38, %v4199_v5  ;;  %v4222_v34 = vrot.slane %v4220_v42, 4  ;;  %v4230_v6 = vrot.slane %v4228_v14, 4  ;;  %v2990_v44 = vrot.slane %v10147_v27, 1  ;;  %v10149_v11 = vld [vmem:[#allocation3 + $0xd8] sm:$0xf] }
 0x2e2   : > { %v4249_v1 = vshrl.u32 %v2989_v21, 16  ;;  %v4208_v29 = vshrl.u32 %v3066_v28, 16  ;;  %v4211_v10 = vshll.u32 %v3066_v28, 16  ;;  %v4252_v43 = vshll.u32 %v2989_v21, 16  ;;  %v2895_v57 = vpop.permute.xlu1 %2894 }
 0x2e3   : > { %4493 = vmatpush1.bf16.msra.mxu0 %v10146_v26  ;;  %4430 = vmatmul.mubr.bf16.gmra.mrb[52].mxu1 %v11794_v32  ;;  %v11811_v61 = vrot.slane %v2566_v56, 1  ;;  %v4182_v9 = vor.u32 %v4181_v33, %v4178_v22  ;;  %v4175_v13 = vor.u32 %v4174_v19, %v4171_v55  ;;  %v4201_v45 = vshrl.u32 %v3064_v40, 16  ;;  %v2893_v54 = vpop.permute.xlu0 %2892  ;;  %v2524_v22 = vld [vmem:[#allocation3 + $0xd0] sm:$0xf8]  ;;  %v2567_v33 = vld [vmem:[#allocation3 + $0xf8] sm:$0x1f] }
 0x2e4   : > { %4494 = vmatprep.subr.bf16.mxu0 %v13656_v0  ;;  %8905 = vmatprep.mubr.msk.bf16.mxu1 %vm322_vm11, %v11802_v31  ;;  %v4204_v47 = vshll.u32 %v3064_v40, 16  ;;  %v4223_v8 = vor.u32 %v4222_v34, %v4219_v12  ;;  %v4260_v63 = vshll.u32 %v11778_v2, 16  ;;  %v11821_v23 = vrot.slane %v4249_v1, 3 }
 0x2e5   : > { %4624 = vmatpush1.bf16.msra.mxu1 %v11491_v24  ;;  %v4257_v24 = vshrl.u32 %v11778_v2, 16  ;;  %v4210_v37 = vrot.slane %v4208_v29, 3  ;;  %v4213_v59 = vrot.slane %v4211_v10, 4  ;;  %v11824_v38 = vrot.slane %v4252_v43, 4 }
 0x2e6   : > { %3986 = vmatmul.mubr.bf16.gmra.mrb[56].mxu0 %v11588_v15  ;;  %4625 = vmatprep.subr.bf16.mxu1 %v13656_v0  ;;  %v10148_v15 = vld [vmem:[%s13651_s3 + $0x20] sm:$0xff]   ;;  %v2992_v5 = vsel %vm1051_vm3, %v2990_v44, %v11811_v61  ;;  %v4203_v42 = vrot.slane %v4201_v45, 3  ;;  %v4206_v14 = vrot.slane %v4204_v47, 4  ;;  %v11830_v2 = vsel %vm1353_vm8, %v4175_v13, %v4182_v9  ;;  %v2899_v29 = vpop.permute.xlu1 %2898 }
 0x2e7   : > { %8897 = vmatprep.mubr.msk.bf16.mxu0 %vm322_vm11, %v11594_v25  ;;  %4495 = vmatpush1.bf16.msra.mxu0 %v10148_v15  ;;  %v4231_v25 = vor.u32 %v4230_v6, %v11787_v48  ;;  %v3071_v48 = vsel %vm322_vm11, %v10149_v11, %v2895_v57  ;;  %v3069_v12 = vsel %vm322_vm11, %v2524_v22, %v2893_v54  ;;  %v4259_v55 = vrot.slane %v4257_v24, 3  ;;  %v2897_v9 = vpop.permute.xlu0 %2896  ;;  %v10153_v24 = vld [vmem:[#allocation3 + $0xe8] sm:$0xf] }
 0x2e8   : > { %4496 = vmatprep.subr.bf16.mxu0 %v13656_v0  ;;  %v4262_v19 = vrot.slane %v4260_v63, 4  ;;  %v2993_v28 = vrot.slane %v10151_v62, 1  ;;  %v4281_v36 = vshrl.u32 %v2992_v5, 16  ;;  %v4240_v26 = vshrl.u32 %v3071_v48, 16 }
 0x2e9   : > { %4626 = vmatpush1.bf16.msra.mxu1 %v11520_v39  ;;  %v10150_v39 = vld [vmem:[%s13651_s3 + $0x28] sm:$0xff]   ;;  %v11839_v21 = vsel %vm1353_vm8, %v4223_v8, %v4231_v25  ;;  %v4243_v56 = vshll.u32 %v3071_v48, 16  ;;  %v4284_v40 = vshll.u32 %v2992_v5, 16  ;;  %v11848_v34 = vrot.slane %v2567_v33, 1 }
 0x2ea   : > { %4627 = vmatprep.subr.bf16.mxu1 %v13656_v0  ;;  %v4214_v6 = vor.u32 %v4213_v59, %v4210_v37  ;;  %v4207_v27 = vor.u32 %v4206_v14, %v4203_v42  ;;  %v4233_v44 = vshrl.u32 %v3069_v12, 16  ;;  %v4236_v1 = vshll.u32 %v3069_v12, 16  ;;  %v10155_v42 = vld [vmem:[#allocation3 + $0x100] sm:$0xf0] }
 0x2eb   : > { %4497 = vmatpush1.bf16.msra.mxu0 %v10150_v39  ;;  %4438 = vmatmul.mubr.bf16.gmra.mrb[56].mxu1 %v11830_v2  ;;  %v4263_v10 = vor.u32 %v4262_v19, %v4259_v55  ;;  %v4292_v43 = vshll.u32 %v11811_v61, 16  ;;  %v11859_v13 = vrot.slane %v4281_v36, 3  ;;  %v4242_v45 = vrot.slane %v4240_v26, 3  ;;  %v10156_v36 = vld [vmem:[%s13651_s3 + $0x40] sm:$0xff]   ;;  %v2903_v26 = vpop.permute.xlu1 %2902 }
 0x2ec   : > { %4498 = vmatprep.subr.bf16.mxu0 %v13656_v0  ;;  %8906 = vmatprep.mubr.msk.bf16.mxu1 %vm322_vm11, %v11839_v21  ;;  %v4245_v47 = vrot.slane %v4243_v56, 4  ;;  %v11862_v15 = vrot.slane %v4284_v40, 4  ;;  %v2995_v57 = vsel %vm1051_vm3, %v2993_v28, %v11848_v34  ;;  %v4235_v8 = vrot.slane %v4233_v44, 3 }
 0x2ed   : > { %4628 = vmatpush1.bf16.msra.mxu1 %v11540_v16  ;;  %v4289_v16 = vshrl.u32 %v11811_v61, 16  ;;  %v4238_v25 = vrot.slane %v4236_v1, 4  ;;  %v3076_v63 = vsel %vm322_vm11, %v10153_v24, %v2899_v29  ;;  %v2526_v61 = vld [vmem:[#allocation3 + $0xe0] sm:$0xf8]  ;;  %v11868_v54 = vsel %vm1353_vm8, %v4207_v27, %v4214_v6 }
 0x2ee   : > { %3994 = vmatmul.mubr.bf16.gmra.mrb[60].mxu0 %v11633_v60  ;;  %4629 = vmatprep.subr.bf16.mxu1 %v13656_v0  ;;  %v10152_v60 = vld [vmem:[%s13651_s3 + $0x30] sm:$0xff]   ;;  %v3074_v37 = vsel %vm322_vm11, %v2526_v61, %v2897_v9  ;;  %v4294_v5 = vrot.slane %v4292_v43, 4  ;;  %v2996_v14 = vrot.slane %v10155_v42, 1  ;;  %v4313_v11 = vshrl.u32 %v2995_v57, 16 }
 0x2ef   : > { %8898 = vmatprep.mubr.msk.bf16.mxu0 %vm322_vm11, %v11639_v3  ;;  %4499 = vmatpush1.bf16.msra.mxu0 %v10152_v60  ;;  %v4255_v3 = vor.u32 %v11824_v38, %v11821_v23  ;;  %v2568_v23 = vld [vmem:[#allocation3 + $0x108] sm:$0x1f]  ;;  %v4291_v38 = vrot.slane %v4289_v16, 3  ;;  %v4321_v48 = vshrl.u32 %v11848_v34, 16  ;;  %v4324_v22 = vshll.u32 %v11848_v34, 16 }
 0x2f0   : > { %4500 = vmatprep.subr.bf16.mxu0 %v13656_v0  ;;  %v4272_v39 = vshrl.u32 %v3076_v63, 16  ;;  %v4275_v33 = vshll.u32 %v3076_v63, 16  ;;  %v4316_v12 = vshll.u32 %v2995_v57, 16  ;;  %v11888_v55 = vrot.slane %v2568_v23, 1  ;;  %v2528_v43 = vld [vmem:[#allocation3 + $0xf0] sm:$0xf8]  ;;  %v2907_v23 = vpop.permute.xlu1 %2906 }
 0x2f1   : > { %4630 = vmatpush1.bf16.msra.mxu1 %v11565_v17  ;;  %v10154_v17 = vld [vmem:[%s13651_s3 + $0x38] sm:$0xff]   ;;  %v11877_v59 = vsel %vm1353_vm8, %v4255_v3, %v4263_v10  ;;  %v4246_v19 = vor.u32 %v4245_v47, %v4242_v45  ;;  %v4265_v62 = vshrl.u32 %v3074_v37, 16  ;;  %v4268_v28 = vshll.u32 %v3074_v37, 16 }
 0x2f2   : > { %4631 = vmatprep.subr.bf16.mxu1 %v13656_v0  ;;  %v4295_v56 = vor.u32 %v4294_v5, %v4291_v38  ;;  %v4315_v40 = vrot.slane %v4313_v11, 3  ;;  %v4323_v34 = vrot.slane %v4321_v48, 3  ;;  %v4326_v6 = vrot.slane %v4324_v22, 4  ;;  %v10157_v10 = vld [vmem:[#allocation3 + $0xf8] sm:$0xf] }
 0x2f3   : > { %4501 = vmatpush1.bf16.msra.mxu0 %v10154_v17  ;;  %4446 = vmatmul.mubr.bf16.gmra.mrb[60].mxu1 %v11868_v54  ;;  %v4274_v27 = vrot.slane %v4272_v39, 3  ;;  %v4277_v44 = vrot.slane %v4275_v33, 4  ;;  %v4318_v1 = vrot.slane %v4316_v12, 4  ;;  %v2998_v60 = vsel %vm1051_vm3, %v2996_v14, %v11888_v55  ;;  %v10160_v33 = vld [vmem:[#allocation3 + $0x108] sm:$0xf] }
 0x2f4   : > { %4502 = vmatprep.subr.bf16.mxu0 %v13656_v0  ;;  %8907 = vmatprep.mubr.msk.bf16.mxu1 %vm322_vm11, %v11877_v59  ;;  %v4267_v29 = vrot.slane %v4265_v62, 3  ;;  %v4270_v3 = vrot.slane %v4268_v28, 4  ;;  %v3081_v16 = vsel %vm322_vm11, %v10157_v10, %v2903_v26  ;;  %v4327_v47 = vor.u32 %v4326_v6, %v4323_v34 }
 0x2f5   : > { %4632 = vmatpush1.bf16.msra.mxu1 %v11583_v49  ;;  %v2901_v49 = vpop.permute.xlu0 %2900  ;;  %v4307_v57 = vshll.u32 %v3081_v16, 16  ;;  %v4278_v24 = vor.u32 %v4277_v44, %v4274_v27  ;;  %v4354_v37 = vshll.u32 %v2998_v60, 16  ;;  %v4359_v38 = vshrl.u32 %v11888_v55, 16 }
 0x2f6   : > { %4002 = vmatmul.mubr.bf16.gmra.mrb[64].mxu0 %v11672_v50  ;;  %v4239_v50 = vor.u32 %v4238_v25, %v4235_v8  ;;  %4633 = vmatprep.subr.bf16.mxu1 %v13656_v0  ;;  %v4319_v8 = vor.u32 %v4318_v1, %v4315_v40  ;;  %v4351_v25 = vshrl.u32 %v2998_v60, 16  ;;  %v4271_v63 = vor.u32 %v4270_v3, %v4267_v29 }
 0x2f7   : > { %8899 = vmatprep.mubr.msk.bf16.mxu0 %vm322_vm11, %v11678_v52  ;;  %4503 = vmatpush1.bf16.msra.mxu0 %v10156_v36  ;;  %v4287_v52 = vor.u32 %v11862_v15, %v11859_v13  ;;  %v10158_v13 = vld [vmem:[%s13651_s3 + $0x48] sm:$0xff]   ;;  %v4304_v15 = vshrl.u32 %v3081_v16, 16  ;;  %v4362_v5 = vshll.u32 %v11888_v55, 16  ;;  %v4309_v14 = vrot.slane %v4307_v57, 4  ;;  %v10161_v55 = vld [vmem:[%s13651_s3 + $0x58] sm:$0xff]  }
 0x2f8   : > { %4504 = vmatprep.subr.bf16.mxu0 %v13656_v0  ;;  %v11902_v9 = vsel %vm1353_vm8, %v4239_v50, %v4246_v19  ;;  %v11928_v11 = vsel %vm1353_vm8, %v4319_v8, %v4327_v47  ;;  %v4353_v48 = vrot.slane %v4351_v25, 3  ;;  %v3086_v12 = vsel %vm322_vm11, %v10160_v33, %v2907_v23  ;;  %v2530_v19 = vld [vmem:[#allocation3 + $0x100] sm:$0xf8]  ;;  %v9909_v8 = vld [vmem:[%s13653_s5 + $0x1d0] ss:$8 sps:$4 sm:$0xff]  }
 0x2f9   : > { %4634 = vmatpush1.bf16.msra.mxu1 %v11608_v53  ;;  %v3079_v53 = vsel %vm322_vm11, %v2528_v43, %v2901_v49  ;;  %v11911_v45 = vsel %vm1353_vm8, %v4287_v52, %v4295_v56  ;;  %v4306_v42 = vrot.slane %v4304_v15, 3  ;;  %v11933_v50 = vsel %vm1353_vm8, %v4271_v63, %v4278_v24  ;;  %v9894_v43 = vld [vmem:[%s13653_s5 + $0x180] ss:$8 sps:$4 sm:$0xff]   ;;  %v9902_v47 = vld [vmem:[%s13653_s5 + $0x1a4] ss:$8 sps:$4 sm:$0xff]  }
 0x2fa   : > { %4635 = vmatprep.subr.bf16.mxu1 %v13656_v0  ;;  %v4297_v61 = vshrl.u32 %v3079_v53, 16  ;;  %v4300_v17 = vshll.u32 %v3079_v53, 16  ;;  %v4361_v28 = vrot.slane %v4359_v38, 3  ;;  %v4364_v36 = vrot.slane %v4362_v5, 4  ;;  %v9899_v53 = vld [vmem:[%s13653_s5 + $0x194] ss:$8 sps:$4 sm:$0xff]  }
 0x2fb   : > { %4505 = vmatpush1.bf16.msra.mxu0 %v10158_v13  ;;  %4454 = vmatmul.mubr.bf16.gmra.mrb[64].mxu1 %v11902_v9  ;;  %v4310_v26 = vor.u32 %v4309_v14, %v4306_v42  ;;  %v4342_v52 = vshrl.u32 %v3086_v12, 16  ;;  %v4345_v49 = vshll.u32 %v3086_v12, 16  ;;  %v9903_v15 = vld [vmem:[%s13653_s5 + $0x1b0] ss:$8 sps:$4 sm:$0xff]   ;;  %v9908_v57 = vld [vmem:[%s13653_s5 + $0x1c4] ss:$8 sps:$4 sm:$0xff]  }
 0x2fc   : > { %4506 = vmatprep.subr.bf16.mxu0 %v13656_v0  ;;  %8908 = vmatprep.mubr.msk.bf16.mxu1 %vm322_vm11, %v11911_v45  ;;  %v4299_v22 = vrot.slane %v4297_v61, 3  ;;  %v4302_v39 = vrot.slane %v4300_v17, 4  ;;  %v4365_v27 = vor.u32 %v4364_v36, %v4361_v28  ;;  %v9914_v25 = vld [vmem:[%s13653_s5 + $0x1e4] ss:$8 sps:$4 sm:$0xff]   ;;  %v9915_v24 = vld [vmem:[%s13653_s5 + $0x1f0] ss:$8 sps:$4 sm:$0xff]  }
 0x2fd   : > { %4636 = vmatpush1.bf16.msra.mxu1 %v11626_v51  ;;  %v2905_v51 = vpop.permute.xlu0 %2904  ;;  %v4344_v44 = vrot.slane %v4342_v52, 3  ;;  %v4347_v1 = vrot.slane %v4345_v49, 4  ;;  %v9920_v63 = vld [vmem:[%s13653_s5 + $0x204] ss:$8 sps:$4 sm:$0xff]   ;;  %v9923_v61 = vld [vmem:[%s13653_s5 + $0x214] ss:$8 sps:$4 sm:$0xff]  }
 0x2fe   : > { %4010 = vmatmul.mubr.bf16.gmra.mrb[68].mxu0 %v11707_v20  ;;  %4637 = vmatprep.subr.bf16.mxu1 %v13656_v0  ;;  %v10159_v20 = vld [vmem:[%s13651_s3 + $0x50] sm:$0xff]   ;;  %v3084_v62 = vsel %vm322_vm11, %v2530_v19, %v2905_v51  ;;  %v4303_v56 = vor.u32 %v4302_v39, %v4299_v22  ;;  %v9924_v38 = vld [vmem:[%s13653_s5 + $0x220] ss:$8 sps:$4 sm:$0xff]   ;;  %v9926_v5 = vld [vmem:[%s13653_s5 + $0x224] ss:$8 sps:$4 sm:$0xff]   ;;  %v2911_v51 = vpop.permute.xlu1 %2910 }
 0x2ff   : > { %8900 = vmatprep.mubr.msk.bf16.mxu0 %vm322_vm11, %v11702_v30  ;;  %4507 = vmatpush1.bf16.msra.mxu0 %v10159_v20  ;;  %v4335_v40 = vshrl.u32 %v3084_v62, 16  ;;  %v4338_v34 = vshll.u32 %v3084_v62, 16  ;;  %v4348_v10 = vor.u32 %v4347_v1, %v4344_v44  ;;  %v10162_v17 = vld [vmem:[#allocation3 + $0x110] sm:$0xf0]  ;;  %v9921_v23 = vld [vmem:[%s13653_s5 + $0x210] ss:$8 sps:$4 sm:$0xff]  }
 0x300   : > { %4508 = vmatprep.subr.bf16.mxu0 %v13656_v0  ;;  %v11950_v3 = vsel %vm1353_vm8, %v4303_v56, %v4310_v26  ;;  %v2532_v22 = vld [vmem:[#allocation3 + $0x110] sm:$0xf8]  ;;  %v9930_v49 = vld [vmem:[%s13653_s5 + $0x240] ss:$8 sps:$4 sm:$0xff]  }
 0x301   : > { %4638 = vmatpush1.bf16.msra.mxu1 %v11653_v7  ;;  %v4356_v7 = vrot.slane %v4354_v37, 4  ;;  %v4337_v60 = vrot.slane %v4335_v40, 3  ;;  %v4340_v29 = vrot.slane %v4338_v34, 4  ;;  %v2909_v39 = vpop.permute.xlu0 %2908  ;;  %v9927_v33 = vld [vmem:[%s13653_s5 + $0x230] ss:$8 sps:$4 sm:$0xff]  }
 0x302   : > { %4639 = vmatprep.subr.bf16.mxu1 %v13656_v0  ;;  %v9932_v40 = vld [vmem:[%s13653_s5 + $0x244] ss:$8 sps:$4 sm:$0xff]  }
 0x303   : > { %4509 = vmatpush1.bf16.msra.mxu0 %v10161_v55  ;;  %4462 = vmatmul.mubr.bf16.gmra.mrb[68].mxu1 %v11933_v50  ;;  %v4357_v6 = vor.u32 %v4356_v7, %v4353_v48  ;;  %v4341_v16 = vor.u32 %v4340_v29, %v4337_v60  ;;  %v3089_v55 = vsel %vm322_vm11, %v2532_v22, %v2909_v39 }
 0x304   : > { %8909 = vmatprep.mubr.msk.bf16.mxu1 %vm322_vm11, %v11928_v11  ;;  %v4583_v52 = vshrl.u32 %v3089_v55, 16  ;;  %v4586_v56 = vshll.u32 %v3089_v55, 16 }
 0x305   : > { %4640 = vmatpush1.bf16.msra.mxu1 %v11668_v18  ;;  %v11954_v18 = vsel %vm1353_vm8, %v4357_v6, %v4365_v27  ;;  %v11968_v13 = vsel %vm1353_vm8, %v4341_v16, %v4348_v10  ;;  %v9933_v27 = vld [vmem:[%s13653_s5 + $0x250] ss:$8 sps:$4 sm:$0xff]   ;;  %v9936_v10 = vld [vmem:[%s13653_s5 + $0x260] ss:$8 sps:$4 sm:$0xff]   ;;  %v9938_v16 = vld [vmem:[%s13653_s5 + $0x264] ss:$8 sps:$4 sm:$0xff]  }
 0x306   : > { %4018 = vmatmul.mubr.bf16.gmra.mrb[72].mxu0 %v11722_v46  ;;  %4641 = vmatprep.subr.bf16.mxu1 %v13656_v0  ;;  %v4585_v60 = vrot.slane %v4583_v52, 3  ;;  %v4588_v29 = vrot.slane %v4586_v56, 4 }
 0x307   : > { %8901 = vmatprep.mubr.msk.bf16.mxu0 %vm322_vm11, %v11734_v4 }
 0x309   : > { %4642 = vmatpush1.bf16.msra.mxu1 %v11691_v58  ;;  %v9896_v58 = vld [vmem:[%s13653_s5 + $0x184] ss:$8 sps:$4 sm:$0xff]  }
 0x30a   : > { %6073 = vmatprep.subr.bf16.mxu0 %v9896_v58  ;;  %7762 = vmatprep.subr.bf16.mxu1 %v9896_v58  ;;  %v4589_v58 = vor.u32 %v4588_v29, %v4585_v60 }
 0x30b   : > { %4470 = vmatmul.mubr.bf16.gmra.mrb[72].mxu1 %v11950_v3 }
 0x30c   : > { %8910 = vmatprep.mubr.msk.bf16.mxu1 %vm322_vm11, %v11954_v18 }
 0x30e   : > { %4026 = vmatmul.mubr.bf16.gmra.mrb[76].mxu0 %v11762_v35 }
 0x30f   : > { %8911 = vmatprep.mubr.msk.bf16.mxu0 %vm322_vm11, %v11702_v30  ;;  %v9897_v30 = vld [vmem:[%s13653_s5 + $0x190] ss:$8 sps:$4 sm:$0xff]  }
 0x313   : > { %4478 = vmatmul.mubr.bf16.gmra.mrb[76].mxu1 %v11968_v13 }
 0x314   : > { %8919 = vmatprep.mubr.msk.bf16.mxu1 %vm322_vm11, %v11771_v41 }
 0x316   : > { %4519 = vmatmul.mubr.bf16.vlgmr.msra.gmra.mrb[80].mxu0 %v11722_v46  ;;  %v9900_v46 = vld [vmem:[%s13653_s5 + $0x1a0] ss:$8 sps:$4 sm:$0xff]  }
 0x317   : > { %8912 = vmatprep.mubr.msk.bf16.mxu0 %vm322_vm11, %v11734_v4  ;;  %6074 = vmatpush1.bf16.msra.mxu0 %v9894_v43  ;;  %v9905_v4 = vld [vmem:[%s13653_s5 + $0x1b4] ss:$8 sps:$4 sm:$0xff]  }
 0x318   : > { %6075 = vmatprep.subr.bf16.mxu0 %v9899_v53 }
 0x31b   : > { %6076 = vmatpush1.bf16.msra.mxu0 %v9897_v30  ;;  %4652 = vmatmul.mubr.bf16.vlgmr.msra.gmra.mrb[80].mxu1 %v11794_v32 }
 0x31c   : > { %6077 = vmatprep.subr.bf16.mxu0 %v9902_v47  ;;  %8920 = vmatprep.mubr.msk.bf16.mxu1 %vm322_vm11, %v11802_v31 }
 0x31d   : > { %7763 = vmatpush1.bf16.msra.mxu1 %v9894_v43  ;;  %v9941_v43 = vld [vmem:[%s13653_s5 + $0x274] ss:$8 sps:$4 sm:$0xff]  }
 0x31e   : > { %4527 = vmatmul.mubr.bf16.gmra.mrb[84].mxu0 %v11762_v35  ;;  %7764 = vmatprep.subr.bf16.mxu1 %v9899_v53  ;;  %v9906_v35 = vld [vmem:[%s13653_s5 + $0x1c0] ss:$8 sps:$4 sm:$0xff]  }
 0x31f   : > { %8913 = vmatprep.mubr.msk.bf16.mxu0 %vm322_vm11, %v11771_v41  ;;  %6078 = vmatpush1.bf16.msra.mxu0 %v9900_v46  ;;  %v9911_v41 = vld [vmem:[%s13653_s5 + $0x1d4] ss:$8 sps:$4 sm:$0xff]  }
 0x320   : > { %6079 = vmatprep.subr.bf16.mxu0 %v9905_v4 }
 0x321   : > { %7765 = vmatpush1.bf16.msra.mxu1 %v9897_v30 }
 0x322   : > { %7766 = vmatprep.subr.bf16.mxu1 %v9902_v47 }
 0x323   : > { %6080 = vmatpush1.bf16.msra.mxu0 %v9903_v15  ;;  %4660 = vmatmul.mubr.bf16.gmra.mrb[84].mxu1 %v11830_v2 }
 0x324   : > { %6081 = vmatprep.subr.bf16.mxu0 %v9908_v57  ;;  %8921 = vmatprep.mubr.msk.bf16.mxu1 %vm322_vm11, %v11839_v21 }
 0x325   : > { %7767 = vmatpush1.bf16.msra.mxu1 %v9900_v46 }
 0x326   : > { %4535 = vmatmul.mubr.bf16.gmra.mrb[88].mxu0 %v11794_v32  ;;  %7768 = vmatprep.subr.bf16.mxu1 %v9905_v4  ;;  %v9912_v32 = vld [vmem:[%s13653_s5 + $0x1e0] ss:$8 sps:$4 sm:$0xff]  }
 0x327   : > { %8914 = vmatprep.mubr.msk.bf16.mxu0 %vm322_vm11, %v11802_v31  ;;  %6082 = vmatpush1.bf16.msra.mxu0 %v9906_v35  ;;  %v9917_v31 = vld [vmem:[%s13653_s5 + $0x1f4] ss:$8 sps:$4 sm:$0xff]  }
 0x328   : > { %6083 = vmatprep.subr.bf16.mxu0 %v9911_v41 }
 0x329   : > { %7769 = vmatpush1.bf16.msra.mxu1 %v9903_v15 }
 0x32a   : > { %7770 = vmatprep.subr.bf16.mxu1 %v9908_v57 }
 0x32b   : > { %6084 = vmatpush1.bf16.msra.mxu0 %v9909_v8  ;;  %4668 = vmatmul.mubr.bf16.gmra.mrb[88].mxu1 %v11868_v54 }
 0x32c   : > { %6085 = vmatprep.subr.bf16.mxu0 %v9914_v25  ;;  %8922 = vmatprep.mubr.msk.bf16.mxu1 %vm322_vm11, %v11877_v59 }
 0x32d   : > { %7771 = vmatpush1.bf16.msra.mxu1 %v9906_v35 }
 0x32e   : > { %4543 = vmatmul.mubr.bf16.gmra.mrb[92].mxu0 %v11830_v2  ;;  %7772 = vmatprep.subr.bf16.mxu1 %v9911_v41  ;;  %v2569_v2 = vld [vmem:[#allocation3 + $0x118] sm:$0x1f] }
 0x32f   : > { %8915 = vmatprep.mubr.msk.bf16.mxu0 %vm322_vm11, %v11839_v21  ;;  %6086 = vmatpush1.bf16.msra.mxu0 %v9912_v32  ;;  %v9918_v21 = vld [vmem:[%s13653_s5 + $0x200] ss:$8 sps:$4 sm:$0xff]   ;;  %v3000_v20 = vrot.slane %v2569_v2, 1  ;;  %v9944_v2 = vld [vmem:[%s13653_s5 + $0x284] ss:$8 sps:$4 sm:$0xff]  }
 0x330   : > { %6087 = vmatprep.subr.bf16.mxu0 %v9917_v31 }
 0x331   : > { %7773 = vmatpush1.bf16.msra.mxu1 %v9909_v8  ;;  %v4610_v48 = vshll.u32 %v3000_v20, 16 }
 0x332   : > { %7774 = vmatprep.subr.bf16.mxu1 %v9914_v25 }
 0x333   : > { %6088 = vmatpush1.bf16.msra.mxu0 %v9915_v24  ;;  %4676 = vmatmul.mubr.bf16.gmra.mrb[92].mxu1 %v11902_v9  ;;  %v4612_v28 = vrot.slane %v4610_v48, 4 }
 0x334   : > { %8923 = vmatprep.mubr.msk.bf16.mxu1 %vm322_vm11, %v11911_v45  ;;  %6089 = vmatprep.subr.bf16.mxu0 %v9920_v63 }
 0x335   : > { %7775 = vmatpush1.bf16.msra.mxu1 %v9912_v32 }
 0x336   : > { %4551 = vmatmul.mubr.bf16.gmra.mrb[96].mxu0 %v11868_v54  ;;  %v2999_v54 = vrot.slane %v10162_v17, 1  ;;  %7776 = vmatprep.subr.bf16.mxu1 %v9917_v31 }
 0x337   : > { %8916 = vmatprep.mubr.msk.bf16.mxu0 %vm322_vm11, %v11877_v59  ;;  %6090 = vmatpush1.bf16.msra.mxu0 %v9918_v21  ;;  %v4607_v59 = vshrl.u32 %v3000_v20, 16 }
 0x338   : > { %6091 = vmatprep.subr.bf16.mxu0 %v9923_v61  ;;  %v3001_v37 = vsel %vm1051_vm3, %v2999_v54, %v3000_v20 }
 0x339   : > { %7777 = vmatpush1.bf16.msra.mxu1 %v9915_v24  ;;  %v4599_v42 = vshrl.u32 %v3001_v37, 16  ;;  %v4602_v14 = vshll.u32 %v3001_v37, 16  ;;  %v4609_v19 = vrot.slane %v4607_v59, 3 }
 0x33a   : > { %7778 = vmatprep.subr.bf16.mxu1 %v9920_v63 }
 0x33b   : > { %4684 = vmatmul.mubr.bf16.gmra.mrb[96].mxu1 %v11933_v50  ;;  %6092 = vmatpush1.bf16.msra.mxu0 %v9921_v23  ;;  %v4601_v62 = vrot.slane %v4599_v42, 3  ;;  %v4604_v7 = vrot.slane %v4602_v14, 4  ;;  %v4613_v6 = vor.u32 %v4612_v28, %v4609_v19 }
 0x33c   : > { %8924 = vmatprep.mubr.msk.bf16.mxu1 %vm322_vm11, %v11928_v11  ;;  %6093 = vmatprep.subr.bf16.mxu0 %v9926_v5 }
 0x33d   : > { %7779 = vmatpush1.bf16.msra.mxu1 %v9918_v21  ;;  %v4605_v34 = vor.u32 %v4604_v7, %v4601_v62 }
 0x33e   : > { %4559 = vmatmul.mubr.bf16.gmra.mrb[100].mxu0 %v11902_v9  ;;  %v9929_v9 = vld [vmem:[%s13653_s5 + $0x234] ss:$8 sps:$4 sm:$0xff]   ;;  %7780 = vmatprep.subr.bf16.mxu1 %v9923_v61 }
 0x33f   : > { %8917 = vmatprep.mubr.msk.bf16.mxu0 %vm322_vm11, %v11911_v45  ;;  %6094 = vmatpush1.bf16.msra.mxu0 %v9924_v38  ;;  %v10163_v45 = vld [vmem:[#allocation3 + $0x118] sm:$0xf] }
 0x340   : > { %v3091_v12 = vsel %vm322_vm11, %v10163_v45, %v2911_v51  ;;  %6095 = vmatprep.subr.bf16.mxu0 %v9929_v9 }
 0x341   : > { %7781 = vmatpush1.bf16.msra.mxu1 %v9921_v23  ;;  %v4590_v36 = vshrl.u32 %v3091_v12, 16  ;;  %v4593_v26 = vshll.u32 %v3091_v12, 16 }
 0x342   : > { %7782 = vmatprep.subr.bf16.mxu1 %v9926_v5 }
 0x343   : > { %4692 = vmatmul.mubr.bf16.gmra.mrb[100].mxu1 %v11950_v3  ;;  %6096 = vmatpush1.bf16.msra.mxu0 %v9927_v33  ;;  %v4592_v44 = vrot.slane %v4590_v36, 3  ;;  %v4595_v1 = vrot.slane %v4593_v26, 4 }
 0x344   : > { %8925 = vmatprep.mubr.msk.bf16.mxu1 %vm322_vm11, %v11954_v18  ;;  %6097 = vmatprep.subr.bf16.mxu0 %v9932_v40 }
 0x345   : > { %7783 = vmatpush1.bf16.msra.mxu1 %v9924_v38  ;;  %v4596_v18 = vor.u32 %v4595_v1, %v4592_v44 }
 0x346   : > { %4567 = vmatmul.mubr.bf16.gmra.mrb[104].mxu0 %v11933_v50  ;;  %v9935_v50 = vld [vmem:[%s13653_s5 + $0x254] ss:$8 sps:$4 sm:$0xff]   ;;  %7784 = vmatprep.subr.bf16.mxu1 %v9929_v9 }
 0x347   : > { %8918 = vmatprep.mubr.msk.bf16.mxu0 %vm322_vm11, %v11928_v11  ;;  %6098 = vmatpush1.bf16.msra.mxu0 %v9930_v49  ;;  %v4614_v11 = vsel %vm1353_vm8, %v4605_v34, %v4613_v6 }
 0x348   : > { %6099 = vmatprep.subr.bf16.mxu0 %v9935_v50 }
 0x349   : > { %7785 = vmatpush1.bf16.msra.mxu1 %v9927_v33 }
 0x34a   : > { %7786 = vmatprep.subr.bf16.mxu1 %v9932_v40 }
 0x34b   : > { %4700 = vmatmul.mubr.bf16.gmra.mrb[104].mxu1 %v11968_v13  ;;  %6100 = vmatpush1.bf16.msra.mxu0 %v9933_v27  ;;  %v4597_v13 = vsel %vm1353_vm8, %v4589_v58, %v4596_v18 }
 0x34c   : > { %8926 = vmatprep.mubr.msk.bf16.mxu1 %vm322_vm11, %v4614_v11  ;;  %6101 = vmatprep.subr.bf16.mxu0 %v9938_v16 }
 0x34d   : > { %7787 = vmatpush1.bf16.msra.mxu1 %v9930_v49 }
 0x34e   : > { %4575 = vmatmul.mubr.bf16.gmra.mrb[108].mxu0 %v11950_v3  ;;  %v9939_v3 = vld [vmem:[%s13653_s5 + $0x270] ss:$8 sps:$4 sm:$0xff]   ;;  %7788 = vmatprep.subr.bf16.mxu1 %v9935_v50 }
 0x34f   : > { %6102 = vmatpush1.bf16.msra.mxu0 %v9936_v10 }
 0x350   : > { %6103 = vmatprep.subr.bf16.mxu0 %v9941_v43 }
 0x351   : > { %7789 = vmatpush1.bf16.msra.mxu1 %v9933_v27 }
 0x352   : > { %7790 = vmatprep.subr.bf16.mxu1 %v9938_v16 }
 0x353   : > { %4708 = vmatmul.mubr.bf16.gmra.mrb[108].mxu1 %v4597_v13  ;;  %6104 = vmatpush1.bf16.msra.mxu0 %v9939_v3 }
 0x354   : > { %6186 = vmatprep.subr.bf16.mxu0 %v9944_v2 }
 0x355   : > { %7791 = vmatpush1.bf16.msra.mxu1 %v9936_v10 }
 0x356   : > { %7792 = vmatprep.subr.bf16.mxu1 %v9941_v43 }
 0x359   : > { %7793 = vmatpush1.bf16.msra.mxu1 %v9939_v3 }
 0x35a   : > { %7875 = vmatprep.subr.bf16.mxu1 %v9944_v2 }
 0x369   : > { %v3594_v53 = vpop.f32.mrb[16].mxu0 }
 0x36a   : > { %v3596_v30 = vpop.f32.mrb[17].mxu0 }
 0x36b   : > { %v3597_v47 = vpop.f32.mrb[18].mxu0 }
 0x36c   : > { %v3599_v46 = vpop.f32.mrb[19].mxu0  ;;  %v3766_v4 = vpop.f32.mrb[16].mxu1 }
 0x36d   : > { %v12110_v15 = vadd.f32 %v3766_v4, %v3594_v53  ;;  %v3768_v57 = vpop.f32.mrb[17].mxu1 }
 0x36e   : > { %v3769_v35 = vpop.f32.mrb[18].mxu1 }
 0x36f   : > { %v12112_v41 = vadd.f32 %v3769_v35, %v3597_v47  ;;  %v3771_v8 = vpop.f32.mrb[19].mxu1 }
 0x371   : > { %v3602_v25 = vpop.f32.mrb[20].mxu0 }
 0x372   : > { %v3604_v32 = vpop.f32.mrb[21].mxu0 }
 0x373   : > { %v3605_v31 = vpop.f32.mrb[22].mxu0 }
 0x374   : > { %v3607_v24 = vpop.f32.mrb[23].mxu0  ;;  %v3774_v21 = vpop.f32.mrb[20].mxu1 }
 0x375   : > { %v12117_v63 = vadd.f32 %v3774_v21, %v3602_v25  ;;  %v3776_v61 = vpop.f32.mrb[21].mxu1 }
 0x376   : > { %v3777_v17 = vpop.f32.mrb[22].mxu1 }
 0x377   : > { %v12119_v54 = vadd.f32 %v3777_v17, %v3605_v31  ;;  %v3779_v20 = vpop.f32.mrb[23].mxu1 }
 0x379   : > { %v3610_v23 = vpop.f32.mrb[24].mxu0 }
 0x37a   : > { %v3612_v37 = vpop.f32.mrb[25].mxu0 }
 0x37b   : > { %v3613_v59 = vpop.f32.mrb[26].mxu0  ;;  %v12148_v37 = vld [vmem:[%s13652_s4] ss:$0 sm:$0xff] }
 0x37c   : > { %v3615_v38 = vpop.f32.mrb[27].mxu0  ;;  %v3782_v5 = vpop.f32.mrb[24].mxu1 }
 0x37d   : > { %v12121_v51 = vadd.f32 %v3782_v5, %v3610_v23  ;;  %v3784_v42 = vpop.f32.mrb[25].mxu1 }
 0x37e   : > { %v3785_v14 = vpop.f32.mrb[26].mxu1 }
 0x37f   : > { %v12123_v48 = vadd.f32 %v3785_v14, %v3613_v59  ;;  %v3787_v9 = vpop.f32.mrb[27].mxu1 }
 0x381   : > { %v3618_v22 = vpop.f32.mrb[28].mxu0 }
 0x382   : > { %v3620_v39 = vpop.f32.mrb[29].mxu0 }
 0x383   : > { %v3621_v33 = vpop.f32.mrb[30].mxu0 }
 0x384   : > { %v3623_v45 = vpop.f32.mrb[31].mxu0  ;;  %v3790_v12 = vpop.f32.mrb[28].mxu1 }
 0x385   : > { %v12125_v19 = vadd.f32 %v3790_v12, %v3618_v22  ;;  %v3792_v55 = vpop.f32.mrb[29].mxu1 }
 0x386   : > { %v3793_v62 = vpop.f32.mrb[30].mxu1 }
 0x387   : > { %v12127_v7 = vadd.f32 %v3793_v62, %v3621_v33  ;;  %v3795_v28 = vpop.f32.mrb[31].mxu1 }
 0x389   : > { %v3626_v36 = vpop.f32.mrb[32].mxu0 }
 0x38a   : > { %v3628_v26 = vpop.f32.mrb[33].mxu0 }
 0x38b   : > { %v3629_v52 = vpop.f32.mrb[34].mxu0 }
 0x38c   : > { %v3631_v56 = vpop.f32.mrb[35].mxu0  ;;  %v3798_v49 = vpop.f32.mrb[32].mxu1 }
 0x38d   : > { %v12129_v40 = vadd.f32 %v3798_v49, %v3626_v36  ;;  %v3800_v34 = vpop.f32.mrb[33].mxu1 }
 0x38e   : > { %v3801_v6 = vpop.f32.mrb[34].mxu1 }
 0x38f   : > { %v12131_v50 = vadd.f32 %v3801_v6, %v3629_v52  ;;  %v3803_v27 = vpop.f32.mrb[35].mxu1 }
 0x391   : > { %v3634_v44 = vpop.f32.mrb[36].mxu0 }
 0x392   : > { %v3636_v1 = vpop.f32.mrb[37].mxu0 }
 0x393   : > { %v3637_v60 = vpop.f32.mrb[38].mxu0 }
 0x394   : > { %v3639_v29 = vpop.f32.mrb[39].mxu0  ;;  %v3806_v11 = vpop.f32.mrb[36].mxu1 }
 0x395   : > { %v12133_v18 = vadd.f32 %v3806_v11, %v3634_v44  ;;  %v3808_v58 = vpop.f32.mrb[37].mxu1 }
 0x396   : > { %v3809_v10 = vpop.f32.mrb[38].mxu1 }
 0x397   : > { %v12135_v16 = vadd.f32 %v3809_v10, %v3637_v60  ;;  %v3811_v43 = vpop.f32.mrb[39].mxu1 }
 0x399   : > { %v3642_v3 = vpop.f32.mrb[40].mxu0 }
 0x39a   : > { %v3644_v13 = vpop.f32.mrb[41].mxu0 }
 0x39b   : > { %v3645_v53 = vpop.f32.mrb[42].mxu0 }
 0x39c   : > { %v3647_v30 = vpop.f32.mrb[43].mxu0  ;;  %v3814_v47 = vpop.f32.mrb[40].mxu1 }
 0x39d   : > { %v12137_v46 = vadd.f32 %v3814_v47, %v3642_v3  ;;  %v3816_v4 = vpop.f32.mrb[41].mxu1 }
 0x39e   : > { %v3817_v57 = vpop.f32.mrb[42].mxu1 }
 0x39f   : > { %v12139_v35 = vadd.f32 %v3817_v57, %v3645_v53  ;;  %v3819_v8 = vpop.f32.mrb[43].mxu1 }
 0x3a1   : > { %v3650_v25 = vpop.f32.mrb[44].mxu0 }
 0x3a2   : > { %v3652_v32 = vpop.f32.mrb[45].mxu0 }
 0x3a3   : > { %v3653_v31 = vpop.f32.mrb[46].mxu0 }
 0x3a4   : > { %v3655_v24 = vpop.f32.mrb[47].mxu0  ;;  %v3822_v2 = vpop.f32.mrb[44].mxu1 }
 0x3a5   : > { %v12141_v21 = vadd.f32 %v3822_v2, %v3650_v25  ;;  %v3824_v61 = vpop.f32.mrb[45].mxu1 }
 0x3a6   : > { %v3825_v17 = vpop.f32.mrb[46].mxu1 }
 0x3a7   : > { %v12143_v20 = vadd.f32 %v3825_v17, %v3653_v31  ;;  %v3827_v23 = vpop.f32.mrb[47].mxu1 }
 0x3a9   : > { %v3971_v59 = vpop.f32.mrb[48].mxu0 }
 0x3aa   : > { %v4034_v38 = vadd.f32 %v3971_v59, %v12110_v15  ;;  %v3973_v5 = vpop.f32.mrb[49].mxu0 }
 0x3ab   : > { %v3974_v42 = vpop.f32.mrb[50].mxu0 }
 0x3ac   : > { %v4056_v14 = vadd.f32 %v12148_v37, %v4034_v38  ;;  %v4035_v9 = vadd.f32 %v3974_v42, %v12112_v41  ;;  %v3976_v22 = vpop.f32.mrb[51].mxu0 }
 0x3ae   : > { %v4057_v39 = vadd.f32 %v12148_v37, %v4035_v9  ;;  %v4072_v33 = vmax.f32 %v4056_v14, 0.0  ;;  %v12154_v12 = vpop.f32.mrb[48].mxu1 }
 0x3af   : > { %v4425_v62 = vpop.f32.mrb[49].mxu1 }
 0x3b0   : > { %v4073_v45 = vmax.f32 %v4057_v39, 0.0  ;;  %v12157_v15 = vpop.f32.mrb[50].mxu1 }
 0x3b1   : > { %v3979_v55 = vpop.f32.mrb[52].mxu0  ;;  %v4428_v56 = vpop.f32.mrb[51].mxu1 }
 0x3b2   : > { %v4088_v28 = vpack.c.bf16 %v4073_v45, %v4072_v33  ;;  %v4036_v36 = vadd.f32 %v3979_v55, %v12117_v63  ;;  %v3981_v26 = vpop.f32.mrb[53].mxu0 }
 0x3b3   : > { %v3982_v52 = vpop.f32.mrb[54].mxu0 }
 0x3b4   : > { %v4104_v49 = vrot.slane %v4088_v28, 4  ;;  %v4058_v41 = vadd.f32 %v12148_v37, %v4036_v36  ;;  %v4037_v34 = vadd.f32 %v3982_v52, %v12119_v54  ;;  %v3984_v6 = vpop.f32.mrb[55].mxu0 }
 0x3b6   : > { %4121 = vst [vmem:[#allocation4 + $0x18] ss:$-4 sps:$4 sm:$0xff] %v4104_v49   ;;  %v4059_v27 = vadd.f32 %v12148_v37, %v4037_v34  ;;  %v4074_v44 = vmax.f32 %v4058_v41, 0.0  ;;  %v12162_v60 = vpop.f32.mrb[52].mxu1 }
 0x3b7   : > { %v4433_v63 = vpop.f32.mrb[53].mxu1 }
 0x3b8   : > { %v4075_v1 = vmax.f32 %v4059_v27, 0.0  ;;  %v12165_v43 = vpop.f32.mrb[54].mxu1 }
 0x3b9   : > { %v3987_v29 = vpop.f32.mrb[56].mxu0  ;;  %v4436_v13 = vpop.f32.mrb[55].mxu1 }
 0x3ba   : > { %v4089_v11 = vpack.c.bf16 %v4075_v1, %v4074_v44  ;;  %v4038_v58 = vadd.f32 %v3987_v29, %v12121_v51  ;;  %v3989_v10 = vpop.f32.mrb[57].mxu0 }
 0x3bb   : > { %v3990_v3 = vpop.f32.mrb[58].mxu0 }
 0x3bc   : > { %v4105_v53 = vrot.slane %v4089_v11, 4  ;;  %v4060_v54 = vadd.f32 %v12148_v37, %v4038_v58  ;;  %v4039_v30 = vadd.f32 %v3990_v3, %v12123_v48  ;;  %v3992_v47 = vpop.f32.mrb[59].mxu0 }
 0x3bd   : > { %v4816_v4 = vld [vmem:[#allocation4 + $0x18] sm:$0xf]  ;;  %v4850_v57 = vld [vmem:[#allocation4 + $0x10] sm:$0xf0] }
 0x3be   : > { %v4815_v8 = vld [vmem:[#allocation4 + $0x10] sm:$0xf8]  ;;  %4123 = vst [vmem:[#allocation4 + $0x28] ss:$-4 sps:$4 sm:$0xff] %v4105_v53   ;;  %v4076_v25 = vmax.f32 %v4060_v54, 0.0  ;;  %v4061_v32 = vadd.f32 %v12148_v37, %v4039_v30  ;;  %v4901_v31 = vshrl.u32 %v4850_v57, 16 }
 0x3bf   : > { %v4903_v51 = vshll.u32 %v4850_v57, 16  ;;  %v4868_v24 = vld [vmem:[#allocation4 + $0x18] sm:$0x1f]  ;;  %v4908_v2 = vshll.u32 %v4816_v4, 16  ;;  %v4912_v61 = vshrl.u32 %v4816_v4, 16  ;;  %v5439_v17 = vshrl.u32 %v4815_v8, 16 }
 0x3c0   : > { %v5442_v23 = vshll.u32 %v4815_v8, 16  ;;  %v4077_v59 = vmax.f32 %v4061_v32, 0.0  ;;  %v12170_v38 = vpop.f32.mrb[56].mxu1  ;;  %v5194_v48 = vrot.slane %v4850_v57, 1  ;;  %v12172_v42 = vrot.slane %v4868_v24, 1 }
 0x3c1   : > { %v4905_v5 = vrot.slane %v4903_v51, 1  ;;  %v3995_v14 = vpop.f32.mrb[60].mxu0  ;;  %v4441_v9 = vpop.f32.mrb[57].mxu1  ;;  %v4910_v22 = vrot.slane %v4908_v2, 1  ;;  %v5441_v39 = vrot.slane %v5439_v17, 3  ;;  %v5446_v45 = vrot.slane %v4912_v61, 3 }
 0x3c2   : > { %v5444_v33 = vrot.slane %v5442_v23, 4  ;;  %v4090_v55 = vpack.c.bf16 %v4077_v59, %v4076_v25  ;;  %v4040_v62 = vadd.f32 %v3995_v14, %v12125_v19  ;;  %v3997_v28 = vpop.f32.mrb[61].mxu0  ;;  %v12175_v36 = vpop.f32.mrb[58].mxu1  ;;  %v5447_v52 = vrot.slane %v4908_v2, 4 }
 0x3c3   : > { %v4906_v26 = vor.u32 %v4905_v5, %v4901_v31  ;;  %v3998_v56 = vpop.f32.mrb[62].mxu0  ;;  %v4444_v49 = vpop.f32.mrb[59].mxu1  ;;  %v4914_v41 = vor.u32 %v4912_v61, %v4910_v22  ;;  %v12179_v6 = vsel %vm1051_vm3, %v5194_v48, %v12172_v42  ;;  %v5476_v27 = vshrl.u32 %v12172_v42, 16 }
 0x3c4   : > { %v5445_v34 = vor.u32 %v5444_v33, %v5441_v39  ;;  %v4106_v44 = vrot.slane %v4090_v55, 4  ;;  %v4062_v1 = vadd.f32 %v12148_v37, %v4040_v62  ;;  %v4041_v19 = vadd.f32 %v3998_v56, %v12127_v7  ;;  %v4000_v29 = vpop.f32.mrb[63].mxu0  ;;  %v9942_v62 = vld [vmem:[%s13653_s5 + $0x280] ss:$8 sps:$4 sm:$0xff]  }
 0x3c5   : > { %v4911_v63 = vsel %vm672_vm4, %v4906_v26, %v4910_v22  ;;  %v5459_v10 = vshrl.u32 %v4914_v41, 16  ;;  %v5462_v3 = vshll.u32 %v4914_v41, 16  ;;  %v4818_v13 = vld [vmem:[#allocation4 + $0x28] sm:$0xf]  ;;  %v5448_v30 = vor.u32 %v5447_v52, %v5446_v45  ;;  %v12186_v47 = vld [vmem:[#allocation4 + $0x20] sm:$0xf0] }
 0x3c6   : > { %v5451_v11 = vshrl.u32 %v4911_v63, 16  ;;  %v5454_v58 = vshll.u32 %v4911_v63, 16  ;;  %4125 = vst [vmem:[#allocation4 + $0x38] ss:$-4 sps:$4 sm:$0xff] %v4106_v44   ;;  %v4078_v53 = vmax.f32 %v4062_v1, 0.0  ;;  %v4063_v54 = vadd.f32 %v12148_v37, %v4041_v19  ;;  %v12188_v51 = vpop.f32.mrb[60].mxu1 }
 0x3c7   : > { %v4923_v4 = vshll.u32 %v4818_v13, 16  ;;  %v5461_v25 = vrot.slane %v5459_v10, 3  ;;  %v5464_v7 = vrot.slane %v5462_v3, 4  ;;  %v4817_v32 = vld [vmem:[#allocation4 + $0x20] sm:$0xf8]  ;;  %v12191_v24 = vsel %vm1353_vm8, %v5445_v34, %v5448_v30  ;;  %v4449_v23 = vpop.f32.mrb[61].mxu1 }
 0x3c8   : > { %v5453_v57 = vrot.slane %v5451_v11, 3  ;;  %v5456_v8 = vrot.slane %v5454_v58, 4  ;;  %v4079_v31 = vmax.f32 %v4063_v54, 0.0  ;;  %v4916_v2 = vshrl.u32 %v12186_v47, 16  ;;  %v12196_v33 = vpop.f32.mrb[62].mxu1 }
 0x3c9   : > { %v4918_v61 = vshll.u32 %v12186_v47, 16  ;;  %v4003_v17 = vpop.f32.mrb[64].mxu0  ;;  %v5465_v5 = vor.u32 %v5464_v7, %v5461_v25  ;;  %v4925_v48 = vrot.slane %v4923_v4, 1  ;;  %v4927_v14 = vshrl.u32 %v4818_v13, 16  ;;  %v4452_v26 = vpop.f32.mrb[63].mxu1 }
 0x3ca   : > { %v5457_v59 = vor.u32 %v5456_v8, %v5453_v57  ;;  %v4091_v9 = vpack.c.bf16 %v4079_v31, %v4078_v53  ;;  %v4042_v22 = vadd.f32 %v4003_v17, %v12129_v40  ;;  %v4005_v39 = vpop.f32.mrb[65].mxu0  ;;  %v5485_v55 = vshrl.u32 %v4817_v32, 16  ;;  %v9947_v40 = vld [vmem:[%s13653_s5 + $0x294] ss:$8 sps:$4 sm:$0xff]   ;;  %v9945_v3 = vld [vmem:[%s13653_s5 + $0x290] ss:$8 sps:$4 sm:$0xff]  }
 0x3cb   : > { %v4920_v45 = vrot.slane %v4918_v61, 1  ;;  %v4006_v28 = vpop.f32.mrb[66].mxu0  ;;  %v4929_v56 = vor.u32 %v4927_v14, %v4925_v48  ;;  %v5488_v49 = vshll.u32 %v4817_v32, 16  ;;  %v5492_v41 = vrot.slane %v4927_v14, 3  ;;  %v9950_v57 = vld [vmem:[%s13653_s5 + $0x2a4] ss:$8 sps:$4 sm:$0xff]  }
 0x3cc   : > { %v12202_v52 = vsel %vm1353_vm8, %v5457_v59, %v5465_v5  ;;  %v4107_v34 = vrot.slane %v4091_v9, 4  ;;  %v4064_v44 = vadd.f32 %v12148_v37, %v4042_v22  ;;  %v4043_v1 = vadd.f32 %v4006_v28, %v12131_v50  ;;  %v4008_v19 = vpop.f32.mrb[67].mxu0 }
 0x3cd   : > { %6105 = vmatprep.mubr.bf16.mxu0 %v12202_v52  ;;  %v4921_v29 = vor.u32 %v4920_v45, %v4916_v2  ;;  %v5505_v63 = vshrl.u32 %v4929_v56, 16  ;;  %v5508_v11 = vshll.u32 %v4929_v56, 16  ;;  %v5487_v58 = vrot.slane %v5485_v55, 3  ;;  %v4852_v30 = vld [vmem:[#allocation4 + $0x30] sm:$0xf0] }
 0x3ce   : > { %6106 = vmatmul.mubr.bf16.vlgmr.msra.gmra.mrb[112].mxu0 %v12191_v24  ;;  %v5490_v10 = vrot.slane %v5488_v49, 4  ;;  %4127 = vst [vmem:[#allocation4 + $0x48] ss:$-4 sps:$4 sm:$0xff] %v4107_v34   ;;  %v4080_v13 = vmax.f32 %v4064_v44, 0.0  ;;  %v4065_v53 = vadd.f32 %v12148_v37, %v4043_v1  ;;  %v5493_v54 = vrot.slane %v4923_v4, 4  ;;  %v12219_v61 = vpop.f32.mrb[64].mxu1 }
 0x3cf   : > { %v4926_v50 = vsel %vm672_vm4, %v4921_v29, %v4925_v48  ;;  %6187 = vmatpush1.bf16.msra.mxu0 %v9942_v62  ;;  %v5507_v7 = vrot.slane %v5505_v63, 3  ;;  %v5510_v32 = vrot.slane %v5508_v11, 4  ;;  %v4820_v31 = vld [vmem:[#allocation4 + $0x38] sm:$0xf]  ;;  %v4931_v59 = vshrl.u32 %v4852_v30, 16  ;;  %v4457_v14 = vpop.f32.mrb[65].mxu1 }
 0x3d0   : > { %v5497_v8 = vshrl.u32 %v4926_v50, 16  ;;  %v5500_v25 = vshll.u32 %v4926_v50, 16  ;;  %6188 = vmatprep.subr.bf16.mxu0 %v9947_v40  ;;  %v4081_v2 = vmax.f32 %v4065_v53, 0.0  ;;  %v5491_v17 = vor.u32 %v5490_v10, %v5487_v58  ;;  %v4819_v5 = vld [vmem:[#allocation4 + $0x30] sm:$0xf8]  ;;  %v12225_v26 = vpop.f32.mrb[66].mxu1 }
 0x3d1   : > { %v5494_v23 = vor.u32 %v5493_v54, %v5492_v41  ;;  %v9948_v4 = vld [vmem:[%s13653_s5 + $0x2a0] ss:$8 sps:$4 sm:$0xff]   ;;  %v4011_v48 = vpop.f32.mrb[68].mxu0  ;;  %v5511_v39 = vor.u32 %v5510_v32, %v5507_v7  ;;  %v4933_v45 = vshll.u32 %v4852_v30, 16  ;;  %v4938_v49 = vshll.u32 %v4820_v31, 16  ;;  %v4460_v34 = vpop.f32.mrb[67].mxu1 }
 0x3d2   : > { %v5499_v9 = vrot.slane %v5497_v8, 3  ;;  %v5502_v22 = vrot.slane %v5500_v25, 4  ;;  %v4092_v55 = vpack.c.bf16 %v4081_v2, %v4080_v13  ;;  %v4044_v62 = vadd.f32 %v4011_v48, %v12133_v18  ;;  %v4013_v28 = vpop.f32.mrb[69].mxu0  ;;  %v9953_v41 = vld [vmem:[%s13653_s5 + $0x2b4] ss:$8 sps:$4 sm:$0xff]  }
 0x3d3   : > { %v12228_v56 = vsel %vm1353_vm8, %v5491_v17, %v5494_v23  ;;  %6189 = vmatpush1.bf16.msra.mxu0 %v9945_v3  ;;  %v4014_v40 = vpop.f32.mrb[70].mxu0  ;;  %v4935_v1 = vrot.slane %v4933_v45, 1  ;;  %v4942_v19 = vshrl.u32 %v4820_v31, 16  ;;  %v5531_v29 = vshrl.u32 %v4819_v5, 16  ;;  %v9956_v17 = vld [vmem:[%s13653_s5 + $0x2c4] ss:$8 sps:$4 sm:$0xff]  }
 0x3d4   : > { %v5503_v44 = vor.u32 %v5502_v22, %v5499_v9  ;;  %6190 = vmatprep.subr.bf16.mxu0 %v9950_v57  ;;  %v4108_v18 = vrot.slane %v4092_v55, 4  ;;  %v4066_v63 = vadd.f32 %v12148_v37, %v4044_v62  ;;  %v4045_v11 = vadd.f32 %v4014_v40, %v12135_v16  ;;  %v4016_v58 = vpop.f32.mrb[71].mxu0  ;;  %v9951_v16 = vld [vmem:[%s13653_s5 + $0x2b0] ss:$8 sps:$4 sm:$0xff]   ;;  %v9954_v14 = vld [vmem:[%s13653_s5 + $0x2c0] ss:$8 sps:$4 sm:$0xff]  }
 0x3d5   : > { %v4940_v10 = vrot.slane %v4938_v49, 1  ;;  %v4936_v13 = vor.u32 %v4935_v1, %v4931_v59  ;;  %v5533_v53 = vrot.slane %v5531_v29, 3  ;;  %v5534_v50 = vshll.u32 %v4819_v5, 16  ;;  %v4853_v54 = vld [vmem:[#allocation4 + $0x40] sm:$0xf0] }
 0x3d6   : > { %v12236_v3 = vsel %vm1353_vm8, %v5503_v44, %v5511_v39  ;;  %4129 = vst [vmem:[#allocation4 + $0x58] ss:$-4 sps:$4 sm:$0xff] %v4108_v18   ;;  %v4082_v30 = vmax.f32 %v4066_v63, 0.0  ;;  %v4067_v8 = vadd.f32 %v12148_v37, %v4045_v11  ;;  %v5538_v25 = vrot.slane %v4942_v19, 3  ;;  %v12248_v59 = vpop.f32.mrb[68].mxu1 }
 0x3d7   : > { %6115 = vmatprep.mubr.bf16.mxu0 %v12236_v3  ;;  %v4944_v57 = vor.u32 %v4942_v19, %v4940_v10  ;;  %6191 = vmatpush1.bf16.msra.mxu0 %v9948_v4  ;;  %v4941_v7 = vsel %vm672_vm4, %v4936_v13, %v4940_v10  ;;  %v5536_v32 = vrot.slane %v5534_v50, 4  ;;  %v5539_v31 = vrot.slane %v4938_v49, 4  ;;  %v4465_v22 = vpop.f32.mrb[69].mxu1  ;;  %v4822_v62 = vld [vmem:[#allocation4 + $0x48] sm:$0xf] }
 0x3d8   : > { %6116 = vmatmul.mubr.bf16.gmra.mrb[116].mxu0 %v12228_v56  ;;  %v4946_v2 = vshrl.u32 %v4853_v54, 16  ;;  %6192 = vmatprep.subr.bf16.mxu0 %v9953_v41  ;;  %v4083_v23 = vmax.f32 %v4067_v8, 0.0  ;;  %v5543_v5 = vshrl.u32 %v4941_v7, 16  ;;  %v5546_v4 = vshll.u32 %v4941_v7, 16  ;;  %v9959_v49 = vld [vmem:[%s13653_s5 + $0x2d4] ss:$8 sps:$4 sm:$0xff]  }
 0x3d9   : > { %v5551_v48 = vshrl.u32 %v4944_v57, 16  ;;  %v4019_v9 = vpop.f32.mrb[72].mxu0  ;;  %v5554_v39 = vshll.u32 %v4944_v57, 16  ;;  %v5537_v45 = vor.u32 %v5536_v32, %v5533_v53  ;;  %v5540_v55 = vor.u32 %v5539_v31, %v5538_v25  ;;  %v12257_v44 = vpop.f32.mrb[70].mxu1  ;;  %v4821_v29 = vld [vmem:[#allocation4 + $0x40] sm:$0xf8] }
 0x3da   : > { %v4948_v28 = vshll.u32 %v4853_v54, 16  ;;  %v4093_v41 = vpack.c.bf16 %v4083_v23, %v4082_v30  ;;  %v4046_v40 = vadd.f32 %v4019_v9, %v12137_v46  ;;  %v4021_v34 = vpop.f32.mrb[73].mxu0  ;;  %v5545_v1 = vrot.slane %v5543_v5, 3  ;;  %v4468_v63 = vpop.f32.mrb[71].mxu1  ;;  %v9962_v9 = vld [vmem:[%s13653_s5 + $0x2e4] ss:$8 sps:$4 sm:$0xff]  }
 0x3db   : > { %v5548_v19 = vrot.slane %v5546_v4, 4  ;;  %6193 = vmatpush1.bf16.msra.mxu0 %v9951_v16  ;;  %v4022_v18 = vpop.f32.mrb[74].mxu0  ;;  %v5553_v11 = vrot.slane %v5551_v48, 3  ;;  %v5556_v58 = vrot.slane %v5554_v39, 4  ;;  %v12260_v10 = vsel %vm1353_vm8, %v5537_v45, %v5540_v55 }
 0x3dc   : > { %v4950_v13 = vrot.slane %v4948_v28, 1  ;;  %6194 = vmatprep.subr.bf16.mxu0 %v9956_v17  ;;  %v4109_v53 = vrot.slane %v4093_v41, 4  ;;  %v4068_v50 = vadd.f32 %v12148_v37, %v4046_v40  ;;  %v4047_v46 = vadd.f32 %v4022_v18, %v12139_v35  ;;  %v4024_v54 = vpop.f32.mrb[75].mxu0  ;;  %v9957_v17 = vld [vmem:[%s13653_s5 + $0x2d0] ss:$8 sps:$4 sm:$0xff]  }
 0x3dd   : > { %v5549_v30 = vor.u32 %v5548_v19, %v5545_v1  ;;  %v5557_v8 = vor.u32 %v5556_v58, %v5553_v11  ;;  %v4953_v25 = vshll.u32 %v4822_v62, 16  ;;  %v4957_v16 = vshrl.u32 %v4822_v62, 16  ;;  %v4854_v7 = vld [vmem:[#allocation4 + $0x50] sm:$0xf0]  ;;  %v9960_v62 = vld [vmem:[%s13653_s5 + $0x2e0] ss:$8 sps:$4 sm:$0xff]  }
 0x3de   : > { %v4951_v57 = vor.u32 %v4950_v13, %v4946_v2  ;;  %4131 = vst [vmem:[#allocation4 + $0x68] ss:$-4 sps:$4 sm:$0xff] %v4109_v53   ;;  %v4084_v32 = vmax.f32 %v4068_v50, 0.0  ;;  %v4069_v31 = vadd.f32 %v12148_v37, %v4047_v46  ;;  %v5577_v23 = vshrl.u32 %v4821_v29, 16  ;;  %v12275_v39 = vpop.f32.mrb[72].mxu1 }
 0x3df   : > { %v5580_v5 = vshll.u32 %v4821_v29, 16  ;;  %6195 = vmatpush1.bf16.msra.mxu0 %v9954_v14  ;;  %v12269_v35 = vsel %vm1353_vm8, %v5549_v30, %v5557_v8  ;;  %v4955_v4 = vrot.slane %v4953_v25, 1  ;;  %v5584_v48 = vrot.slane %v4957_v16, 3  ;;  %v9965_v19 = vld [vmem:[%s13653_s5 + $0x2f4] ss:$8 sps:$4 sm:$0xff]  }
 0x3e0   : > { %v5585_v2 = vrot.slane %v4953_v25, 4  ;;  %6196 = vmatprep.subr.bf16.mxu0 %v9959_v49  ;;  %v4085_v22 = vmax.f32 %v4069_v31, 0.0  ;;  %6125 = vmatprep.mubr.bf16.mxu0 %v12269_v35  ;;  %v5579_v14 = vrot.slane %v5577_v23, 3  ;;  %v4961_v55 = vshrl.u32 %v4854_v7, 16  ;;  %v4473_v49 = vpop.f32.mrb[73].mxu1 }
 0x3e1   : > { %v5582_v45 = vrot.slane %v5580_v5, 4  ;;  %6126 = vmatmul.mubr.bf16.gmra.mrb[120].mxu0 %v12260_v10  ;;  %v4027_v28 = vpop.f32.mrb[76].mxu0  ;;  %v4956_v41 = vsel %vm672_vm4, %v4951_v57, %v4955_v4  ;;  %v4959_v40 = vor.u32 %v4957_v16, %v4955_v4  ;;  %v4963_v1 = vshll.u32 %v4854_v7, 16  ;;  %v12286_v11 = vpop.f32.mrb[74].mxu1  ;;  %v4824_v53 = vld [vmem:[#allocation4 + $0x58] sm:$0xf] }
 0x3e2   : > { %v5586_v34 = vor.u32 %v5585_v2, %v5584_v48  ;;  %v4094_v29 = vpack.c.bf16 %v4085_v22, %v4084_v32  ;;  %v4048_v18 = vadd.f32 %v4027_v28, %v12141_v21  ;;  %v4029_v63 = vpop.f32.mrb[77].mxu0  ;;  %v5589_v58 = vshrl.u32 %v4956_v41, 16  ;;  %v4476_v46 = vpop.f32.mrb[75].mxu1  ;;  %v4823_v31 = vld [vmem:[#allocation4 + $0x50] sm:$0xf8] }
 0x3e3   : > { %v5592_v13 = vshll.u32 %v4956_v41, 16  ;;  %6197 = vmatpush1.bf16.msra.mxu0 %v9957_v17  ;;  %v4030_v50 = vpop.f32.mrb[78].mxu0  ;;  %v5597_v54 = vshrl.u32 %v4959_v40, 16  ;;  %v5600_v30 = vshll.u32 %v4959_v40, 16  ;;  %v5583_v8 = vor.u32 %v5582_v45, %v5579_v14  ;;  %v9963_v41 = vld [vmem:[%s13653_s5 + $0x2f0] ss:$8 sps:$4 sm:$0xff]  }
 0x3e4   : > { %v4965_v57 = vrot.slane %v4963_v1, 1  ;;  %6198 = vmatprep.subr.bf16.mxu0 %v9962_v9  ;;  %v4110_v25 = vrot.slane %v4094_v29, 4  ;;  %v4070_v16 = vadd.f32 %v12148_v37, %v4048_v18  ;;  %v4049_v7 = vadd.f32 %v4030_v50, %v12143_v20  ;;  %v4032_v21 = vpop.f32.mrb[79].mxu0  ;;  %v9968_v40 = vld [vmem:[%s13653_s5 + $0x4] ss:$8 sps:$4 sm:$0xff]  }
 0x3e5   : > { %v5591_v32 = vrot.slane %v5589_v58, 3  ;;  %v5594_v23 = vrot.slane %v5592_v13, 4  ;;  %v5599_v5 = vrot.slane %v5597_v54, 3  ;;  %v5602_v4 = vrot.slane %v5600_v30, 4  ;;  %v12294_v14 = vld [vmem:[#allocation4 + $0x60] sm:$0xf0] }
 0x3e6   : > { %v12291_v17 = vsel %vm1353_vm8, %v5583_v8, %v5586_v34  ;;  %4133 = vst [vmem:[#allocation4 + $0x78] ss:$-4 sps:$4 sm:$0xff] %v4110_v25   ;;  %v4086_v48 = vmax.f32 %v4070_v16, 0.0  ;;  %v4071_v2 = vadd.f32 %v12148_v37, %v4049_v7  ;;  %v4966_v22 = vor.u32 %v4965_v57, %v4961_v55  ;;  %v12302_v1 = vpop.f32.mrb[76].mxu1  ;;  %v4826_v25 = vld [vmem:[#allocation4 + $0x68] sm:$0xf] }
 0x3e7   : > { %v4968_v9 = vshll.u32 %v4824_v53, 16  ;;  %6199 = vmatpush1.bf16.msra.mxu0 %v9960_v62  ;;  %v5595_v45 = vor.u32 %v5594_v23, %v5591_v32  ;;  %v5603_v20 = vor.u32 %v5602_v4, %v5599_v5  ;;  %v4972_v28 = vshrl.u32 %v4824_v53, 16  ;;  %v4481_v63 = vpop.f32.mrb[77].mxu1 }
 0x3e8   : > { %v5623_v49 = vshrl.u32 %v4823_v31, 16  ;;  %6200 = vmatprep.subr.bf16.mxu0 %v9965_v19  ;;  %v4087_v34 = vmax.f32 %v4071_v2, 0.0  ;;  %v5626_v29 = vshll.u32 %v4823_v31, 16  ;;  %v4976_v50 = vshrl.u32 %v12294_v14, 16  ;;  %v12310_v54 = vpop.f32.mrb[78].mxu1 }
 0x3e9   : > { %v4970_v55 = vrot.slane %v4968_v9, 1  ;;  %v5631_v18 = vrot.slane %v4968_v9, 4  ;;  %v12305_v62 = vsel %vm1353_vm8, %v5595_v45, %v5603_v20  ;;  %v4520_v58 = vpop.f32.mrb[80].mxu0  ;;  %v5630_v53 = vrot.slane %v4972_v28, 3  ;;  %v4484_v16 = vpop.f32.mrb[79].mxu1 }
 0x3ea   : > { %v5625_v13 = vrot.slane %v5623_v49, 3  ;;  %v4095_v19 = vpack.c.bf16 %v4087_v34, %v4086_v48  ;;  %6135 = vmatprep.mubr.bf16.mxu0 %v12305_v62  ;;  %v4521_v46 = vadd.f32 %v4520_v58, %v12154_v12  ;;  %v4522_v30 = vpop.f32.mrb[81].mxu0  ;;  %v5628_v31 = vrot.slane %v5626_v29, 4  ;;  %v4825_v9 = vld [vmem:[#allocation4 + $0x60] sm:$0xf8] }
 0x3eb   : > { %v4971_v8 = vsel %vm672_vm4, %v4966_v22, %v4970_v55  ;;  %v4974_v57 = vor.u32 %v4972_v28, %v4970_v55  ;;  %6136 = vmatmul.mubr.bf16.gmra.mrb[124].mxu0 %v12291_v17  ;;  %v4523_v7 = vpop.f32.mrb[82].mxu0  ;;  %v5632_v23 = vor.u32 %v5631_v18, %v5630_v53  ;;  %v4978_v28 = vshll.u32 %v12294_v14, 16 }
 0x3ec   : > { %v5635_v21 = vshrl.u32 %v4971_v8, 16  ;;  %v5638_v32 = vshll.u32 %v4971_v8, 16  ;;  %v4111_v5 = vrot.slane %v4095_v19, 4  ;;  %v4524_v4 = vadd.f32 %v4523_v7, %v12157_v15  ;;  %v4525_v48 = vpop.f32.mrb[83].mxu0  ;;  %6201 = vmatpush1.bf16.msra.mxu0 %v9963_v41 }
 0x3ed   : > { %v5643_v12 = vshrl.u32 %v4974_v57, 16  ;;  %v5646_v2 = vshll.u32 %v4974_v57, 16  ;;  %v5629_v20 = vor.u32 %v5628_v31, %v5625_v13  ;;  %6539 = vmatprep.subr.bf16.mxu0 %v9968_v40  ;;  %v4983_v55 = vshll.u32 %v4826_v25, 16 }
 0x3ee   : > { %v5637_v45 = vrot.slane %v5635_v21, 3  ;;  %v5640_v22 = vrot.slane %v5638_v32, 4  ;;  %4135 = vst [vmem:[#allocation4 + $0x88] ss:$-4 sps:$4 sm:$0xff] %v4111_v5   ;;  %v4987_v29 = vshrl.u32 %v4826_v25, 16  ;;  %v4980_v15 = vrot.slane %v4978_v28, 1 }
 0x3ef   : > { %v5645_v49 = vrot.slane %v5643_v12, 3  ;;  %v5648_v34 = vrot.slane %v5646_v2, 4  ;;  %v12317_v63 = vsel %vm1353_vm8, %v5629_v20, %v5632_v23  ;;  %v5669_v58 = vshrl.u32 %v4825_v9, 16  ;;  %v4653_v19 = vpop.f32.mrb[80].mxu1 }
 0x3f0   : > { %v5641_v18 = vor.u32 %v5640_v22, %v5637_v45  ;;  %v4985_v41 = vrot.slane %v4983_v55, 1  ;;  %v5672_v30 = vshll.u32 %v4825_v9, 16  ;;  %v5676_v8 = vrot.slane %v4987_v29, 3  ;;  %v4655_v14 = vpop.f32.mrb[81].mxu1  ;;  %v4856_v45 = vld [vmem:[#allocation4 + $0x70] sm:$0xf0] }
 0x3f1   : > { %v5649_v53 = vor.u32 %v5648_v34, %v5645_v49  ;;  %v4716_v13 = vadd.f32 %v4653_v19, %v4521_v46  ;;  %v4528_v57 = vpop.f32.mrb[84].mxu0  ;;  %v4981_v40 = vor.u32 %v4980_v15, %v4976_v50  ;;  %v5671_v16 = vrot.slane %v5669_v58, 3  ;;  %v4656_v31 = vpop.f32.mrb[82].mxu1  ;;  %v4827_v15 = vld [vmem:[#allocation4 + $0x70] sm:$0xf8] }
 0x3f2   : > { %v5677_v7 = vrot.slane %v4983_v55, 4  ;;  %v4529_v25 = vadd.f32 %v4528_v57, %v12162_v60  ;;  %v4530_v32 = vpop.f32.mrb[85].mxu0  ;;  %v4989_v23 = vor.u32 %v4987_v29, %v4985_v41  ;;  %v5674_v5 = vrot.slane %v5672_v30, 4  ;;  %v4658_v2 = vpop.f32.mrb[83].mxu1 }
 0x3f3   : > { %v12320_v21 = vsel %vm1353_vm8, %v5641_v18, %v5649_v53  ;;  %v4732_v48 = vadd.f32 %v12148_v37, %v4716_v13  ;;  %v4717_v12 = vadd.f32 %v4656_v31, %v4524_v4  ;;  %v4531_v46 = vpop.f32.mrb[86].mxu0  ;;  %v4986_v50 = vsel %vm672_vm4, %v4981_v40, %v4985_v41  ;;  %v4828_v4 = vld [vmem:[#allocation4 + $0x78] sm:$0xf] }
 0x3f4   : > { %6145 = vmatprep.mubr.bf16.mxu0 %v12320_v21  ;;  %v5678_v9 = vor.u32 %v5677_v7, %v5676_v8  ;;  %v4532_v22 = vadd.f32 %v4531_v46, %v12165_v43  ;;  %v4533_v60 = vpop.f32.mrb[87].mxu0  ;;  %v5681_v20 = vshrl.u32 %v4986_v50, 16  ;;  %v5684_v28 = vshll.u32 %v4986_v50, 16 }
 0x3f5   : > { %6146 = vmatmul.mubr.bf16.gmra.mrb[128].mxu0 %v12317_v63  ;;  %v5689_v49 = vshrl.u32 %v4989_v23, 16  ;;  %v4748_v34 = vmax.f32 %v4732_v48, 0.0  ;;  %v4733_v55 = vadd.f32 %v12148_v37, %v4717_v12  ;;  %v5692_v29 = vshll.u32 %v4989_v23, 16 }
 0x3f6   : > { %v5675_v18 = vor.u32 %v5674_v5, %v5671_v16  ;;  %v5683_v58 = vrot.slane %v5681_v20, 3  ;;  %v5686_v53 = vrot.slane %v5684_v28, 4  ;;  %v4991_v41 = vshrl.u32 %v4856_v45, 16  ;;  %v4661_v14 = vpop.f32.mrb[84].mxu1 }
 0x3f7   : > { %v5691_v19 = vrot.slane %v5689_v49, 3  ;;  %v4749_v30 = vmax.f32 %v4733_v55, 0.0  ;;  %v5694_v8 = vrot.slane %v5692_v29, 4  ;;  %v4993_v43 = vshll.u32 %v4856_v45, 16  ;;  %v4663_v48 = vpop.f32.mrb[85].mxu1 }
 0x3f8   : > { %v12330_v13 = vsel %vm1353_vm8, %v5675_v18, %v5678_v9  ;;  %v5687_v57 = vor.u32 %v5686_v53, %v5683_v58  ;;  %v4998_v40 = vshll.u32 %v4828_v4, 16  ;;  %v5002_v7 = vshrl.u32 %v4828_v4, 16  ;;  %v4664_v50 = vpop.f32.mrb[86].mxu1 }
 0x3f9   : > { %v5715_v32 = vshrl.u32 %v4827_v15, 16  ;;  %v4764_v31 = vpack.c.bf16 %v4749_v30, %v4748_v34  ;;  %v5695_v23 = vor.u32 %v5694_v8, %v5691_v19  ;;  %v4718_v16 = vadd.f32 %v4661_v14, %v4529_v25  ;;  %v4536_v5 = vpop.f32.mrb[88].mxu0  ;;  %v4666_v29 = vpop.f32.mrb[87].mxu1  ;;  %v4857_v8 = vld [vmem:[#allocation4 + $0x80] sm:$0xf0] }
 0x3fa   : > { %v4995_v12 = vrot.slane %v4993_v43, 1  ;;  %v4537_v46 = vadd.f32 %v4536_v5, %v12170_v38  ;;  %v4538_v2 = vpop.f32.mrb[89].mxu0  ;;  %v5000_v60 = vrot.slane %v4998_v40, 1  ;;  %v5718_v9 = vshll.u32 %v4827_v15, 16 }
 0x3fb   : > { %v5717_v20 = vrot.slane %v5715_v32, 3  ;;  %v4780_v28 = vrot.slane %v4764_v31, 4  ;;  %v12334_v45 = vsel %vm1353_vm8, %v5687_v57, %v5695_v23  ;;  %v4734_v49 = vadd.f32 %v12148_v37, %v4718_v16  ;;  %v4539_v34 = vpop.f32.mrb[90].mxu0  ;;  %v4830_v23 = vld [vmem:[#allocation4 + $0x88] sm:$0xf] }
 0x3fc   : > { %v4719_v55 = vadd.f32 %v4664_v50, %v4532_v22  ;;  %6155 = vmatprep.mubr.bf16.mxu0 %v12334_v45  ;;  %v4540_v25 = vadd.f32 %v4539_v34, %v12175_v36  ;;  %v4541_v18 = vpop.f32.mrb[91].mxu0  ;;  %v4996_v38 = vor.u32 %v4995_v12, %v4991_v41  ;;  %v5004_v4 = vor.u32 %v5002_v7, %v5000_v60 }
 0x3fd   : > { %v5720_v58 = vrot.slane %v5718_v9, 4  ;;  %4797 = vst [vmem:[#allocation4 + $0x98] ss:$-4 sps:$4 sm:$0xff] %v4780_v28   ;;  %6156 = vmatmul.mubr.bf16.gmra.mrb[132].mxu0 %v12330_v13  ;;  %v4750_v15 = vmax.f32 %v4734_v49, 0.0  ;;  %v5722_v19 = vrot.slane %v5002_v7, 3  ;;  %v5723_v30 = vrot.slane %v4998_v40, 4 }
 0x3fe   : > { %v4735_v53 = vadd.f32 %v12148_v37, %v4719_v55  ;;  %v5001_v22 = vsel %vm672_vm4, %v4996_v38, %v5000_v60  ;;  %v5735_v43 = vshrl.u32 %v5004_v4, 16  ;;  %v5738_v57 = vshll.u32 %v5004_v4, 16  ;;  %v4669_v48 = vpop.f32.mrb[88].mxu1  ;;  %v4829_v38 = vld [vmem:[#allocation4 + $0x80] sm:$0xf8] }
 0x3ff   : > { %v5721_v14 = vor.u32 %v5720_v58, %v5717_v20  ;;  %v5727_v36 = vshrl.u32 %v5001_v22, 16  ;;  %v5730_v31 = vshll.u32 %v5001_v22, 16  ;;  %v5724_v41 = vor.u32 %v5723_v30, %v5722_v19  ;;  %v4671_v28 = vpop.f32.mrb[89].mxu1 }
 0x400   : > { %v4751_v32 = vmax.f32 %v4735_v53, 0.0  ;;  %v5737_v16 = vrot.slane %v5735_v43, 3  ;;  %v5740_v5 = vrot.slane %v5738_v57, 4  ;;  %v5006_v12 = vshrl.u32 %v4857_v8, 16  ;;  %v4672_v29 = vpop.f32.mrb[90].mxu1 }
 0x401   : > { %v5008_v2 = vshll.u32 %v4857_v8, 16  ;;  %v5729_v9 = vrot.slane %v5727_v36, 3  ;;  %v5732_v7 = vrot.slane %v5730_v31, 4  ;;  %v12343_v40 = vsel %vm1353_vm8, %v5721_v14, %v5724_v41  ;;  %v4544_v60 = vpop.f32.mrb[92].mxu0 }
 0x402   : > { %v4765_v50 = vpack.c.bf16 %v4751_v32, %v4750_v15  ;;  %13721 = vst [vmem:[#allocation8_spill] sm:$0xff] %v12343_v40  ;;  %v5741_v49 = vor.u32 %v5740_v5, %v5737_v16  ;;  %v4720_v20 = vadd.f32 %v4669_v48, %v4537_v46  ;;  %v4545_v55 = vadd.f32 %v4544_v60, %v12188_v51  ;;  %v4546_v34 = vpop.f32.mrb[93].mxu0  ;;  %v4674_v15 = vpop.f32.mrb[91].mxu1 }
 0x403   : > { %v5010_v18 = vrot.slane %v5008_v2, 1  ;;  %v5733_v58 = vor.u32 %v5732_v7, %v5729_v9  ;;  %v4721_v53 = vadd.f32 %v4672_v29, %v4540_v25  ;;  %v4547_v19 = vpop.f32.mrb[94].mxu0  ;;  %v5013_v30 = vshll.u32 %v4830_v23, 16 }
 0x404   : > { %v4781_v4 = vrot.slane %v4765_v50, 4  ;;  %v4736_v8 = vadd.f32 %v12148_v37, %v4720_v20  ;;  %v4548_v22 = vadd.f32 %v4547_v19, %v12196_v33  ;;  %v4549_v43 = vpop.f32.mrb[95].mxu0  ;;  %v5017_v14 = vshrl.u32 %v4830_v23, 16  ;;  %v4858_v15 = vld [vmem:[#allocation4 + $0x90] sm:$0xf0] }
 0x405   : > { %v5011_v57 = vor.u32 %v5010_v18, %v5006_v12  ;;  %v12349_v51 = vsel %vm1353_vm8, %v5733_v58, %v5741_v49  ;;  %v4737_v46 = vadd.f32 %v12148_v37, %v4721_v53  ;;  %v5015_v32 = vrot.slane %v5013_v30, 1 }
 0x406   : > { %4799 = vst [vmem:[#allocation4 + $0xa8] ss:$-4 sps:$4 sm:$0xff] %v4781_v4   ;;  %v5785_v36 = vshrl.u32 %v4829_v38, 16  ;;  %6165 = vmatprep.mubr.bf16.mxu0 %v12349_v51  ;;  %v4752_v25 = vmax.f32 %v4736_v8, 0.0  ;;  %v5788_v31 = vshll.u32 %v4829_v38, 16  ;;  %v5792_v41 = vrot.slane %v5017_v14, 3 }
 0x407   : > { %v5793_v16 = vrot.slane %v5013_v30, 4  ;;  %6166 = vmatmul.mubr.bf16.gmra.mrb[136].mxu0 %v12343_v40  ;;  %v4753_v33 = vmax.f32 %v4737_v46, 0.0  ;;  %v5016_v5 = vsel %vm672_vm4, %v5011_v57, %v5015_v32  ;;  %v5019_v23 = vor.u32 %v5017_v14, %v5015_v32  ;;  %v4677_v7 = vpop.f32.mrb[92].mxu1 }
 0x408   : > { %v5787_v48 = vrot.slane %v5785_v36, 3  ;;  %v5797_v12 = vshrl.u32 %v5016_v5, 16  ;;  %v5800_v2 = vshll.u32 %v5016_v5, 16  ;;  %v5790_v50 = vrot.slane %v5788_v31, 4  ;;  %v4679_v29 = vpop.f32.mrb[93].mxu1 }
 0x409   : > { %v5794_v9 = vor.u32 %v5793_v16, %v5792_v41  ;;  %v4766_v60 = vpack.c.bf16 %v4753_v33, %v4752_v25  ;;  %v5805_v28 = vshrl.u32 %v5019_v23, 16  ;;  %v5808_v49 = vshll.u32 %v5019_v23, 16  ;;  %v4552_v34 = vpop.f32.mrb[96].mxu0  ;;  %v4680_v19 = vpop.f32.mrb[94].mxu1  ;;  %v4832_v5 = vld [vmem:[#allocation4 + $0x98] sm:$0xf] }
 0x40a   : > { %v4722_v20 = vadd.f32 %v4677_v7, %v4545_v55  ;;  %v5799_v18 = vrot.slane %v5797_v12, 3  ;;  %v5802_v38 = vrot.slane %v5800_v2, 4  ;;  %v5791_v4 = vor.u32 %v5790_v50, %v5787_v48  ;;  %v4554_v53 = vpop.f32.mrb[97].mxu0  ;;  %v4682_v46 = vpop.f32.mrb[95].mxu1  ;;  %v4831_v12 = vld [vmem:[#allocation4 + $0x90] sm:$0xf8] }
 0x40b   : > { %v4553_v58 = vadd.f32 %v4552_v34, %v12219_v61  ;;  %v4782_v30 = vrot.slane %v4766_v60, 4  ;;  %v5807_v8 = vrot.slane %v5805_v28, 3  ;;  %v5810_v43 = vrot.slane %v5808_v49, 4  ;;  %v4555_v14 = vpop.f32.mrb[98].mxu0 }
 0x40c   : > { %v4738_v57 = vadd.f32 %v12148_v37, %v4722_v20  ;;  %v5803_v32 = vor.u32 %v5802_v38, %v5799_v18  ;;  %v12358_v55 = vsel %vm1353_vm8, %v5791_v4, %v5794_v9  ;;  %v4723_v36 = vadd.f32 %v4680_v19, %v4548_v22  ;;  %v4557_v31 = vpop.f32.mrb[99].mxu0  ;;  %v12366_v37 = vld [vmem:[%s13652_s4] ss:$0 sm:$0xff] }
 0x40d   : > { %13722 = vst [vmem:[#allocation9_spill] sm:$0xff] %v12358_v55  ;;  %v4556_v25 = vadd.f32 %v4555_v14, %v12225_v26  ;;  %4801 = vst [vmem:[#allocation4 + $0xb8] ss:$-4 sps:$4 sm:$0xff] %v4782_v30   ;;  %v5811_v61 = vor.u32 %v5810_v43, %v5807_v8  ;;  %v5468_v16 = vshrl.u32 %v12179_v6, 16  ;;  %v5471_v33 = vshll.u32 %v12179_v6, 16 }
 0x40e   : > { %v4754_v41 = vmax.f32 %v4738_v57, 0.0  ;;  %v4739_v23 = vadd.f32 %v12366_v37, %v4723_v36  ;;  %v5478_v22 = vrot.slane %v5476_v27, 3  ;;  %v5479_v26 = vshll.u32 %v12172_v42, 16  ;;  %v4685_v28 = vpop.f32.mrb[96].mxu1 }
 0x40f   : > { %v5021_v48 = vshrl.u32 %v4858_v15, 16  ;;  %v12373_v2 = vsel %vm1353_vm8, %v5803_v32, %v5811_v61  ;;  %v5470_v50 = vrot.slane %v5468_v16, 3  ;;  %v5473_v6 = vrot.slane %v5471_v33, 4  ;;  %v4687_v29 = vpop.f32.mrb[97].mxu1 }
 0x410   : > { %13723 = vst [vmem:[#allocation10_spill] sm:$0xff] %v12373_v2  ;;  %v5023_v9 = vshll.u32 %v4858_v15, 16  ;;  %6175 = vmatprep.mubr.bf16.mxu0 %v12373_v2  ;;  %v4755_v7 = vmax.f32 %v4739_v23, 0.0  ;;  %v5481_v60 = vrot.slane %v5479_v26, 4  ;;  %v5028_v49 = vshll.u32 %v4832_v5, 16  ;;  %v4688_v30 = vpop.f32.mrb[98].mxu1 }
 0x411   : > { %v5032_v20 = vshrl.u32 %v4832_v5, 16  ;;  %6176 = vmatmul.mubr.bf16.gmra.mrb[140].mxu0 %v12358_v55  ;;  %v5474_v27 = vor.u32 %v5473_v6, %v5470_v50  ;;  %v4724_v34 = vadd.f32 %v4685_v28, %v4553_v58  ;;  %v4560_v42 = vpop.f32.mrb[100].mxu0  ;;  %v6766_v38 = vshrl.u32 %v4831_v12, 16  ;;  %v4690_v46 = vpop.f32.mrb[99].mxu1  ;;  %v4869_v28 = vld [vmem:[#allocation4 + $0x28] sm:$0x1f] }
 0x412   : > { %v5025_v18 = vrot.slane %v5023_v9, 1  ;;  %v4767_v4 = vpack.c.bf16 %v4755_v7, %v4754_v41  ;;  %6218 = vmatprep.mubr.bf16.mxu0 %v13656_v0  ;;  %v5482_v53 = vor.u32 %v5481_v60, %v5478_v22  ;;  %v4561_v19 = vadd.f32 %v4560_v42, %v12248_v59  ;;  %v4562_v15 = vpop.f32.mrb[101].mxu0  ;;  %v9966_v59 = vld [vmem:[%s13653_s5] ss:$8 sps:$4 sm:$0xff]   ;;  %v9971_v22 = vld [vmem:[%s13653_s5 + $0x14] ss:$8 sps:$4 sm:$0xff]  }
 0x413   : > { %v5030_v8 = vrot.slane %v5028_v49, 1  ;;  %v4740_v43 = vadd.f32 %v12366_v37, %v4724_v34  ;;  %v4725_v57 = vadd.f32 %v4688_v30, %v4556_v25  ;;  %v4563_v14 = vpop.f32.mrb[102].mxu0  ;;  %v6768_v58 = vrot.slane %v6766_v38, 3  ;;  %v10185_v55 = vld [vmem:[#allocation4 + $0x70] sm:$0xf0] }
 0x414   : > { %v5026_v32 = vor.u32 %v5025_v18, %v5021_v48  ;;  %v4783_v36 = vrot.slane %v4767_v4, 4  ;;  %v12381_v31 = vsel %vm1353_vm8, %v5474_v27, %v5482_v53  ;;  %v4564_v61 = vadd.f32 %v4563_v14, %v12257_v44  ;;  %v4565_v16 = vpop.f32.mrb[103].mxu0 }
 0x415   : > { %13724 = vst [vmem:[#allocation11_spill] sm:$0xff] %v12381_v31  ;;  %v5034_v41 = vor.u32 %v5032_v20, %v5030_v8  ;;  %v4756_v33 = vmax.f32 %v4740_v43, 0.0  ;;  %v4741_v5 = vadd.f32 %v12366_v37, %v4725_v57  ;;  %v6769_v23 = vshll.u32 %v4831_v12, 16  ;;  %v9969_v12 = vld [vmem:[%s13653_s5 + $0x10] ss:$8 sps:$4 sm:$0xff]  }
 0x416   : > { %v5031_v25 = vsel %vm672_vm4, %v5026_v32, %v5030_v8  ;;  %4803 = vst [vmem:[#allocation4 + $0xc8] ss:$-4 sps:$4 sm:$0xff] %v4783_v36   ;;  %v6773_v7 = vrot.slane %v5032_v20, 3  ;;  %v6774_v60 = vrot.slane %v5028_v49, 4  ;;  %v4693_v18 = vpop.f32.mrb[100].mxu1  ;;  %v5197_v15 = vrot.slane %v12186_v47, 1 }
 0x417   : > { %v6778_v26 = vshrl.u32 %v5031_v25, 16  ;;  %v6781_v48 = vshll.u32 %v5031_v25, 16  ;;  %v6786_v44 = vshrl.u32 %v5034_v41, 16  ;;  %v6789_v50 = vshll.u32 %v5034_v41, 16  ;;  %v4695_v20 = vpop.f32.mrb[101].mxu1 }
 0x418   : > { %v4757_v6 = vmax.f32 %v4741_v5, 0.0  ;;  %v6771_v9 = vrot.slane %v6769_v23, 4  ;;  %v6775_v53 = vor.u32 %v6774_v60, %v6773_v7  ;;  %v5198_v43 = vrot.slane %v4869_v28, 1  ;;  %v9974_v57 = vld [vmem:[%s13653_s5 + $0x24] ss:$8 sps:$4 sm:$0xff]   ;;  %v4696_v32 = vpop.f32.mrb[102].mxu1 }
 0x419   : > { %v6780_v27 = vrot.slane %v6778_v26, 3  ;;  %v6783_v34 = vrot.slane %v6781_v48, 4  ;;  %v6788_v42 = vrot.slane %v6786_v44, 3  ;;  %v6791_v29 = vrot.slane %v6789_v50, 4  ;;  %6219 = vmatmul.mubr.bf16.vlgmr.msra.gmra.mrb[112].mxu0 %v12381_v31  ;;  %v4568_v30 = vpop.f32.mrb[104].mxu0 }
 0x41a   : > { %v4768_v38 = vpack.c.bf16 %v4757_v6, %v4756_v33  ;;  %v6772_v4 = vor.u32 %v6771_v9, %v6768_v58  ;;  %6540 = vmatpush1.bf16.msra.mxu0 %v9966_v59  ;;  %6228 = vmatprep.mubr.bf16.mxu0 %v13656_v0  ;;  %v4726_v14 = vadd.f32 %v4693_v18, %v4561_v19  ;;  %v4570_v46 = vpop.f32.mrb[105].mxu0  ;;  %v4698_v59 = vpop.f32.mrb[103].mxu1  ;;  %v12407_v33 = vld [vmem:[#allocation4 + $0xa0] sm:$0xf0]  ;;  %v5522_v25 = vshrl.u32 %v5198_v43, 16 }
 0x41b   : > { %v6784_v49 = vor.u32 %v6783_v34, %v6780_v27  ;;  %v6792_v8 = vor.u32 %v6791_v29, %v6788_v42  ;;  %6541 = vmatprep.subr.bf16.mxu0 %v9971_v22  ;;  %v12405_v47 = vadd.f32 %v4568_v30, %v12275_v39  ;;  %v4727_v41 = vadd.f32 %v4696_v32, %v4564_v61  ;;  %v4571_v16 = vpop.f32.mrb[106].mxu0  ;;  %v9972_v39 = vld [vmem:[%s13653_s5 + $0x20] ss:$8 sps:$4 sm:$0xff]   ;;  %v9977_v18 = vld [vmem:[%s13653_s5 + $0x34] ss:$8 sps:$4 sm:$0xff]  }
 0x41c   : > { %v4784_v58 = vrot.slane %v4768_v38, 4  ;;  %v12402_v36 = vsel %vm1353_vm8, %v6772_v4, %v6775_v53  ;;  %v5199_v19 = vsel %vm1051_vm3, %v5197_v15, %v5198_v43  ;;  %v5525_v23 = vshll.u32 %v5198_v43, 16  ;;  %v4573_v22 = vpop.f32.mrb[107].mxu0  ;;  %v4834_v50 = vld [vmem:[#allocation4 + $0xa8] sm:$0xf] }
 0x41d   : > { %13725 = vst [vmem:[#allocation12_spill] sm:$0xff] %v12402_v36  ;;  %v12410_v5 = vsel %vm1353_vm8, %v6784_v49, %v6792_v8  ;;  %v5514_v26 = vshrl.u32 %v5199_v19, 16  ;;  %v5517_v48 = vshll.u32 %v5199_v19, 16  ;;  %v4742_v61 = vadd.f32 %v12366_v37, %v4726_v14  ;;  %v4833_v28 = vld [vmem:[#allocation4 + $0xa0] sm:$0xf8] }
 0x41e   : > { %13726 = vst [vmem:[#allocation13_spill] sm:$0xff] %v12410_v5  ;;  %4805 = vst [vmem:[#allocation4 + $0xd8] ss:$-4 sps:$4 sm:$0xff] %v4784_v58   ;;  %7794 = vmatprep.mubr.bf16.mxu1 %v12410_v5  ;;  %v4743_v44 = vadd.f32 %v12366_v37, %v4727_v41  ;;  %6542 = vmatpush1.bf16.msra.mxu0 %v9969_v12  ;;  %v5524_v6 = vrot.slane %v5522_v25, 3  ;;  %v5527_v9 = vrot.slane %v5525_v23, 4  ;;  %v5036_v60 = vshrl.u32 %v12407_v33, 16 }
 0x41f   : > { %7795 = vmatmul.mubr.bf16.vlgmr.msra.gmra.mrb[112].mxu1 %v12402_v36  ;;  %v12421_v7 = vadd.f32 %v4571_v16, %v12286_v11  ;;  %v10165_v27 = vld [vmem:[%s13653_s5 + $0x280] ss:$8 sps:$4 sm:$0xff]   ;;  %v5516_v34 = vrot.slane %v5514_v26, 3  ;;  %v5519_v42 = vrot.slane %v5517_v48, 4  ;;  %6543 = vmatprep.subr.bf16.mxu0 %v9974_v57  ;;  %v4758_v29 = vmax.f32 %v4742_v61, 0.0  ;;  %v4701_v20 = vpop.f32.mrb[104].mxu1 }
 0x420   : > { %7876 = vmatpush1.bf16.msra.mxu1 %v10165_v27  ;;  %v4759_v12 = vmax.f32 %v4743_v44, 0.0  ;;  %v5528_v38 = vor.u32 %v5527_v9, %v5524_v6  ;;  %v9975_v11 = vld [vmem:[%s13653_s5 + $0x30] ss:$8 sps:$4 sm:$0xff]   ;;  %v5038_v4 = vshll.u32 %v12407_v33, 16  ;;  %v5043_v53 = vshll.u32 %v4834_v50, 16  ;;  %v4703_v58 = vpop.f32.mrb[105].mxu1 }
 0x421   : > { %v5047_v15 = vshrl.u32 %v4834_v50, 16  ;;  %v10166_v30 = vld [vmem:[%s13653_s5 + $0x294] ss:$8 sps:$4 sm:$0xff]   ;;  %v5520_v49 = vor.u32 %v5519_v42, %v5516_v34  ;;  %v7420_v43 = vshrl.u32 %v4833_v28, 16  ;;  %v7423_v57 = vshll.u32 %v4833_v28, 16  ;;  %v4576_v32 = vpop.f32.mrb[108].mxu0 }
 0x422   : > { %7877 = vmatprep.subr.bf16.mxu1 %v10166_v30  ;;  %v4769_v8 = vpack.c.bf16 %v4759_v12, %v4758_v29  ;;  %v4870_v14 = vld [vmem:[#allocation4 + $0x38] sm:$0x1f]  ;;  %v9980_v46 = vld [vmem:[%s13653_s5 + $0x44] ss:$8 sps:$4 sm:$0xff]   ;;  %6544 = vmatpush1.bf16.msra.mxu0 %v9972_v39  ;;  %v5040_v41 = vrot.slane %v5038_v4, 1  ;;  %v5045_v16 = vrot.slane %v5043_v53, 1  ;;  %v12455_v4 = vadd.f32 %v4576_v32, %v12302_v1 }
 0x423   : > { %v7427_v59 = vrot.slane %v5047_v15, 3  ;;  %v7428_v19 = vrot.slane %v5043_v53, 4  ;;  %v4578_v25 = vpop.f32.mrb[109].mxu0  ;;  %v4704_v23 = vpop.f32.mrb[106].mxu1  ;;  %v12441_v22 = vsel %vm1353_vm8, %v5520_v49, %v5528_v38  ;;  %6545 = vmatprep.subr.bf16.mxu0 %v9977_v18  ;;  %v7422_v48 = vrot.slane %v7420_v43, 3 }
 0x424   : > { %13727 = vst [vmem:[#allocation14_spill] sm:$0xff] %v12441_v22  ;;  %v4785_v26 = vrot.slane %v4769_v8, 4  ;;  %v7425_v61 = vrot.slane %v7423_v57, 4  ;;  %v10167_v44 = vld [vmem:[%s13653_s5 + $0x290] ss:$8 sps:$4 sm:$0xff]   ;;  %v12446_v50 = vpop.f32.mrb[110].mxu0  ;;  %6229 = vmatmul.mubr.bf16.gmra.mrb[116].mxu0 %v12441_v22  ;;  %v5041_v6 = vor.u32 %v5040_v41, %v5036_v60  ;;  %v5049_v9 = vor.u32 %v5047_v15, %v5045_v16 }
 0x425   : > { %7878 = vmatpush1.bf16.msra.mxu1 %v10167_v44  ;;  %v4706_v39 = vpop.f32.mrb[107].mxu1  ;;  %v7429_v28 = vor.u32 %v7428_v19, %v7427_v59  ;;  %v10168_v27 = vld [vmem:[#allocation4 + $0x30] sm:$0xf0]  ;;  %v10169_v42 = vld [vmem:[%s13653_s5 + $0x2a4] ss:$8 sps:$4 sm:$0xff]   ;;  %v4581_v29 = vpop.f32.mrb[111].mxu0  ;;  %6238 = vmatprep.mubr.bf16.mxu0 %v13656_v0  ;;  %v4728_v38 = vadd.f32 %v4701_v20, %v12405_v47  ;;  %v4729_v49 = vadd.f32 %v4704_v23, %v12421_v7 }
 0x426   : > { %v5200_v34 = vrot.slane %v10168_v27, 1  ;;  %7879 = vmatprep.subr.bf16.mxu1 %v10169_v42  ;;  %4807 = vst [vmem:[#allocation4 + $0xe8] ss:$-4 sps:$4 sm:$0xff] %v4785_v26   ;;  %v7426_v18 = vor.u32 %v7425_v61, %v7422_v48  ;;  %v5201_v12 = vrot.slane %v4870_v14, 1  ;;  %6546 = vmatpush1.bf16.msra.mxu0 %v9975_v11  ;;  %v5046_v60 = vsel %vm672_vm4, %v5041_v6, %v5045_v16  ;;  %v9978_v30 = vld [vmem:[%s13653_s5 + $0x40] ss:$8 sps:$4 sm:$0xff]  }
 0x427   : > { %v7440_v53 = vshrl.u32 %v5049_v9, 16  ;;  %v7443_v15 = vshll.u32 %v5049_v9, 16  ;;  %v7432_v8 = vshrl.u32 %v5046_v60, 16  ;;  %v7435_v43 = vshll.u32 %v5046_v60, 16  ;;  %6547 = vmatprep.subr.bf16.mxu0 %v9980_v46  ;;  %v9983_v1 = vld [vmem:[%s13653_s5 + $0x54] ss:$8 sps:$4 sm:$0xff]  }
 0x428   : > { %v12463_v57 = vsel %vm1353_vm8, %v7426_v18, %v7429_v28  ;;  %v5202_v47 = vsel %vm1051_vm3, %v5200_v34, %v5201_v12  ;;  %v12469_v11 = vld [vmem:[#allocation4 + $0xb0] sm:$0xf0]  ;;  %v10170_v20 = vld [vmem:[%s13653_s5 + $0x2a0] ss:$8 sps:$4 sm:$0xff]   ;;  %v9981_v41 = vld [vmem:[%s13653_s5 + $0x50] ss:$8 sps:$4 sm:$0xff]   ;;  %v4744_v6 = vadd.f32 %v12366_v37, %v4728_v38  ;;  %v4745_v29 = vadd.f32 %v12366_v37, %v4729_v49 }
 0x429   : > { %13728 = vst [vmem:[#allocation15_spill] sm:$0xff] %v12463_v57  ;;  %7880 = vmatpush1.bf16.msra.mxu1 %v10170_v20  ;;  %v7442_v7 = vrot.slane %v7440_v53, 3  ;;  %v7445_v14 = vrot.slane %v7443_v15, 4  ;;  %v5560_v32 = vshrl.u32 %v5202_v47, 16  ;;  %v5563_v58 = vshll.u32 %v5202_v47, 16  ;;  %v12477_v46 = vpop.f32.mrb[108].mxu1 }
 0x42a   : > { %v10171_v16 = vld [vmem:[%s13653_s5 + $0x2b4] ss:$8 sps:$4 sm:$0xff]   ;;  %v7434_v59 = vrot.slane %v7432_v8, 3  ;;  %v7437_v19 = vrot.slane %v7435_v43, 4  ;;  %v5568_v25 = vshrl.u32 %v5201_v12, 16  ;;  %v5571_v23 = vshll.u32 %v5201_v12, 16  ;;  %6548 = vmatpush1.bf16.msra.mxu0 %v9978_v30 }
 0x42b   : > { %7881 = vmatprep.subr.bf16.mxu1 %v10171_v16  ;;  %v9986_v26 = vld [vmem:[%s13653_s5 + $0x64] ss:$8 sps:$4 sm:$0xff]   ;;  %v4711_v48 = vpop.f32.mrb[109].mxu1  ;;  %v7446_v61 = vor.u32 %v7445_v14, %v7442_v7  ;;  %v5562_v44 = vrot.slane %v5560_v32, 3  ;;  %v5565_v39 = vrot.slane %v5563_v58, 4  ;;  %6549 = vmatprep.subr.bf16.mxu0 %v9983_v1  ;;  %v4760_v15 = vmax.f32 %v4744_v6, 0.0 }
 0x42c   : > { %v4836_v9 = vld [vmem:[#allocation4 + $0xb8] sm:$0xf]  ;;  %v4712_v28 = vpop.f32.mrb[110].mxu1  ;;  %v7438_v27 = vor.u32 %v7437_v19, %v7434_v59  ;;  %v5570_v34 = vrot.slane %v5568_v25, 3  ;;  %v5573_v42 = vrot.slane %v5571_v23, 4  ;;  %v4580_v38 = vadd.f32 %v12446_v50, %v12310_v54 }
 0x42d   : > { %v4835_v18 = vld [vmem:[#allocation4 + $0xb0] sm:$0xf8]  ;;  %v4714_v12 = vpop.f32.mrb[111].mxu1  ;;  %v5566_v53 = vor.u32 %v5565_v39, %v5562_v44  ;;  %v5051_v30 = vshrl.u32 %v12469_v11, 16  ;;  %v10173_v8 = vld [vmem:[%s13653_s5 + $0x2c4] ss:$8 sps:$4 sm:$0xff]  }
 0x42e   : > { %v10172_v60 = vld [vmem:[%s13653_s5 + $0x2b0] ss:$8 sps:$4 sm:$0xff]   ;;  %v12497_v49 = vsel %vm1353_vm8, %v7438_v27, %v7446_v61  ;;  %v5574_v43 = vor.u32 %v5573_v42, %v5570_v34  ;;  %v4761_v47 = vmax.f32 %v4745_v29, 0.0  ;;  %v5053_v1 = vshll.u32 %v12469_v11, 16  ;;  %v9984_v20 = vld [vmem:[%s13653_s5 + $0x60] ss:$8 sps:$4 sm:$0xff]   ;;  %6550 = vmatpush1.bf16.msra.mxu0 %v9981_v41 }
 0x42f   : > { %7882 = vmatpush1.bf16.msra.mxu1 %v10172_v60  ;;  %13729 = vst [vmem:[#allocation16_spill] sm:$0xff] %v12497_v49  ;;  %7804 = vmatprep.mubr.bf16.mxu1 %v12497_v49  ;;  %v5058_v54 = vshll.u32 %v4836_v9, 16  ;;  %v5062_v50 = vshrl.u32 %v4836_v9, 16  ;;  %v7466_v7 = vshrl.u32 %v4835_v18, 16  ;;  %v7469_v14 = vshll.u32 %v4835_v18, 16 }
 0x430   : > { %7883 = vmatprep.subr.bf16.mxu1 %v10173_v8  ;;  %v4871_v32 = vld [vmem:[#allocation4 + $0x48] sm:$0x1f]  ;;  %7805 = vmatmul.mubr.bf16.gmra.mrb[116].mxu1 %v12463_v57  ;;  %v12506_v58 = vsel %vm1353_vm8, %v5566_v53, %v5574_v43  ;;  %v4770_v16 = vpack.c.bf16 %v4761_v47, %v4760_v15  ;;  %v5055_v59 = vrot.slane %v5053_v1, 1  ;;  %v10174_v19 = vld [vmem:[#allocation4 + $0x40] sm:$0xf0]  ;;  %v4730_v18 = vadd.f32 %v12477_v46, %v12455_v4 }
 0x431   : > { %13730 = vst [vmem:[#allocation17_spill] sm:$0xff] %v12506_v58  ;;  %v5203_v25 = vrot.slane %v10174_v19, 1  ;;  %6551 = vmatprep.subr.bf16.mxu0 %v9986_v26  ;;  %v12511_v23 = vld [vmem:[%s13653_s5 + $0x74] ss:$8 sps:$4 sm:$0xff]   ;;  %6239 = vmatmul.mubr.bf16.gmra.mrb[120].mxu0 %v12506_v58  ;;  %v5060_v41 = vrot.slane %v5058_v54, 1  ;;  %v7468_v48 = vrot.slane %v7466_v7, 3  ;;  %v4731_v60 = vadd.f32 %v4712_v28, %v4580_v38 }
 0x432   : > { %v7471_v61 = vrot.slane %v7469_v14, 4  ;;  %v7473_v44 = vrot.slane %v5062_v50, 3  ;;  %v10175_v39 = vld [vmem:[%s13653_s5 + $0x2c0] ss:$8 sps:$4 sm:$0xff]   ;;  %v4786_v6 = vrot.slane %v4770_v16, 4  ;;  %v5056_v9 = vor.u32 %v5055_v59, %v5051_v30  ;;  %6248 = vmatprep.mubr.bf16.mxu0 %v13656_v0  ;;  %6552 = vmatpush1.bf16.msra.mxu0 %v9984_v20 }
 0x433   : > { %7884 = vmatpush1.bf16.msra.mxu1 %v10175_v39  ;;  %v7474_v26 = vrot.slane %v5058_v54, 4  ;;  %v5204_v27 = vrot.slane %v4871_v32, 1  ;;  %v10176_v34 = vld [vmem:[%s13653_s5 + $0x2d4] ss:$8 sps:$4 sm:$0xff]   ;;  %v5064_v42 = vor.u32 %v5062_v50, %v5060_v41  ;;  %v12526_v12 = vld [vmem:[%s13653_s5 + $0x70] ss:$8 sps:$4 sm:$0xff]   ;;  %6553 = vmatprep.subr.bf16.mxu0 %v12511_v23  ;;  %v4746_v39 = vadd.f32 %v12366_v37, %v4730_v18 }
 0x434   : > { %7885 = vmatprep.subr.bf16.mxu1 %v10176_v34  ;;  %v7472_v29 = vor.u32 %v7471_v61, %v7468_v48  ;;  %4809 = vst [vmem:[#allocation4 + $0xf8] ss:$-4 sps:$4 sm:$0xff] %v4786_v6   ;;  %v5061_v53 = vsel %vm672_vm4, %v5056_v9, %v5060_v41  ;;  %v12534_v43 = vld [vmem:[%s13653_s5 + $0x84] ss:$8 sps:$4 sm:$0xff]   ;;  %v12539_v28 = vld [vmem:[%s13653_s5 + $0x80] ss:$8 sps:$4 sm:$0xff]   ;;  %v4747_v34 = vadd.f32 %v12366_v37, %v4731_v60 }
 0x435   : > { %v7475_v15 = vor.u32 %v7474_v26, %v7473_v44  ;;  %v5205_v30 = vsel %vm1051_vm3, %v5203_v25, %v5204_v27  ;;  %v5614_v8 = vshrl.u32 %v5204_v27, 16  ;;  %v7478_v4 = vshrl.u32 %v5061_v53, 16  ;;  %v10177_v38 = vld [vmem:[%s13653_s5 + $0x2d0] ss:$8 sps:$4 sm:$0xff]   ;;  %v12547_v14 = vld [vmem:[#allocation4 + $0xc0] sm:$0xf0] }
 0x436   : > { %v7481_v46 = vshll.u32 %v5061_v53, 16  ;;  %v7486_v47 = vshrl.u32 %v5064_v42, 16  ;;  %v7489_v1 = vshll.u32 %v5064_v42, 16  ;;  %v5606_v54 = vshrl.u32 %v5205_v30, 16  ;;  %v10178_v32 = vld [vmem:[%s13653_s5 + $0x2e4] ss:$8 sps:$4 sm:$0xff]   ;;  %6554 = vmatpush1.bf16.msra.mxu0 %v12526_v12 }
 0x437   : > { %7886 = vmatpush1.bf16.msra.mxu1 %v10177_v38  ;;  %v12545_v20 = vsel %vm1353_vm8, %v7472_v29, %v7475_v15  ;;  %v5609_v50 = vshll.u32 %v5205_v30, 16  ;;  %v5616_v7 = vrot.slane %v5614_v8, 3  ;;  %v7480_v16 = vrot.slane %v7478_v4, 3  ;;  %v12556_v41 = vld [vmem:[%s13653_s5 + $0x94] ss:$8 sps:$4 sm:$0xff]   ;;  %6555 = vmatprep.subr.bf16.mxu0 %v12534_v43 }
 0x438   : > { %13731 = vst [vmem:[#allocation18_spill] sm:$0xff] %v12545_v20  ;;  %7887 = vmatprep.subr.bf16.mxu1 %v10178_v32  ;;  %v7483_v59 = vrot.slane %v7481_v46, 4  ;;  %v7488_v19 = vrot.slane %v7486_v47, 3  ;;  %v7491_v25 = vrot.slane %v7489_v1, 4  ;;  %v5608_v48 = vrot.slane %v5606_v54, 3 }
 0x439   : > { %v5611_v61 = vrot.slane %v5609_v50, 4  ;;  %v5617_v44 = vshll.u32 %v5204_v27, 16  ;;  %v4838_v6 = vld [vmem:[#allocation4 + $0xc8] sm:$0xf]  ;;  %v5066_v42 = vshrl.u32 %v12547_v14, 16  ;;  %v4762_v27 = vmax.f32 %v4746_v39, 0.0 }
 0x43a   : > { %v7484_v9 = vor.u32 %v7483_v59, %v7480_v16  ;;  %v7492_v26 = vor.u32 %v7491_v25, %v7488_v19  ;;  %v4837_v29 = vld [vmem:[#allocation4 + $0xc0] sm:$0xf8]  ;;  %v5068_v18 = vshll.u32 %v12547_v14, 16  ;;  %v12569_v8 = vld [vmem:[%s13653_s5 + $0x90] ss:$8 sps:$4 sm:$0xff]   ;;  %v4763_v4 = vmax.f32 %v4747_v34, 0.0  ;;  %6556 = vmatpush1.bf16.msra.mxu0 %v12539_v28 }
 0x43b   : > { %v10179_v53 = vld [vmem:[%s13653_s5 + $0x2e0] ss:$8 sps:$4 sm:$0xff]   ;;  %v5612_v15 = vor.u32 %v5611_v61, %v5608_v48  ;;  %v5619_v30 = vrot.slane %v5617_v44, 4  ;;  %v10180_v37 = vld [vmem:[%s13653_s5 + $0x2f4] ss:$8 sps:$4 sm:$0xff]   ;;  %v5073_v46 = vshll.u32 %v4838_v6, 16  ;;  %6557 = vmatprep.subr.bf16.mxu0 %v12556_v41 }
 0x43c   : > { %7888 = vmatpush1.bf16.msra.mxu1 %v10179_v53  ;;  %v12575_v60 = vsel %vm1353_vm8, %v7484_v9, %v7492_v26  ;;  %v5077_v47 = vshrl.u32 %v4838_v6, 16  ;;  %v12581_v1 = vld [vmem:[%s13653_s5 + $0xa4] ss:$8 sps:$4 sm:$0xff]   ;;  %v5070_v54 = vrot.slane %v5068_v18, 1  ;;  %v7512_v50 = vshrl.u32 %v4837_v29, 16 }
 0x43d   : > { %7889 = vmatprep.subr.bf16.mxu1 %v10180_v37  ;;  %13732 = vst [vmem:[#allocation19_spill] sm:$0xff] %v12575_v60  ;;  %7814 = vmatprep.mubr.bf16.mxu1 %v12575_v60  ;;  %v5620_v38 = vor.u32 %v5619_v30, %v5616_v7  ;;  %v7515_v32 = vshll.u32 %v4837_v29, 16  ;;  %v4872_v16 = vld [vmem:[#allocation4 + $0x58] sm:$0x1f]  ;;  %v4771_v59 = vpack.c.bf16 %v4763_v4, %v4762_v27  ;;  %v5075_v19 = vrot.slane %v5073_v46, 1 }
 0x43e   : > { %7815 = vmatmul.mubr.bf16.gmra.mrb[120].mxu1 %v12545_v20  ;;  %v7519_v25 = vrot.slane %v5077_v47, 3  ;;  %v7520_v48 = vrot.slane %v5073_v46, 4  ;;  %v12586_v61 = vld [vmem:[#allocation4 + $0xd0] sm:$0xf0]  ;;  %v5071_v39 = vor.u32 %v5070_v54, %v5066_v42  ;;  %v7514_v6 = vrot.slane %v7512_v50, 3  ;;  %6558 = vmatpush1.bf16.msra.mxu0 %v12569_v8 }
 0x43f   : > { %v12589_v44 = vsel %vm1353_vm8, %v5612_v15, %v5620_v38  ;;  %v7517_v7 = vrot.slane %v7515_v32, 4  ;;  %v10181_v9 = vld [vmem:[%s13653_s5 + $0x2f0] ss:$8 sps:$4 sm:$0xff]   ;;  %v4787_v26 = vrot.slane %v4771_v59, 4  ;;  %v5079_v34 = vor.u32 %v5077_v47, %v5075_v19  ;;  %v10182_v53 = vld [vmem:[#allocation4 + $0x50] sm:$0xf0]  ;;  %6559 = vmatprep.subr.bf16.mxu0 %v12581_v1 }
 0x440   : > { %13733 = vst [vmem:[#allocation20_spill] sm:$0xff] %v12589_v44  ;;  %7890 = vmatpush1.bf16.msra.mxu1 %v10181_v9  ;;  %6249 = vmatmul.mubr.bf16.gmra.mrb[124].mxu0 %v12589_v44  ;;  %v7521_v29 = vor.u32 %v7520_v48, %v7519_v25  ;;  %v5206_v30 = vrot.slane %v10182_v53, 1  ;;  %v10183_v15 = vld [vmem:[%s13653_s5 + $0x4] ss:$8 sps:$4 sm:$0xff]   ;;  %v5076_v42 = vsel %vm672_vm4, %v5071_v39, %v5075_v19  ;;  %v5207_v18 = vrot.slane %v4872_v16, 1 }
 0x441   : > { %7988 = vmatprep.subr.bf16.mxu1 %v10183_v15  ;;  %6258 = vmatprep.mubr.bf16.mxu0 %v13656_v0  ;;  %v7518_v27 = vor.u32 %v7517_v7, %v7514_v6  ;;  %v5081_v37 = vshrl.u32 %v12586_v61, 16  ;;  %v12605_v4 = vld [vmem:[%s13653_s5 + $0xa0] ss:$8 sps:$4 sm:$0xff]   ;;  %4811 = vst [vmem:[#allocation4 + $0x108] ss:$-4 sps:$4 sm:$0xff] %v4787_v26   ;;  %v7524_v46 = vshrl.u32 %v5076_v42, 16 }
 0x442   : > { %v7527_v47 = vshll.u32 %v5076_v42, 16  ;;  %v7532_v38 = vshrl.u32 %v5079_v34, 16  ;;  %v7535_v54 = vshll.u32 %v5079_v34, 16  ;;  %v12611_v50 = vld [vmem:[%s13653_s5 + $0xb4] ss:$8 sps:$4 sm:$0xff]   ;;  %v5208_v16 = vsel %vm1051_vm3, %v5206_v30, %v5207_v18  ;;  %6560 = vmatpush1.bf16.msra.mxu0 %v12605_v4 }
 0x443   : > { %v12614_v32 = vsel %vm1353_vm8, %v7518_v27, %v7521_v29  ;;  %v5660_v59 = vshrl.u32 %v5207_v18, 16  ;;  %v5663_v19 = vshll.u32 %v5207_v18, 16  ;;  %v4840_v25 = vld [vmem:[#allocation4 + $0xd8] sm:$0xf]  ;;  %v7526_v48 = vrot.slane %v7524_v46, 3  ;;  %6561 = vmatprep.subr.bf16.mxu0 %v12611_v50 }
 0x444   : > { %13734 = vst [vmem:[#allocation21_spill] sm:$0xff] %v12614_v32  ;;  %v7529_v39 = vrot.slane %v7527_v47, 4  ;;  %v7534_v6 = vrot.slane %v7532_v38, 3  ;;  %v7537_v7 = vrot.slane %v7535_v54, 4  ;;  %v12620_v9 = vld [vmem:[%s13653_s5 + $0xb0] ss:$8 sps:$4 sm:$0xff]  }
 0x445   : > { %v5652_v26 = vshrl.u32 %v5208_v16, 16  ;;  %v5655_v34 = vshll.u32 %v5208_v16, 16  ;;  %v5662_v53 = vrot.slane %v5660_v59, 3  ;;  %v5665_v15 = vrot.slane %v5663_v19, 4  ;;  %v4839_v29 = vld [vmem:[#allocation4 + $0xd0] sm:$0xf8] }
 0x446   : > { %v7530_v30 = vor.u32 %v7529_v39, %v7526_v48  ;;  %v7538_v42 = vor.u32 %v7537_v7, %v7534_v6  ;;  %v5083_v27 = vshll.u32 %v12586_v61, 16  ;;  %v5088_v18 = vshll.u32 %v4840_v25, 16  ;;  %v12628_v46 = vld [vmem:[%s13653_s5 + $0xc4] ss:$8 sps:$4 sm:$0xff]   ;;  %v12633_v59 = vld [vmem:[%s13653_s5 + $0xc0] ss:$8 sps:$4 sm:$0xff]   ;;  %6562 = vmatpush1.bf16.msra.mxu0 %v12620_v9 }
 0x447   : > { %13735 = vst [vmem:[#allocation22_spill] sm:$0xff] %v12628_v46  ;;  %v5654_v47 = vrot.slane %v5652_v26, 3  ;;  %v5657_v38 = vrot.slane %v5655_v34, 4  ;;  %v5666_v54 = vor.u32 %v5665_v15, %v5662_v53  ;;  %v5092_v16 = vshrl.u32 %v4840_v25, 16  ;;  %13736 = vst [vmem:[#allocation23_spill] sm:$0xff] %v12633_v59  ;;  %6563 = vmatprep.subr.bf16.mxu0 %v12628_v46 }
 0x448   : > { %v12636_v19 = vsel %vm1353_vm8, %v7530_v30, %v7538_v42  ;;  %v5085_v48 = vrot.slane %v5083_v27, 1  ;;  %v5090_v39 = vrot.slane %v5088_v18, 1  ;;  %v7558_v6 = vshrl.u32 %v4839_v29, 16  ;;  %v4873_v7 = vld [vmem:[#allocation4 + $0x68] sm:$0x1f] }
 0x449   : > { %13737 = vst [vmem:[#allocation24_spill] sm:$0xff] %v12636_v19  ;;  %7824 = vmatprep.mubr.bf16.mxu1 %v12636_v19  ;;  %v5658_v0 = vor.u32 %v5657_v38, %v5654_v47  ;;  %v7561_v44 = vshll.u32 %v4839_v29, 16  ;;  %v7565_v26 = vrot.slane %v5092_v16, 3  ;;  %v7566_v34 = vrot.slane %v5088_v18, 4  ;;  %v12640_v25 = vld [vmem:[#allocation4 + $0xe0] sm:$0xf0] }
 0x44a   : > { %7825 = vmatmul.mubr.bf16.gmra.mrb[124].mxu1 %v12614_v32  ;;  %v5086_v53 = vor.u32 %v5085_v48, %v5081_v37  ;;  %v5094_v15 = vor.u32 %v5092_v16, %v5090_v39  ;;  %v7560_v30 = vrot.slane %v7558_v6, 3  ;;  %v10184_v42 = vld [vmem:[#allocation4 + $0x60] sm:$0xf0]  ;;  %v12647_v47 = vld [vmem:[%s13653_s5 + $0xd4] ss:$8 sps:$4 sm:$0xff]   ;;  %v5210_v19 = vrot.slane %v4873_v7, 1  ;;  %6564 = vmatpush1.bf16.msra.mxu0 %v12633_v59 }
 0x44b   : > { %v5209_v27 = vrot.slane %v10184_v42, 1  ;;  %13738 = vst [vmem:[#allocation25_spill] sm:$0xff] %v12647_v47  ;;  %v12650_v29 = vsel %vm1353_vm8, %v5658_v0, %v5666_v54  ;;  %v7563_v18 = vrot.slane %v7561_v44, 4  ;;  %v7567_v38 = vor.u32 %v7566_v34, %v7565_v26  ;;  %v12661_v0 = vld [vmem:[%s13653_s5 + $0xd0] ss:$8 sps:$4 sm:$0xff]   ;;  %6565 = vmatprep.subr.bf16.mxu0 %v12647_v47 }
 0x44c   : > { %13739 = vst [vmem:[#allocation26_spill] sm:$0xff] %v12650_v29  ;;  %6259 = vmatmul.mubr.bf16.gmra.mrb[128].mxu0 %v12650_v29  ;;  %v5091_v37 = vsel %vm672_vm4, %v5086_v53, %v5090_v39  ;;  %v7578_v16 = vshrl.u32 %v5094_v15, 16  ;;  %v7581_v48 = vshll.u32 %v5094_v15, 16  ;;  %v5096_v6 = vshrl.u32 %v12640_v25, 16  ;;  %13741 = vst [vmem:[#allocation27_spill] sm:$0xff] %v12661_v0 }
 0x44d   : > { %v7570_v42 = vshrl.u32 %v5091_v37, 16  ;;  %v7573_v32 = vshll.u32 %v5091_v37, 16  ;;  %v13740_v20 = vmov 0   ;;  %v7564_v58 = vor.u32 %v7563_v18, %v7560_v30  ;;  %v12666_v44 = vld [vmem:[%s13653_s5 + $0xe4] ss:$8 sps:$4 sm:$0xff]  }
 0x44e   : > { %6268 = vmatprep.mubr.bf16.mxu0 %v13740_v20  ;;  %v5211_v60 = vsel %vm1051_vm3, %v5209_v27, %v5210_v19  ;;  %13742 = vst [vmem:[#allocation28_spill] sm:$0xff] %v12666_v44  ;;  %v7580_v54 = vrot.slane %v7578_v16, 3  ;;  %v7583_v39 = vrot.slane %v7581_v48, 4  ;;  %v4842_v34 = vld [vmem:[#allocation4 + $0xe8] sm:$0xf]  ;;  %v5706_v27 = vshrl.u32 %v5210_v19, 16  ;;  %6566 = vmatpush1.bf16.msra.mxu0 %v12661_v0 }
 0x44f   : > { %v5698_v7 = vshrl.u32 %v5211_v60, 16  ;;  %v5701_v26 = vshll.u32 %v5211_v60, 16  ;;  %v7572_v53 = vrot.slane %v7570_v42, 3  ;;  %v7575_v15 = vrot.slane %v7573_v32, 4  ;;  %v4841_v18 = vld [vmem:[#allocation4 + $0xe0] sm:$0xf8]  ;;  %6567 = vmatprep.subr.bf16.mxu0 %v12666_v44 }
 0x450   : > { %v12670_v30 = vsel %vm1353_vm8, %v7564_v58, %v7567_v38  ;;  %v7584_v37 = vor.u32 %v7583_v39, %v7580_v54  ;;  %v5709_v22 = vshll.u32 %v5210_v19, 16  ;;  %v12675_v16 = vld [vmem:[%s13653_s5 + $0xe0] ss:$8 sps:$4 sm:$0xff]   ;;  %v5708_v48 = vrot.slane %v5706_v27, 3  ;;  %v4874_v32 = vld [vmem:[#allocation4 + $0x78] sm:$0x1f] }
 0x451   : > { %13743 = vst [vmem:[#allocation29_spill] sm:$0xff] %v12670_v30  ;;  %v5700_v29 = vrot.slane %v5698_v7, 3  ;;  %v5703_v57 = vrot.slane %v5701_v26, 4  ;;  %13744 = vst [vmem:[#allocation30_spill] sm:$0xff] %v12675_v16  ;;  %v7576_v60 = vor.u32 %v7575_v15, %v7572_v53  ;;  %v5098_v49 = vshll.u32 %v12640_v25, 16 }
 0x452   : > { %v5103_v42 = vshll.u32 %v4842_v34, 16  ;;  %v5711_v38 = vrot.slane %v5709_v22, 4  ;;  %v5107_v36 = vshrl.u32 %v4842_v34, 16  ;;  %v7604_v54 = vshrl.u32 %v4841_v18, 16  ;;  %v12683_v19 = vld [vmem:[%s13653_s5 + $0xf4] ss:$8 sps:$4 sm:$0xff]   ;;  %6568 = vmatpush1.bf16.msra.mxu0 %v12675_v16 }
 0x453   : > { %v5704_v58 = vor.u32 %v5703_v57, %v5700_v29  ;;  %13745 = vst [vmem:[#allocation31_spill] sm:$0xff] %v12683_v19  ;;  %v12686_v39 = vsel %vm1353_vm8, %v7576_v60, %v7584_v37  ;;  %v5100_v7 = vrot.slane %v5098_v49, 1  ;;  %v7607_v53 = vshll.u32 %v4841_v18, 16  ;;  %v12688_v15 = vld [vmem:[#allocation4 + $0xf0] sm:$0xf0]  ;;  %6569 = vmatprep.subr.bf16.mxu0 %v12683_v19 }
 0x454   : > { %13746 = vst [vmem:[#allocation32_spill] sm:$0xff] %v12686_v39  ;;  %v5105_v26 = vrot.slane %v5103_v42, 1  ;;  %7834 = vmatprep.mubr.bf16.mxu1 %v12686_v39  ;;  %v5712_v22 = vor.u32 %v5711_v38, %v5708_v48  ;;  %v7606_v57 = vrot.slane %v7604_v54, 3  ;;  %v7611_v29 = vrot.slane %v5107_v36, 3  ;;  %v12696_v49 = vld [vmem:[%s13653_s5 + $0xf0] ss:$8 sps:$4 sm:$0xff]  }
 0x455   : > { %v7612_v34 = vrot.slane %v5103_v42, 4  ;;  %7835 = vmatmul.mubr.bf16.gmra.mrb[128].mxu1 %v12670_v30  ;;  %v5101_v27 = vor.u32 %v5100_v7, %v5096_v6  ;;  %v7609_v5 = vrot.slane %v7607_v53, 4  ;;  %v5212_v2 = vrot.slane %v10185_v55, 1  ;;  %13747 = vst [vmem:[#allocation33_spill] sm:$0xff] %v12696_v49  ;;  %v12706_v55 = vld [vmem:[%s13653_s5 + $0x104] ss:$8 sps:$4 sm:$0xff]  }
 0x456   : > { %v5109_v31 = vor.u32 %v5107_v36, %v5105_v26  ;;  %v12699_v18 = vsel %vm1353_vm8, %v5704_v58, %v5712_v22  ;;  %v5213_v60 = vrot.slane %v4874_v32, 1  ;;  %v5111_v48 = vshrl.u32 %v12688_v15, 16  ;;  %13749 = vst [vmem:[#allocation35_spill] sm:$0xff] %v12706_v55  ;;  %v4844_v30 = vld [vmem:[#allocation4 + $0xf8] sm:$0xf]  ;;  %6570 = vmatpush1.bf16.msra.mxu0 %v12696_v49 }
 0x457   : > { %13748 = vst [vmem:[#allocation34_spill] sm:$0xff] %v12699_v18  ;;  %v7613_v37 = vor.u32 %v7612_v34, %v7611_v29  ;;  %6269 = vmatmul.mubr.bf16.gmra.mrb[132].mxu0 %v12699_v18  ;;  %v5106_v36 = vsel %vm672_vm4, %v5101_v27, %v5105_v26  ;;  %v7610_v38 = vor.u32 %v7609_v5, %v7606_v57  ;;  %v4843_v57 = vld [vmem:[#allocation4 + $0xf0] sm:$0xf8]  ;;  %v4813_v47 = vld [vmem:[#allocation4] sm:$0xf8] }
 0x458   : > { %v7624_v6 = vshrl.u32 %v5109_v31, 16  ;;  %v7627_v42 = vshll.u32 %v5109_v31, 16  ;;  %v7616_v58 = vshrl.u32 %v5106_v36, 16  ;;  %v7619_v54 = vshll.u32 %v5106_v36, 16  ;;  %6278 = vmatprep.mubr.bf16.mxu0 %v13740_v20  ;;  %6652 = vmatprep.subr.bf16.mxu0 %v12706_v55 }
 0x459   : > { %v5214_v32 = vsel %vm1051_vm3, %v5212_v2, %v5213_v60  ;;  %v5752_v7 = vshrl.u32 %v5213_v60, 16  ;;  %v12713_v29 = vsel %vm1353_vm8, %v7610_v38, %v7613_v37  ;;  %v5755_v2 = vshll.u32 %v5213_v60, 16 }
 0x45a   : > { %v7626_v53 = vrot.slane %v7624_v6, 3  ;;  %v7629_v22 = vrot.slane %v7627_v42, 4  ;;  %13750 = vst [vmem:[#allocation36_spill] sm:$0xff] %v12713_v29  ;;  %v5744_v34 = vshrl.u32 %v5214_v32, 16  ;;  %v7618_v26 = vrot.slane %v7616_v58, 3 }
 0x45b   : > { %v7621_v27 = vrot.slane %v7619_v54, 4  ;;  %v5747_v31 = vshll.u32 %v5214_v32, 16  ;;  %v5754_v5 = vrot.slane %v5752_v7, 3  ;;  %v5113_v6 = vshll.u32 %v12688_v15, 16  ;;  %v4875_v58 = vld [vmem:[#allocation4 + $0x88] sm:$0x1f] }
 0x45c   : > { %v7630_v36 = vor.u32 %v7629_v22, %v7626_v53  ;;  %v5746_v18 = vrot.slane %v5744_v34, 3  ;;  %v5118_v37 = vshll.u32 %v4844_v30, 16  ;;  %v5122_v38 = vshrl.u32 %v4844_v30, 16  ;;  %v12721_v53 = vld [vmem:[#allocation4 + $0x100] sm:$0xf0] }
 0x45d   : > { %v7622_v42 = vor.u32 %v7621_v27, %v7618_v26  ;;  %v5749_v39 = vrot.slane %v5747_v31, 4  ;;  %v5757_v19 = vrot.slane %v5755_v2, 4  ;;  %v5115_v16 = vrot.slane %v5113_v6, 1  ;;  %v10186_v31 = vld [vmem:[#allocation4 + $0x80] sm:$0xf0] }
 0x45e   : > { %v7650_v44 = vshrl.u32 %v4843_v57, 16  ;;  %v7653_v49 = vshll.u32 %v4843_v57, 16  ;;  %v5120_v7 = vrot.slane %v5118_v37, 1  ;;  %v7657_v55 = vrot.slane %v5122_v38, 3 }
 0x45f   : > { %v12719_v54 = vsel %vm1353_vm8, %v7622_v42, %v7630_v36  ;;  %v5750_v32 = vor.u32 %v5749_v39, %v5746_v18  ;;  %v5758_v60 = vor.u32 %v5757_v19, %v5754_v5  ;;  %v5116_v22 = vor.u32 %v5115_v16, %v5111_v48 }
 0x460   : > { %13751 = vst [vmem:[#allocation37_spill] sm:$0xff] %v12719_v54  ;;  %7844 = vmatprep.mubr.bf16.mxu1 %v12719_v54  ;;  %v7652_v34 = vrot.slane %v7650_v44, 3  ;;  %v7655_v26 = vrot.slane %v7653_v49, 4  ;;  %v5124_v30 = vor.u32 %v5122_v38, %v5120_v7  ;;  %v7658_v27 = vrot.slane %v5118_v37, 4 }
 0x461   : > { %7845 = vmatmul.mubr.bf16.gmra.mrb[132].mxu1 %v12713_v29  ;;  %v5215_v57 = vrot.slane %v10186_v31, 1  ;;  %v5216_v2 = vrot.slane %v4875_v58, 1  ;;  %v12726_v36 = vsel %vm1353_vm8, %v5750_v32, %v5758_v60  ;;  %v5121_v39 = vsel %vm672_vm4, %v5116_v22, %v5120_v7  ;;  %v4846_v60 = vld [vmem:[#allocation4 + $0x108] sm:$0xf] }
 0x462   : > { %13752 = vst [vmem:[#allocation38_spill] sm:$0xff] %v12726_v36  ;;  %v7656_v18 = vor.u32 %v7655_v26, %v7652_v34  ;;  %v5126_v6 = vshrl.u32 %v12721_v53, 16  ;;  %6279 = vmatmul.mubr.bf16.gmra.mrb[136].mxu0 %v12726_v36  ;;  %v7662_v16 = vshrl.u32 %v5121_v39, 16  ;;  %v7665_v44 = vshll.u32 %v5121_v39, 16 }
 0x463   : > { %v7670_v19 = vshrl.u32 %v5124_v30, 16  ;;  %v7673_v49 = vshll.u32 %v5124_v30, 16  ;;  %6288 = vmatprep.mubr.bf16.mxu0 %v13740_v20  ;;  %v7659_v48 = vor.u32 %v7658_v27, %v7657_v55  ;;  %v5217_v5 = vsel %vm1051_vm3, %v5215_v57, %v5216_v2  ;;  %v12737_v27 = vld [vmem:[#allocation4 + $0x8] sm:$0xf]  ;;  %v12739_v57 = vld [vmem:[#allocation4] sm:$0xf0] }
 0x464   : > { %v5822_v42 = vshrl.u32 %v5216_v2, 16  ;;  %v5825_v37 = vshll.u32 %v5216_v2, 16  ;;  %v7664_v38 = vrot.slane %v7662_v16, 3  ;;  %v7667_v58 = vrot.slane %v7665_v44, 4 }
 0x465   : > { %v7672_v32 = vrot.slane %v7670_v19, 3  ;;  %v7675_v7 = vrot.slane %v7673_v49, 4  ;;  %v12734_v22 = vsel %vm1353_vm8, %v7656_v18, %v7659_v48  ;;  %v5814_v34 = vshrl.u32 %v5217_v5, 16  ;;  %v4845_v49 = vld [vmem:[#allocation4 + $0x100] sm:$0xf8] }
 0x466   : > { %13753 = vst [vmem:[#allocation39_spill] sm:$0xff] %v12734_v22  ;;  %v5817_v26 = vshll.u32 %v5217_v5, 16  ;;  %v5824_v31 = vrot.slane %v5822_v42, 3  ;;  %v7668_v39 = vor.u32 %v7667_v58, %v7664_v38  ;;  %v5827_v36 = vrot.slane %v5825_v37, 4 }
 0x467   : > { %v7676_v30 = vor.u32 %v7675_v7, %v7672_v32  ;;  %v5128_v55 = vshll.u32 %v12721_v53, 16  ;;  %v5816_v2 = vrot.slane %v5814_v34, 3  ;;  %v5133_v44 = vshll.u32 %v4846_v60, 16 }
 0x468   : > { %v5819_v16 = vrot.slane %v5817_v26, 4  ;;  %v5137_v19 = vshrl.u32 %v4846_v60, 16  ;;  %v5828_v48 = vor.u32 %v5827_v36, %v5824_v31  ;;  %v4886_v42 = vshrl.u32 %v12739_v57, 16 }
 0x469   : > { %v12742_v18 = vsel %vm1353_vm8, %v7668_v39, %v7676_v30  ;;  %v5130_v5 = vrot.slane %v5128_v55, 1  ;;  %v5135_v38 = vrot.slane %v5133_v44, 1  ;;  %v4888_v58 = vshll.u32 %v12739_v57, 16 }
 0x46a   : > { %13754 = vst [vmem:[#allocation40_spill] sm:$0xff] %v12742_v18  ;;  %7854 = vmatprep.mubr.bf16.mxu1 %v12742_v18  ;;  %v5820_v37 = vor.u32 %v5819_v16, %v5816_v2  ;;  %v4893_v32 = vshll.u32 %v12737_v27, 16  ;;  %v4897_v60 = vshrl.u32 %v12737_v27, 16  ;;  %v7714_v34 = vshrl.u32 %v4845_v49, 16 }
 0x46b   : > { %7855 = vmatmul.mubr.bf16.gmra.mrb[136].mxu1 %v12734_v22  ;;  %v5131_v7 = vor.u32 %v5130_v5, %v5126_v6  ;;  %v7717_v26 = vshll.u32 %v4845_v49, 16  ;;  %v5139_v31 = vor.u32 %v5137_v19, %v5135_v38  ;;  %v4890_v39 = vrot.slane %v4888_v58, 1 }
 0x46c   : > { %v12751_v36 = vsel %vm1353_vm8, %v5820_v37, %v5828_v48  ;;  %v4895_v30 = vrot.slane %v4893_v32, 1  ;;  %v7716_v2 = vrot.slane %v7714_v34, 3  ;;  %v7721_v18 = vrot.slane %v5137_v19, 3 }
 0x46d   : > { %13755 = vst [vmem:[#allocation41_spill] sm:$0xff] %v12751_v36  ;;  %6289 = vmatmul.mubr.bf16.gmra.mrb[140].mxu0 %v12751_v36  ;;  %v5136_v55 = vsel %vm672_vm4, %v5131_v7, %v5135_v38  ;;  %v7719_v16 = vrot.slane %v7717_v26, 4  ;;  %v7734_v6 = vshrl.u32 %v5139_v31, 16  ;;  %v7737_v5 = vshll.u32 %v5139_v31, 16 }
 0x46e   : > { %v7726_v29 = vshrl.u32 %v5136_v55, 16  ;;  %v7729_v22 = vshll.u32 %v5136_v55, 16  ;;  %v4891_v27 = vor.u32 %v4890_v39, %v4886_v42  ;;  %v4899_v54 = vor.u32 %v4897_v60, %v4895_v30 }
 0x46f   : > { %v7720_v49 = vor.u32 %v7719_v16, %v7716_v2  ;;  %v7722_v0 = vrot.slane %v5133_v44, 4  ;;  %v7736_v40 = vrot.slane %v7734_v6, 3  ;;  %v7739_v58 = vrot.slane %v7737_v5, 4  ;;  %v4877_v16 = vld [vmem:[#allocation4 + $0xa8] sm:$0x1f] }
 0x470   : > { %v7728_v48 = vrot.slane %v7726_v29, 3  ;;  %v7731_v37 = vrot.slane %v7729_v22, 4  ;;  %v4896_v36 = vsel %vm672_vm4, %v4891_v27, %v4895_v30  ;;  %v5413_v59 = vshrl.u32 %v4899_v54, 16  ;;  %v4876_v29 = vld [vmem:[#allocation4 + $0x98] sm:$0x1f] }
 0x471   : > { %v5416_v38 = vshll.u32 %v4899_v54, 16  ;;  %v7723_v7 = vor.u32 %v7722_v0, %v7721_v18  ;;  %v7740_v19 = vor.u32 %v7739_v58, %v7736_v40  ;;  %v5405_v26 = vshrl.u32 %v4896_v36, 16  ;;  %v10187_v6 = vld [vmem:[#allocation4 + $0x90] sm:$0xf0] }
 0x472   : > { %v7732_v34 = vor.u32 %v7731_v37, %v7728_v48  ;;  %v5408_v55 = vshll.u32 %v4896_v36, 16  ;;  %v5415_v46 = vrot.slane %v5413_v59, 3  ;;  %v5393_v44 = vshrl.u32 %v4813_v47, 16 }
 0x473   : > { %v5418_v31 = vrot.slane %v5416_v38, 4  ;;  %v12757_v42 = vsel %vm1353_vm8, %v7720_v49, %v7723_v7  ;;  %v5407_v39 = vrot.slane %v5405_v26, 3  ;;  %v5396_v30 = vshll.u32 %v4813_v47, 16  ;;  %v12771_v38 = vld [vmem:[%s13653_s5 + $0x100] ss:$8 sps:$4 sm:$0xff]  }
 0x474   : > { %13756 = vst [vmem:[#allocation42_spill] sm:$0xff] %v12757_v42  ;;  %v12760_v22 = vsel %vm1353_vm8, %v7732_v34, %v7740_v19  ;;  %v5410_v2 = vrot.slane %v5408_v55, 4  ;;  %v5395_v40 = vrot.slane %v5393_v44, 3  ;;  %v5400_v54 = vrot.slane %v4897_v60, 3 }
 0x475   : > { %13757 = vst [vmem:[#allocation43_spill] sm:$0xff] %v12760_v22  ;;  %7864 = vmatprep.mubr.bf16.mxu1 %v12760_v22  ;;  %v5419_v0 = vor.u32 %v5418_v31, %v5415_v46  ;;  %v5401_v18 = vrot.slane %v4893_v32, 4  ;;  %v5398_v36 = vrot.slane %v5396_v30, 4  ;;  %v5218_v5 = vrot.slane %v10187_v6, 1  ;;  %v4878_v32 = vld [vmem:[#allocation4 + $0xb8] sm:$0x1f] }
 0x476   : > { %v5411_v59 = vor.u32 %v5410_v2, %v5407_v39  ;;  %7865 = vmatmul.mubr.bf16.gmra.mrb[140].mxu1 %v12757_v42  ;;  %v5219_v27 = vrot.slane %v4876_v29, 1  ;;  %v5221_v48 = vrot.slane %v12407_v33, 1  ;;  %v5222_v47 = vrot.slane %v4877_v16, 1  ;;  %v12777_v33 = vld [vmem:[%s13653_s5 + $0x114] ss:$8 sps:$4 sm:$0xff]  }
 0x477   : > { %v5402_v49 = vor.u32 %v5401_v18, %v5400_v54  ;;  %7907 = vmatprep.mubr.bf16.mxu1 %v13740_v20  ;;  %v5399_v58 = vor.u32 %v5398_v36, %v5395_v40  ;;  %v5224_v40 = vrot.slane %v12469_v11, 1  ;;  %v5225_v54 = vrot.slane %v4878_v32, 1  ;;  %v12786_v18 = vld [vmem:[%s13653_s5 + $0x110] ss:$8 sps:$4 sm:$0xff]   ;;  %v13185_v42 = vld [vmem:[%s13653_s5 + $0x3d4] ss:$8 sps:$4 sm:$0xff]  }
 0x478   : > { %v5420_v37 = vsel %vm1353_vm8, %v5411_v59, %v5419_v0  ;;  %v5220_v46 = vsel %vm1051_vm3, %v5218_v5, %v5219_v27  ;;  %v6803_v60 = vshrl.u32 %v5219_v27, 16  ;;  %v6806_v19 = vshll.u32 %v5219_v27, 16  ;;  %v13787_v22 = vld [vmem:[#allocation34_spill] sm:$0xff] }
 0x479   : > { %6571 = vmatprep.mubr.bf16.mxu0 %v5420_v37  ;;  %v6795_v7 = vshrl.u32 %v5220_v46, 16  ;;  %v6798_v34 = vshll.u32 %v5220_v46, 16  ;;  %v5223_v26 = vsel %vm1051_vm3, %v5221_v48, %v5222_v47  ;;  %v5403_v55 = vsel %vm1353_vm8, %v5399_v58, %v5402_v49  ;;  %v10188_v37 = vld [vmem:[%s13653_s5] ss:$8 sps:$4 sm:$0xff]   ;;  %v12812_v46 = vld [vmem:[%s13653_s5 + $0x134] ss:$8 sps:$4 sm:$0xff]  }
 0x47a   : > { %v6805_v31 = vrot.slane %v6803_v60, 3  ;;  %v7449_v44 = vshrl.u32 %v5223_v26, 16  ;;  %v7452_v29 = vshll.u32 %v5223_v26, 16  ;;  %6572 = vmatmul.mubr.bf16.vlgmr.msra.gmra.mrb[112].mxu0 %v5403_v55  ;;  %v6808_v30 = vrot.slane %v6806_v19, 4  ;;  %v4879_v58 = vld [vmem:[#allocation4 + $0xc8] sm:$0x1f] }
 0x47b   : > { %v6797_v39 = vrot.slane %v6795_v7, 3  ;;  %v6800_v2 = vrot.slane %v6798_v34, 4  ;;  %v7457_v16 = vshrl.u32 %v5222_v47, 16  ;;  %6581 = vmatprep.mubr.bf16.mxu0 %v12202_v52  ;;  %v7460_v0 = vshll.u32 %v5222_v47, 16  ;;  %6653 = vmatpush1.bf16.msra.mxu0 %v12771_v38  ;;  %v12792_v52 = vld [vmem:[%s13653_s5 + $0x124] ss:$8 sps:$4 sm:$0xff]  }
 0x47c   : > { %v6809_v36 = vor.u32 %v6808_v30, %v6805_v31  ;;  %6654 = vmatprep.subr.bf16.mxu0 %v12777_v33  ;;  %v7451_v6 = vrot.slane %v7449_v44, 3  ;;  %v7454_v5 = vrot.slane %v7452_v29, 4  ;;  %v5226_v48 = vsel %vm1051_vm3, %v5224_v40, %v5225_v54  ;;  %v12803_v47 = vld [vmem:[%s13653_s5 + $0x120] ss:$8 sps:$4 sm:$0xff]   ;;  %v10189_v60 = vld [vmem:[%s13653_s5 + $0x14] ss:$8 sps:$4 sm:$0xff]  }
 0x47d   : > { %v6801_v59 = vor.u32 %v6800_v2, %v6797_v39  ;;  %v7459_v27 = vrot.slane %v7457_v16, 3  ;;  %v7462_v49 = vrot.slane %v7460_v0, 4  ;;  %v7503_v7 = vshrl.u32 %v5225_v54, 16  ;;  %v12825_v29 = vld [vmem:[%s13653_s5 + $0x130] ss:$8 sps:$4 sm:$0xff]  }
 0x47e   : > { %v7455_v32 = vor.u32 %v7454_v5, %v7451_v6  ;;  %v7495_v19 = vshrl.u32 %v5226_v48, 16  ;;  %v7498_v26 = vshll.u32 %v5226_v48, 16  ;;  %v7506_v55 = vshll.u32 %v5225_v54, 16  ;;  %v10191_v39 = vld [vmem:[%s13653_s5 + $0x24] ss:$8 sps:$4 sm:$0xff]  }
 0x47f   : > { %v12795_v11 = vsel %vm1353_vm8, %v6801_v59, %v6809_v36  ;;  %6655 = vmatpush1.bf16.msra.mxu0 %v12786_v18  ;;  %v7463_v34 = vor.u32 %v7462_v49, %v7459_v27  ;;  %v5227_v31 = vrot.slane %v12547_v14, 1  ;;  %v5228_v44 = vrot.slane %v4879_v58, 1  ;;  %v12837_v2 = vld [vmem:[%s13653_s5 + $0x144] ss:$8 sps:$4 sm:$0xff]   ;;  %v4880_v54 = vld [vmem:[#allocation4 + $0xd8] sm:$0x1f] }
 0x480   : > { %7908 = vmatmul.mubr.bf16.vlgmr.msra.gmra.mrb[112].mxu1 %v12795_v11  ;;  %6656 = vmatprep.subr.bf16.mxu0 %v12792_v52  ;;  %v7505_v14 = vrot.slane %v7503_v7, 3  ;;  %v7497_v16 = vrot.slane %v7495_v19, 3  ;;  %v7500_v0 = vrot.slane %v7498_v26, 4  ;;  %v7508_v40 = vrot.slane %v7506_v55, 4  ;;  %v12848_v36 = vld [vmem:[%s13653_s5 + $0x140] ss:$8 sps:$4 sm:$0xff]  }
 0x481   : > { %7989 = vmatpush1.bf16.msra.mxu1 %v10188_v37  ;;  %7917 = vmatprep.mubr.bf16.mxu1 %v13740_v20  ;;  %v12840_v30 = vsel %vm1353_vm8, %v7455_v32, %v7463_v34  ;;  %v5229_v59 = vsel %vm1051_vm3, %v5227_v31, %v5228_v44  ;;  %v10192_v6 = vld [vmem:[%s13653_s5 + $0x20] ss:$8 sps:$4 sm:$0xff]   ;;  %v12857_v5 = vld [vmem:[%s13653_s5 + $0x154] ss:$8 sps:$4 sm:$0xff]   ;;  %v7549_v49 = vshrl.u32 %v5228_v44, 16  ;;  %v7552_v48 = vshll.u32 %v5228_v44, 16 }
 0x482   : > { %7990 = vmatprep.subr.bf16.mxu1 %v10189_v60  ;;  %6582 = vmatmul.mubr.bf16.gmra.mrb[116].mxu0 %v12191_v24  ;;  %v10190_v24 = vld [vmem:[%s13653_s5 + $0x10] ss:$8 sps:$4 sm:$0xff]   ;;  %v10193_v27 = vld [vmem:[%s13653_s5 + $0x34] ss:$8 sps:$4 sm:$0xff]   ;;  %v5230_v37 = vrot.slane %v12586_v61, 1  ;;  %v5231_v58 = vrot.slane %v4880_v54, 1  ;;  %v7501_v60 = vor.u32 %v7500_v0, %v7497_v16  ;;  %v7509_v32 = vor.u32 %v7508_v40, %v7505_v14 }
 0x483   : > { %6591 = vmatprep.mubr.bf16.mxu0 %v12236_v3  ;;  %6657 = vmatpush1.bf16.msra.mxu0 %v12803_v47  ;;  %v7541_v7 = vshrl.u32 %v5229_v59, 16  ;;  %v7544_v34 = vshll.u32 %v5229_v59, 16  ;;  %v12870_v19 = vld [vmem:[%s13653_s5 + $0x150] ss:$8 sps:$4 sm:$0xff]   ;;  %v10195_v26 = vld [vmem:[%s13653_s5 + $0x44] ss:$8 sps:$4 sm:$0xff]  }
 0x484   : > { %6658 = vmatprep.subr.bf16.mxu0 %v12812_v46  ;;  %v10194_v61 = vld [vmem:[%s13653_s5 + $0x30] ss:$8 sps:$4 sm:$0xff]   ;;  %v7551_v55 = vrot.slane %v7549_v49, 3  ;;  %v7554_v31 = vrot.slane %v7552_v48, 4  ;;  %v12882_v44 = vld [vmem:[%s13653_s5 + $0x164] ss:$8 sps:$4 sm:$0xff]   ;;  %v5232_v16 = vsel %vm1051_vm3, %v5230_v37, %v5231_v58 }
 0x485   : > { %7991 = vmatpush1.bf16.msra.mxu1 %v10190_v24  ;;  %v12885_v24 = vsel %vm1353_vm8, %v7501_v60, %v7509_v32  ;;  %v7546_v14 = vrot.slane %v7544_v34, 4  ;;  %v12893_v0 = vld [vmem:[%s13653_s5 + $0x160] ss:$8 sps:$4 sm:$0xff]   ;;  %v12902_v59 = vld [vmem:[%s13653_s5 + $0x174] ss:$8 sps:$4 sm:$0xff]   ;;  %v7595_v49 = vshrl.u32 %v5231_v58, 16 }
 0x486   : > { %7992 = vmatprep.subr.bf16.mxu1 %v10191_v39  ;;  %v7543_v39 = vrot.slane %v7541_v7, 3  ;;  %v10196_v40 = vld [vmem:[%s13653_s5 + $0x40] ss:$8 sps:$4 sm:$0xff]   ;;  %v7555_v37 = vor.u32 %v7554_v31, %v7551_v55  ;;  %v7590_v60 = vshll.u32 %v5232_v16, 16  ;;  %v7598_v32 = vshll.u32 %v5231_v58, 16 }
 0x487   : > { %6659 = vmatpush1.bf16.msra.mxu0 %v12825_v29  ;;  %v4881_v54 = vld [vmem:[#allocation4 + $0xe8] sm:$0x1f]  ;;  %v5233_v7 = vrot.slane %v12640_v25, 1  ;;  %v7597_v25 = vrot.slane %v7595_v49, 3 }
 0x488   : > { %7918 = vmatmul.mubr.bf16.gmra.mrb[116].mxu1 %v12840_v30  ;;  %6660 = vmatprep.subr.bf16.mxu0 %v12837_v2  ;;  %v7547_v48 = vor.u32 %v7546_v14, %v7543_v39  ;;  %v5234_v34 = vrot.slane %v4881_v54, 1  ;;  %v10199_v58 = vld [vmem:[%s13653_s5 + $0x64] ss:$8 sps:$4 sm:$0xff]   ;;  %v7592_v14 = vrot.slane %v7590_v60, 4 }
 0x489   : > { %7993 = vmatpush1.bf16.msra.mxu1 %v10192_v6  ;;  %7927 = vmatprep.mubr.bf16.mxu1 %v13740_v20  ;;  %v10197_v6 = vld [vmem:[%s13653_s5 + $0x54] ss:$8 sps:$4 sm:$0xff]   ;;  %v12927_v55 = vld [vmem:[%s13653_s5 + $0x304] ss:$8 sps:$4 sm:$0xff]  }
 0x48a   : > { %7994 = vmatprep.subr.bf16.mxu1 %v10193_v27  ;;  %6592 = vmatmul.mubr.bf16.gmra.mrb[120].mxu0 %v12228_v56  ;;  %v7587_v27 = vshrl.u32 %v5232_v16, 16  ;;  %v12930_v31 = vsel %vm1353_vm8, %v7547_v48, %v7555_v37  ;;  %v7600_v16 = vrot.slane %v7598_v32, 4  ;;  %v5235_v54 = vsel %vm1051_vm3, %v5233_v7, %v5234_v34 }
 0x48b   : > { %6601 = vmatprep.mubr.bf16.mxu0 %v12269_v35  ;;  %6661 = vmatpush1.bf16.msra.mxu0 %v12848_v36  ;;  %v7641_v49 = vshrl.u32 %v5234_v34, 16  ;;  %v5236_v48 = vrot.slane %v12688_v15, 1  ;;  %v7633_v7 = vshrl.u32 %v5235_v54, 16 }
 0x48c   : > { %6662 = vmatprep.subr.bf16.mxu0 %v12857_v5  ;;  %v7589_v39 = vrot.slane %v7587_v27, 3  ;;  %v7644_v27 = vshll.u32 %v5234_v34, 16  ;;  %v7601_v32 = vor.u32 %v7600_v16, %v7597_v25  ;;  %v4883_v25 = vld [vmem:[#allocation4 + $0x108] sm:$0x1f] }
 0x48d   : > { %7995 = vmatpush1.bf16.msra.mxu1 %v10194_v61  ;;  %v12915_v61 = vld [vmem:[%s13653_s5 + $0x170] ss:$8 sps:$4 sm:$0xff]   ;;  %v7635_v15 = vrot.slane %v7633_v7, 3 }
 0x48e   : > { %7996 = vmatprep.subr.bf16.mxu1 %v10195_v26  ;;  %v10198_v26 = vld [vmem:[%s13653_s5 + $0x50] ss:$8 sps:$4 sm:$0xff]   ;;  %v7593_v60 = vor.u32 %v7592_v14, %v7589_v39  ;;  %v4867_v39 = vld [vmem:[#allocation4 + $0x8] sm:$0x1f] }
 0x48f   : > { %6663 = vmatpush1.bf16.msra.mxu0 %v12870_v19 }
 0x490   : > { %7928 = vmatmul.mubr.bf16.gmra.mrb[120].mxu1 %v12885_v24  ;;  %6664 = vmatprep.subr.bf16.mxu0 %v12882_v44  ;;  %v12947_v34 = vsel %vm1353_vm8, %v7593_v60, %v7601_v32  ;;  %v5192_v60 = vrot.slane %v4867_v39, 1 }
 0x491   : > { %7997 = vmatpush1.bf16.msra.mxu1 %v10196_v40  ;;  %7937 = vmatprep.mubr.bf16.mxu1 %v13740_v20  ;;  %v4882_v40 = vld [vmem:[#allocation4 + $0xf8] sm:$0x1f] }
 0x492   : > { %7998 = vmatprep.subr.bf16.mxu1 %v10197_v6  ;;  %6602 = vmatmul.mubr.bf16.gmra.mrb[124].mxu0 %v12260_v10  ;;  %v10200_v6 = vld [vmem:[%s13653_s5 + $0x60] ss:$8 sps:$4 sm:$0xff]   ;;  %v5237_v37 = vrot.slane %v4882_v40, 1 }
 0x493   : > { %6611 = vmatprep.mubr.bf16.mxu0 %v12305_v62  ;;  %6665 = vmatpush1.bf16.msra.mxu0 %v12893_v0 }
 0x494   : > { %6666 = vmatprep.subr.bf16.mxu0 %v12902_v59 }
 0x495   : > { %7999 = vmatpush1.bf16.msra.mxu1 %v10198_v26  ;;  %v7636_v26 = vshll.u32 %v5235_v54, 16 }
 0x496   : > { %8000 = vmatprep.subr.bf16.mxu1 %v10199_v58  ;;  %v7646_v58 = vrot.slane %v7644_v27, 4  ;;  %v5239_v27 = vrot.slane %v12721_v53, 1 }
 0x497   : > { %6667 = vmatpush1.bf16.msra.mxu0 %v12915_v61  ;;  %v7638_v40 = vrot.slane %v7636_v26, 4 }
 0x498   : > { %7938 = vmatmul.mubr.bf16.gmra.mrb[124].mxu1 %v12930_v31  ;;  %7054 = vmatprep.subr.bf16.mxu0 %v12927_v55 }
 0x499   : > { %8001 = vmatpush1.bf16.msra.mxu1 %v10200_v6  ;;  %7947 = vmatprep.mubr.bf16.mxu1 %v13740_v20  ;;  %v5238_v6 = vsel %vm1051_vm3, %v5236_v48, %v5237_v37  ;;  %v7639_v14 = vor.u32 %v7638_v40, %v7635_v15  ;;  %v5240_v48 = vrot.slane %v4883_v25, 1 }
 0x49a   : > { %8002 = vmatprep.subr.bf16.mxu1 %v12511_v23  ;;  %6612 = vmatmul.mubr.bf16.gmra.mrb[128].mxu0 %v12291_v17  ;;  %v7643_v23 = vrot.slane %v7641_v49, 3  ;;  %v7682_v54 = vshll.u32 %v5238_v6, 16  ;;  %v7690_v49 = vshll.u32 %v5237_v37, 16 }
 0x49b   : > { %6621 = vmatprep.mubr.bf16.mxu0 %v12320_v21  ;;  %v7754_v53 = vshll.u32 %v5240_v48, 16 }
 0x49c   : > { %v7647_v16 = vor.u32 %v7646_v58, %v7643_v23  ;;  %v7684_v26 = vrot.slane %v7682_v54, 4  ;;  %v7692_v23 = vrot.slane %v7690_v49, 4 }
 0x49d   : > { %8003 = vmatpush1.bf16.msra.mxu1 %v12526_v12  ;;  %v7679_v12 = vshrl.u32 %v5238_v6, 16  ;;  %v7756_v54 = vrot.slane %v7754_v53, 4 }
 0x49e   : > { %8004 = vmatprep.subr.bf16.mxu1 %v12534_v43  ;;  %v7687_v43 = vshrl.u32 %v5237_v37, 16  ;;  %v12961_v32 = vsel %vm1353_vm8, %v7639_v14, %v7647_v16  ;;  %v5241_v37 = vsel %vm1051_vm3, %v5239_v27, %v5240_v48 }
 0x49f   : > { %v7681_v7 = vrot.slane %v7679_v12, 3  ;;  %v7743_v15 = vshrl.u32 %v5241_v37, 16  ;;  %v7746_v40 = vshll.u32 %v5241_v37, 16  ;;  %v5430_v12 = vshrl.u32 %v5192_v60, 16 }
 0x4a0   : > { %7948 = vmatmul.mubr.bf16.gmra.mrb[128].mxu1 %v12947_v34 }
 0x4a1   : > { %8005 = vmatpush1.bf16.msra.mxu1 %v12539_v28  ;;  %7957 = vmatprep.mubr.bf16.mxu1 %v13740_v20  ;;  %v5191_v28 = vrot.slane %v12739_v57, 1  ;;  %v7685_v57 = vor.u32 %v7684_v26, %v7681_v7  ;;  %v7745_v14 = vrot.slane %v7743_v15, 3  ;;  %v7748_v16 = vrot.slane %v7746_v40, 4  ;;  %v13765_v15 = vld [vmem:[#allocation30_spill] sm:$0xff] }
 0x4a2   : > { %8006 = vmatprep.subr.bf16.mxu1 %v12556_v41  ;;  %6622 = vmatmul.mubr.bf16.gmra.mrb[132].mxu0 %v12317_v63  ;;  %v7689_v41 = vrot.slane %v7687_v43, 3  ;;  %v13758_v43 = vld [vmem:[#allocation22_spill] sm:$0xff] }
 0x4a3   : > { %6631 = vmatprep.mubr.bf16.mxu0 %v12334_v45  ;;  %v7749_v7 = vor.u32 %v7748_v16, %v7745_v14  ;;  %v13766_v40 = vld [vmem:[#allocation10_spill] sm:$0xff]  ;;  %v13770_v14 = vld [vmem:[#allocation9_spill] sm:$0xff] }
 0x4a4   : > { %v7693_v58 = vor.u32 %v7692_v23, %v7689_v41  ;;  %v13759_v41 = vld [vmem:[#allocation23_spill] sm:$0xff]  ;;  %v13022_v16 = vld [vmem:[%s13653_s5 + $0x320] ss:$8 sps:$4 sm:$0xff]  }
 0x4a5   : > { %8007 = vmatpush1.bf16.msra.mxu1 %v12569_v8  ;;  %v5193_v8 = vsel %vm1051_vm3, %v5191_v28, %v5192_v60 }
 0x4a6   : > { %8008 = vmatprep.subr.bf16.mxu1 %v12581_v1  ;;  %v7751_v1 = vshrl.u32 %v5240_v48, 16  ;;  %v5422_v6 = vshrl.u32 %v5193_v8, 16  ;;  %v5425_v25 = vshll.u32 %v5193_v8, 16  ;;  %v5432_v48 = vrot.slane %v5430_v12, 3  ;;  %v13762_v8 = vld [vmem:[#allocation27_spill] sm:$0xff] }
 0x4a7   : > { %v13006_v12 = vld [vmem:[%s13653_s5 + $0x310] ss:$8 sps:$4 sm:$0xff]  }
 0x4a8   : > { %7958 = vmatmul.mubr.bf16.gmra.mrb[132].mxu1 %v12961_v32  ;;  %v7753_v39 = vrot.slane %v7751_v1, 3  ;;  %v5424_v49 = vrot.slane %v5422_v6, 3  ;;  %v5427_v27 = vrot.slane %v5425_v25, 4  ;;  %v13763_v1 = vld [vmem:[#allocation28_spill] sm:$0xff]  ;;  %v12999_v6 = vld [vmem:[%s13653_s5 + $0x314] ss:$8 sps:$4 sm:$0xff]  }
 0x4a9   : > { %8009 = vmatpush1.bf16.msra.mxu1 %v12605_v4  ;;  %7967 = vmatprep.mubr.bf16.mxu1 %v13740_v20  ;;  %v5433_v4 = vshll.u32 %v5192_v60, 16  ;;  %v13761_v60 = vld [vmem:[#allocation8_spill] sm:$0xff]  ;;  %v13767_v25 = vld [vmem:[#allocation31_spill] sm:$0xff] }
 0x4aa   : > { %8010 = vmatprep.subr.bf16.mxu1 %v12611_v50  ;;  %6632 = vmatmul.mubr.bf16.gmra.mrb[136].mxu0 %v12330_v13  ;;  %v12974_v50 = vsel %vm1353_vm8, %v7685_v57, %v7693_v58  ;;  %v7757_v26 = vor.u32 %v7756_v54, %v7753_v39  ;;  %v5428_v23 = vor.u32 %v5427_v27, %v5424_v49  ;;  %v12992_v58 = vld [vmem:[%s13653_s5 + $0x300] ss:$8 sps:$4 sm:$0xff]   ;;  %v13769_v39 = vld [vmem:[#allocation35_spill] sm:$0xff] }
 0x4ab   : > { %6641 = vmatprep.mubr.bf16.mxu0 %v12349_v51  ;;  %v5435_v28 = vrot.slane %v5433_v4, 4  ;;  %v13768_v4 = vld [vmem:[#allocation33_spill] sm:$0xff]  ;;  %v13029_v54 = vld [vmem:[%s13653_s5 + $0x334] ss:$8 sps:$4 sm:$0xff]  }
 0x4ac   : > { %v12985_v53 = vsel %vm1353_vm8, %v7749_v7, %v7757_v26  ;;  %v13771_v49 = vld [vmem:[#allocation13_spill] sm:$0xff]  ;;  %v13772_v27 = vld [vmem:[#allocation11_spill] sm:$0xff] }
 0x4ad   : > { %8011 = vmatpush1.bf16.msra.mxu1 %v12620_v9  ;;  %v13760_v9 = vld [vmem:[#allocation25_spill] sm:$0xff]  ;;  %v5436_v37 = vor.u32 %v5435_v28, %v5432_v48  ;;  %13764 = vst [vmem:[#allocation22_spill] sm:$0xff] %v12985_v53  ;;  %v13038_v48 = vld [vmem:[%s13653_s5 + $0x330] ss:$8 sps:$4 sm:$0xff]  }
 0x4ae   : > { %8012 = vmatprep.subr.bf16.mxu1 %v13758_v43  ;;  %v13014_v43 = vld [vmem:[%s13653_s5 + $0x324] ss:$8 sps:$4 sm:$0xff]   ;;  %v13054_v28 = vld [vmem:[%s13653_s5 + $0x340] ss:$8 sps:$4 sm:$0xff]   ;;  %v13777_v26 = vld [vmem:[#allocation19_spill] sm:$0xff] }
 0x4af   : > { %v5437_v57 = vsel %vm1353_vm8, %v5428_v23, %v5436_v37  ;;  %v13077_v7 = vld [vmem:[%s13653_s5 + $0x364] ss:$8 sps:$4 sm:$0xff]   ;;  %v13093_v23 = vld [vmem:[%s13653_s5 + $0x374] ss:$8 sps:$4 sm:$0xff]  }
 0x4b0   : > { %7968 = vmatmul.mubr.bf16.gmra.mrb[136].mxu1 %v12974_v50  ;;  %v13109_v37 = vld [vmem:[%s13653_s5 + $0x384] ss:$8 sps:$4 sm:$0xff]  }
 0x4b1   : > { %8013 = vmatpush1.bf16.msra.mxu1 %v13759_v41  ;;  %7977 = vmatprep.mubr.bf16.mxu1 %v13740_v20  ;;  %v13774_v41 = vld [vmem:[#allocation16_spill] sm:$0xff] }
 0x4b2   : > { %8014 = vmatprep.subr.bf16.mxu1 %v13760_v9  ;;  %6642 = vmatmul.mubr.bf16.gmra.mrb[140].mxu0 %v13761_v60  ;;  %v13070_v9 = vld [vmem:[%s13653_s5 + $0x350] ss:$8 sps:$4 sm:$0xff]  }
 0x4b3   : > { %6684 = vmatprep.mubr.bf16.mxu0 %v13740_v20 }
 0x4b5   : > { %8015 = vmatpush1.bf16.msra.mxu1 %v13762_v8  ;;  %v13780_v8 = vld [vmem:[#allocation24_spill] sm:$0xff] }
 0x4b6   : > { %8016 = vmatprep.subr.bf16.mxu1 %v13763_v1  ;;  %v13125_v1 = vld [vmem:[%s13653_s5 + $0x394] ss:$8 sps:$4 sm:$0xff]  }
 0x4b8   : > { %7978 = vmatmul.mubr.bf16.gmra.mrb[140].mxu1 %v12985_v53  ;;  %v13786_v53 = vld [vmem:[#allocation37_spill] sm:$0xff] }
 0x4b9   : > { %8017 = vmatpush1.bf16.msra.mxu1 %v13765_v15  ;;  %8020 = vmatprep.mubr.bf16.mxu1 %v13766_v40  ;;  %v13783_v15 = vld [vmem:[#allocation32_spill] sm:$0xff] }
 0x4ba   : > { %8018 = vmatprep.subr.bf16.mxu1 %v13767_v25  ;;  %6685 = vmatmul.mubr.bf16.vlgmr.msra.gmra.mrb[112].mxu0 %v5437_v57  ;;  %v13141_v57 = vld [vmem:[%s13653_s5 + $0x3a4] ss:$8 sps:$4 sm:$0xff]   ;;  %v13157_v25 = vld [vmem:[%s13653_s5 + $0x3b4] ss:$8 sps:$4 sm:$0xff]  }
 0x4bb   : > { %7055 = vmatpush1.bf16.msra.mxu0 %v12992_v58  ;;  %6694 = vmatprep.mubr.bf16.mxu0 %v13740_v20 }
 0x4bc   : > { %7056 = vmatprep.subr.bf16.mxu0 %v12999_v6 }
 0x4bd   : > { %8019 = vmatpush1.bf16.msra.mxu1 %v13768_v4  ;;  %v13171_v4 = vld [vmem:[%s13653_s5 + $0x3c4] ss:$8 sps:$4 sm:$0xff]  }
 0x4be   : > { %8101 = vmatprep.subr.bf16.mxu1 %v13769_v39  ;;  %v13785_v39 = vld [vmem:[#allocation29_spill] sm:$0xff] }
 0x4bf   : > { %7057 = vmatpush1.bf16.msra.mxu0 %v13006_v12 }
 0x4c0   : > { %8021 = vmatmul.mubr.bf16.vlgmr.msra.gmra.mrb[112].mxu1 %v13770_v14  ;;  %7058 = vmatprep.subr.bf16.mxu0 %v13014_v43 }
 0x4c1   : > { %8102 = vmatpush1.bf16.msra.mxu1 %v12771_v38  ;;  %8030 = vmatprep.mubr.bf16.mxu1 %v13771_v49  ;;  %v13046_v38 = vld [vmem:[%s13653_s5 + $0x344] ss:$8 sps:$4 sm:$0xff]  }
 0x4c2   : > { %8103 = vmatprep.subr.bf16.mxu1 %v12777_v33  ;;  %6695 = vmatmul.mubr.bf16.gmra.mrb[116].mxu0 %v13772_v27  ;;  %v13773_v33 = vld [vmem:[#allocation12_spill] sm:$0xff] }
 0x4c3   : > { %7059 = vmatpush1.bf16.msra.mxu0 %v13022_v16  ;;  %6704 = vmatprep.mubr.bf16.mxu0 %v13740_v20  ;;  %v13178_v27 = vld [vmem:[%s13653_s5 + $0x3c0] ss:$8 sps:$4 sm:$0xff]  }
 0x4c4   : > { %7060 = vmatprep.subr.bf16.mxu0 %v13029_v54 }
 0x4c5   : > { %8104 = vmatpush1.bf16.msra.mxu1 %v12786_v18  ;;  %v13061_v18 = vld [vmem:[%s13653_s5 + $0x354] ss:$8 sps:$4 sm:$0xff]  }
 0x4c6   : > { %8105 = vmatprep.subr.bf16.mxu1 %v12792_v52  ;;  %v13775_v52 = vld [vmem:[#allocation14_spill] sm:$0xff] }
 0x4c7   : > { %7061 = vmatpush1.bf16.msra.mxu0 %v13038_v48 }
 0x4c8   : > { %8031 = vmatmul.mubr.bf16.gmra.mrb[116].mxu1 %v13773_v33  ;;  %7062 = vmatprep.subr.bf16.mxu0 %v13046_v38 }
 0x4c9   : > { %8040 = vmatprep.mubr.bf16.mxu1 %v13774_v41  ;;  %8106 = vmatpush1.bf16.msra.mxu1 %v12803_v47  ;;  %v13776_v47 = vld [vmem:[#allocation15_spill] sm:$0xff] }
 0x4ca   : > { %6705 = vmatmul.mubr.bf16.gmra.mrb[120].mxu0 %v13775_v52  ;;  %8107 = vmatprep.subr.bf16.mxu1 %v12812_v46  ;;  %v13086_v46 = vld [vmem:[%s13653_s5 + $0x360] ss:$8 sps:$4 sm:$0xff]  }
 0x4cb   : > { %7063 = vmatpush1.bf16.msra.mxu0 %v13054_v28  ;;  %6714 = vmatprep.mubr.bf16.mxu0 %v13740_v20 }
 0x4cc   : > { %7064 = vmatprep.subr.bf16.mxu0 %v13061_v18 }
 0x4cd   : > { %8108 = vmatpush1.bf16.msra.mxu1 %v12825_v29  ;;  %v13778_v29 = vld [vmem:[#allocation17_spill] sm:$0xff] }
 0x4ce   : > { %8109 = vmatprep.subr.bf16.mxu1 %v12837_v2  ;;  %v13102_v2 = vld [vmem:[%s13653_s5 + $0x370] ss:$8 sps:$4 sm:$0xff]  }
 0x4cf   : > { %7065 = vmatpush1.bf16.msra.mxu0 %v13070_v9 }
 0x4d0   : > { %8041 = vmatmul.mubr.bf16.gmra.mrb[120].mxu1 %v13776_v47  ;;  %7066 = vmatprep.subr.bf16.mxu0 %v13077_v7 }
 0x4d1   : > { %8050 = vmatprep.mubr.bf16.mxu1 %v13777_v26  ;;  %8110 = vmatpush1.bf16.msra.mxu1 %v12848_v36  ;;  %v13779_v36 = vld [vmem:[#allocation18_spill] sm:$0xff] }
 0x4d2   : > { %6715 = vmatmul.mubr.bf16.gmra.mrb[124].mxu0 %v13778_v29  ;;  %8111 = vmatprep.subr.bf16.mxu1 %v12857_v5  ;;  %v13118_v5 = vld [vmem:[%s13653_s5 + $0x380] ss:$8 sps:$4 sm:$0xff]  }
 0x4d3   : > { %7067 = vmatpush1.bf16.msra.mxu0 %v13086_v46  ;;  %6724 = vmatprep.mubr.bf16.mxu0 %v13740_v20  ;;  %v13792_v29 = vld [vmem:[#allocation41_spill] sm:$0xff] }
 0x4d4   : > { %7068 = vmatprep.subr.bf16.mxu0 %v13093_v23 }
 0x4d5   : > { %8112 = vmatpush1.bf16.msra.mxu1 %v12870_v19  ;;  %v13781_v19 = vld [vmem:[#allocation20_spill] sm:$0xff] }
 0x4d6   : > { %8113 = vmatprep.subr.bf16.mxu1 %v12882_v44  ;;  %v13134_v44 = vld [vmem:[%s13653_s5 + $0x390] ss:$8 sps:$4 sm:$0xff]  }
 0x4d7   : > { %7069 = vmatpush1.bf16.msra.mxu0 %v13102_v2 }
 0x4d8   : > { %8051 = vmatmul.mubr.bf16.gmra.mrb[124].mxu1 %v13779_v36  ;;  %7070 = vmatprep.subr.bf16.mxu0 %v13109_v37  ;;  %v13255_v36 = vld [vmem:[%s13653_s5 + $0x424] ss:$8 sps:$4 sm:$0xff]  }
 0x4d9   : > { %8060 = vmatprep.mubr.bf16.mxu1 %v13780_v8  ;;  %8114 = vmatpush1.bf16.msra.mxu1 %v12893_v0  ;;  %v13782_v0 = vld [vmem:[#allocation21_spill] sm:$0xff]  ;;  %v13791_v8 = vld [vmem:[#allocation39_spill] sm:$0xff] }
 0x4da   : > { %6725 = vmatmul.mubr.bf16.gmra.mrb[128].mxu0 %v13781_v19  ;;  %8115 = vmatprep.subr.bf16.mxu1 %v12902_v59  ;;  %v13150_v59 = vld [vmem:[%s13653_s5 + $0x3a0] ss:$8 sps:$4 sm:$0xff]   ;;  %v13790_v19 = vld [vmem:[#allocation38_spill] sm:$0xff] }
 0x4db   : > { %7071 = vmatpush1.bf16.msra.mxu0 %v13118_v5  ;;  %6734 = vmatprep.mubr.bf16.mxu0 %v13740_v20 }
 0x4dc   : > { %7072 = vmatprep.subr.bf16.mxu0 %v13125_v1 }
 0x4dd   : > { %8116 = vmatpush1.bf16.msra.mxu1 %v12915_v61  ;;  %v13784_v61 = vld [vmem:[#allocation26_spill] sm:$0xff] }
 0x4de   : > { %8263 = vmatprep.subr.bf16.mxu1 %v12927_v55  ;;  %v13164_v55 = vld [vmem:[%s13653_s5 + $0x3b0] ss:$8 sps:$4 sm:$0xff]  }
 0x4df   : > { %7073 = vmatpush1.bf16.msra.mxu0 %v13134_v44 }
 0x4e0   : > { %8061 = vmatmul.mubr.bf16.gmra.mrb[128].mxu1 %v13782_v0  ;;  %7074 = vmatprep.subr.bf16.mxu0 %v13141_v57  ;;  %v13213_v0 = vld [vmem:[%s13653_s5 + $0x3f4] ss:$8 sps:$4 sm:$0xff]  }
 0x4e1   : > { %8070 = vmatprep.mubr.bf16.mxu1 %v13783_v15  ;;  %v13789_v15 = vld [vmem:[#allocation40_spill] sm:$0xff] }
 0x4e2   : > { %6735 = vmatmul.mubr.bf16.gmra.mrb[132].mxu0 %v13784_v61  ;;  %v13788_v61 = vld [vmem:[#allocation36_spill] sm:$0xff] }
 0x4e3   : > { %7075 = vmatpush1.bf16.msra.mxu0 %v13150_v59  ;;  %6744 = vmatprep.mubr.bf16.mxu0 %v13740_v20 }
 0x4e4   : > { %7076 = vmatprep.subr.bf16.mxu0 %v13157_v25 }
 0x4e7   : > { %7077 = vmatpush1.bf16.msra.mxu0 %v13164_v55 }
 0x4e8   : > { %8071 = vmatmul.mubr.bf16.gmra.mrb[132].mxu1 %v13785_v39  ;;  %7078 = vmatprep.subr.bf16.mxu0 %v13171_v4  ;;  %v13192_v39 = vld [vmem:[%s13653_s5 + $0x3d0] ss:$8 sps:$4 sm:$0xff]  }
 0x4e9   : > { %8080 = vmatprep.mubr.bf16.mxu1 %v13786_v53  ;;  %v13199_v53 = vld [vmem:[%s13653_s5 + $0x3e4] ss:$8 sps:$4 sm:$0xff]  }
 0x4ea   : > { %6745 = vmatmul.mubr.bf16.gmra.mrb[136].mxu0 %v13787_v22  ;;  %v13206_v22 = vld [vmem:[%s13653_s5 + $0x3e0] ss:$8 sps:$4 sm:$0xff]  }
 0x4eb   : > { %7079 = vmatpush1.bf16.msra.mxu0 %v13178_v27  ;;  %6754 = vmatprep.mubr.bf16.mxu0 %v13740_v20 }
 0x4ec   : > { %7080 = vmatprep.subr.bf16.mxu0 %v13185_v42 }
 0x4ef   : > { %7081 = vmatpush1.bf16.msra.mxu0 %v13192_v39 }
 0x4f0   : > { %8081 = vmatmul.mubr.bf16.gmra.mrb[136].mxu1 %v13788_v61  ;;  %7082 = vmatprep.subr.bf16.mxu0 %v13199_v53  ;;  %v13221_v61 = vld [vmem:[%s13653_s5 + $0x3f0] ss:$8 sps:$4 sm:$0xff]  }
 0x4f1   : > { %8090 = vmatprep.mubr.bf16.mxu1 %v13789_v15  ;;  %v13227_v15 = vld [vmem:[%s13653_s5 + $0x404] ss:$8 sps:$4 sm:$0xff]  }
 0x4f2   : > { %6755 = vmatmul.mubr.bf16.gmra.mrb[140].mxu0 %v13790_v19  ;;  %v13241_v19 = vld [vmem:[%s13653_s5 + $0x414] ss:$8 sps:$4 sm:$0xff]  }
 0x4f3   : > { %7083 = vmatpush1.bf16.msra.mxu0 %v13206_v22  ;;  %7086 = vmatprep.mubr.bf16.mxu0 %v12236_v3  ;;  %v13234_v3 = vld [vmem:[%s13653_s5 + $0x400] ss:$8 sps:$4 sm:$0xff]  }
 0x4f4   : > { %7084 = vmatprep.subr.bf16.mxu0 %v13213_v0 }
 0x4f7   : > { %7085 = vmatpush1.bf16.msra.mxu0 %v13221_v61 }
 0x4f8   : > { %8091 = vmatmul.mubr.bf16.gmra.mrb[140].mxu1 %v13791_v8  ;;  %7167 = vmatprep.subr.bf16.mxu0 %v13227_v15  ;;  %v13249_v8 = vld [vmem:[%s13653_s5 + $0x410] ss:$8 sps:$4 sm:$0xff]  }
 0x4f9   : > { %8133 = vmatprep.mubr.bf16.mxu1 %v13740_v20 }
 0x4fa   : > { %7087 = vmatmul.mubr.bf16.vlgmr.msra.gmra.mrb[112].mxu0 %v12228_v56  ;;  %v13262_v56 = vld [vmem:[%s13653_s5 + $0x420] ss:$8 sps:$4 sm:$0xff]  }
 0x4fb   : > { %7096 = vmatprep.mubr.bf16.mxu0 %v12269_v35  ;;  %7168 = vmatpush1.bf16.msra.mxu0 %v13234_v3  ;;  %v13269_v35 = vld [vmem:[%s13653_s5 + $0x434] ss:$8 sps:$4 sm:$0xff]  }
 0x4fc   : > { %7169 = vmatprep.subr.bf16.mxu0 %v13241_v19 }
 0x4ff   : > { %7170 = vmatpush1.bf16.msra.mxu0 %v13249_v8 }
 0x500   : > { %8134 = vmatmul.mubr.bf16.vlgmr.msra.gmra.mrb[112].mxu1 %v13792_v29  ;;  %7171 = vmatprep.subr.bf16.mxu0 %v13255_v36 }
 0x501   : > { %8264 = vmatpush1.bf16.msra.mxu1 %v12992_v58  ;;  %8143 = vmatprep.mubr.bf16.mxu1 %v13740_v20  ;;  %v13279_v58 = vld [vmem:[%s13653_s5 + $0x430] ss:$8 sps:$4 sm:$0xff]  }
 0x502   : > { %8265 = vmatprep.subr.bf16.mxu1 %v12999_v6  ;;  %7097 = vmatmul.mubr.bf16.gmra.mrb[116].mxu0 %v12260_v10  ;;  %v13287_v6 = vld [vmem:[%s13653_s5 + $0x444] ss:$8 sps:$4 sm:$0xff]   ;;  %v13294_v10 = vld [vmem:[%s13653_s5 + $0x440] ss:$8 sps:$4 sm:$0xff]  }
 0x503   : > { %7106 = vmatprep.mubr.bf16.mxu0 %v12305_v62  ;;  %7172 = vmatpush1.bf16.msra.mxu0 %v13262_v56  ;;  %v13301_v62 = vld [vmem:[%s13653_s5 + $0x454] ss:$8 sps:$4 sm:$0xff]  }
 0x504   : > { %7173 = vmatprep.subr.bf16.mxu0 %v13269_v35 }
 0x505   : > { %8266 = vmatpush1.bf16.msra.mxu1 %v13006_v12  ;;  %v13311_v12 = vld [vmem:[%s13653_s5 + $0x450] ss:$8 sps:$4 sm:$0xff]  }
 0x506   : > { %8267 = vmatprep.subr.bf16.mxu1 %v13014_v43  ;;  %v13319_v43 = vld [vmem:[%s13653_s5 + $0x464] ss:$8 sps:$4 sm:$0xff]  }
 0x507   : > { %7174 = vmatpush1.bf16.msra.mxu0 %v13279_v58 }
 0x508   : > { %8144 = vmatmul.mubr.bf16.gmra.mrb[116].mxu1 %v12795_v11  ;;  %7175 = vmatprep.subr.bf16.mxu0 %v13287_v6 }
 0x509   : > { %8268 = vmatpush1.bf16.msra.mxu1 %v13022_v16  ;;  %8153 = vmatprep.mubr.bf16.mxu1 %v13740_v20  ;;  %v13343_v16 = vld [vmem:[%s13653_s5 + $0x470] ss:$8 sps:$4 sm:$0xff]  }
 0x50a   : > { %8269 = vmatprep.subr.bf16.mxu1 %v13029_v54  ;;  %7107 = vmatmul.mubr.bf16.gmra.mrb[120].mxu0 %v12291_v17  ;;  %v13326_v17 = vld [vmem:[%s13653_s5 + $0x460] ss:$8 sps:$4 sm:$0xff]  }
 0x50b   : > { %7116 = vmatprep.mubr.bf16.mxu0 %v12320_v21  ;;  %7176 = vmatpush1.bf16.msra.mxu0 %v13294_v10  ;;  %v13333_v21 = vld [vmem:[%s13653_s5 + $0x474] ss:$8 sps:$4 sm:$0xff]  }
 0x50c   : > { %7177 = vmatprep.subr.bf16.mxu0 %v13301_v62 }
 0x50d   : > { %8270 = vmatpush1.bf16.msra.mxu1 %v13038_v48 }
 0x50e   : > { %8271 = vmatprep.subr.bf16.mxu1 %v13046_v38  ;;  %v13800_v38 = vld [vmem:[#allocation29_spill] sm:$0xff] }
 0x50f   : > { %7178 = vmatpush1.bf16.msra.mxu0 %v13311_v12 }
 0x510   : > { %8154 = vmatmul.mubr.bf16.gmra.mrb[120].mxu1 %v12840_v30  ;;  %7179 = vmatprep.subr.bf16.mxu0 %v13319_v43 }
 0x511   : > { %8272 = vmatpush1.bf16.msra.mxu1 %v13054_v28  ;;  %8163 = vmatprep.mubr.bf16.mxu1 %v13740_v20 }
 0x512   : > { %8273 = vmatprep.subr.bf16.mxu1 %v13061_v18  ;;  %7117 = vmatmul.mubr.bf16.gmra.mrb[124].mxu0 %v12317_v63  ;;  %v13793_v63 = vld [vmem:[#allocation17_spill] sm:$0xff]  ;;  %v13802_v18 = vld [vmem:[#allocation34_spill] sm:$0xff] }
 0x513   : > { %7126 = vmatprep.mubr.bf16.mxu0 %v12334_v45  ;;  %7180 = vmatpush1.bf16.msra.mxu0 %v13326_v17  ;;  %v13795_v45 = vld [vmem:[#allocation24_spill] sm:$0xff] }
 0x514   : > { %7181 = vmatprep.subr.bf16.mxu0 %v13333_v21 }
 0x515   : > { %8274 = vmatpush1.bf16.msra.mxu1 %v13070_v9 }
 0x516   : > { %8275 = vmatprep.subr.bf16.mxu1 %v13077_v7 }
 0x517   : > { %7182 = vmatpush1.bf16.msra.mxu0 %v13343_v16 }
 0x518   : > { %8164 = vmatmul.mubr.bf16.gmra.mrb[124].mxu1 %v12885_v24 }
 0x519   : > { %8276 = vmatpush1.bf16.msra.mxu1 %v13086_v46  ;;  %8173 = vmatprep.mubr.bf16.mxu1 %v13740_v20  ;;  %v13804_v46 = vld [vmem:[#allocation40_spill] sm:$0xff] }
 0x51a   : > { %8277 = vmatprep.subr.bf16.mxu1 %v13093_v23  ;;  %7127 = vmatmul.mubr.bf16.gmra.mrb[128].mxu0 %v12330_v13  ;;  %v13794_v13 = vld [vmem:[#allocation18_spill] sm:$0xff] }
 0x51b   : > { %7136 = vmatprep.mubr.bf16.mxu0 %v12349_v51  ;;  %v13796_v51 = vld [vmem:[#allocation20_spill] sm:$0xff] }
 0x51d   : > { %8278 = vmatpush1.bf16.msra.mxu1 %v13102_v2 }
 0x51e   : > { %8279 = vmatprep.subr.bf16.mxu1 %v13109_v37 }
 0x520   : > { %8174 = vmatmul.mubr.bf16.gmra.mrb[128].mxu1 %v12930_v31 }
 0x521   : > { %8280 = vmatpush1.bf16.msra.mxu1 %v13118_v5  ;;  %8183 = vmatprep.mubr.bf16.mxu1 %v13740_v20 }
 0x522   : > { %8281 = vmatprep.subr.bf16.mxu1 %v13125_v1  ;;  %7137 = vmatmul.mubr.bf16.gmra.mrb[132].mxu0 %v13761_v60  ;;  %v13798_v60 = vld [vmem:[#allocation32_spill] sm:$0xff] }
 0x523   : > { %7146 = vmatprep.mubr.bf16.mxu0 %v13766_v40  ;;  %v4848_v40 = vld [vmem:[#allocation4 + $0x118] sm:$0xf] }
 0x524   : > { %v5148_v54 = vshll.u32 %v4848_v40, 16 }
 0x525   : > { %8282 = vmatpush1.bf16.msra.mxu1 %v13134_v44  ;;  %v4847_v44 = vld [vmem:[#allocation4 + $0x110] sm:$0xf8] }
 0x526   : > { %8283 = vmatprep.subr.bf16.mxu1 %v13141_v57  ;;  %v5150_v28 = vrot.slane %v5148_v54, 1  ;;  %v13806_v57 = vld [vmem:[#allocation39_spill] sm:$0xff] }
 0x528   : > { %8184 = vmatmul.mubr.bf16.gmra.mrb[132].mxu1 %v12947_v34 }
 0x529   : > { %8284 = vmatpush1.bf16.msra.mxu1 %v13150_v59  ;;  %8193 = vmatprep.mubr.bf16.mxu1 %v13740_v20  ;;  %v8215_v59 = vshrl.u32 %v4847_v44, 16 }
 0x52a   : > { %8285 = vmatprep.subr.bf16.mxu1 %v13157_v25  ;;  %7147 = vmatmul.mubr.bf16.gmra.mrb[136].mxu0 %v13770_v14 }
 0x52b   : > { %7156 = vmatprep.mubr.bf16.mxu0 %v13771_v49 }
 0x52d   : > { %8286 = vmatpush1.bf16.msra.mxu1 %v13164_v55  ;;  %v8217_v55 = vrot.slane %v8215_v59, 3 }
 0x52e   : > { %8287 = vmatprep.subr.bf16.mxu1 %v13171_v4 }
 0x530   : > { %8194 = vmatmul.mubr.bf16.gmra.mrb[136].mxu1 %v12961_v32 }
 0x531   : > { %8288 = vmatpush1.bf16.msra.mxu1 %v13178_v27  ;;  %8203 = vmatprep.mubr.bf16.mxu1 %v13740_v20  ;;  %v8223_v27 = vrot.slane %v5148_v54, 4 }
 0x532   : > { %8289 = vmatprep.subr.bf16.mxu1 %v13185_v42  ;;  %7157 = vmatmul.mubr.bf16.gmra.mrb[140].mxu0 %v13773_v33  ;;  %v13797_v42 = vld [vmem:[#allocation21_spill] sm:$0xff] }
 0x533   : > { %7199 = vmatprep.mubr.bf16.mxu0 %v13740_v20  ;;  %v13801_v33 = vld [vmem:[#allocation37_spill] sm:$0xff] }
 0x535   : > { %8290 = vmatpush1.bf16.msra.mxu1 %v13192_v39 }
 0x536   : > { %8291 = vmatprep.subr.bf16.mxu1 %v13199_v53  ;;  %v13799_v53 = vld [vmem:[#allocation26_spill] sm:$0xff] }
 0x538   : > { %8204 = vmatmul.mubr.bf16.gmra.mrb[140].mxu1 %v12974_v50 }
 0x539   : > { %8292 = vmatpush1.bf16.msra.mxu1 %v13206_v22  ;;  %8295 = vmatprep.mubr.bf16.mxu1 %v13774_v41  ;;  %v13406_v22 = vld [vmem:[#allocation4 + $0x110] sm:$0xf0]  ;;  %v5152_v41 = vshrl.u32 %v4848_v40, 16 }
 0x53a   : > { %8293 = vmatprep.subr.bf16.mxu1 %v13213_v0  ;;  %7200 = vmatmul.mubr.bf16.vlgmr.msra.gmra.mrb[112].mxu0 %v13775_v52  ;;  %v5143_v14 = vshll.u32 %v13406_v22, 16  ;;  %v5141_v49 = vshrl.u32 %v13406_v22, 16  ;;  %v13807_v0 = vld [vmem:[#allocation43_spill] sm:$0xff] }
 0x53b   : > { %7209 = vmatprep.mubr.bf16.mxu0 %v13740_v20  ;;  %v5154_v9 = vor.u32 %v5152_v41, %v5150_v28  ;;  %v8222_v39 = vrot.slane %v5152_v41, 3 }
 0x53c   : > { %v5145_v48 = vrot.slane %v5143_v14, 1 }
 0x53d   : > { %8294 = vmatpush1.bf16.msra.mxu1 %v13221_v61  ;;  %v8235_v2 = vshrl.u32 %v5154_v9, 16  ;;  %v8238_v37 = vshll.u32 %v5154_v9, 16 }
 0x53e   : > { %8376 = vmatprep.subr.bf16.mxu1 %v13227_v15  ;;  %v5146_v52 = vor.u32 %v5145_v48, %v5141_v49  ;;  %v8218_v15 = vshll.u32 %v4847_v44, 16 }
 0x53f   : > { %v8237_v1 = vrot.slane %v8235_v2, 3 }
 0x540   : > { %8296 = vmatmul.mubr.bf16.vlgmr.msra.gmra.mrb[112].mxu1 %v13776_v47  ;;  %v5151_v7 = vsel %vm672_vm4, %v5146_v52, %v5150_v28  ;;  %v13803_v47 = vld [vmem:[#allocation36_spill] sm:$0xff]  ;;  %v8220_v4 = vrot.slane %v8218_v15, 4 }
 0x541   : > { %8377 = vmatpush1.bf16.msra.mxu1 %v13234_v3  ;;  %8305 = vmatprep.mubr.bf16.mxu1 %v13777_v26  ;;  %v8227_v26 = vshrl.u32 %v5151_v7, 16  ;;  %v8230_v23 = vshll.u32 %v5151_v7, 16 }
 0x542   : > { %8378 = vmatprep.subr.bf16.mxu1 %v13241_v19  ;;  %7210 = vmatmul.mubr.bf16.gmra.mrb[116].mxu0 %v13793_v63  ;;  %v8240_v19 = vrot.slane %v8238_v37, 4 }
 0x543   : > { %7219 = vmatprep.mubr.bf16.mxu0 %v13740_v20  ;;  %v8229_v5 = vrot.slane %v8227_v26, 3 }
 0x544   : > { %v8241_v61 = vor.u32 %v8240_v19, %v8237_v1 }
 0x545   : > { %8379 = vmatpush1.bf16.msra.mxu1 %v13249_v8  ;;  %v8232_v8 = vrot.slane %v8230_v23, 4 }
 0x546   : > { %8380 = vmatprep.subr.bf16.mxu1 %v13255_v36  ;;  %v13805_v36 = vld [vmem:[#allocation38_spill] sm:$0xff] }
 0x547   : > { %v8233_v25 = vor.u32 %v8232_v8, %v8229_v5 }
 0x548   : > { %8306 = vmatmul.mubr.bf16.gmra.mrb[116].mxu1 %v13794_v13  ;;  %v7313_v13 = vlaneseq }
 0x549   : > { %8315 = vmatprep.mubr.bf16.mxu1 %v13795_v45  ;;  %8381 = vmatpush1.bf16.msra.mxu1 %v13262_v56  ;;  %v8242_v3 = vsel %vm1353_vm8, %v8233_v25, %v8241_v61  ;;  %v13808_v56 = vld [vmem:[#allocation42_spill] sm:$0xff] }
 0x54a   : > { %8382 = vmatprep.subr.bf16.mxu1 %v13269_v35  ;;  %7220 = vmatmul.mubr.bf16.gmra.mrb[120].mxu0 %v13796_v51  ;;  %v8221_v35 = vor.u32 %v8220_v4, %v8217_v55  ;;  %v7314_v45 = vshrl.u32 %v7313_v13, 7 }
 0x54b   : > { %7229 = vmatprep.mubr.bf16.mxu0 %v13740_v20 }
 0x54c   : > { %v7315_v51 = vsub.s32 0, %v7314_v45 }
 0x54d   : > { %8383 = vmatpush1.bf16.msra.mxu1 %v13279_v58  ;;  %v8224_v58 = vor.u32 %v8223_v27, %v8222_v39 }
 0x54e   : > { %8384 = vmatprep.subr.bf16.mxu1 %v13287_v6 }
 0x54f   : > { %v8225_v6 = vsel %vm1353_vm8, %v8221_v35, %v8224_v58 }
 0x550   : > { %8316 = vmatmul.mubr.bf16.gmra.mrb[120].mxu1 %v13797_v42  ;;  %v5391_v42 = vld [vmem:[%s13654_s6] sm:$0x3] }
 0x551   : > { %8325 = vmatprep.mubr.bf16.mxu1 %v13798_v60  ;;  %8385 = vmatpush1.bf16.msra.mxu1 %v13294_v10  ;;  %v13459_v60 = vrot.slane %v5391_v42, %v7315_v51 }
 0x552   : > { %8386 = vmatprep.subr.bf16.mxu1 %v13301_v62  ;;  %7230 = vmatmul.mubr.bf16.gmra.mrb[124].mxu0 %v13799_v53 }
 0x553   : > { %7239 = vmatprep.mubr.bf16.mxu0 %v13740_v20 }
 0x555   : > { %8387 = vmatpush1.bf16.msra.mxu1 %v13311_v12 }
 0x556   : > { %8388 = vmatprep.subr.bf16.mxu1 %v13319_v43 }
 0x558   : > { %8326 = vmatmul.mubr.bf16.gmra.mrb[124].mxu1 %v13800_v38 }
 0x559   : > { %8335 = vmatprep.mubr.bf16.mxu1 %v13801_v33  ;;  %8389 = vmatpush1.bf16.msra.mxu1 %v13326_v17 }
 0x55a   : > { %8390 = vmatprep.subr.bf16.mxu1 %v13333_v21  ;;  %7240 = vmatmul.mubr.bf16.gmra.mrb[128].mxu0 %v13802_v18  ;;  %v13809_v21 = vld [vmem:[#allocation22_spill] sm:$0xff] }
 0x55b   : > { %7249 = vmatprep.mubr.bf16.mxu0 %v13740_v20 }
 0x55d   : > { %8391 = vmatpush1.bf16.msra.mxu1 %v13343_v16 }
 0x560   : > { %8336 = vmatmul.mubr.bf16.gmra.mrb[128].mxu1 %v13803_v47 }
 0x561   : > { %8345 = vmatprep.mubr.bf16.mxu1 %v13804_v46 }
 0x562   : > { %7250 = vmatmul.mubr.bf16.gmra.mrb[132].mxu0 %v13805_v36 }
 0x563   : > { %7259 = vmatprep.mubr.bf16.mxu0 %v13740_v20 }
 0x568   : > { %8346 = vmatmul.mubr.bf16.gmra.mrb[132].mxu1 %v13806_v57 }
 0x569   : > { %8355 = vmatprep.mubr.bf16.mxu1 %v13807_v0 }
 0x56a   : > { %7260 = vmatmul.mubr.bf16.gmra.mrb[136].mxu0 %v13792_v29 }
 0x56b   : > { %7269 = vmatprep.mubr.bf16.mxu0 %v13740_v20 }
 0x570   : > { %8356 = vmatmul.mubr.bf16.gmra.mrb[136].mxu1 %v13808_v56 }
 0x571   : > { %8365 = vmatprep.mubr.bf16.mxu1 %v8242_v3 }
 0x572   : > { %7270 = vmatmul.mubr.bf16.gmra.mrb[140].mxu0 %v12795_v11  ;;  %v4884_v11 = vld [vmem:[#allocation4 + $0x118] sm:$0x1f] }
 0x573   : > { %v5243_v29 = vrot.slane %v4884_v11, 1 }
 0x575   : > { %v8252_v62 = vshrl.u32 %v5243_v29, 16 }
 0x577   : > { %v8254_v17 = vrot.slane %v8252_v62, 3 }
 0x578   : > { %8366 = vmatmul.mubr.bf16.gmra.mrb[140].mxu1 %v8225_v6 }
 0x579   : > { %8408 = vmatprep.mubr.bf16.mxu1 %v13740_v20 }
 0x580   : > { %8409 = vmatmul.mubr.bf16.vlgmr.msra.gmra.mrb[112].mxu1 %v12840_v30  ;;  %v5242_v30 = vrot.slane %v13406_v22, 1  ;;  %v7319_v22 = vsub.s32 1, %v7314_v45 }
 0x581   : > { %8418 = vmatprep.mubr.bf16.mxu1 %v13740_v20 }
 0x582   : > { %v13461_v53 = vrot.slane %v5391_v42, %v7319_v22 }
 0x588   : > { %8419 = vmatmul.mubr.bf16.gmra.mrb[116].mxu1 %v12885_v24  ;;  %v5244_v24 = vsel %vm1051_vm3, %v5242_v30, %v5243_v29 }
 0x589   : > { %8428 = vmatprep.mubr.bf16.mxu1 %v13740_v20  ;;  %v8247_v10 = vshll.u32 %v5244_v24, 16 }
 0x58b   : > { %v8249_v43 = vrot.slane %v8247_v10, 4 }
 0x590   : > { %8429 = vmatmul.mubr.bf16.gmra.mrb[120].mxu1 %v12930_v31  ;;  %v8244_v31 = vshrl.u32 %v5244_v24, 16 }
 0x591   : > { %8438 = vmatprep.mubr.bf16.mxu1 %v13740_v20 }
 0x592   : > { %v8246_v12 = vrot.slane %v8244_v31, 3 }
 0x594   : > { %v8250_v16 = vor.u32 %v8249_v43, %v8246_v12 }
 0x598   : > { %8439 = vmatmul.mubr.bf16.gmra.mrb[124].mxu1 %v12947_v34  ;;  %v8255_v34 = vshll.u32 %v5243_v29, 16 }
 0x599   : > { %8448 = vmatprep.mubr.bf16.mxu1 %v13740_v20 }
 0x5a0   : > { %8449 = vmatmul.mubr.bf16.gmra.mrb[128].mxu1 %v12961_v32  ;;  %v8257_v32 = vrot.slane %v8255_v34, 4 }
 0x5a1   : > { %8458 = vmatprep.mubr.bf16.mxu1 %v13740_v20 }
 0x5a2   : > { %v8258_v63 = vor.u32 %v8257_v32, %v8254_v17 }
 0x5a8   : > { %8459 = vmatmul.mubr.bf16.gmra.mrb[132].mxu1 %v12974_v50  ;;  %v8259_v50 = vsel %vm1353_vm8, %v8250_v16, %v8258_v63 }
 0x5a9   : > { %8468 = vmatprep.mubr.bf16.mxu1 %v13740_v20 }
 0x5b0   : > { %8469 = vmatmul.mubr.bf16.gmra.mrb[136].mxu1 %v13809_v21 }
 0x5b1   : > { %8478 = vmatprep.mubr.bf16.mxu1 %v13740_v20 }
 0x5b8   : > { %8479 = vmatmul.mubr.bf16.gmra.mrb[140].mxu1 %v8259_v50 }
 0x60d   : > { %v7201_v20 = vpop.f32.mrb[112].mxu0 }
 0x60e   : > { %v7323_v40 = vadd.f32 %v13459_v60, %v7201_v20  ;;  %v7203_v14 = vpop.f32.mrb[113].mxu0 }
 0x60f   : > { %v7324_v54 = vadd.f32 %v13461_v53, %v7203_v14  ;;  %v7205_v49 = vpop.f32.mrb[114].mxu0 }
 0x610   : > { %v7355_v48 = vmax.f32 %v7323_v40, 0.0  ;;  %v7325_v38 = vadd.f32 %v13459_v60, %v7205_v49  ;;  %v7207_v33 = vpop.f32.mrb[115].mxu0 }
 0x611   : > { %v7356_v28 = vmax.f32 %v7324_v54, 0.0  ;;  %v7326_v41 = vadd.f32 %v13461_v53, %v7207_v33 }
 0x612   : > { %7387 = vst [vmem:[%s13469_s16] sm:$0xff] %v7355_v48  ;;  %v7357_v18 = vmax.f32 %v7325_v38, 0.0 }
 0x613   : > { %7388 = vst [vmem:[%s13469_s16 + $0x8] sm:$0xff] %v7356_v28  ;;  %v7358_v52 = vmax.f32 %v7326_v41, 0.0 }
 0x614   : > { %7389 = vst [vmem:[%s13469_s16 + $0x10] sm:$0xff] %v7357_v18 }
 0x615   : > { %7390 = vst [vmem:[%s13469_s16 + $0x18] sm:$0xff] %v7358_v52  ;;  %v7211_v9 = vpop.f32.mrb[116].mxu0 }
 0x616   : > { %v7327_v7 = vadd.f32 %v13459_v60, %v7211_v9  ;;  %v7213_v47 = vpop.f32.mrb[117].mxu0 }
 0x617   : > { %v7328_v46 = vadd.f32 %v13461_v53, %v7213_v47  ;;  %v7215_v26 = vpop.f32.mrb[118].mxu0 }
 0x618   : > { %v7359_v23 = vmax.f32 %v7327_v7, 0.0  ;;  %v7329_v2 = vadd.f32 %v13459_v60, %v7215_v26  ;;  %v7217_v37 = vpop.f32.mrb[119].mxu0 }
 0x619   : > { %v7360_v36 = vmax.f32 %v7328_v46, 0.0  ;;  %v7330_v5 = vadd.f32 %v13461_v53, %v7217_v37 }
 0x61a   : > { %7391 = vst [vmem:[%s13469_s16 + $0x20] sm:$0xff] %v7359_v23  ;;  %v7361_v8 = vmax.f32 %v7329_v2, 0.0 }
 0x61b   : > { %7392 = vst [vmem:[%s13469_s16 + $0x28] sm:$0xff] %v7360_v36  ;;  %v7362_v1 = vmax.f32 %v7330_v5, 0.0 }
 0x61c   : > { %7393 = vst [vmem:[%s13469_s16 + $0x30] sm:$0xff] %v7361_v8 }
 0x61d   : > { %7394 = vst [vmem:[%s13469_s16 + $0x38] sm:$0xff] %v7362_v1  ;;  %v7221_v19 = vpop.f32.mrb[120].mxu0 }
 0x61e   : > { %v7331_v44 = vadd.f32 %v13459_v60, %v7221_v19  ;;  %v7223_v57 = vpop.f32.mrb[121].mxu0 }
 0x61f   : > { %v7332_v0 = vadd.f32 %v13461_v53, %v7223_v57  ;;  %v7225_v59 = vpop.f32.mrb[122].mxu0 }
 0x620   : > { %v7363_v15 = vmax.f32 %v7331_v44, 0.0  ;;  %v7333_v25 = vadd.f32 %v13459_v60, %v7225_v59  ;;  %v7227_v61 = vpop.f32.mrb[123].mxu0 }
 0x621   : > { %v7364_v55 = vmax.f32 %v7332_v0, 0.0  ;;  %v7334_v4 = vadd.f32 %v13461_v53, %v7227_v61 }
 0x622   : > { %7395 = vst [vmem:[%s13469_s16 + $0x40] sm:$0xff] %v7363_v15  ;;  %v7365_v39 = vmax.f32 %v7333_v25, 0.0 }
 0x623   : > { %7396 = vst [vmem:[%s13469_s16 + $0x48] sm:$0xff] %v7364_v55  ;;  %v7366_v27 = vmax.f32 %v7334_v4, 0.0 }
 0x624   : > { %7397 = vst [vmem:[%s13469_s16 + $0x50] sm:$0xff] %v7365_v39 }
 0x625   : > { %7398 = vst [vmem:[%s13469_s16 + $0x58] sm:$0xff] %v7366_v27  ;;  %v7231_v3 = vpop.f32.mrb[124].mxu0 }
 0x626   : > { %v7335_v56 = vadd.f32 %v13459_v60, %v7231_v3  ;;  %v7233_v35 = vpop.f32.mrb[125].mxu0 }
 0x627   : > { %v7336_v58 = vadd.f32 %v13461_v53, %v7233_v35  ;;  %v7235_v6 = vpop.f32.mrb[126].mxu0 }
 0x628   : > { %v7367_v11 = vmax.f32 %v7335_v56, 0.0  ;;  %v7337_v30 = vadd.f32 %v13459_v60, %v7235_v6  ;;  %v7237_v29 = vpop.f32.mrb[127].mxu0 }
 0x629   : > { %v7368_v24 = vmax.f32 %v7336_v58, 0.0  ;;  %v7338_v31 = vadd.f32 %v13461_v53, %v7237_v29 }
 0x62a   : > { %7399 = vst [vmem:[%s13469_s16 + $0x60] sm:$0xff] %v7367_v11  ;;  %v7369_v10 = vmax.f32 %v7337_v30, 0.0 }
 0x62b   : > { %7400 = vst [vmem:[%s13469_s16 + $0x68] sm:$0xff] %v7368_v24  ;;  %v7370_v62 = vmax.f32 %v7338_v31, 0.0 }
 0x62c   : > { %7401 = vst [vmem:[%s13469_s16 + $0x70] sm:$0xff] %v7369_v10 }
 0x62d   : > { %7402 = vst [vmem:[%s13469_s16 + $0x78] sm:$0xff] %v7370_v62  ;;  %v7241_v34 = vpop.f32.mrb[128].mxu0 }
 0x62e   : > { %v7339_v12 = vadd.f32 %v13459_v60, %v7241_v34  ;;  %v7243_v43 = vpop.f32.mrb[129].mxu0 }
 0x62f   : > { %v7340_v17 = vadd.f32 %v13461_v53, %v7243_v43  ;;  %v7245_v32 = vpop.f32.mrb[130].mxu0 }
 0x630   : > { %v7371_v21 = vmax.f32 %v7339_v12, 0.0  ;;  %v7341_v16 = vadd.f32 %v13459_v60, %v7245_v32  ;;  %v7247_v63 = vpop.f32.mrb[131].mxu0 }
 0x631   : > { %v7372_v50 = vmax.f32 %v7340_v17, 0.0  ;;  %v7342_v13 = vadd.f32 %v13461_v53, %v7247_v63 }
 0x632   : > { %7403 = vst [vmem:[%s13469_s16 + $0x80] sm:$0xff] %v7371_v21  ;;  %v7373_v45 = vmax.f32 %v7341_v16, 0.0 }
 0x633   : > { %7404 = vst [vmem:[%s13469_s16 + $0x88] sm:$0xff] %v7372_v50  ;;  %v7374_v51 = vmax.f32 %v7342_v13, 0.0 }
 0x634   : > { %7405 = vst [vmem:[%s13469_s16 + $0x90] sm:$0xff] %v7373_v45 }
 0x635   : > { %7406 = vst [vmem:[%s13469_s16 + $0x98] sm:$0xff] %v7374_v51  ;;  %v7251_v42 = vpop.f32.mrb[132].mxu0 }
 0x636   : > { %v7343_v22 = vadd.f32 %v13459_v60, %v7251_v42  ;;  %v7253_v20 = vpop.f32.mrb[133].mxu0 }
 0x637   : > { %v7344_v40 = vadd.f32 %v13461_v53, %v7253_v20  ;;  %v7255_v14 = vpop.f32.mrb[134].mxu0 }
 0x638   : > { %v7375_v54 = vmax.f32 %v7343_v22, 0.0  ;;  %v7345_v49 = vadd.f32 %v13459_v60, %v7255_v14  ;;  %v7257_v48 = vpop.f32.mrb[135].mxu0 }
 0x639   : > { %v7376_v38 = vmax.f32 %v7344_v40, 0.0  ;;  %v7346_v33 = vadd.f32 %v13461_v53, %v7257_v48 }
 0x63a   : > { %7407 = vst [vmem:[%s13469_s16 + $0xa0] sm:$0xff] %v7375_v54  ;;  %v7377_v28 = vmax.f32 %v7345_v49, 0.0 }
 0x63b   : > { %7408 = vst [vmem:[%s13469_s16 + $0xa8] sm:$0xff] %v7376_v38  ;;  %v7378_v41 = vmax.f32 %v7346_v33, 0.0 }
 0x63c   : > { %7409 = vst [vmem:[%s13469_s16 + $0xb0] sm:$0xff] %v7377_v28 }
 0x63d   : > { %7410 = vst [vmem:[%s13469_s16 + $0xb8] sm:$0xff] %v7378_v41  ;;  %v7261_v18 = vpop.f32.mrb[136].mxu0 }
 0x63e   : > { %v7347_v52 = vadd.f32 %v13459_v60, %v7261_v18  ;;  %v7263_v9 = vpop.f32.mrb[137].mxu0 }
 0x63f   : > { %v7348_v7 = vadd.f32 %v13461_v53, %v7263_v9  ;;  %v7265_v47 = vpop.f32.mrb[138].mxu0 }
 0x640   : > { %v7379_v46 = vmax.f32 %v7347_v52, 0.0  ;;  %v7349_v26 = vadd.f32 %v13459_v60, %v7265_v47  ;;  %v7267_v23 = vpop.f32.mrb[139].mxu0 }
 0x641   : > { %v7380_v2 = vmax.f32 %v7348_v7, 0.0  ;;  %v7350_v37 = vadd.f32 %v13461_v53, %v7267_v23 }
 0x642   : > { %7411 = vst [vmem:[%s13469_s16 + $0xc0] sm:$0xff] %v7379_v46  ;;  %v7381_v36 = vmax.f32 %v7349_v26, 0.0 }
 0x643   : > { %7412 = vst [vmem:[%s13469_s16 + $0xc8] sm:$0xff] %v7380_v2  ;;  %v7382_v5 = vmax.f32 %v7350_v37, 0.0 }
 0x644   : > { %7413 = vst [vmem:[%s13469_s16 + $0xd0] sm:$0xff] %v7381_v36 }
 0x645   : > { %7414 = vst [vmem:[%s13469_s16 + $0xd8] sm:$0xff] %v7382_v5  ;;  %v7271_v8 = vpop.f32.mrb[140].mxu0 }
 0x646   : > { %v7351_v1 = vadd.f32 %v13459_v60, %v7271_v8  ;;  %v7273_v19 = vpop.f32.mrb[141].mxu0 }
 0x647   : > { %v7352_v44 = vadd.f32 %v13461_v53, %v7273_v19  ;;  %v7275_v57 = vpop.f32.mrb[142].mxu0 }
 0x648   : > { %v7383_v0 = vmax.f32 %v7351_v1, 0.0  ;;  %v7353_v59 = vadd.f32 %v13459_v60, %v7275_v57  ;;  %v7277_v15 = vpop.f32.mrb[143].mxu0 }
 0x649   : > { %v7384_v25 = vmax.f32 %v7352_v44, 0.0  ;;  %v7354_v61 = vadd.f32 %v13461_v53, %v7277_v15 }
 0x64a   : > { %7415 = vst [vmem:[%s13469_s16 + $0xe0] sm:$0xff] %v7383_v0  ;;  %v7385_v55 = vmax.f32 %v7353_v59, 0.0 }
 0x64b   : > { %7416 = vst [vmem:[%s13469_s16 + $0xe8] sm:$0xff] %v7384_v25  ;;  %v7386_v4 = vmax.f32 %v7354_v61, 0.0 }
 0x64c   : > { %7417 = vst [vmem:[%s13469_s16 + $0xf0] sm:$0xff] %v7385_v55 }
 0x64d   : > { %7418 = vst [vmem:[%s13469_s16 + $0xf8] sm:$0xff] %v7386_v4 }
 0x653   : > { %v8410_v39 = vpop.f32.mrb[112].mxu1 }
 0x654   : > { %v8521_v27 = vadd.f32 %v8410_v39, %v13459_v60  ;;  %v8412_v3 = vpop.f32.mrb[113].mxu1 }
 0x655   : > { %v8522_v56 = vadd.f32 %v8412_v3, %v13461_v53  ;;  %v8414_v35 = vpop.f32.mrb[114].mxu1 }
 0x656   : > { %v8553_v58 = vmax.f32 %v8521_v27, 0.0  ;;  %v8523_v6 = vadd.f32 %v8414_v35, %v13459_v60  ;;  %v8416_v11 = vpop.f32.mrb[115].mxu1 }
 0x657   : > { %v8554_v30 = vmax.f32 %v8522_v56, 0.0  ;;  %v8524_v29 = vadd.f32 %v8416_v11, %v13461_v53 }
 0x658   : > { %9167 = vst [vmem:[%s13469_s16 + $0x100] sm:$0xff] %v8553_v58  ;;  %v8555_v24 = vmax.f32 %v8523_v6, 0.0 }
 0x659   : > { %9168 = vst [vmem:[%s13469_s16 + $0x108] sm:$0xff] %v8554_v30  ;;  %v8556_v31 = vmax.f32 %v8524_v29, 0.0 }
 0x65a   : > { %9169 = vst [vmem:[%s13469_s16 + $0x110] sm:$0xff] %v8555_v24 }
 0x65b   : > { %9170 = vst [vmem:[%s13469_s16 + $0x118] sm:$0xff] %v8556_v31  ;;  %v8420_v10 = vpop.f32.mrb[116].mxu1 }
 0x65c   : > { %v8525_v62 = vadd.f32 %v8420_v10, %v13459_v60  ;;  %v8422_v34 = vpop.f32.mrb[117].mxu1 }
 0x65d   : > { %v8526_v12 = vadd.f32 %v8422_v34, %v13461_v53  ;;  %v8424_v43 = vpop.f32.mrb[118].mxu1 }
 0x65e   : > { %v8557_v17 = vmax.f32 %v8525_v62, 0.0  ;;  %v8527_v32 = vadd.f32 %v8424_v43, %v13459_v60  ;;  %v8426_v21 = vpop.f32.mrb[119].mxu1 }
 0x65f   : > { %v8558_v16 = vmax.f32 %v8526_v12, 0.0  ;;  %v8528_v63 = vadd.f32 %v8426_v21, %v13461_v53 }
 0x660   : > { %9171 = vst [vmem:[%s13469_s16 + $0x120] sm:$0xff] %v8557_v17  ;;  %v8559_v50 = vmax.f32 %v8527_v32, 0.0 }
 0x661   : > { %9172 = vst [vmem:[%s13469_s16 + $0x128] sm:$0xff] %v8558_v16  ;;  %v8560_v13 = vmax.f32 %v8528_v63, 0.0 }
 0x662   : > { %9173 = vst [vmem:[%s13469_s16 + $0x130] sm:$0xff] %v8559_v50 }
 0x663   : > { %9174 = vst [vmem:[%s13469_s16 + $0x138] sm:$0xff] %v8560_v13  ;;  %v8430_v45 = vpop.f32.mrb[120].mxu1 }
 0x664   : > { %v8529_v51 = vadd.f32 %v8430_v45, %v13459_v60  ;;  %v8432_v42 = vpop.f32.mrb[121].mxu1 }
 0x665   : > { %v8530_v22 = vadd.f32 %v8432_v42, %v13461_v53  ;;  %v8434_v20 = vpop.f32.mrb[122].mxu1 }
 0x666   : > { %v8561_v40 = vmax.f32 %v8529_v51, 0.0  ;;  %v8531_v14 = vadd.f32 %v8434_v20, %v13459_v60  ;;  %v8436_v54 = vpop.f32.mrb[123].mxu1 }
 0x667   : > { %v8562_v49 = vmax.f32 %v8530_v22, 0.0  ;;  %v8532_v48 = vadd.f32 %v8436_v54, %v13461_v53 }
 0x668   : > { %9175 = vst [vmem:[%s13469_s16 + $0x140] sm:$0xff] %v8561_v40  ;;  %v8563_v38 = vmax.f32 %v8531_v14, 0.0 }
 0x669   : > { %9176 = vst [vmem:[%s13469_s16 + $0x148] sm:$0xff] %v8562_v49  ;;  %v8564_v33 = vmax.f32 %v8532_v48, 0.0 }
 0x66a   : > { %9177 = vst [vmem:[%s13469_s16 + $0x150] sm:$0xff] %v8563_v38 }
 0x66b   : > { %9178 = vst [vmem:[%s13469_s16 + $0x158] sm:$0xff] %v8564_v33  ;;  %v8440_v28 = vpop.f32.mrb[124].mxu1 }
 0x66c   : > { %v8533_v41 = vadd.f32 %v8440_v28, %v13459_v60  ;;  %v8442_v18 = vpop.f32.mrb[125].mxu1 }
 0x66d   : > { %v8534_v52 = vadd.f32 %v8442_v18, %v13461_v53  ;;  %v8444_v9 = vpop.f32.mrb[126].mxu1 }
 0x66e   : > { %v8565_v7 = vmax.f32 %v8533_v41, 0.0  ;;  %v8535_v47 = vadd.f32 %v8444_v9, %v13459_v60  ;;  %v8446_v46 = vpop.f32.mrb[127].mxu1 }
 0x66f   : > { %v8566_v26 = vmax.f32 %v8534_v52, 0.0  ;;  %v8536_v23 = vadd.f32 %v8446_v46, %v13461_v53 }
 0x670   : > { %9179 = vst [vmem:[%s13469_s16 + $0x160] sm:$0xff] %v8565_v7  ;;  %v8567_v2 = vmax.f32 %v8535_v47, 0.0 }
 0x671   : > { %9180 = vst [vmem:[%s13469_s16 + $0x168] sm:$0xff] %v8566_v26  ;;  %v8568_v37 = vmax.f32 %v8536_v23, 0.0 }
 0x672   : > { %9181 = vst [vmem:[%s13469_s16 + $0x170] sm:$0xff] %v8567_v2 }
 0x673   : > { %9182 = vst [vmem:[%s13469_s16 + $0x178] sm:$0xff] %v8568_v37  ;;  %v8450_v36 = vpop.f32.mrb[128].mxu1 }
 0x674   : > { %v8537_v5 = vadd.f32 %v8450_v36, %v13459_v60  ;;  %v8452_v8 = vpop.f32.mrb[129].mxu1 }
 0x675   : > { %v8538_v1 = vadd.f32 %v8452_v8, %v13461_v53  ;;  %v8454_v19 = vpop.f32.mrb[130].mxu1 }
 0x676   : > { %v8569_v44 = vmax.f32 %v8537_v5, 0.0  ;;  %v8539_v57 = vadd.f32 %v8454_v19, %v13459_v60  ;;  %v8456_v0 = vpop.f32.mrb[131].mxu1 }
 0x677   : > { %v8570_v59 = vmax.f32 %v8538_v1, 0.0  ;;  %v8540_v15 = vadd.f32 %v8456_v0, %v13461_v53 }
 0x678   : > { %9183 = vst [vmem:[%s13469_s16 + $0x180] sm:$0xff] %v8569_v44  ;;  %v8571_v25 = vmax.f32 %v8539_v57, 0.0 }
 0x679   : > { %9184 = vst [vmem:[%s13469_s16 + $0x188] sm:$0xff] %v8570_v59  ;;  %v8572_v61 = vmax.f32 %v8540_v15, 0.0 }
 0x67a   : > { %9185 = vst [vmem:[%s13469_s16 + $0x190] sm:$0xff] %v8571_v25 }
 0x67b   : > { %9186 = vst [vmem:[%s13469_s16 + $0x198] sm:$0xff] %v8572_v61  ;;  %v8460_v55 = vpop.f32.mrb[132].mxu1 }
 0x67c   : > { %v8541_v4 = vadd.f32 %v8460_v55, %v13459_v60  ;;  %v8462_v39 = vpop.f32.mrb[133].mxu1 }
 0x67d   : > { %v8542_v27 = vadd.f32 %v8462_v39, %v13461_v53  ;;  %v8464_v3 = vpop.f32.mrb[134].mxu1 }
 0x67e   : > { %v8573_v56 = vmax.f32 %v8541_v4, 0.0  ;;  %v8543_v35 = vadd.f32 %v8464_v3, %v13459_v60  ;;  %v8466_v58 = vpop.f32.mrb[135].mxu1 }
 0x67f   : > { %v8574_v6 = vmax.f32 %v8542_v27, 0.0  ;;  %v8544_v11 = vadd.f32 %v8466_v58, %v13461_v53 }
 0x680   : > { %9187 = vst [vmem:[%s13469_s16 + $0x1a0] sm:$0xff] %v8573_v56  ;;  %v8575_v30 = vmax.f32 %v8543_v35, 0.0 }
 0x681   : > { %9188 = vst [vmem:[%s13469_s16 + $0x1a8] sm:$0xff] %v8574_v6  ;;  %v8576_v29 = vmax.f32 %v8544_v11, 0.0 }
 0x682   : > { %9189 = vst [vmem:[%s13469_s16 + $0x1b0] sm:$0xff] %v8575_v30 }
 0x683   : > { %9190 = vst [vmem:[%s13469_s16 + $0x1b8] sm:$0xff] %v8576_v29  ;;  %v8470_v24 = vpop.f32.mrb[136].mxu1 }
 0x684   : > { %v8545_v31 = vadd.f32 %v8470_v24, %v13459_v60  ;;  %v8472_v10 = vpop.f32.mrb[137].mxu1 }
 0x685   : > { %v8546_v62 = vadd.f32 %v8472_v10, %v13461_v53  ;;  %v8474_v34 = vpop.f32.mrb[138].mxu1 }
 0x686   : > { %v8577_v12 = vmax.f32 %v8545_v31, 0.0  ;;  %v8547_v43 = vadd.f32 %v8474_v34, %v13459_v60  ;;  %v8476_v17 = vpop.f32.mrb[139].mxu1 }
 0x687   : > { %v8578_v32 = vmax.f32 %v8546_v62, 0.0  ;;  %v8548_v21 = vadd.f32 %v8476_v17, %v13461_v53 }
 0x688   : > { %9191 = vst [vmem:[%s13469_s16 + $0x1c0] sm:$0xff] %v8577_v12  ;;  %v8579_v16 = vmax.f32 %v8547_v43, 0.0 }
 0x689   : > { %9192 = vst [vmem:[%s13469_s16 + $0x1c8] sm:$0xff] %v8578_v32  ;;  %v8580_v63 = vmax.f32 %v8548_v21, 0.0 }
 0x68a   : > { %9193 = vst [vmem:[%s13469_s16 + $0x1d0] sm:$0xff] %v8579_v16 }
 0x68b   : > { %9194 = vst [vmem:[%s13469_s16 + $0x1d8] sm:$0xff] %v8580_v63  ;;  %v8480_v50 = vpop.f32.mrb[140].mxu1 }
 0x68c   : > { %v8549_v13 = vadd.f32 %v8480_v50, %v13459_v60  ;;  %v8482_v45 = vpop.f32.mrb[141].mxu1 }
 0x68d   : > { %v8550_v51 = vadd.f32 %v8482_v45, %v13461_v53  ;;  %v8484_v42 = vpop.f32.mrb[142].mxu1 }
 0x68e   : > { %v8581_v22 = vmax.f32 %v8549_v13, 0.0  ;;  %v8551_v20 = vadd.f32 %v8484_v42, %v13459_v60  ;;  %v8486_v40 = vpop.f32.mrb[143].mxu1 }
 0x68f   : > { %v8582_v14 = vmax.f32 %v8550_v51, 0.0  ;;  %v8552_v54 = vadd.f32 %v8486_v40, %v13461_v53 }
 0x690   : > { %9195 = vst [vmem:[%s13469_s16 + $0x1e0] sm:$0xff] %v8581_v22  ;;  %v8583_v49 = vmax.f32 %v8551_v20, 0.0 }
 0x691   : > { %9196 = vst [vmem:[%s13469_s16 + $0x1e8] sm:$0xff] %v8582_v14  ;;  %v8584_v48 = vmax.f32 %v8552_v54, 0.0 }
 0x692   : > { %9197 = vst [vmem:[%s13469_s16 + $0x1f0] sm:$0xff] %v8583_v49 }
 0x693   : > { %9198 = vst [vmem:[%s13469_s16 + $0x1f8] sm:$0xff] %v8584_v48 }
 0x694   : > { %10214 = shalt.err (!%p10211_p3)
}
 0x695   : > { %s10215_s13 = scalar_lea.hbm %s13597_s22, 8192  ;;  %s10219_s16 = scalar_lea.hbm %s13655_s7, 16384 }
 0x696   : > { %p10216_p4 = scmp.ne.s32.totalorder %s13597_s22, %s10215_s13  ;;  %p10220_p9 = scmp.lt.u32.totalorder %s13597_s22, %s13655_s7 }
 0x697   : > { %p10221_p10 = scmp.lt.u32.totalorder %s10219_s16, %s10215_s13  ;;  %p10223_p12 = scmp.lt.u32.totalorder %s10215_s13, %s13597_s22 }
 0x698   : > { %p10217_p7 = pnand %p10216_p4, %p10349_p5 }
 0x699   : > { %p10222_p11 = por %p10221_p10, %p10220_p9 }
 0x69a   : > { %p10218_p8 = pneg %p10217_p7 }
 0x69b   : > { %p10224_p13 = por %p10223_p12, %p10222_p11 }
 0x69d   : > { %p10225_p0 = pnand %p10224_p13, %p10218_p8 }
 0x69f   : > { %10228 = shalt.err (!%p10225_p0)
}
 0x6a0   : > { %s10270_s21 = smov 256  }
 0x6a1   : > { %9776 = dma.vmem_to_hbm [thread:$0]  (%p10349_p5), %s13600_s19, 8192, %s13597_s22, %s13606_s28, %s10270_s21, %s10270_s21, %s10266_s18  }
 0x6a2 PF: > { %p9782_p1 = scmp.ge.s32.totalorder %s10263_s27, 2  ;;  %s8647_s23 = sand.u32 1, %s10251_s24  }
 0x6a3   : > { %s8648_s29 = scalar_lea.sflag [#allocation6], %s8647_s23 }
 0x6a4   : > { %p9779_p2 = pnand %p9782_p1, %p10353_p6 }
 0x6a6   : > { %10246 = dma.done.wait (!%p9779_p2), %s8648_s29, 8192  }
 0x6a7   : > { %10248 = vsyncadd (!%p9779_p2), %s8648_s29, 4294959104  ;;  %p17_p3 = scmp.ge.s32.totalorder %s10336_s30, 4   ;;  %s13810_s24 = smov %s10255_s25 }
 0x6a8   : > { %s13811_s25 = smov %s10259_s26  ;;  %s13812_s26 = smov %s10347_s10 }
 0x6a9   : > { %s13813_s27 = smov %s10336_s30  ;;  %19 = sbr.rel (!%p17_p3) target bundleno = 3 (0x3), region = 98 }
 0x6b0   :  { %8653 = vsyncpa [#allocation6], 1 }
 0x6b1   :  { %8655 = vsyncpa [#allocation6 + $0x1], 1 }

</bundles_post_ra>
